<compile_context>
chip_gen: v7x
topology: tpu7x:2x2x1
jax: 0.10.0
libtpu: 0.0.40
codegen_flags: <defaults>
</compile_context>

<pallas_src>
import math
from functools import partial

import numpy as np
import jax
import jax.numpy as jnp
from jax import lax
from jax.experimental import pallas as pl
from jax.experimental.pallas import tpu as pltpu


_NEG = -1.0e30  # "log of zero weight" sentinel for padded points of real batches


# --------------------------------------------------------------------------
# epsilon-scaling schedule (geomloss defaults for 'squared_euclidean': p=2,
# blur=eps, diameter=4.0, scaling=0.5)
# --------------------------------------------------------------------------
def make_eps_schedule(blur, diameter, scaling, p=2):
    target = float(blur) ** p
    e = float(diameter) ** p
    sched = []
    while e > target:
        sched.append(e)
        e = e * (float(scaling) ** p)
    sched.append(target)
    return tuple(sched)


# --------------------------------------------------------------------------
# Pallas kernel.
#
# Persistent Gram stack (VMEM scratch): [xy, xx, yy], each (nb, P, P).
# The transposed xy block (needed for the g potentials) is regenerated per row
# chunk on the MXU (idle during the VPU/EUP-bound sweeps).
#
# softmin(eps, C, h)_i = 0.5*|x_i|^2 - eps * lse_j( (h_j - 0.5*|y_j|^2/eps) + G_ij/eps )
# --------------------------------------------------------------------------
def _sinkhorn_kernel(la_ref, x_ref, lb_ref, y_ref, out_ref,
                     g3_ref, res3_ref, resx_ref,
                     *, eps_list, row_chunk):
    nb = la_ref.shape[0]
    Pp = x_ref.shape[1]
    n_chunks = Pp // row_chunk
    dims = (((2,), (2,)), ((0,), (0,)))

    la = la_ref[...]                                    # (nb, 1, P)  log alpha (row layout)
    lb = lb_ref[...]                                    # (nb, 1, P)  log beta
    xb = x_ref[...].astype(jnp.float32)                 # (nb, P, D)
    yb = y_ref[...].astype(jnp.float32)                 # (nb, P, D)

    # half squared norms: column + one-time row transposes
    x2c = 0.5 * jnp.sum(xb * xb, axis=-1, keepdims=True)   # (nb, P, 1)
    y2c = 0.5 * jnp.sum(yb * yb, axis=-1, keepdims=True)
    x2r = jnp.swapaxes(x2c, -1, -2)                         # (nb, 1, P)
    y2r = jnp.swapaxes(y2c, -1, -2)

    # persistent Gram stack [xy, xx, yy] — written straight into the scratch,
    # no L/R concatenate copies; the yx block is NOT stored (regenerated per chunk).
    g3_ref[0:nb] = lax.dot_general(xb, yb, dims, preferred_element_type=jnp.float32)
    g3_ref[nb:2 * nb] = lax.dot_general(xb, xb, dims, preferred_element_type=jnp.float32)
    g3_ref[2 * nb:3 * nb] = lax.dot_general(yb, yb, dims, preferred_element_type=jnp.float32)

    # family-constant row terms for [xy, xx, yy]: log-weight & half-norm of the
    # reduction variable (y, x, y respectively)
    w3 = jnp.concatenate([lb, la, lb], axis=0)              # (3nb, 1, P)
    q3 = jnp.concatenate([y2r, x2r, y2r], axis=0)           # (3nb, 1, P)

    def lse_last(z):
        m = jnp.max(z, axis=-1, keepdims=True)
        return m + jnp.log(jnp.sum(jnp.exp(z - m), axis=-1, keepdims=True))

    def sweep(eps, off3, off_x, nfam3):
        """One softmin sweep at temperature eps, row-chunked over the sublane axis.
        Writes raw row-layout lse results into res3_ref[0:nfam3] / resx_ref."""
        inv = 1.0 / eps

        def body(c, carry):
            if n_chunks == 1:
                r0 = 0
            else:
                r0 = pl.multiple_of(c * row_chunk, row_chunk)
            rows = pl.ds(r0, row_chunk)
            # persistent families (xy[, xx, yy]) — chunked read keeps temps small
            z3 = g3_ref[0:nfam3, rows, :] * inv + off3                 # (nfam3, C, P)
            res3_ref[0:nfam3, :, rows] = jnp.swapaxes(lse_last(z3), -1, -2)
            # transposed (yx) family regenerated on the fly on the MXU
            ych = y_ref[:, rows, :].astype(jnp.float32)                # (nb, C, D)
            zx = lax.dot_general(ych, xb, dims,
                                 preferred_element_type=jnp.float32) * inv + off_x
            resx_ref[:, :, rows] = jnp.swapaxes(lse_last(zx), -1, -2)
            return carry

        if n_chunks == 1:
            body(0, 0)
        else:
            lax.fori_loop(0, n_chunks, body, 0)
        return res3_ref[0:nfam3], resx_ref[...]

    # --- initialization at the largest epsilon (zero potentials) ----------
    eps0 = eps_list[0]
    inv0 = 1.0 / eps0
    l3, lx = sweep(eps0, w3 - q3 * inv0, la - x2r * inv0, 3 * nb)
    f_ab = x2r - eps0 * l3[0:nb]
    f_aa = x2r - eps0 * l3[nb:2 * nb]
    g_bb = y2r - eps0 * l3[2 * nb:3 * nb]
    g_ba = y2r - eps0 * lx

    # --- epsilon-scaling loop (unrolled; all potentials stay in row layout) -
    for eps in eps_list:
        inv = 1.0 / eps
        off3 = w3 + (jnp.concatenate([g_ba, f_aa, g_bb], axis=0) - q3) * inv
        off_x = la + (f_ab - x2r) * inv
        l3, lx = sweep(eps, off3, off_x, 3 * nb)
        f_ab = 0.5 * (f_ab + x2r - eps * l3[0:nb])
        f_aa = 0.5 * (f_aa + x2r - eps * l3[nb:2 * nb])
        g_bb = 0.5 * (g_bb + y2r - eps * l3[2 * nb:3 * nb])
        g_ba = 0.5 * (g_ba + y2r - eps * lx)

    # --- final extrapolation at eps = blur^p (cross families only) --------
    epsf = eps_list[-1]
    invf = 1.0 / epsf
    l3f, lxf = sweep(epsf, lb + (g_ba - y2r) * invf, la + (f_ab - x2r) * invf, nb)
    f_fin = x2r - epsf * l3f
    g_fin = y2r - epsf * lxf

    # --- debiased divergence:  <a, f_fin - f_aa> + <b, g_fin - g_bb> ------
    a_row = jnp.exp(la)
    b_row = jnp.exp(lb)
    per_b = (jnp.sum(a_row * (f_fin - f_aa), axis=-1, keepdims=True)
             + jnp.sum(b_row * (g_fin - g_bb), axis=-1, keepdims=True))   # (nb, 1, 1)
    out_ref[0] = jnp.broadcast_to(per_b[:, 0, :], (nb, 128))


# --------------------------------------------------------------------------
# VMEM-aware sizing helpers
# --------------------------------------------------------------------------
def _vmem_capacity_bytes():
    try:
        return int(pltpu.get_tpu_info().vmem_capacity_bytes)
    except Exception:
        return 64 * 1024 * 1024     # v7x-safe fallback


def _footprint_bytes(nb, Pp, D, row_chunk):
    f32 = 4
    g3 = 3 * nb * Pp * Pp * f32                        # persistent Gram scratch
    init_tmp = nb * Pp * Pp * f32                      # one family before its scratch store
    sweep_tmp = 3 * 4 * nb * row_chunk * Pp * f32      # z / exp temporaries per chunk
    io = 2 * 2 * nb * Pp * (D + 2) * f32               # double-buffered input blocks
    small = 24 * nb * Pp * f32                         # potentials / offsets / res scratches
    return g3 + max(init_tmp, sweep_tmp) + io + small


def _choose_batch_block(B, Pp, D, row_chunk, budget):
    nb_cap = 1
    for nb in range(1, B + 1):
        if _footprint_bytes(nb, Pp, D, row_chunk) <= budget:
            nb_cap = nb
        else:
            break
    divs = [d for d in range(1, B + 1) if B % d == 0 and d <= nb_cap]
    pref = [d for d in divs if B // d >= 2]   # keep grid >= 2 for v7x megacore
    if pref:
        return max(pref)
    if divs:
        return max(divs)
    return nb_cap


# --------------------------------------------------------------------------
# Wrapper: padding, grid setup, per-batch reduction.
# --------------------------------------------------------------------------
def sinkhorn_divergence_sum(true_weights, true_data, weights_x, x,
                            *, blur=0.05, diameter=4.0, scaling=0.5,
                            batch_block=None):
    """sum over the batch of the weighted debiased Sinkhorn divergence (scalar)."""
    B, P1, D = true_data.shape
    Bx, P2, Dx = x.shape
    assert B == Bx and D == Dx

    # point-count padding: tight (multiple of 8) when P <= 128 — do NOT blow 64 up
    # to 128; lane-aligned (multiple of 128) when P > 128 so chunking stays aligned.
    Pmax = max(P1, P2)
    if Pmax <= 128:
        Pp = 8 * int(math.ceil(Pmax / 8))
    else:
        Pp = 128 * int(math.ceil(Pmax / 128))
    row_chunk = Pp if Pp <= 128 else 128

    vmem_cap = _vmem_capacity_bytes()
    if batch_block is None:
        B_blk = _choose_batch_block(B, Pp, D, row_chunk, int(0.45 * vmem_cap))
    else:
        B_blk = max(1, min(int(batch_block), B))
    G = int(math.ceil(B / B_blk))
    B_pad = G * B_blk

    vmem_limit = int(min(max(2 * _footprint_bytes(B_blk, Pp, D, row_chunk),
                             32 * 1024 * 1024),
                         int(0.9 * vmem_cap)))

    def pad_pts(d, P):
        return jnp.pad(d.astype(jnp.float32),
                       ((0, B_pad - B), (0, Pp - P), (0, 0)))

    def pad_logw(w, P):
        w = w.astype(jnp.float32)
        lw = jnp.where(w > 0, jnp.log(jnp.maximum(w, 1e-37)), _NEG)
        lw = jnp.pad(lw, ((0, 0), (0, Pp - P)), constant_values=_NEG)
        if B_pad > B:
            # fully padded batch slabs get uniform dummy weights so their
            # potentials stay O(1); results are discarded below anyway.
            dummy = jnp.full((B_pad - B, Pp), math.log(1.0 / Pp), jnp.float32)
            lw = jnp.concatenate([lw, dummy], axis=0)
        return lw.reshape(B_pad, 1, Pp)

    xd = pad_pts(true_data, P1)
    yd = pad_pts(x, P2)
    la = pad_logw(true_weights, P1)
    lb = pad_logw(weights_x, P2)

    eps_list = make_eps_schedule(blur, diameter, scaling, p=2)
    kernel = partial(_sinkhorn_kernel, eps_list=eps_list, row_chunk=row_chunk)

    out = pl.pallas_call(
        kernel,
        out_shape=jax.ShapeDtypeStruct((G, B_blk, 128), jnp.float32),
        grid_spec=pltpu.PrefetchScalarGridSpec(
            num_scalar_prefetch=0,
            grid=(G,),
            in_specs=[
                pl.BlockSpec((B_blk, 1, Pp), lambda g: (g, 0, 0)),   # log alpha
                pl.BlockSpec((B_blk, Pp, D), lambda g: (g, 0, 0)),   # true_data  (x)
                pl.BlockSpec((B_blk, 1, Pp), lambda g: (g, 0, 0)),   # log beta
                pl.BlockSpec((B_blk, Pp, D), lambda g: (g, 0, 0)),   # particles  (y)
            ],
            out_specs=pl.BlockSpec((1, B_blk, 128), lambda g: (g, 0, 0)),
            scratch_shapes=[
                pltpu.VMEM((3 * B_blk, Pp, Pp), jnp.float32),   # Gram stack [xy, xx, yy]
                pltpu.VMEM((3 * B_blk, 1, Pp), jnp.float32),    # row-layout lse results
                pltpu.VMEM((B_blk, 1, Pp), jnp.float32),        # row-layout lse (yx family)
            ]),
        compiler_params=pltpu.CompilerParams(
            dimension_semantics=("parallel",),
            vmem_limit_bytes=vmem_limit),
    )(la, xd, lb, yd)

    per_batch = out[:, :, 0].reshape(-1)[:B]
    return jnp.sum(per_batch)


# --------------------------------------------------------------------------
# Module-level glue (plain JAX): particles + rm_map + forward()
# --------------------------------------------------------------------------
# TODO(synk): `rm_map` and `particles` are external modules in the reference;
# here they are replaced by a deterministic edge-mixing map / fixed particle set.
def rm_map(particle_data, particle_weights, edges):
    # edges: (B, P2, P2) row-stochastic mixing matrices
    x = jnp.einsum('bij,jd->bid', edges, particle_data)
    w = jnp.einsum('bij,j->bi', edges, particle_weights)
    w = w / jnp.sum(w, axis=1, keepdims=True)
    return x, w


class SinkhornWeighted:
    """JAX/Pallas port of core/sinkhorn.py::Sinkhorn_weighted
    (kernel_type='squared_euclidean' -> p=2, blur=eps, diameter=4.0)."""

    def __init__(self, particle_data, particle_weights, rm_map_fn, eps=0.05):
        self.eps = eps
        self.particle_data = particle_data
        self.particle_weights = particle_weights
        self.rm_map = rm_map_fn
        self.loss_diameter = 4.0       # diameter passed to SamplesLoss for p=2
        self.diameter = 10.0           # stored attribute (unused by the loss)
        self.scaling = 0.5
        self.x = None
        self.weights_x = None

    def forward(self, true_data, true_weights, edges):
        x, weights_x = self.rm_map(self.particle_data, self.particle_weights, edges)
        self.x = x
        self.weights_x = weights_x
        return sinkhorn_divergence_sum(
            true_weights, true_data, weights_x, x,
            blur=self.eps, diameter=self.loss_diameter, scaling=self.scaling)


# --------------------------------------------------------------------------
# Pure-JAX reference (same math) for a correctness check.
# --------------------------------------------------------------------------
def _ref_softmin(eps, C, h):
    z = h[None, :] - C / eps
    return -eps * jax.scipy.special.logsumexp(z, axis=1)


def _ref_divergence_batch(a, x, b, y, eps_list):
    C_xy = 0.5 * jnp.sum((x[:, None, :] - y[None, :, :]) ** 2, axis=-1)
    C_yx = C_xy.T
    C_xx = 0.5 * jnp.sum((x[:, None, :] - x[None, :, :]) ** 2, axis=-1)
    C_yy = 0.5 * jnp.sum((y[:, None, :] - y[None, :, :]) ** 2, axis=-1)
    la, lb = jnp.log(a), jnp.log(b)
    e0 = eps_list[0]
    f_ab = _ref_softmin(e0, C_xy, lb)
    g_ba = _ref_softmin(e0, C_yx, la)
    f_aa = _ref_softmin(e0, C_xx, la)
    g_bb = _ref_softmin(e0, C_yy, lb)
    for eps in eps_list:
        ft = _ref_softmin(eps, C_xy, lb + g_ba / eps)
        gt = _ref_softmin(eps, C_yx, la + f_ab / eps)
        f_ab, g_ba = 0.5 * (f_ab + ft), 0.5 * (g_ba + gt)
        f_aa = 0.5 * (f_aa + _ref_softmin(eps, C_xx, la + f_aa / eps))
        g_bb = 0.5 * (g_bb + _ref_softmin(eps, C_yy, lb + g_bb / eps))
    ef = eps_list[-1]
    f_fin = _ref_softmin(ef, C_xy, lb + g_ba / ef)
    g_fin = _ref_softmin(ef, C_yx, la + f_ab / ef)
    return jnp.sum(a * (f_fin - f_aa)) + jnp.sum(b * (g_fin - g_bb))


def reference_forward(model, true_data, true_weights, edges):
    x, wx = model.rm_map(model.particle_data, model.particle_weights, edges)
    eps_list = make_eps_schedule(model.eps, model.loss_diameter, model.scaling, p=2)
    total = 0.0
    for bidx in range(true_data.shape[0]):
        total = total + _ref_divergence_batch(
            true_weights[bidx], true_data[bidx], wx[bidx], x[bidx], eps_list)
    return total


# --------------------------------------------------------------------------
if __name__ == "__main__":
    B, P1, P2, D = 2, 64, 64, 8

    key = jax.random.PRNGKey(0)
    k1, k2, k3, k4 = jax.random.split(key, 4)

    # "true" empirical measure (N, P1, D) + weights (N, P1) summing to 1.
    true_data = jax.random.normal(k1, (B, P1, D), dtype=jnp.float32)
    true_weights = jax.nn.softmax(jax.random.normal(k2, (B, P1), dtype=jnp.float32), axis=-1)

    # deterministic "particles" (parameters of the module).
    particle_data = jax.random.normal(k3, (P2, D), dtype=jnp.float32)
    particle_weights = jnp.full((P2,), 1.0 / P2, dtype=jnp.float32)

    # edges: row-stochastic mixing matrices used by rm_map.
    edges = jax.nn.softmax(jax.random.normal(k4, (B, P2, P2), dtype=jnp.float32), axis=-1)

    model = SinkhornWeighted(particle_data, particle_weights, rm_map, eps=0.05)

    out = model.forward(true_data, true_weights, edges)
    out = jax.block_until_ready(out)

    ref = jax.block_until_ready(reference_forward(model, true_data, true_weights, edges))

    assert np.isfinite(np.asarray(out)), "non-finite kernel output"
    np.testing.assert_allclose(np.asarray(out), np.asarray(ref), rtol=5e-2, atol=5e-2)

    print("KERNEL_OK")
</pallas_src>

<mosaic_0001>
module attributes {stable_mosaic.version = 11 : i64} {
  func.func @_sinkhorn_kernel(%arg0: i32, %arg1: memref<1x1x64xf32, #tpu.memory_space<vmem>>, %arg2: memref<1x64x8xf32, #tpu.memory_space<vmem>>, %arg3: memref<1x1x64xf32, #tpu.memory_space<vmem>>, %arg4: memref<1x64x8xf32, #tpu.memory_space<vmem>>, %arg5: memref<1x1x128xf32, #tpu.memory_space<vmem>>, %arg6: memref<3x64x64xf32, #tpu.memory_space<vmem>>, %arg7: memref<3x1x64xf32, #tpu.memory_space<vmem>>, %arg8: memref<1x1x64xf32, #tpu.memory_space<vmem>>) attributes {dimension_semantics = [#tpu.dimension_semantics<parallel>], iteration_bounds = array<i64: 2>, scalar_prefetch = 0 : i64, scratch_operands = 3 : i64, tpu.core_type = #tpu.core_type<tc>, window_params = [{transform_indices = @transform_0, window_bounds = array<i64: 1, 1, 64>}, {transform_indices = @transform_1, window_bounds = array<i64: 1, 64, 8>}, {transform_indices = @transform_2, window_bounds = array<i64: 1, 1, 64>}, {transform_indices = @transform_3, window_bounds = array<i64: 1, 64, 8>}, {transform_indices = @transform_4, window_bounds = array<i64: 1, 1, 128>}]} {
    %c0 = arith.constant 0 : index
    %c0_0 = arith.constant 0 : index
    %c0_1 = arith.constant 0 : index
    %0 = vector.load %arg1[%c0, %c0_0, %c0_1] : memref<1x1x64xf32, #tpu.memory_space<vmem>>, vector<1x1x64xf32>
    %c0_2 = arith.constant 0 : index
    %c0_3 = arith.constant 0 : index
    %c0_4 = arith.constant 0 : index
    %1 = vector.load %arg3[%c0_2, %c0_3, %c0_4] : memref<1x1x64xf32, #tpu.memory_space<vmem>>, vector<1x1x64xf32>
    %c0_5 = arith.constant 0 : index
    %c0_6 = arith.constant 0 : index
    %c0_7 = arith.constant 0 : index
    %2 = vector.load %arg2[%c0_5, %c0_6, %c0_7] : memref<1x64x8xf32, #tpu.memory_space<vmem>>, vector<1x64x8xf32>
    %c0_8 = arith.constant 0 : index
    %c0_9 = arith.constant 0 : index
    %c0_10 = arith.constant 0 : index
    %3 = vector.load %arg4[%c0_8, %c0_9, %c0_10] : memref<1x64x8xf32, #tpu.memory_space<vmem>>, vector<1x64x8xf32>
    %4 = arith.mulf %2, %2 : vector<1x64x8xf32>
    %cst = arith.constant dense<0.000000e+00> : vector<1x64xf32>
    %5 = vector.multi_reduction <add>, %4, %cst [2] : vector<1x64x8xf32> to vector<1x64xf32>
    %6 = vector.shape_cast %5 : vector<1x64xf32> to vector<1x64x1xf32>
    %cst_11 = arith.constant 5.000000e-01 : f32
    %7 = vector.broadcast %cst_11 : f32 to vector<1x64x1xf32>
    %8 = arith.mulf %7, %6 : vector<1x64x1xf32>
    %9 = arith.mulf %3, %3 : vector<1x64x8xf32>
    %cst_12 = arith.constant dense<0.000000e+00> : vector<1x64xf32>
    %10 = vector.multi_reduction <add>, %9, %cst_12 [2] : vector<1x64x8xf32> to vector<1x64xf32>
    %11 = vector.shape_cast %10 : vector<1x64xf32> to vector<1x64x1xf32>
    %cst_13 = arith.constant 5.000000e-01 : f32
    %12 = vector.broadcast %cst_13 : f32 to vector<1x64x1xf32>
    %13 = arith.mulf %12, %11 : vector<1x64x1xf32>
    %14 = tpu.transpose %8, [0, 2, 1] : vector<1x64x1xf32> -> vector<1x1x64xf32>
    %15 = tpu.transpose %13, [0, 2, 1] : vector<1x64x1xf32> -> vector<1x1x64xf32>
    %cst_14 = arith.constant dense<0.000000e+00> : vector<1x64x64xf32>
    %16 = tpu.matmul %2, %3, %cst_14 {dimension_numbers = #tpu.dot_dimension_numbers<[2], [2], [1], [1], [0, 0, 0, 1, 1, 1], [0], [0]>} : vector<1x64x8xf32>, vector<1x64x8xf32>, vector<1x64x64xf32> -> vector<1x64x64xf32>
    %c0_15 = arith.constant 0 : index
    %c0_16 = arith.constant 0 : index
    %c0_17 = arith.constant 0 : index
    %17 = vector.load %arg6[%c0_15, %c0_16, %c0_17] : memref<3x64x64xf32, #tpu.memory_space<vmem>>, vector<1x64x64xf32>
    tpu.vector_store %arg6[%c0_15, %c0_16, %c0_17], %16 {strides = array<i32>} : memref<3x64x64xf32, #tpu.memory_space<vmem>>, vector<1x64x64xf32>,
    %cst_18 = arith.constant dense<0.000000e+00> : vector<1x64x64xf32>
    %18 = tpu.matmul %2, %2, %cst_18 {dimension_numbers = #tpu.dot_dimension_numbers<[2], [2], [1], [1], [0, 0, 0, 1, 1, 1], [0], [0]>} : vector<1x64x8xf32>, vector<1x64x8xf32>, vector<1x64x64xf32> -> vector<1x64x64xf32>
    %c1 = arith.constant 1 : index
    %c0_19 = arith.constant 0 : index
    %c0_20 = arith.constant 0 : index
    %19 = vector.load %arg6[%c1, %c0_19, %c0_20] : memref<3x64x64xf32, #tpu.memory_space<vmem>>, vector<1x64x64xf32>
    tpu.vector_store %arg6[%c1, %c0_19, %c0_20], %18 {strides = array<i32>} : memref<3x64x64xf32, #tpu.memory_space<vmem>>, vector<1x64x64xf32>,
    %cst_21 = arith.constant dense<0.000000e+00> : vector<1x64x64xf32>
    %20 = tpu.matmul %3, %3, %cst_21 {dimension_numbers = #tpu.dot_dimension_numbers<[2], [2], [1], [1], [0, 0, 0, 1, 1, 1], [0], [0]>} : vector<1x64x8xf32>, vector<1x64x8xf32>, vector<1x64x64xf32> -> vector<1x64x64xf32>
    %c2 = arith.constant 2 : index
    %c0_22 = arith.constant 0 : index
    %c0_23 = arith.constant 0 : index
    %21 = vector.load %arg6[%c2, %c0_22, %c0_23] : memref<3x64x64xf32, #tpu.memory_space<vmem>>, vector<1x64x64xf32>
    tpu.vector_store %arg6[%c2, %c0_22, %c0_23], %20 {strides = array<i32>} : memref<3x64x64xf32, #tpu.memory_space<vmem>>, vector<1x64x64xf32>,
    %22 = tpu.concatenate %1, %0, %1 in 0 : vector<1x1x64xf32>, vector<1x1x64xf32>, vector<1x1x64xf32> -> vector<3x1x64xf32>
    %23 = tpu.concatenate %15, %14, %15 in 0 : vector<1x1x64xf32>, vector<1x1x64xf32>, vector<1x1x64xf32> -> vector<3x1x64xf32>
    %cst_24 = arith.constant 6.250000e-02 : f32
    %24 = vector.broadcast %cst_24 : f32 to vector<3x1x64xf32>
    %25 = arith.mulf %23, %24 : vector<3x1x64xf32>
    %26 = arith.subf %22, %25 : vector<3x1x64xf32>
    %cst_25 = arith.constant 6.250000e-02 : f32
    %27 = vector.broadcast %cst_25 : f32 to vector<1x1x64xf32>
    %28 = arith.mulf %14, %27 : vector<1x1x64xf32>
    %29 = arith.subf %0, %28 : vector<1x1x64xf32>
    %c0_26 = arith.constant 0 : index
    %c0_27 = arith.constant 0 : index
    %c0_28 = arith.constant 0 : index
    %30 = vector.load %arg6[%c0_26, %c0_27, %c0_28] : memref<3x64x64xf32, #tpu.memory_space<vmem>>, vector<3x64x64xf32>
    %cst_29 = arith.constant 6.250000e-02 : f32
    %31 = vector.broadcast %cst_29 : f32 to vector<3x64x64xf32>
    %32 = arith.mulf %30, %31 : vector<3x64x64xf32>
    %33 = vector.broadcast %26 : vector<3x1x64xf32> to vector<3x64x64xf32>
    %34 = arith.addf %32, %33 : vector<3x64x64xf32>
    %cst_30 = arith.constant dense<0xFF800000> : vector<3x64xf32>
    %35 = vector.multi_reduction <maximumf>, %34, %cst_30 [2] : vector<3x64x64xf32> to vector<3x64xf32>
    %36 = vector.shape_cast %35 : vector<3x64xf32> to vector<3x64x1xf32>
    %37 = vector.broadcast %36 : vector<3x64x1xf32> to vector<3x64x64xf32>
    %38 = arith.subf %34, %37 : vector<3x64x64xf32>
    %39 = math.exp %38 : vector<3x64x64xf32>
    %cst_31 = arith.constant dense<0.000000e+00> : vector<3x64xf32>
    %40 = vector.multi_reduction <add>, %39, %cst_31 [2] : vector<3x64x64xf32> to vector<3x64xf32>
    %41 = vector.shape_cast %40 : vector<3x64xf32> to vector<3x64x1xf32>
    %42 = math.log %41 : vector<3x64x1xf32>
    %43 = arith.addf %36, %42 : vector<3x64x1xf32>
    %44 = tpu.transpose %43, [0, 2, 1] : vector<3x64x1xf32> -> vector<3x1x64xf32>
    %c0_32 = arith.constant 0 : index
    %c0_33 = arith.constant 0 : index
    %c0_34 = arith.constant 0 : index
    %45 = vector.load %arg7[%c0_32, %c0_33, %c0_34] : memref<3x1x64xf32, #tpu.memory_space<vmem>>, vector<3x1x64xf32>
    tpu.vector_store %arg7[%c0_32, %c0_33, %c0_34], %44 {strides = array<i32>} : memref<3x1x64xf32, #tpu.memory_space<vmem>>, vector<3x1x64xf32>,
    %c0_35 = arith.constant 0 : index
    %c0_36 = arith.constant 0 : index
    %c0_37 = arith.constant 0 : index
    %46 = vector.load %arg4[%c0_35, %c0_36, %c0_37] : memref<1x64x8xf32, #tpu.memory_space<vmem>>, vector<1x64x8xf32>
    %cst_38 = arith.constant dense<0.000000e+00> : vector<1x64x64xf32>
    %47 = tpu.matmul %46, %2, %cst_38 {dimension_numbers = #tpu.dot_dimension_numbers<[2], [2], [1], [1], [0, 0, 0, 1, 1, 1], [0], [0]>} : vector<1x64x8xf32>, vector<1x64x8xf32>, vector<1x64x64xf32> -> vector<1x64x64xf32>
    %cst_39 = arith.constant 6.250000e-02 : f32
    %48 = vector.broadcast %cst_39 : f32 to vector<1x64x64xf32>
    %49 = arith.mulf %47, %48 : vector<1x64x64xf32>
    %50 = vector.broadcast %29 : vector<1x1x64xf32> to vector<1x64x64xf32>
    %51 = arith.addf %49, %50 : vector<1x64x64xf32>
    %cst_40 = arith.constant dense<0xFF800000> : vector<1x64xf32>
    %52 = vector.multi_reduction <maximumf>, %51, %cst_40 [2] : vector<1x64x64xf32> to vector<1x64xf32>
    %53 = vector.shape_cast %52 : vector<1x64xf32> to vector<1x64x1xf32>
    %54 = vector.broadcast %53 : vector<1x64x1xf32> to vector<1x64x64xf32>
    %55 = arith.subf %51, %54 : vector<1x64x64xf32>
    %56 = math.exp %55 : vector<1x64x64xf32>
    %cst_41 = arith.constant dense<0.000000e+00> : vector<1x64xf32>
    %57 = vector.multi_reduction <add>, %56, %cst_41 [2] : vector<1x64x64xf32> to vector<1x64xf32>
    %58 = vector.shape_cast %57 : vector<1x64xf32> to vector<1x64x1xf32>
    %59 = math.log %58 : vector<1x64x1xf32>
    %60 = arith.addf %53, %59 : vector<1x64x1xf32>
    %61 = tpu.transpose %60, [0, 2, 1] : vector<1x64x1xf32> -> vector<1x1x64xf32>
    %c0_42 = arith.constant 0 : index
    %c0_43 = arith.constant 0 : index
    %c0_44 = arith.constant 0 : index
    %62 = vector.load %arg8[%c0_42, %c0_43, %c0_44] : memref<1x1x64xf32, #tpu.memory_space<vmem>>, vector<1x1x64xf32>
    tpu.vector_store %arg8[%c0_42, %c0_43, %c0_44], %61 {strides = array<i32>} : memref<1x1x64xf32, #tpu.memory_space<vmem>>, vector<1x1x64xf32>,
    %c0_45 = arith.constant 0 : index
    %c0_46 = arith.constant 0 : index
    %c0_47 = arith.constant 0 : index
    %63 = vector.load %arg7[%c0_45, %c0_46, %c0_47] : memref<3x1x64xf32, #tpu.memory_space<vmem>>, vector<3x1x64xf32>
    %c0_48 = arith.constant 0 : index
    %c0_49 = arith.constant 0 : index
    %c0_50 = arith.constant 0 : index
    %64 = vector.load %arg8[%c0_48, %c0_49, %c0_50] : memref<1x1x64xf32, #tpu.memory_space<vmem>>, vector<1x1x64xf32>
    %65 = vector.extract_strided_slice %63 {offsets = [0, 0, 0], sizes = [1, 1, 64], strides = [1, 1, 1]} : vector<3x1x64xf32> to vector<1x1x64xf32>
    %cst_51 = arith.constant 1.600000e+01 : f32
    %66 = vector.broadcast %cst_51 : f32 to vector<1x1x64xf32>
    %67 = arith.mulf %66, %65 : vector<1x1x64xf32>
    %68 = arith.subf %14, %67 : vector<1x1x64xf32>
    %69 = vector.extract_strided_slice %63 {offsets = [1, 0, 0], sizes = [1, 1, 64], strides = [1, 1, 1]} : vector<3x1x64xf32> to vector<1x1x64xf32>
    %cst_52 = arith.constant 1.600000e+01 : f32
    %70 = vector.broadcast %cst_52 : f32 to vector<1x1x64xf32>
    %71 = arith.mulf %70, %69 : vector<1x1x64xf32>
    %72 = arith.subf %14, %71 : vector<1x1x64xf32>
    %73 = vector.extract_strided_slice %63 {offsets = [2, 0, 0], sizes = [1, 1, 64], strides = [1, 1, 1]} : vector<3x1x64xf32> to vector<1x1x64xf32>
    %cst_53 = arith.constant 1.600000e+01 : f32
    %74 = vector.broadcast %cst_53 : f32 to vector<1x1x64xf32>
    %75 = arith.mulf %74, %73 : vector<1x1x64xf32>
    %76 = arith.subf %15, %75 : vector<1x1x64xf32>
    %cst_54 = arith.constant 1.600000e+01 : f32
    %77 = vector.broadcast %cst_54 : f32 to vector<1x1x64xf32>
    %78 = arith.mulf %77, %64 : vector<1x1x64xf32>
    %79 = arith.subf %15, %78 : vector<1x1x64xf32>
    %80 = tpu.concatenate %79, %72, %76 in 0 : vector<1x1x64xf32>, vector<1x1x64xf32>, vector<1x1x64xf32> -> vector<3x1x64xf32>
    %81 = arith.subf %80, %23 : vector<3x1x64xf32>
    %cst_55 = arith.constant 6.250000e-02 : f32
    %82 = vector.broadcast %cst_55 : f32 to vector<3x1x64xf32>
    %83 = arith.mulf %81, %82 : vector<3x1x64xf32>
    %84 = arith.addf %22, %83 : vector<3x1x64xf32>
    %85 = arith.subf %68, %14 : vector<1x1x64xf32>
    %cst_56 = arith.constant 6.250000e-02 : f32
    %86 = vector.broadcast %cst_56 : f32 to vector<1x1x64xf32>
    %87 = arith.mulf %85, %86 : vector<1x1x64xf32>
    %88 = arith.addf %0, %87 : vector<1x1x64xf32>
    %c0_57 = arith.constant 0 : index
    %c0_58 = arith.constant 0 : index
    %c0_59 = arith.constant 0 : index
    %89 = vector.load %arg6[%c0_57, %c0_58, %c0_59] : memref<3x64x64xf32, #tpu.memory_space<vmem>>, vector<3x64x64xf32>
    %cst_60 = arith.constant 6.250000e-02 : f32
    %90 = vector.broadcast %cst_60 : f32 to vector<3x64x64xf32>
    %91 = arith.mulf %89, %90 : vector<3x64x64xf32>
    %92 = vector.broadcast %84 : vector<3x1x64xf32> to vector<3x64x64xf32>
    %93 = arith.addf %91, %92 : vector<3x64x64xf32>
    %cst_61 = arith.constant dense<0xFF800000> : vector<3x64xf32>
    %94 = vector.multi_reduction <maximumf>, %93, %cst_61 [2] : vector<3x64x64xf32> to vector<3x64xf32>
    %95 = vector.shape_cast %94 : vector<3x64xf32> to vector<3x64x1xf32>
    %96 = vector.broadcast %95 : vector<3x64x1xf32> to vector<3x64x64xf32>
    %97 = arith.subf %93, %96 : vector<3x64x64xf32>
    %98 = math.exp %97 : vector<3x64x64xf32>
    %cst_62 = arith.constant dense<0.000000e+00> : vector<3x64xf32>
    %99 = vector.multi_reduction <add>, %98, %cst_62 [2] : vector<3x64x64xf32> to vector<3x64xf32>
    %100 = vector.shape_cast %99 : vector<3x64xf32> to vector<3x64x1xf32>
    %101 = math.log %100 : vector<3x64x1xf32>
    %102 = arith.addf %95, %101 : vector<3x64x1xf32>
    %103 = tpu.transpose %102, [0, 2, 1] : vector<3x64x1xf32> -> vector<3x1x64xf32>
    %c0_63 = arith.constant 0 : index
    %c0_64 = arith.constant 0 : index
    %c0_65 = arith.constant 0 : index
    %104 = vector.load %arg7[%c0_63, %c0_64, %c0_65] : memref<3x1x64xf32, #tpu.memory_space<vmem>>, vector<3x1x64xf32>
    tpu.vector_store %arg7[%c0_63, %c0_64, %c0_65], %103 {strides = array<i32>} : memref<3x1x64xf32, #tpu.memory_space<vmem>>, vector<3x1x64xf32>,
    %c0_66 = arith.constant 0 : index
    %c0_67 = arith.constant 0 : index
    %c0_68 = arith.constant 0 : index
    %105 = vector.load %arg4[%c0_66, %c0_67, %c0_68] : memref<1x64x8xf32, #tpu.memory_space<vmem>>, vector<1x64x8xf32>
    %cst_69 = arith.constant dense<0.000000e+00> : vector<1x64x64xf32>
    %106 = tpu.matmul %105, %2, %cst_69 {dimension_numbers = #tpu.dot_dimension_numbers<[2], [2], [1], [1], [0, 0, 0, 1, 1, 1], [0], [0]>} : vector<1x64x8xf32>, vector<1x64x8xf32>, vector<1x64x64xf32> -> vector<1x64x64xf32>
    %cst_70 = arith.constant 6.250000e-02 : f32
    %107 = vector.broadcast %cst_70 : f32 to vector<1x64x64xf32>
    %108 = arith.mulf %106, %107 : vector<1x64x64xf32>
    %109 = vector.broadcast %88 : vector<1x1x64xf32> to vector<1x64x64xf32>
    %110 = arith.addf %108, %109 : vector<1x64x64xf32>
    %cst_71 = arith.constant dense<0xFF800000> : vector<1x64xf32>
    %111 = vector.multi_reduction <maximumf>, %110, %cst_71 [2] : vector<1x64x64xf32> to vector<1x64xf32>
    %112 = vector.shape_cast %111 : vector<1x64xf32> to vector<1x64x1xf32>
    %113 = vector.broadcast %112 : vector<1x64x1xf32> to vector<1x64x64xf32>
    %114 = arith.subf %110, %113 : vector<1x64x64xf32>
    %115 = math.exp %114 : vector<1x64x64xf32>
    %cst_72 = arith.constant dense<0.000000e+00> : vector<1x64xf32>
    %116 = vector.multi_reduction <add>, %115, %cst_72 [2] : vector<1x64x64xf32> to vector<1x64xf32>
    %117 = vector.shape_cast %116 : vector<1x64xf32> to vector<1x64x1xf32>
    %118 = math.log %117 : vector<1x64x1xf32>
    %119 = arith.addf %112, %118 : vector<1x64x1xf32>
    %120 = tpu.transpose %119, [0, 2, 1] : vector<1x64x1xf32> -> vector<1x1x64xf32>
    %c0_73 = arith.constant 0 : index
    %c0_74 = arith.constant 0 : index
    %c0_75 = arith.constant 0 : index
    %121 = vector.load %arg8[%c0_73, %c0_74, %c0_75] : memref<1x1x64xf32, #tpu.memory_space<vmem>>, vector<1x1x64xf32>
    tpu.vector_store %arg8[%c0_73, %c0_74, %c0_75], %120 {strides = array<i32>} : memref<1x1x64xf32, #tpu.memory_space<vmem>>, vector<1x1x64xf32>,
    %c0_76 = arith.constant 0 : index
    %c0_77 = arith.constant 0 : index
    %c0_78 = arith.constant 0 : index
    %122 = vector.load %arg7[%c0_76, %c0_77, %c0_78] : memref<3x1x64xf32, #tpu.memory_space<vmem>>, vector<3x1x64xf32>
    %c0_79 = arith.constant 0 : index
    %c0_80 = arith.constant 0 : index
    %c0_81 = arith.constant 0 : index
    %123 = vector.load %arg8[%c0_79, %c0_80, %c0_81] : memref<1x1x64xf32, #tpu.memory_space<vmem>>, vector<1x1x64xf32>
    %124 = arith.addf %68, %14 : vector<1x1x64xf32>
    %125 = vector.extract_strided_slice %122 {offsets = [0, 0, 0], sizes = [1, 1, 64], strides = [1, 1, 1]} : vector<3x1x64xf32> to vector<1x1x64xf32>
    %cst_82 = arith.constant 1.600000e+01 : f32
    %126 = vector.broadcast %cst_82 : f32 to vector<1x1x64xf32>
    %127 = arith.mulf %126, %125 : vector<1x1x64xf32>
    %128 = arith.subf %124, %127 : vector<1x1x64xf32>
    %cst_83 = arith.constant 5.000000e-01 : f32
    %129 = vector.broadcast %cst_83 : f32 to vector<1x1x64xf32>
    %130 = arith.mulf %129, %128 : vector<1x1x64xf32>
    %131 = arith.addf %72, %14 : vector<1x1x64xf32>
    %132 = vector.extract_strided_slice %122 {offsets = [1, 0, 0], sizes = [1, 1, 64], strides = [1, 1, 1]} : vector<3x1x64xf32> to vector<1x1x64xf32>
    %cst_84 = arith.constant 1.600000e+01 : f32
    %133 = vector.broadcast %cst_84 : f32 to vector<1x1x64xf32>
    %134 = arith.mulf %133, %132 : vector<1x1x64xf32>
    %135 = arith.subf %131, %134 : vector<1x1x64xf32>
    %cst_85 = arith.constant 5.000000e-01 : f32
    %136 = vector.broadcast %cst_85 : f32 to vector<1x1x64xf32>
    %137 = arith.mulf %136, %135 : vector<1x1x64xf32>
    %138 = arith.addf %76, %15 : vector<1x1x64xf32>
    %139 = vector.extract_strided_slice %122 {offsets = [2, 0, 0], sizes = [1, 1, 64], strides = [1, 1, 1]} : vector<3x1x64xf32> to vector<1x1x64xf32>
    %cst_86 = arith.constant 1.600000e+01 : f32
    %140 = vector.broadcast %cst_86 : f32 to vector<1x1x64xf32>
    %141 = arith.mulf %140, %139 : vector<1x1x64xf32>
    %142 = arith.subf %138, %141 : vector<1x1x64xf32>
    %cst_87 = arith.constant 5.000000e-01 : f32
    %143 = vector.broadcast %cst_87 : f32 to vector<1x1x64xf32>
    %144 = arith.mulf %143, %142 : vector<1x1x64xf32>
    %145 = arith.addf %79, %15 : vector<1x1x64xf32>
    %cst_88 = arith.constant 1.600000e+01 : f32
    %146 = vector.broadcast %cst_88 : f32 to vector<1x1x64xf32>
    %147 = arith.mulf %146, %123 : vector<1x1x64xf32>
    %148 = arith.subf %145, %147 : vector<1x1x64xf32>
    %cst_89 = arith.constant 5.000000e-01 : f32
    %149 = vector.broadcast %cst_89 : f32 to vector<1x1x64xf32>
    %150 = arith.mulf %149, %148 : vector<1x1x64xf32>
    %151 = tpu.concatenate %150, %137, %144 in 0 : vector<1x1x64xf32>, vector<1x1x64xf32>, vector<1x1x64xf32> -> vector<3x1x64xf32>
    %152 = arith.subf %151, %23 : vector<3x1x64xf32>
    %cst_90 = arith.constant 2.500000e-01 : f32
    %153 = vector.broadcast %cst_90 : f32 to vector<3x1x64xf32>
    %154 = arith.mulf %152, %153 : vector<3x1x64xf32>
    %155 = arith.addf %22, %154 : vector<3x1x64xf32>
    %156 = arith.subf %130, %14 : vector<1x1x64xf32>
    %cst_91 = arith.constant 2.500000e-01 : f32
    %157 = vector.broadcast %cst_91 : f32 to vector<1x1x64xf32>
    %158 = arith.mulf %156, %157 : vector<1x1x64xf32>
    %159 = arith.addf %0, %158 : vector<1x1x64xf32>
    %c0_92 = arith.constant 0 : index
    %c0_93 = arith.constant 0 : index
    %c0_94 = arith.constant 0 : index
    %160 = vector.load %arg6[%c0_92, %c0_93, %c0_94] : memref<3x64x64xf32, #tpu.memory_space<vmem>>, vector<3x64x64xf32>
    %cst_95 = arith.constant 2.500000e-01 : f32
    %161 = vector.broadcast %cst_95 : f32 to vector<3x64x64xf32>
    %162 = arith.mulf %160, %161 : vector<3x64x64xf32>
    %163 = vector.broadcast %155 : vector<3x1x64xf32> to vector<3x64x64xf32>
    %164 = arith.addf %162, %163 : vector<3x64x64xf32>
    %cst_96 = arith.constant dense<0xFF800000> : vector<3x64xf32>
    %165 = vector.multi_reduction <maximumf>, %164, %cst_96 [2] : vector<3x64x64xf32> to vector<3x64xf32>
    %166 = vector.shape_cast %165 : vector<3x64xf32> to vector<3x64x1xf32>
    %167 = vector.broadcast %166 : vector<3x64x1xf32> to vector<3x64x64xf32>
    %168 = arith.subf %164, %167 : vector<3x64x64xf32>
    %169 = math.exp %168 : vector<3x64x64xf32>
    %cst_97 = arith.constant dense<0.000000e+00> : vector<3x64xf32>
    %170 = vector.multi_reduction <add>, %169, %cst_97 [2] : vector<3x64x64xf32> to vector<3x64xf32>
    %171 = vector.shape_cast %170 : vector<3x64xf32> to vector<3x64x1xf32>
    %172 = math.log %171 : vector<3x64x1xf32>
    %173 = arith.addf %166, %172 : vector<3x64x1xf32>
    %174 = tpu.transpose %173, [0, 2, 1] : vector<3x64x1xf32> -> vector<3x1x64xf32>
    %c0_98 = arith.constant 0 : index
    %c0_99 = arith.constant 0 : index
    %c0_100 = arith.constant 0 : index
    %175 = vector.load %arg7[%c0_98, %c0_99, %c0_100] : memref<3x1x64xf32, #tpu.memory_space<vmem>>, vector<3x1x64xf32>
    tpu.vector_store %arg7[%c0_98, %c0_99, %c0_100], %174 {strides = array<i32>} : memref<3x1x64xf32, #tpu.memory_space<vmem>>, vector<3x1x64xf32>,
    %c0_101 = arith.constant 0 : index
    %c0_102 = arith.constant 0 : index
    %c0_103 = arith.constant 0 : index
    %176 = vector.load %arg4[%c0_101, %c0_102, %c0_103] : memref<1x64x8xf32, #tpu.memory_space<vmem>>, vector<1x64x8xf32>
    %cst_104 = arith.constant dense<0.000000e+00> : vector<1x64x64xf32>
    %177 = tpu.matmul %176, %2, %cst_104 {dimension_numbers = #tpu.dot_dimension_numbers<[2], [2], [1], [1], [0, 0, 0, 1, 1, 1], [0], [0]>} : vector<1x64x8xf32>, vector<1x64x8xf32>, vector<1x64x64xf32> -> vector<1x64x64xf32>
    %cst_105 = arith.constant 2.500000e-01 : f32
    %178 = vector.broadcast %cst_105 : f32 to vector<1x64x64xf32>
    %179 = arith.mulf %177, %178 : vector<1x64x64xf32>
    %180 = vector.broadcast %159 : vector<1x1x64xf32> to vector<1x64x64xf32>
    %181 = arith.addf %179, %180 : vector<1x64x64xf32>
    %cst_106 = arith.constant dense<0xFF800000> : vector<1x64xf32>
    %182 = vector.multi_reduction <maximumf>, %181, %cst_106 [2] : vector<1x64x64xf32> to vector<1x64xf32>
    %183 = vector.shape_cast %182 : vector<1x64xf32> to vector<1x64x1xf32>
    %184 = vector.broadcast %183 : vector<1x64x1xf32> to vector<1x64x64xf32>
    %185 = arith.subf %181, %184 : vector<1x64x64xf32>
    %186 = math.exp %185 : vector<1x64x64xf32>
    %cst_107 = arith.constant dense<0.000000e+00> : vector<1x64xf32>
    %187 = vector.multi_reduction <add>, %186, %cst_107 [2] : vector<1x64x64xf32> to vector<1x64xf32>
    %188 = vector.shape_cast %187 : vector<1x64xf32> to vector<1x64x1xf32>
    %189 = math.log %188 : vector<1x64x1xf32>
    %190 = arith.addf %183, %189 : vector<1x64x1xf32>
    %191 = tpu.transpose %190, [0, 2, 1] : vector<1x64x1xf32> -> vector<1x1x64xf32>
    %c0_108 = arith.constant 0 : index
    %c0_109 = arith.constant 0 : index
    %c0_110 = arith.constant 0 : index
    %192 = vector.load %arg8[%c0_108, %c0_109, %c0_110] : memref<1x1x64xf32, #tpu.memory_space<vmem>>, vector<1x1x64xf32>
    tpu.vector_store %arg8[%c0_108, %c0_109, %c0_110], %191 {strides = array<i32>} : memref<1x1x64xf32, #tpu.memory_space<vmem>>, vector<1x1x64xf32>,
    %c0_111 = arith.constant 0 : index
    %c0_112 = arith.constant 0 : index
    %c0_113 = arith.constant 0 : index
    %193 = vector.load %arg7[%c0_111, %c0_112, %c0_113] : memref<3x1x64xf32, #tpu.memory_space<vmem>>, vector<3x1x64xf32>
    %c0_114 = arith.constant 0 : index
    %c0_115 = arith.constant 0 : index
    %c0_116 = arith.constant 0 : index
    %194 = vector.load %arg8[%c0_114, %c0_115, %c0_116] : memref<1x1x64xf32, #tpu.memory_space<vmem>>, vector<1x1x64xf32>
    %195 = arith.addf %130, %14 : vector<1x1x64xf32>
    %196 = vector.extract_strided_slice %193 {offsets = [0, 0, 0], sizes = [1, 1, 64], strides = [1, 1, 1]} : vector<3x1x64xf32> to vector<1x1x64xf32>
    %cst_117 = arith.constant 4.000000e+00 : f32
    %197 = vector.broadcast %cst_117 : f32 to vector<1x1x64xf32>
    %198 = arith.mulf %197, %196 : vector<1x1x64xf32>
    %199 = arith.subf %195, %198 : vector<1x1x64xf32>
    %cst_118 = arith.constant 5.000000e-01 : f32
    %200 = vector.broadcast %cst_118 : f32 to vector<1x1x64xf32>
    %201 = arith.mulf %200, %199 : vector<1x1x64xf32>
    %202 = arith.addf %137, %14 : vector<1x1x64xf32>
    %203 = vector.extract_strided_slice %193 {offsets = [1, 0, 0], sizes = [1, 1, 64], strides = [1, 1, 1]} : vector<3x1x64xf32> to vector<1x1x64xf32>
    %cst_119 = arith.constant 4.000000e+00 : f32
    %204 = vector.broadcast %cst_119 : f32 to vector<1x1x64xf32>
    %205 = arith.mulf %204, %203 : vector<1x1x64xf32>
    %206 = arith.subf %202, %205 : vector<1x1x64xf32>
    %cst_120 = arith.constant 5.000000e-01 : f32
    %207 = vector.broadcast %cst_120 : f32 to vector<1x1x64xf32>
    %208 = arith.mulf %207, %206 : vector<1x1x64xf32>
    %209 = arith.addf %144, %15 : vector<1x1x64xf32>
    %210 = vector.extract_strided_slice %193 {offsets = [2, 0, 0], sizes = [1, 1, 64], strides = [1, 1, 1]} : vector<3x1x64xf32> to vector<1x1x64xf32>
    %cst_121 = arith.constant 4.000000e+00 : f32
    %211 = vector.broadcast %cst_121 : f32 to vector<1x1x64xf32>
    %212 = arith.mulf %211, %210 : vector<1x1x64xf32>
    %213 = arith.subf %209, %212 : vector<1x1x64xf32>
    %cst_122 = arith.constant 5.000000e-01 : f32
    %214 = vector.broadcast %cst_122 : f32 to vector<1x1x64xf32>
    %215 = arith.mulf %214, %213 : vector<1x1x64xf32>
    %216 = arith.addf %150, %15 : vector<1x1x64xf32>
    %cst_123 = arith.constant 4.000000e+00 : f32
    %217 = vector.broadcast %cst_123 : f32 to vector<1x1x64xf32>
    %218 = arith.mulf %217, %194 : vector<1x1x64xf32>
    %219 = arith.subf %216, %218 : vector<1x1x64xf32>
    %cst_124 = arith.constant 5.000000e-01 : f32
    %220 = vector.broadcast %cst_124 : f32 to vector<1x1x64xf32>
    %221 = arith.mulf %220, %219 : vector<1x1x64xf32>
    %222 = tpu.concatenate %221, %208, %215 in 0 : vector<1x1x64xf32>, vector<1x1x64xf32>, vector<1x1x64xf32> -> vector<3x1x64xf32>
    %223 = arith.subf %222, %23 : vector<3x1x64xf32>
    %cst_125 = arith.constant 1.000000e+00 : f32
    %224 = vector.broadcast %cst_125 : f32 to vector<3x1x64xf32>
    %225 = arith.mulf %223, %224 : vector<3x1x64xf32>
    %226 = arith.addf %22, %225 : vector<3x1x64xf32>
    %227 = arith.subf %201, %14 : vector<1x1x64xf32>
    %cst_126 = arith.constant 1.000000e+00 : f32
    %228 = vector.broadcast %cst_126 : f32 to vector<1x1x64xf32>
    %229 = arith.mulf %227, %228 : vector<1x1x64xf32>
    %230 = arith.addf %0, %229 : vector<1x1x64xf32>
    %c0_127 = arith.constant 0 : index
    %c0_128 = arith.constant 0 : index
    %c0_129 = arith.constant 0 : index
    %231 = vector.load %arg6[%c0_127, %c0_128, %c0_129] : memref<3x64x64xf32, #tpu.memory_space<vmem>>, vector<3x64x64xf32>
    %cst_130 = arith.constant 1.000000e+00 : f32
    %232 = vector.broadcast %cst_130 : f32 to vector<3x64x64xf32>
    %233 = arith.mulf %231, %232 : vector<3x64x64xf32>
    %234 = vector.broadcast %226 : vector<3x1x64xf32> to vector<3x64x64xf32>
    %235 = arith.addf %233, %234 : vector<3x64x64xf32>
    %cst_131 = arith.constant dense<0xFF800000> : vector<3x64xf32>
    %236 = vector.multi_reduction <maximumf>, %235, %cst_131 [2] : vector<3x64x64xf32> to vector<3x64xf32>
    %237 = vector.shape_cast %236 : vector<3x64xf32> to vector<3x64x1xf32>
    %238 = vector.broadcast %237 : vector<3x64x1xf32> to vector<3x64x64xf32>
    %239 = arith.subf %235, %238 : vector<3x64x64xf32>
    %240 = math.exp %239 : vector<3x64x64xf32>
    %cst_132 = arith.constant dense<0.000000e+00> : vector<3x64xf32>
    %241 = vector.multi_reduction <add>, %240, %cst_132 [2] : vector<3x64x64xf32> to vector<3x64xf32>
    %242 = vector.shape_cast %241 : vector<3x64xf32> to vector<3x64x1xf32>
    %243 = math.log %242 : vector<3x64x1xf32>
    %244 = arith.addf %237, %243 : vector<3x64x1xf32>
    %245 = tpu.transpose %244, [0, 2, 1] : vector<3x64x1xf32> -> vector<3x1x64xf32>
    %c0_133 = arith.constant 0 : index
    %c0_134 = arith.constant 0 : index
    %c0_135 = arith.constant 0 : index
    %246 = vector.load %arg7[%c0_133, %c0_134, %c0_135] : memref<3x1x64xf32, #tpu.memory_space<vmem>>, vector<3x1x64xf32>
    tpu.vector_store %arg7[%c0_133, %c0_134, %c0_135], %245 {strides = array<i32>} : memref<3x1x64xf32, #tpu.memory_space<vmem>>, vector<3x1x64xf32>,
    %c0_136 = arith.constant 0 : index
    %c0_137 = arith.constant 0 : index
    %c0_138 = arith.constant 0 : index
    %247 = vector.load %arg4[%c0_136, %c0_137, %c0_138] : memref<1x64x8xf32, #tpu.memory_space<vmem>>, vector<1x64x8xf32>
    %cst_139 = arith.constant dense<0.000000e+00> : vector<1x64x64xf32>
    %248 = tpu.matmul %247, %2, %cst_139 {dimension_numbers = #tpu.dot_dimension_numbers<[2], [2], [1], [1], [0, 0, 0, 1, 1, 1], [0], [0]>} : vector<1x64x8xf32>, vector<1x64x8xf32>, vector<1x64x64xf32> -> vector<1x64x64xf32>
    %cst_140 = arith.constant 1.000000e+00 : f32
    %249 = vector.broadcast %cst_140 : f32 to vector<1x64x64xf32>
    %250 = arith.mulf %248, %249 : vector<1x64x64xf32>
    %251 = vector.broadcast %230 : vector<1x1x64xf32> to vector<1x64x64xf32>
    %252 = arith.addf %250, %251 : vector<1x64x64xf32>
    %cst_141 = arith.constant dense<0xFF800000> : vector<1x64xf32>
    %253 = vector.multi_reduction <maximumf>, %252, %cst_141 [2] : vector<1x64x64xf32> to vector<1x64xf32>
    %254 = vector.shape_cast %253 : vector<1x64xf32> to vector<1x64x1xf32>
    %255 = vector.broadcast %254 : vector<1x64x1xf32> to vector<1x64x64xf32>
    %256 = arith.subf %252, %255 : vector<1x64x64xf32>
    %257 = math.exp %256 : vector<1x64x64xf32>
    %cst_142 = arith.constant dense<0.000000e+00> : vector<1x64xf32>
    %258 = vector.multi_reduction <add>, %257, %cst_142 [2] : vector<1x64x64xf32> to vector<1x64xf32>
    %259 = vector.shape_cast %258 : vector<1x64xf32> to vector<1x64x1xf32>
    %260 = math.log %259 : vector<1x64x1xf32>
    %261 = arith.addf %254, %260 : vector<1x64x1xf32>
    %262 = tpu.transpose %261, [0, 2, 1] : vector<1x64x1xf32> -> vector<1x1x64xf32>
    %c0_143 = arith.constant 0 : index
    %c0_144 = arith.constant 0 : index
    %c0_145 = arith.constant 0 : index
    %263 = vector.load %arg8[%c0_143, %c0_144, %c0_145] : memref<1x1x64xf32, #tpu.memory_space<vmem>>, vector<1x1x64xf32>
    tpu.vector_store %arg8[%c0_143, %c0_144, %c0_145], %262 {strides = array<i32>} : memref<1x1x64xf32, #tpu.memory_space<vmem>>, vector<1x1x64xf32>,
    %c0_146 = arith.constant 0 : index
    %c0_147 = arith.constant 0 : index
    %c0_148 = arith.constant 0 : index
    %264 = vector.load %arg7[%c0_146, %c0_147, %c0_148] : memref<3x1x64xf32, #tpu.memory_space<vmem>>, vector<3x1x64xf32>
    %c0_149 = arith.constant 0 : index
    %c0_150 = arith.constant 0 : index
    %c0_151 = arith.constant 0 : index
    %265 = vector.load %arg8[%c0_149, %c0_150, %c0_151] : memref<1x1x64xf32, #tpu.memory_space<vmem>>, vector<1x1x64xf32>
    %266 = arith.addf %201, %14 : vector<1x1x64xf32>
    %267 = vector.extract_strided_slice %264 {offsets = [0, 0, 0], sizes = [1, 1, 64], strides = [1, 1, 1]} : vector<3x1x64xf32> to vector<1x1x64xf32>
    %cst_152 = arith.constant 1.000000e+00 : f32
    %268 = vector.broadcast %cst_152 : f32 to vector<1x1x64xf32>
    %269 = arith.mulf %268, %267 : vector<1x1x64xf32>
    %270 = arith.subf %266, %269 : vector<1x1x64xf32>
    %cst_153 = arith.constant 5.000000e-01 : f32
    %271 = vector.broadcast %cst_153 : f32 to vector<1x1x64xf32>
    %272 = arith.mulf %271, %270 : vector<1x1x64xf32>
    %273 = arith.addf %208, %14 : vector<1x1x64xf32>
    %274 = vector.extract_strided_slice %264 {offsets = [1, 0, 0], sizes = [1, 1, 64], strides = [1, 1, 1]} : vector<3x1x64xf32> to vector<1x1x64xf32>
    %cst_154 = arith.constant 1.000000e+00 : f32
    %275 = vector.broadcast %cst_154 : f32 to vector<1x1x64xf32>
    %276 = arith.mulf %275, %274 : vector<1x1x64xf32>
    %277 = arith.subf %273, %276 : vector<1x1x64xf32>
    %cst_155 = arith.constant 5.000000e-01 : f32
    %278 = vector.broadcast %cst_155 : f32 to vector<1x1x64xf32>
    %279 = arith.mulf %278, %277 : vector<1x1x64xf32>
    %280 = arith.addf %215, %15 : vector<1x1x64xf32>
    %281 = vector.extract_strided_slice %264 {offsets = [2, 0, 0], sizes = [1, 1, 64], strides = [1, 1, 1]} : vector<3x1x64xf32> to vector<1x1x64xf32>
    %cst_156 = arith.constant 1.000000e+00 : f32
    %282 = vector.broadcast %cst_156 : f32 to vector<1x1x64xf32>
    %283 = arith.mulf %282, %281 : vector<1x1x64xf32>
    %284 = arith.subf %280, %283 : vector<1x1x64xf32>
    %cst_157 = arith.constant 5.000000e-01 : f32
    %285 = vector.broadcast %cst_157 : f32 to vector<1x1x64xf32>
    %286 = arith.mulf %285, %284 : vector<1x1x64xf32>
    %287 = arith.addf %221, %15 : vector<1x1x64xf32>
    %cst_158 = arith.constant 1.000000e+00 : f32
    %288 = vector.broadcast %cst_158 : f32 to vector<1x1x64xf32>
    %289 = arith.mulf %288, %265 : vector<1x1x64xf32>
    %290 = arith.subf %287, %289 : vector<1x1x64xf32>
    %cst_159 = arith.constant 5.000000e-01 : f32
    %291 = vector.broadcast %cst_159 : f32 to vector<1x1x64xf32>
    %292 = arith.mulf %291, %290 : vector<1x1x64xf32>
    %293 = tpu.concatenate %292, %279, %286 in 0 : vector<1x1x64xf32>, vector<1x1x64xf32>, vector<1x1x64xf32> -> vector<3x1x64xf32>
    %294 = arith.subf %293, %23 : vector<3x1x64xf32>
    %cst_160 = arith.constant 4.000000e+00 : f32
    %295 = vector.broadcast %cst_160 : f32 to vector<3x1x64xf32>
    %296 = arith.mulf %294, %295 : vector<3x1x64xf32>
    %297 = arith.addf %22, %296 : vector<3x1x64xf32>
    %298 = arith.subf %272, %14 : vector<1x1x64xf32>
    %cst_161 = arith.constant 4.000000e+00 : f32
    %299 = vector.broadcast %cst_161 : f32 to vector<1x1x64xf32>
    %300 = arith.mulf %298, %299 : vector<1x1x64xf32>
    %301 = arith.addf %0, %300 : vector<1x1x64xf32>
    %c0_162 = arith.constant 0 : index
    %c0_163 = arith.constant 0 : index
    %c0_164 = arith.constant 0 : index
    %302 = vector.load %arg6[%c0_162, %c0_163, %c0_164] : memref<3x64x64xf32, #tpu.memory_space<vmem>>, vector<3x64x64xf32>
    %cst_165 = arith.constant 4.000000e+00 : f32
    %303 = vector.broadcast %cst_165 : f32 to vector<3x64x64xf32>
    %304 = arith.mulf %302, %303 : vector<3x64x64xf32>
    %305 = vector.broadcast %297 : vector<3x1x64xf32> to vector<3x64x64xf32>
    %306 = arith.addf %304, %305 : vector<3x64x64xf32>
    %cst_166 = arith.constant dense<0xFF800000> : vector<3x64xf32>
    %307 = vector.multi_reduction <maximumf>, %306, %cst_166 [2] : vector<3x64x64xf32> to vector<3x64xf32>
    %308 = vector.shape_cast %307 : vector<3x64xf32> to vector<3x64x1xf32>
    %309 = vector.broadcast %308 : vector<3x64x1xf32> to vector<3x64x64xf32>
    %310 = arith.subf %306, %309 : vector<3x64x64xf32>
    %311 = math.exp %310 : vector<3x64x64xf32>
    %cst_167 = arith.constant dense<0.000000e+00> : vector<3x64xf32>
    %312 = vector.multi_reduction <add>, %311, %cst_167 [2] : vector<3x64x64xf32> to vector<3x64xf32>
    %313 = vector.shape_cast %312 : vector<3x64xf32> to vector<3x64x1xf32>
    %314 = math.log %313 : vector<3x64x1xf32>
    %315 = arith.addf %308, %314 : vector<3x64x1xf32>
    %316 = tpu.transpose %315, [0, 2, 1] : vector<3x64x1xf32> -> vector<3x1x64xf32>
    %c0_168 = arith.constant 0 : index
    %c0_169 = arith.constant 0 : index
    %c0_170 = arith.constant 0 : index
    %317 = vector.load %arg7[%c0_168, %c0_169, %c0_170] : memref<3x1x64xf32, #tpu.memory_space<vmem>>, vector<3x1x64xf32>
    tpu.vector_store %arg7[%c0_168, %c0_169, %c0_170], %316 {strides = array<i32>} : memref<3x1x64xf32, #tpu.memory_space<vmem>>, vector<3x1x64xf32>,
    %c0_171 = arith.constant 0 : index
    %c0_172 = arith.constant 0 : index
    %c0_173 = arith.constant 0 : index
    %318 = vector.load %arg4[%c0_171, %c0_172, %c0_173] : memref<1x64x8xf32, #tpu.memory_space<vmem>>, vector<1x64x8xf32>
    %cst_174 = arith.constant dense<0.000000e+00> : vector<1x64x64xf32>
    %319 = tpu.matmul %318, %2, %cst_174 {dimension_numbers = #tpu.dot_dimension_numbers<[2], [2], [1], [1], [0, 0, 0, 1, 1, 1], [0], [0]>} : vector<1x64x8xf32>, vector<1x64x8xf32>, vector<1x64x64xf32> -> vector<1x64x64xf32>
    %cst_175 = arith.constant 4.000000e+00 : f32
    %320 = vector.broadcast %cst_175 : f32 to vector<1x64x64xf32>
    %321 = arith.mulf %319, %320 : vector<1x64x64xf32>
    %322 = vector.broadcast %301 : vector<1x1x64xf32> to vector<1x64x64xf32>
    %323 = arith.addf %321, %322 : vector<1x64x64xf32>
    %cst_176 = arith.constant dense<0xFF800000> : vector<1x64xf32>
    %324 = vector.multi_reduction <maximumf>, %323, %cst_176 [2] : vector<1x64x64xf32> to vector<1x64xf32>
    %325 = vector.shape_cast %324 : vector<1x64xf32> to vector<1x64x1xf32>
    %326 = vector.broadcast %325 : vector<1x64x1xf32> to vector<1x64x64xf32>
    %327 = arith.subf %323, %326 : vector<1x64x64xf32>
    %328 = math.exp %327 : vector<1x64x64xf32>
    %cst_177 = arith.constant dense<0.000000e+00> : vector<1x64xf32>
    %329 = vector.multi_reduction <add>, %328, %cst_177 [2] : vector<1x64x64xf32> to vector<1x64xf32>
    %330 = vector.shape_cast %329 : vector<1x64xf32> to vector<1x64x1xf32>
    %331 = math.log %330 : vector<1x64x1xf32>
    %332 = arith.addf %325, %331 : vector<1x64x1xf32>
    %333 = tpu.transpose %332, [0, 2, 1] : vector<1x64x1xf32> -> vector<1x1x64xf32>
    %c0_178 = arith.constant 0 : index
    %c0_179 = arith.constant 0 : index
    %c0_180 = arith.constant 0 : index
    %334 = vector.load %arg8[%c0_178, %c0_179, %c0_180] : memref<1x1x64xf32, #tpu.memory_space<vmem>>, vector<1x1x64xf32>
    tpu.vector_store %arg8[%c0_178, %c0_179, %c0_180], %333 {strides = array<i32>} : memref<1x1x64xf32, #tpu.memory_space<vmem>>, vector<1x1x64xf32>,
    %c0_181 = arith.constant 0 : index
    %c0_182 = arith.constant 0 : index
    %c0_183 = arith.constant 0 : index
    %335 = vector.load %arg7[%c0_181, %c0_182, %c0_183] : memref<3x1x64xf32, #tpu.memory_space<vmem>>, vector<3x1x64xf32>
    %c0_184 = arith.constant 0 : index
    %c0_185 = arith.constant 0 : index
    %c0_186 = arith.constant 0 : index
    %336 = vector.load %arg8[%c0_184, %c0_185, %c0_186] : memref<1x1x64xf32, #tpu.memory_space<vmem>>, vector<1x1x64xf32>
    %337 = arith.addf %272, %14 : vector<1x1x64xf32>
    %338 = vector.extract_strided_slice %335 {offsets = [0, 0, 0], sizes = [1, 1, 64], strides = [1, 1, 1]} : vector<3x1x64xf32> to vector<1x1x64xf32>
    %cst_187 = arith.constant 2.500000e-01 : f32
    %339 = vector.broadcast %cst_187 : f32 to vector<1x1x64xf32>
    %340 = arith.mulf %339, %338 : vector<1x1x64xf32>
    %341 = arith.subf %337, %340 : vector<1x1x64xf32>
    %cst_188 = arith.constant 5.000000e-01 : f32
    %342 = vector.broadcast %cst_188 : f32 to vector<1x1x64xf32>
    %343 = arith.mulf %342, %341 : vector<1x1x64xf32>
    %344 = arith.addf %279, %14 : vector<1x1x64xf32>
    %345 = vector.extract_strided_slice %335 {offsets = [1, 0, 0], sizes = [1, 1, 64], strides = [1, 1, 1]} : vector<3x1x64xf32> to vector<1x1x64xf32>
    %cst_189 = arith.constant 2.500000e-01 : f32
    %346 = vector.broadcast %cst_189 : f32 to vector<1x1x64xf32>
    %347 = arith.mulf %346, %345 : vector<1x1x64xf32>
    %348 = arith.subf %344, %347 : vector<1x1x64xf32>
    %cst_190 = arith.constant 5.000000e-01 : f32
    %349 = vector.broadcast %cst_190 : f32 to vector<1x1x64xf32>
    %350 = arith.mulf %349, %348 : vector<1x1x64xf32>
    %351 = arith.addf %286, %15 : vector<1x1x64xf32>
    %352 = vector.extract_strided_slice %335 {offsets = [2, 0, 0], sizes = [1, 1, 64], strides = [1, 1, 1]} : vector<3x1x64xf32> to vector<1x1x64xf32>
    %cst_191 = arith.constant 2.500000e-01 : f32
    %353 = vector.broadcast %cst_191 : f32 to vector<1x1x64xf32>
    %354 = arith.mulf %353, %352 : vector<1x1x64xf32>
    %355 = arith.subf %351, %354 : vector<1x1x64xf32>
    %cst_192 = arith.constant 5.000000e-01 : f32
    %356 = vector.broadcast %cst_192 : f32 to vector<1x1x64xf32>
    %357 = arith.mulf %356, %355 : vector<1x1x64xf32>
    %358 = arith.addf %292, %15 : vector<1x1x64xf32>
    %cst_193 = arith.constant 2.500000e-01 : f32
    %359 = vector.broadcast %cst_193 : f32 to vector<1x1x64xf32>
    %360 = arith.mulf %359, %336 : vector<1x1x64xf32>
    %361 = arith.subf %358, %360 : vector<1x1x64xf32>
    %cst_194 = arith.constant 5.000000e-01 : f32
    %362 = vector.broadcast %cst_194 : f32 to vector<1x1x64xf32>
    %363 = arith.mulf %362, %361 : vector<1x1x64xf32>
    %364 = tpu.concatenate %363, %350, %357 in 0 : vector<1x1x64xf32>, vector<1x1x64xf32>, vector<1x1x64xf32> -> vector<3x1x64xf32>
    %365 = arith.subf %364, %23 : vector<3x1x64xf32>
    %cst_195 = arith.constant 1.600000e+01 : f32
    %366 = vector.broadcast %cst_195 : f32 to vector<3x1x64xf32>
    %367 = arith.mulf %365, %366 : vector<3x1x64xf32>
    %368 = arith.addf %22, %367 : vector<3x1x64xf32>
    %369 = arith.subf %343, %14 : vector<1x1x64xf32>
    %cst_196 = arith.constant 1.600000e+01 : f32
    %370 = vector.broadcast %cst_196 : f32 to vector<1x1x64xf32>
    %371 = arith.mulf %369, %370 : vector<1x1x64xf32>
    %372 = arith.addf %0, %371 : vector<1x1x64xf32>
    %c0_197 = arith.constant 0 : index
    %c0_198 = arith.constant 0 : index
    %c0_199 = arith.constant 0 : index
    %373 = vector.load %arg6[%c0_197, %c0_198, %c0_199] : memref<3x64x64xf32, #tpu.memory_space<vmem>>, vector<3x64x64xf32>
    %cst_200 = arith.constant 1.600000e+01 : f32
    %374 = vector.broadcast %cst_200 : f32 to vector<3x64x64xf32>
    %375 = arith.mulf %373, %374 : vector<3x64x64xf32>
    %376 = vector.broadcast %368 : vector<3x1x64xf32> to vector<3x64x64xf32>
    %377 = arith.addf %375, %376 : vector<3x64x64xf32>
    %cst_201 = arith.constant dense<0xFF800000> : vector<3x64xf32>
    %378 = vector.multi_reduction <maximumf>, %377, %cst_201 [2] : vector<3x64x64xf32> to vector<3x64xf32>
    %379 = vector.shape_cast %378 : vector<3x64xf32> to vector<3x64x1xf32>
    %380 = vector.broadcast %379 : vector<3x64x1xf32> to vector<3x64x64xf32>
    %381 = arith.subf %377, %380 : vector<3x64x64xf32>
    %382 = math.exp %381 : vector<3x64x64xf32>
    %cst_202 = arith.constant dense<0.000000e+00> : vector<3x64xf32>
    %383 = vector.multi_reduction <add>, %382, %cst_202 [2] : vector<3x64x64xf32> to vector<3x64xf32>
    %384 = vector.shape_cast %383 : vector<3x64xf32> to vector<3x64x1xf32>
    %385 = math.log %384 : vector<3x64x1xf32>
    %386 = arith.addf %379, %385 : vector<3x64x1xf32>
    %387 = tpu.transpose %386, [0, 2, 1] : vector<3x64x1xf32> -> vector<3x1x64xf32>
    %c0_203 = arith.constant 0 : index
    %c0_204 = arith.constant 0 : index
    %c0_205 = arith.constant 0 : index
    %388 = vector.load %arg7[%c0_203, %c0_204, %c0_205] : memref<3x1x64xf32, #tpu.memory_space<vmem>>, vector<3x1x64xf32>
    tpu.vector_store %arg7[%c0_203, %c0_204, %c0_205], %387 {strides = array<i32>} : memref<3x1x64xf32, #tpu.memory_space<vmem>>, vector<3x1x64xf32>,
    %c0_206 = arith.constant 0 : index
    %c0_207 = arith.constant 0 : index
    %c0_208 = arith.constant 0 : index
    %389 = vector.load %arg4[%c0_206, %c0_207, %c0_208] : memref<1x64x8xf32, #tpu.memory_space<vmem>>, vector<1x64x8xf32>
    %cst_209 = arith.constant dense<0.000000e+00> : vector<1x64x64xf32>
    %390 = tpu.matmul %389, %2, %cst_209 {dimension_numbers = #tpu.dot_dimension_numbers<[2], [2], [1], [1], [0, 0, 0, 1, 1, 1], [0], [0]>} : vector<1x64x8xf32>, vector<1x64x8xf32>, vector<1x64x64xf32> -> vector<1x64x64xf32>
    %cst_210 = arith.constant 1.600000e+01 : f32
    %391 = vector.broadcast %cst_210 : f32 to vector<1x64x64xf32>
    %392 = arith.mulf %390, %391 : vector<1x64x64xf32>
    %393 = vector.broadcast %372 : vector<1x1x64xf32> to vector<1x64x64xf32>
    %394 = arith.addf %392, %393 : vector<1x64x64xf32>
    %cst_211 = arith.constant dense<0xFF800000> : vector<1x64xf32>
    %395 = vector.multi_reduction <maximumf>, %394, %cst_211 [2] : vector<1x64x64xf32> to vector<1x64xf32>
    %396 = vector.shape_cast %395 : vector<1x64xf32> to vector<1x64x1xf32>
    %397 = vector.broadcast %396 : vector<1x64x1xf32> to vector<1x64x64xf32>
    %398 = arith.subf %394, %397 : vector<1x64x64xf32>
    %399 = math.exp %398 : vector<1x64x64xf32>
    %cst_212 = arith.constant dense<0.000000e+00> : vector<1x64xf32>
    %400 = vector.multi_reduction <add>, %399, %cst_212 [2] : vector<1x64x64xf32> to vector<1x64xf32>
    %401 = vector.shape_cast %400 : vector<1x64xf32> to vector<1x64x1xf32>
    %402 = math.log %401 : vector<1x64x1xf32>
    %403 = arith.addf %396, %402 : vector<1x64x1xf32>
    %404 = tpu.transpose %403, [0, 2, 1] : vector<1x64x1xf32> -> vector<1x1x64xf32>
    %c0_213 = arith.constant 0 : index
    %c0_214 = arith.constant 0 : index
    %c0_215 = arith.constant 0 : index
    %405 = vector.load %arg8[%c0_213, %c0_214, %c0_215] : memref<1x1x64xf32, #tpu.memory_space<vmem>>, vector<1x1x64xf32>
    tpu.vector_store %arg8[%c0_213, %c0_214, %c0_215], %404 {strides = array<i32>} : memref<1x1x64xf32, #tpu.memory_space<vmem>>, vector<1x1x64xf32>,
    %c0_216 = arith.constant 0 : index
    %c0_217 = arith.constant 0 : index
    %c0_218 = arith.constant 0 : index
    %406 = vector.load %arg7[%c0_216, %c0_217, %c0_218] : memref<3x1x64xf32, #tpu.memory_space<vmem>>, vector<3x1x64xf32>
    %c0_219 = arith.constant 0 : index
    %c0_220 = arith.constant 0 : index
    %c0_221 = arith.constant 0 : index
    %407 = vector.load %arg8[%c0_219, %c0_220, %c0_221] : memref<1x1x64xf32, #tpu.memory_space<vmem>>, vector<1x1x64xf32>
    %408 = arith.addf %343, %14 : vector<1x1x64xf32>
    %409 = vector.extract_strided_slice %406 {offsets = [0, 0, 0], sizes = [1, 1, 64], strides = [1, 1, 1]} : vector<3x1x64xf32> to vector<1x1x64xf32>
    %cst_222 = arith.constant 6.250000e-02 : f32
    %410 = vector.broadcast %cst_222 : f32 to vector<1x1x64xf32>
    %411 = arith.mulf %410, %409 : vector<1x1x64xf32>
    %412 = arith.subf %408, %411 : vector<1x1x64xf32>
    %cst_223 = arith.constant 5.000000e-01 : f32
    %413 = vector.broadcast %cst_223 : f32 to vector<1x1x64xf32>
    %414 = arith.mulf %413, %412 : vector<1x1x64xf32>
    %415 = arith.addf %350, %14 : vector<1x1x64xf32>
    %416 = vector.extract_strided_slice %406 {offsets = [1, 0, 0], sizes = [1, 1, 64], strides = [1, 1, 1]} : vector<3x1x64xf32> to vector<1x1x64xf32>
    %cst_224 = arith.constant 6.250000e-02 : f32
    %417 = vector.broadcast %cst_224 : f32 to vector<1x1x64xf32>
    %418 = arith.mulf %417, %416 : vector<1x1x64xf32>
    %419 = arith.subf %415, %418 : vector<1x1x64xf32>
    %cst_225 = arith.constant 5.000000e-01 : f32
    %420 = vector.broadcast %cst_225 : f32 to vector<1x1x64xf32>
    %421 = arith.mulf %420, %419 : vector<1x1x64xf32>
    %422 = arith.addf %357, %15 : vector<1x1x64xf32>
    %423 = vector.extract_strided_slice %406 {offsets = [2, 0, 0], sizes = [1, 1, 64], strides = [1, 1, 1]} : vector<3x1x64xf32> to vector<1x1x64xf32>
    %cst_226 = arith.constant 6.250000e-02 : f32
    %424 = vector.broadcast %cst_226 : f32 to vector<1x1x64xf32>
    %425 = arith.mulf %424, %423 : vector<1x1x64xf32>
    %426 = arith.subf %422, %425 : vector<1x1x64xf32>
    %cst_227 = arith.constant 5.000000e-01 : f32
    %427 = vector.broadcast %cst_227 : f32 to vector<1x1x64xf32>
    %428 = arith.mulf %427, %426 : vector<1x1x64xf32>
    %429 = arith.addf %363, %15 : vector<1x1x64xf32>
    %cst_228 = arith.constant 6.250000e-02 : f32
    %430 = vector.broadcast %cst_228 : f32 to vector<1x1x64xf32>
    %431 = arith.mulf %430, %407 : vector<1x1x64xf32>
    %432 = arith.subf %429, %431 : vector<1x1x64xf32>
    %cst_229 = arith.constant 5.000000e-01 : f32
    %433 = vector.broadcast %cst_229 : f32 to vector<1x1x64xf32>
    %434 = arith.mulf %433, %432 : vector<1x1x64xf32>
    %435 = tpu.concatenate %434, %421, %428 in 0 : vector<1x1x64xf32>, vector<1x1x64xf32>, vector<1x1x64xf32> -> vector<3x1x64xf32>
    %436 = arith.subf %435, %23 : vector<3x1x64xf32>
    %cst_230 = arith.constant 6.400000e+01 : f32
    %437 = vector.broadcast %cst_230 : f32 to vector<3x1x64xf32>
    %438 = arith.mulf %436, %437 : vector<3x1x64xf32>
    %439 = arith.addf %22, %438 : vector<3x1x64xf32>
    %440 = arith.subf %414, %14 : vector<1x1x64xf32>
    %cst_231 = arith.constant 6.400000e+01 : f32
    %441 = vector.broadcast %cst_231 : f32 to vector<1x1x64xf32>
    %442 = arith.mulf %440, %441 : vector<1x1x64xf32>
    %443 = arith.addf %0, %442 : vector<1x1x64xf32>
    %c0_232 = arith.constant 0 : index
    %c0_233 = arith.constant 0 : index
    %c0_234 = arith.constant 0 : index
    %444 = vector.load %arg6[%c0_232, %c0_233, %c0_234] : memref<3x64x64xf32, #tpu.memory_space<vmem>>, vector<3x64x64xf32>
    %cst_235 = arith.constant 6.400000e+01 : f32
    %445 = vector.broadcast %cst_235 : f32 to vector<3x64x64xf32>
    %446 = arith.mulf %444, %445 : vector<3x64x64xf32>
    %447 = vector.broadcast %439 : vector<3x1x64xf32> to vector<3x64x64xf32>
    %448 = arith.addf %446, %447 : vector<3x64x64xf32>
    %cst_236 = arith.constant dense<0xFF800000> : vector<3x64xf32>
    %449 = vector.multi_reduction <maximumf>, %448, %cst_236 [2] : vector<3x64x64xf32> to vector<3x64xf32>
    %450 = vector.shape_cast %449 : vector<3x64xf32> to vector<3x64x1xf32>
    %451 = vector.broadcast %450 : vector<3x64x1xf32> to vector<3x64x64xf32>
    %452 = arith.subf %448, %451 : vector<3x64x64xf32>
    %453 = math.exp %452 : vector<3x64x64xf32>
    %cst_237 = arith.constant dense<0.000000e+00> : vector<3x64xf32>
    %454 = vector.multi_reduction <add>, %453, %cst_237 [2] : vector<3x64x64xf32> to vector<3x64xf32>
    %455 = vector.shape_cast %454 : vector<3x64xf32> to vector<3x64x1xf32>
    %456 = math.log %455 : vector<3x64x1xf32>
    %457 = arith.addf %450, %456 : vector<3x64x1xf32>
    %458 = tpu.transpose %457, [0, 2, 1] : vector<3x64x1xf32> -> vector<3x1x64xf32>
    %c0_238 = arith.constant 0 : index
    %c0_239 = arith.constant 0 : index
    %c0_240 = arith.constant 0 : index
    %459 = vector.load %arg7[%c0_238, %c0_239, %c0_240] : memref<3x1x64xf32, #tpu.memory_space<vmem>>, vector<3x1x64xf32>
    tpu.vector_store %arg7[%c0_238, %c0_239, %c0_240], %458 {strides = array<i32>} : memref<3x1x64xf32, #tpu.memory_space<vmem>>, vector<3x1x64xf32>,
    %c0_241 = arith.constant 0 : index
    %c0_242 = arith.constant 0 : index
    %c0_243 = arith.constant 0 : index
    %460 = vector.load %arg4[%c0_241, %c0_242, %c0_243] : memref<1x64x8xf32, #tpu.memory_space<vmem>>, vector<1x64x8xf32>
    %cst_244 = arith.constant dense<0.000000e+00> : vector<1x64x64xf32>
    %461 = tpu.matmul %460, %2, %cst_244 {dimension_numbers = #tpu.dot_dimension_numbers<[2], [2], [1], [1], [0, 0, 0, 1, 1, 1], [0], [0]>} : vector<1x64x8xf32>, vector<1x64x8xf32>, vector<1x64x64xf32> -> vector<1x64x64xf32>
    %cst_245 = arith.constant 6.400000e+01 : f32
    %462 = vector.broadcast %cst_245 : f32 to vector<1x64x64xf32>
    %463 = arith.mulf %461, %462 : vector<1x64x64xf32>
    %464 = vector.broadcast %443 : vector<1x1x64xf32> to vector<1x64x64xf32>
    %465 = arith.addf %463, %464 : vector<1x64x64xf32>
    %cst_246 = arith.constant dense<0xFF800000> : vector<1x64xf32>
    %466 = vector.multi_reduction <maximumf>, %465, %cst_246 [2] : vector<1x64x64xf32> to vector<1x64xf32>
    %467 = vector.shape_cast %466 : vector<1x64xf32> to vector<1x64x1xf32>
    %468 = vector.broadcast %467 : vector<1x64x1xf32> to vector<1x64x64xf32>
    %469 = arith.subf %465, %468 : vector<1x64x64xf32>
    %470 = math.exp %469 : vector<1x64x64xf32>
    %cst_247 = arith.constant dense<0.000000e+00> : vector<1x64xf32>
    %471 = vector.multi_reduction <add>, %470, %cst_247 [2] : vector<1x64x64xf32> to vector<1x64xf32>
    %472 = vector.shape_cast %471 : vector<1x64xf32> to vector<1x64x1xf32>
    %473 = math.log %472 : vector<1x64x1xf32>
    %474 = arith.addf %467, %473 : vector<1x64x1xf32>
    %475 = tpu.transpose %474, [0, 2, 1] : vector<1x64x1xf32> -> vector<1x1x64xf32>
    %c0_248 = arith.constant 0 : index
    %c0_249 = arith.constant 0 : index
    %c0_250 = arith.constant 0 : index
    %476 = vector.load %arg8[%c0_248, %c0_249, %c0_250] : memref<1x1x64xf32, #tpu.memory_space<vmem>>, vector<1x1x64xf32>
    tpu.vector_store %arg8[%c0_248, %c0_249, %c0_250], %475 {strides = array<i32>} : memref<1x1x64xf32, #tpu.memory_space<vmem>>, vector<1x1x64xf32>,
    %c0_251 = arith.constant 0 : index
    %c0_252 = arith.constant 0 : index
    %c0_253 = arith.constant 0 : index
    %477 = vector.load %arg7[%c0_251, %c0_252, %c0_253] : memref<3x1x64xf32, #tpu.memory_space<vmem>>, vector<3x1x64xf32>
    %c0_254 = arith.constant 0 : index
    %c0_255 = arith.constant 0 : index
    %c0_256 = arith.constant 0 : index
    %478 = vector.load %arg8[%c0_254, %c0_255, %c0_256] : memref<1x1x64xf32, #tpu.memory_space<vmem>>, vector<1x1x64xf32>
    %479 = arith.addf %414, %14 : vector<1x1x64xf32>
    %480 = vector.extract_strided_slice %477 {offsets = [0, 0, 0], sizes = [1, 1, 64], strides = [1, 1, 1]} : vector<3x1x64xf32> to vector<1x1x64xf32>
    %cst_257 = arith.constant 1.562500e-02 : f32
    %481 = vector.broadcast %cst_257 : f32 to vector<1x1x64xf32>
    %482 = arith.mulf %481, %480 : vector<1x1x64xf32>
    %483 = arith.subf %479, %482 : vector<1x1x64xf32>
    %cst_258 = arith.constant 5.000000e-01 : f32
    %484 = vector.broadcast %cst_258 : f32 to vector<1x1x64xf32>
    %485 = arith.mulf %484, %483 : vector<1x1x64xf32>
    %486 = arith.addf %421, %14 : vector<1x1x64xf32>
    %487 = vector.extract_strided_slice %477 {offsets = [1, 0, 0], sizes = [1, 1, 64], strides = [1, 1, 1]} : vector<3x1x64xf32> to vector<1x1x64xf32>
    %cst_259 = arith.constant 1.562500e-02 : f32
    %488 = vector.broadcast %cst_259 : f32 to vector<1x1x64xf32>
    %489 = arith.mulf %488, %487 : vector<1x1x64xf32>
    %490 = arith.subf %486, %489 : vector<1x1x64xf32>
    %cst_260 = arith.constant 5.000000e-01 : f32
    %491 = vector.broadcast %cst_260 : f32 to vector<1x1x64xf32>
    %492 = arith.mulf %491, %490 : vector<1x1x64xf32>
    %493 = arith.addf %428, %15 : vector<1x1x64xf32>
    %494 = vector.extract_strided_slice %477 {offsets = [2, 0, 0], sizes = [1, 1, 64], strides = [1, 1, 1]} : vector<3x1x64xf32> to vector<1x1x64xf32>
    %cst_261 = arith.constant 1.562500e-02 : f32
    %495 = vector.broadcast %cst_261 : f32 to vector<1x1x64xf32>
    %496 = arith.mulf %495, %494 : vector<1x1x64xf32>
    %497 = arith.subf %493, %496 : vector<1x1x64xf32>
    %cst_262 = arith.constant 5.000000e-01 : f32
    %498 = vector.broadcast %cst_262 : f32 to vector<1x1x64xf32>
    %499 = arith.mulf %498, %497 : vector<1x1x64xf32>
    %500 = arith.addf %434, %15 : vector<1x1x64xf32>
    %cst_263 = arith.constant 1.562500e-02 : f32
    %501 = vector.broadcast %cst_263 : f32 to vector<1x1x64xf32>
    %502 = arith.mulf %501, %478 : vector<1x1x64xf32>
    %503 = arith.subf %500, %502 : vector<1x1x64xf32>
    %cst_264 = arith.constant 5.000000e-01 : f32
    %504 = vector.broadcast %cst_264 : f32 to vector<1x1x64xf32>
    %505 = arith.mulf %504, %503 : vector<1x1x64xf32>
    %506 = tpu.concatenate %505, %492, %499 in 0 : vector<1x1x64xf32>, vector<1x1x64xf32>, vector<1x1x64xf32> -> vector<3x1x64xf32>
    %507 = arith.subf %506, %23 : vector<3x1x64xf32>
    %cst_265 = arith.constant 2.560000e+02 : f32
    %508 = vector.broadcast %cst_265 : f32 to vector<3x1x64xf32>
    %509 = arith.mulf %507, %508 : vector<3x1x64xf32>
    %510 = arith.addf %22, %509 : vector<3x1x64xf32>
    %511 = arith.subf %485, %14 : vector<1x1x64xf32>
    %cst_266 = arith.constant 2.560000e+02 : f32
    %512 = vector.broadcast %cst_266 : f32 to vector<1x1x64xf32>
    %513 = arith.mulf %511, %512 : vector<1x1x64xf32>
    %514 = arith.addf %0, %513 : vector<1x1x64xf32>
    %c0_267 = arith.constant 0 : index
    %c0_268 = arith.constant 0 : index
    %c0_269 = arith.constant 0 : index
    %515 = vector.load %arg6[%c0_267, %c0_268, %c0_269] : memref<3x64x64xf32, #tpu.memory_space<vmem>>, vector<3x64x64xf32>
    %cst_270 = arith.constant 2.560000e+02 : f32
    %516 = vector.broadcast %cst_270 : f32 to vector<3x64x64xf32>
    %517 = arith.mulf %515, %516 : vector<3x64x64xf32>
    %518 = vector.broadcast %510 : vector<3x1x64xf32> to vector<3x64x64xf32>
    %519 = arith.addf %517, %518 : vector<3x64x64xf32>
    %cst_271 = arith.constant dense<0xFF800000> : vector<3x64xf32>
    %520 = vector.multi_reduction <maximumf>, %519, %cst_271 [2] : vector<3x64x64xf32> to vector<3x64xf32>
    %521 = vector.shape_cast %520 : vector<3x64xf32> to vector<3x64x1xf32>
    %522 = vector.broadcast %521 : vector<3x64x1xf32> to vector<3x64x64xf32>
    %523 = arith.subf %519, %522 : vector<3x64x64xf32>
    %524 = math.exp %523 : vector<3x64x64xf32>
    %cst_272 = arith.constant dense<0.000000e+00> : vector<3x64xf32>
    %525 = vector.multi_reduction <add>, %524, %cst_272 [2] : vector<3x64x64xf32> to vector<3x64xf32>
    %526 = vector.shape_cast %525 : vector<3x64xf32> to vector<3x64x1xf32>
    %527 = math.log %526 : vector<3x64x1xf32>
    %528 = arith.addf %521, %527 : vector<3x64x1xf32>
    %529 = tpu.transpose %528, [0, 2, 1] : vector<3x64x1xf32> -> vector<3x1x64xf32>
    %c0_273 = arith.constant 0 : index
    %c0_274 = arith.constant 0 : index
    %c0_275 = arith.constant 0 : index
    %530 = vector.load %arg7[%c0_273, %c0_274, %c0_275] : memref<3x1x64xf32, #tpu.memory_space<vmem>>, vector<3x1x64xf32>
    tpu.vector_store %arg7[%c0_273, %c0_274, %c0_275], %529 {strides = array<i32>} : memref<3x1x64xf32, #tpu.memory_space<vmem>>, vector<3x1x64xf32>,
    %c0_276 = arith.constant 0 : index
    %c0_277 = arith.constant 0 : index
    %c0_278 = arith.constant 0 : index
    %531 = vector.load %arg4[%c0_276, %c0_277, %c0_278] : memref<1x64x8xf32, #tpu.memory_space<vmem>>, vector<1x64x8xf32>
    %cst_279 = arith.constant dense<0.000000e+00> : vector<1x64x64xf32>
    %532 = tpu.matmul %531, %2, %cst_279 {dimension_numbers = #tpu.dot_dimension_numbers<[2], [2], [1], [1], [0, 0, 0, 1, 1, 1], [0], [0]>} : vector<1x64x8xf32>, vector<1x64x8xf32>, vector<1x64x64xf32> -> vector<1x64x64xf32>
    %cst_280 = arith.constant 2.560000e+02 : f32
    %533 = vector.broadcast %cst_280 : f32 to vector<1x64x64xf32>
    %534 = arith.mulf %532, %533 : vector<1x64x64xf32>
    %535 = vector.broadcast %514 : vector<1x1x64xf32> to vector<1x64x64xf32>
    %536 = arith.addf %534, %535 : vector<1x64x64xf32>
    %cst_281 = arith.constant dense<0xFF800000> : vector<1x64xf32>
    %537 = vector.multi_reduction <maximumf>, %536, %cst_281 [2] : vector<1x64x64xf32> to vector<1x64xf32>
    %538 = vector.shape_cast %537 : vector<1x64xf32> to vector<1x64x1xf32>
    %539 = vector.broadcast %538 : vector<1x64x1xf32> to vector<1x64x64xf32>
    %540 = arith.subf %536, %539 : vector<1x64x64xf32>
    %541 = math.exp %540 : vector<1x64x64xf32>
    %cst_282 = arith.constant dense<0.000000e+00> : vector<1x64xf32>
    %542 = vector.multi_reduction <add>, %541, %cst_282 [2] : vector<1x64x64xf32> to vector<1x64xf32>
    %543 = vector.shape_cast %542 : vector<1x64xf32> to vector<1x64x1xf32>
    %544 = math.log %543 : vector<1x64x1xf32>
    %545 = arith.addf %538, %544 : vector<1x64x1xf32>
    %546 = tpu.transpose %545, [0, 2, 1] : vector<1x64x1xf32> -> vector<1x1x64xf32>
    %c0_283 = arith.constant 0 : index
    %c0_284 = arith.constant 0 : index
    %c0_285 = arith.constant 0 : index
    %547 = vector.load %arg8[%c0_283, %c0_284, %c0_285] : memref<1x1x64xf32, #tpu.memory_space<vmem>>, vector<1x1x64xf32>
    tpu.vector_store %arg8[%c0_283, %c0_284, %c0_285], %546 {strides = array<i32>} : memref<1x1x64xf32, #tpu.memory_space<vmem>>, vector<1x1x64xf32>,
    %c0_286 = arith.constant 0 : index
    %c0_287 = arith.constant 0 : index
    %c0_288 = arith.constant 0 : index
    %548 = vector.load %arg7[%c0_286, %c0_287, %c0_288] : memref<3x1x64xf32, #tpu.memory_space<vmem>>, vector<3x1x64xf32>
    %c0_289 = arith.constant 0 : index
    %c0_290 = arith.constant 0 : index
    %c0_291 = arith.constant 0 : index
    %549 = vector.load %arg8[%c0_289, %c0_290, %c0_291] : memref<1x1x64xf32, #tpu.memory_space<vmem>>, vector<1x1x64xf32>
    %550 = arith.addf %485, %14 : vector<1x1x64xf32>
    %551 = vector.extract_strided_slice %548 {offsets = [0, 0, 0], sizes = [1, 1, 64], strides = [1, 1, 1]} : vector<3x1x64xf32> to vector<1x1x64xf32>
    %cst_292 = arith.constant 3.906250e-03 : f32
    %552 = vector.broadcast %cst_292 : f32 to vector<1x1x64xf32>
    %553 = arith.mulf %552, %551 : vector<1x1x64xf32>
    %554 = arith.subf %550, %553 : vector<1x1x64xf32>
    %cst_293 = arith.constant 5.000000e-01 : f32
    %555 = vector.broadcast %cst_293 : f32 to vector<1x1x64xf32>
    %556 = arith.mulf %555, %554 : vector<1x1x64xf32>
    %557 = arith.addf %492, %14 : vector<1x1x64xf32>
    %558 = vector.extract_strided_slice %548 {offsets = [1, 0, 0], sizes = [1, 1, 64], strides = [1, 1, 1]} : vector<3x1x64xf32> to vector<1x1x64xf32>
    %cst_294 = arith.constant 3.906250e-03 : f32
    %559 = vector.broadcast %cst_294 : f32 to vector<1x1x64xf32>
    %560 = arith.mulf %559, %558 : vector<1x1x64xf32>
    %561 = arith.subf %557, %560 : vector<1x1x64xf32>
    %cst_295 = arith.constant 5.000000e-01 : f32
    %562 = vector.broadcast %cst_295 : f32 to vector<1x1x64xf32>
    %563 = arith.mulf %562, %561 : vector<1x1x64xf32>
    %564 = arith.addf %499, %15 : vector<1x1x64xf32>
    %565 = vector.extract_strided_slice %548 {offsets = [2, 0, 0], sizes = [1, 1, 64], strides = [1, 1, 1]} : vector<3x1x64xf32> to vector<1x1x64xf32>
    %cst_296 = arith.constant 3.906250e-03 : f32
    %566 = vector.broadcast %cst_296 : f32 to vector<1x1x64xf32>
    %567 = arith.mulf %566, %565 : vector<1x1x64xf32>
    %568 = arith.subf %564, %567 : vector<1x1x64xf32>
    %cst_297 = arith.constant 5.000000e-01 : f32
    %569 = vector.broadcast %cst_297 : f32 to vector<1x1x64xf32>
    %570 = arith.mulf %569, %568 : vector<1x1x64xf32>
    %571 = arith.addf %505, %15 : vector<1x1x64xf32>
    %cst_298 = arith.constant 3.906250e-03 : f32
    %572 = vector.broadcast %cst_298 : f32 to vector<1x1x64xf32>
    %573 = arith.mulf %572, %549 : vector<1x1x64xf32>
    %574 = arith.subf %571, %573 : vector<1x1x64xf32>
    %cst_299 = arith.constant 5.000000e-01 : f32
    %575 = vector.broadcast %cst_299 : f32 to vector<1x1x64xf32>
    %576 = arith.mulf %575, %574 : vector<1x1x64xf32>
    %577 = tpu.concatenate %576, %563, %570 in 0 : vector<1x1x64xf32>, vector<1x1x64xf32>, vector<1x1x64xf32> -> vector<3x1x64xf32>
    %578 = arith.subf %577, %23 : vector<3x1x64xf32>
    %cst_300 = arith.constant 4.000000e+02 : f32
    %579 = vector.broadcast %cst_300 : f32 to vector<3x1x64xf32>
    %580 = arith.mulf %578, %579 : vector<3x1x64xf32>
    %581 = arith.addf %22, %580 : vector<3x1x64xf32>
    %582 = arith.subf %556, %14 : vector<1x1x64xf32>
    %cst_301 = arith.constant 4.000000e+02 : f32
    %583 = vector.broadcast %cst_301 : f32 to vector<1x1x64xf32>
    %584 = arith.mulf %582, %583 : vector<1x1x64xf32>
    %585 = arith.addf %0, %584 : vector<1x1x64xf32>
    %c0_302 = arith.constant 0 : index
    %c0_303 = arith.constant 0 : index
    %c0_304 = arith.constant 0 : index
    %586 = vector.load %arg6[%c0_302, %c0_303, %c0_304] : memref<3x64x64xf32, #tpu.memory_space<vmem>>, vector<3x64x64xf32>
    %cst_305 = arith.constant 4.000000e+02 : f32
    %587 = vector.broadcast %cst_305 : f32 to vector<3x64x64xf32>
    %588 = arith.mulf %586, %587 : vector<3x64x64xf32>
    %589 = vector.broadcast %581 : vector<3x1x64xf32> to vector<3x64x64xf32>
    %590 = arith.addf %588, %589 : vector<3x64x64xf32>
    %cst_306 = arith.constant dense<0xFF800000> : vector<3x64xf32>
    %591 = vector.multi_reduction <maximumf>, %590, %cst_306 [2] : vector<3x64x64xf32> to vector<3x64xf32>
    %592 = vector.shape_cast %591 : vector<3x64xf32> to vector<3x64x1xf32>
    %593 = vector.broadcast %592 : vector<3x64x1xf32> to vector<3x64x64xf32>
    %594 = arith.subf %590, %593 : vector<3x64x64xf32>
    %595 = math.exp %594 : vector<3x64x64xf32>
    %cst_307 = arith.constant dense<0.000000e+00> : vector<3x64xf32>
    %596 = vector.multi_reduction <add>, %595, %cst_307 [2] : vector<3x64x64xf32> to vector<3x64xf32>
    %597 = vector.shape_cast %596 : vector<3x64xf32> to vector<3x64x1xf32>
    %598 = math.log %597 : vector<3x64x1xf32>
    %599 = arith.addf %592, %598 : vector<3x64x1xf32>
    %600 = tpu.transpose %599, [0, 2, 1] : vector<3x64x1xf32> -> vector<3x1x64xf32>
    %c0_308 = arith.constant 0 : index
    %c0_309 = arith.constant 0 : index
    %c0_310 = arith.constant 0 : index
    %601 = vector.load %arg7[%c0_308, %c0_309, %c0_310] : memref<3x1x64xf32, #tpu.memory_space<vmem>>, vector<3x1x64xf32>
    tpu.vector_store %arg7[%c0_308, %c0_309, %c0_310], %600 {strides = array<i32>} : memref<3x1x64xf32, #tpu.memory_space<vmem>>, vector<3x1x64xf32>,
    %c0_311 = arith.constant 0 : index
    %c0_312 = arith.constant 0 : index
    %c0_313 = arith.constant 0 : index
    %602 = vector.load %arg4[%c0_311, %c0_312, %c0_313] : memref<1x64x8xf32, #tpu.memory_space<vmem>>, vector<1x64x8xf32>
    %cst_314 = arith.constant dense<0.000000e+00> : vector<1x64x64xf32>
    %603 = tpu.matmul %602, %2, %cst_314 {dimension_numbers = #tpu.dot_dimension_numbers<[2], [2], [1], [1], [0, 0, 0, 1, 1, 1], [0], [0]>} : vector<1x64x8xf32>, vector<1x64x8xf32>, vector<1x64x64xf32> -> vector<1x64x64xf32>
    %cst_315 = arith.constant 4.000000e+02 : f32
    %604 = vector.broadcast %cst_315 : f32 to vector<1x64x64xf32>
    %605 = arith.mulf %603, %604 : vector<1x64x64xf32>
    %606 = vector.broadcast %585 : vector<1x1x64xf32> to vector<1x64x64xf32>
    %607 = arith.addf %605, %606 : vector<1x64x64xf32>
    %cst_316 = arith.constant dense<0xFF800000> : vector<1x64xf32>
    %608 = vector.multi_reduction <maximumf>, %607, %cst_316 [2] : vector<1x64x64xf32> to vector<1x64xf32>
    %609 = vector.shape_cast %608 : vector<1x64xf32> to vector<1x64x1xf32>
    %610 = vector.broadcast %609 : vector<1x64x1xf32> to vector<1x64x64xf32>
    %611 = arith.subf %607, %610 : vector<1x64x64xf32>
    %612 = math.exp %611 : vector<1x64x64xf32>
    %cst_317 = arith.constant dense<0.000000e+00> : vector<1x64xf32>
    %613 = vector.multi_reduction <add>, %612, %cst_317 [2] : vector<1x64x64xf32> to vector<1x64xf32>
    %614 = vector.shape_cast %613 : vector<1x64xf32> to vector<1x64x1xf32>
    %615 = math.log %614 : vector<1x64x1xf32>
    %616 = arith.addf %609, %615 : vector<1x64x1xf32>
    %617 = tpu.transpose %616, [0, 2, 1] : vector<1x64x1xf32> -> vector<1x1x64xf32>
    %c0_318 = arith.constant 0 : index
    %c0_319 = arith.constant 0 : index
    %c0_320 = arith.constant 0 : index
    %618 = vector.load %arg8[%c0_318, %c0_319, %c0_320] : memref<1x1x64xf32, #tpu.memory_space<vmem>>, vector<1x1x64xf32>
    tpu.vector_store %arg8[%c0_318, %c0_319, %c0_320], %617 {strides = array<i32>} : memref<1x1x64xf32, #tpu.memory_space<vmem>>, vector<1x1x64xf32>,
    %c0_321 = arith.constant 0 : index
    %c0_322 = arith.constant 0 : index
    %c0_323 = arith.constant 0 : index
    %619 = vector.load %arg7[%c0_321, %c0_322, %c0_323] : memref<3x1x64xf32, #tpu.memory_space<vmem>>, vector<3x1x64xf32>
    %c0_324 = arith.constant 0 : index
    %c0_325 = arith.constant 0 : index
    %c0_326 = arith.constant 0 : index
    %620 = vector.load %arg8[%c0_324, %c0_325, %c0_326] : memref<1x1x64xf32, #tpu.memory_space<vmem>>, vector<1x1x64xf32>
    %621 = arith.addf %556, %14 : vector<1x1x64xf32>
    %622 = vector.extract_strided_slice %619 {offsets = [0, 0, 0], sizes = [1, 1, 64], strides = [1, 1, 1]} : vector<3x1x64xf32> to vector<1x1x64xf32>
    %cst_327 = arith.constant 2.500000e-03 : f32
    %623 = vector.broadcast %cst_327 : f32 to vector<1x1x64xf32>
    %624 = arith.mulf %623, %622 : vector<1x1x64xf32>
    %625 = arith.subf %621, %624 : vector<1x1x64xf32>
    %cst_328 = arith.constant 5.000000e-01 : f32
    %626 = vector.broadcast %cst_328 : f32 to vector<1x1x64xf32>
    %627 = arith.mulf %626, %625 : vector<1x1x64xf32>
    %628 = arith.addf %563, %14 : vector<1x1x64xf32>
    %629 = vector.extract_strided_slice %619 {offsets = [1, 0, 0], sizes = [1, 1, 64], strides = [1, 1, 1]} : vector<3x1x64xf32> to vector<1x1x64xf32>
    %cst_329 = arith.constant 2.500000e-03 : f32
    %630 = vector.broadcast %cst_329 : f32 to vector<1x1x64xf32>
    %631 = arith.mulf %630, %629 : vector<1x1x64xf32>
    %632 = arith.subf %628, %631 : vector<1x1x64xf32>
    %cst_330 = arith.constant 5.000000e-01 : f32
    %633 = vector.broadcast %cst_330 : f32 to vector<1x1x64xf32>
    %634 = arith.mulf %633, %632 : vector<1x1x64xf32>
    %635 = arith.addf %570, %15 : vector<1x1x64xf32>
    %636 = vector.extract_strided_slice %619 {offsets = [2, 0, 0], sizes = [1, 1, 64], strides = [1, 1, 1]} : vector<3x1x64xf32> to vector<1x1x64xf32>
    %cst_331 = arith.constant 2.500000e-03 : f32
    %637 = vector.broadcast %cst_331 : f32 to vector<1x1x64xf32>
    %638 = arith.mulf %637, %636 : vector<1x1x64xf32>
    %639 = arith.subf %635, %638 : vector<1x1x64xf32>
    %cst_332 = arith.constant 5.000000e-01 : f32
    %640 = vector.broadcast %cst_332 : f32 to vector<1x1x64xf32>
    %641 = arith.mulf %640, %639 : vector<1x1x64xf32>
    %642 = arith.addf %576, %15 : vector<1x1x64xf32>
    %cst_333 = arith.constant 2.500000e-03 : f32
    %643 = vector.broadcast %cst_333 : f32 to vector<1x1x64xf32>
    %644 = arith.mulf %643, %620 : vector<1x1x64xf32>
    %645 = arith.subf %642, %644 : vector<1x1x64xf32>
    %cst_334 = arith.constant 5.000000e-01 : f32
    %646 = vector.broadcast %cst_334 : f32 to vector<1x1x64xf32>
    %647 = arith.mulf %646, %645 : vector<1x1x64xf32>
    %648 = arith.subf %647, %15 : vector<1x1x64xf32>
    %cst_335 = arith.constant 4.000000e+02 : f32
    %649 = vector.broadcast %cst_335 : f32 to vector<1x1x64xf32>
    %650 = arith.mulf %648, %649 : vector<1x1x64xf32>
    %651 = arith.addf %1, %650 : vector<1x1x64xf32>
    %652 = arith.subf %627, %14 : vector<1x1x64xf32>
    %cst_336 = arith.constant 4.000000e+02 : f32
    %653 = vector.broadcast %cst_336 : f32 to vector<1x1x64xf32>
    %654 = arith.mulf %652, %653 : vector<1x1x64xf32>
    %655 = arith.addf %0, %654 : vector<1x1x64xf32>
    %c0_337 = arith.constant 0 : index
    %c0_338 = arith.constant 0 : index
    %c0_339 = arith.constant 0 : index
    %656 = vector.load %arg6[%c0_337, %c0_338, %c0_339] : memref<3x64x64xf32, #tpu.memory_space<vmem>>, vector<1x64x64xf32>
    %cst_340 = arith.constant 4.000000e+02 : f32
    %657 = vector.broadcast %cst_340 : f32 to vector<1x64x64xf32>
    %658 = arith.mulf %656, %657 : vector<1x64x64xf32>
    %659 = vector.broadcast %651 : vector<1x1x64xf32> to vector<1x64x64xf32>
    %660 = arith.addf %658, %659 : vector<1x64x64xf32>
    %cst_341 = arith.constant dense<0xFF800000> : vector<1x64xf32>
    %661 = vector.multi_reduction <maximumf>, %660, %cst_341 [2] : vector<1x64x64xf32> to vector<1x64xf32>
    %662 = vector.shape_cast %661 : vector<1x64xf32> to vector<1x64x1xf32>
    %663 = vector.broadcast %662 : vector<1x64x1xf32> to vector<1x64x64xf32>
    %664 = arith.subf %660, %663 : vector<1x64x64xf32>
    %665 = math.exp %664 : vector<1x64x64xf32>
    %cst_342 = arith.constant dense<0.000000e+00> : vector<1x64xf32>
    %666 = vector.multi_reduction <add>, %665, %cst_342 [2] : vector<1x64x64xf32> to vector<1x64xf32>
    %667 = vector.shape_cast %666 : vector<1x64xf32> to vector<1x64x1xf32>
    %668 = math.log %667 : vector<1x64x1xf32>
    %669 = arith.addf %662, %668 : vector<1x64x1xf32>
    %670 = tpu.transpose %669, [0, 2, 1] : vector<1x64x1xf32> -> vector<1x1x64xf32>
    %c0_343 = arith.constant 0 : index
    %c0_344 = arith.constant 0 : index
    %c0_345 = arith.constant 0 : index
    %671 = vector.load %arg7[%c0_343, %c0_344, %c0_345] : memref<3x1x64xf32, #tpu.memory_space<vmem>>, vector<1x1x64xf32>
    tpu.vector_store %arg7[%c0_343, %c0_344, %c0_345], %670 {strides = array<i32>} : memref<3x1x64xf32, #tpu.memory_space<vmem>>, vector<1x1x64xf32>,
    %c0_346 = arith.constant 0 : index
    %c0_347 = arith.constant 0 : index
    %c0_348 = arith.constant 0 : index
    %672 = vector.load %arg4[%c0_346, %c0_347, %c0_348] : memref<1x64x8xf32, #tpu.memory_space<vmem>>, vector<1x64x8xf32>
    %cst_349 = arith.constant dense<0.000000e+00> : vector<1x64x64xf32>
    %673 = tpu.matmul %672, %2, %cst_349 {dimension_numbers = #tpu.dot_dimension_numbers<[2], [2], [1], [1], [0, 0, 0, 1, 1, 1], [0], [0]>} : vector<1x64x8xf32>, vector<1x64x8xf32>, vector<1x64x64xf32> -> vector<1x64x64xf32>
    %cst_350 = arith.constant 4.000000e+02 : f32
    %674 = vector.broadcast %cst_350 : f32 to vector<1x64x64xf32>
    %675 = arith.mulf %673, %674 : vector<1x64x64xf32>
    %676 = vector.broadcast %655 : vector<1x1x64xf32> to vector<1x64x64xf32>
    %677 = arith.addf %675, %676 : vector<1x64x64xf32>
    %cst_351 = arith.constant dense<0xFF800000> : vector<1x64xf32>
    %678 = vector.multi_reduction <maximumf>, %677, %cst_351 [2] : vector<1x64x64xf32> to vector<1x64xf32>
    %679 = vector.shape_cast %678 : vector<1x64xf32> to vector<1x64x1xf32>
    %680 = vector.broadcast %679 : vector<1x64x1xf32> to vector<1x64x64xf32>
    %681 = arith.subf %677, %680 : vector<1x64x64xf32>
    %682 = math.exp %681 : vector<1x64x64xf32>
    %cst_352 = arith.constant dense<0.000000e+00> : vector<1x64xf32>
    %683 = vector.multi_reduction <add>, %682, %cst_352 [2] : vector<1x64x64xf32> to vector<1x64xf32>
    %684 = vector.shape_cast %683 : vector<1x64xf32> to vector<1x64x1xf32>
    %685 = math.log %684 : vector<1x64x1xf32>
    %686 = arith.addf %679, %685 : vector<1x64x1xf32>
    %687 = tpu.transpose %686, [0, 2, 1] : vector<1x64x1xf32> -> vector<1x1x64xf32>
    %c0_353 = arith.constant 0 : index
    %c0_354 = arith.constant 0 : index
    %c0_355 = arith.constant 0 : index
    %688 = vector.load %arg8[%c0_353, %c0_354, %c0_355] : memref<1x1x64xf32, #tpu.memory_space<vmem>>, vector<1x1x64xf32>
    tpu.vector_store %arg8[%c0_353, %c0_354, %c0_355], %687 {strides = array<i32>} : memref<1x1x64xf32, #tpu.memory_space<vmem>>, vector<1x1x64xf32>,
    %c0_356 = arith.constant 0 : index
    %c0_357 = arith.constant 0 : index
    %c0_358 = arith.constant 0 : index
    %689 = vector.load %arg7[%c0_356, %c0_357, %c0_358] : memref<3x1x64xf32, #tpu.memory_space<vmem>>, vector<1x1x64xf32>
    %c0_359 = arith.constant 0 : index
    %c0_360 = arith.constant 0 : index
    %c0_361 = arith.constant 0 : index
    %690 = vector.load %arg8[%c0_359, %c0_360, %c0_361] : memref<1x1x64xf32, #tpu.memory_space<vmem>>, vector<1x1x64xf32>
    %cst_362 = arith.constant 2.500000e-03 : f32
    %691 = vector.broadcast %cst_362 : f32 to vector<1x1x64xf32>
    %692 = arith.mulf %691, %689 : vector<1x1x64xf32>
    %693 = arith.subf %14, %692 : vector<1x1x64xf32>
    %cst_363 = arith.constant 2.500000e-03 : f32
    %694 = vector.broadcast %cst_363 : f32 to vector<1x1x64xf32>
    %695 = arith.mulf %694, %690 : vector<1x1x64xf32>
    %696 = arith.subf %15, %695 : vector<1x1x64xf32>
    %697 = math.exp %0 : vector<1x1x64xf32>
    %698 = math.exp %1 : vector<1x1x64xf32>
    %699 = arith.subf %693, %634 : vector<1x1x64xf32>
    %700 = arith.mulf %697, %699 : vector<1x1x64xf32>
    %cst_364 = arith.constant dense<0.000000e+00> : vector<1x1xf32>
    %701 = vector.multi_reduction <add>, %700, %cst_364 [2] : vector<1x1x64xf32> to vector<1x1xf32>
    %702 = vector.shape_cast %701 : vector<1x1xf32> to vector<1x1x1xf32>
    %703 = arith.subf %696, %641 : vector<1x1x64xf32>
    %704 = arith.mulf %698, %703 : vector<1x1x64xf32>
    %cst_365 = arith.constant dense<0.000000e+00> : vector<1x1xf32>
    %705 = vector.multi_reduction <add>, %704, %cst_365 [2] : vector<1x1x64xf32> to vector<1x1xf32>
    %706 = vector.shape_cast %705 : vector<1x1xf32> to vector<1x1x1xf32>
    %707 = arith.addf %702, %706 : vector<1x1x1xf32>
    %708 = vector.shape_cast %707 : vector<1x1x1xf32> to vector<1x1xf32>
    %709 = vector.shape_cast %708 : vector<1x1xf32> to vector<1x1xf32>
    %710 = vector.broadcast %709 : vector<1x1xf32> to vector<1x128xf32>
    %c0_366 = arith.constant 0 : index
    %c0_367 = arith.constant 0 : index
    %c0_368 = arith.constant 0 : index
    %711 = vector.load %arg5[%c0_366, %c0_367, %c0_368] : memref<1x1x128xf32, #tpu.memory_space<vmem>>, vector<1x1x128xf32>
    %712 = vector.shape_cast %711 : vector<1x1x128xf32> to vector<1x128xf32>
    %713 = vector.shape_cast %710 : vector<1x128xf32> to vector<1x1x128xf32>
    tpu.vector_store %arg5[%c0_366, %c0_367, %c0_368], %713 {strides = array<i32>} : memref<1x1x128xf32, #tpu.memory_space<vmem>>, vector<1x1x128xf32>,
    return
  }
  func.func @transform_0(%arg0: i32) -> (i32, i32, i32) {
    %c0_i32 = arith.constant 0 : i32
    %c0_i32_0 = arith.constant 0 : i32
    %c0_i32_1 = arith.constant 0 : i32
    return %arg0, %c0_i32, %c0_i32_0 : i32, i32, i32
  }
  func.func @transform_1(%arg0: i32) -> (i32, i32, i32) {
    %c0_i32 = arith.constant 0 : i32
    %c0_i32_0 = arith.constant 0 : i32
    %c0_i32_1 = arith.constant 0 : i32
    return %arg0, %c0_i32, %c0_i32_0 : i32, i32, i32
  }
  func.func @transform_2(%arg0: i32) -> (i32, i32, i32) {
    %c0_i32 = arith.constant 0 : i32
    %c0_i32_0 = arith.constant 0 : i32
    %c0_i32_1 = arith.constant 0 : i32
    return %arg0, %c0_i32, %c0_i32_0 : i32, i32, i32
  }
  func.func @transform_3(%arg0: i32) -> (i32, i32, i32) {
    %c0_i32 = arith.constant 0 : i32
    %c0_i32_0 = arith.constant 0 : i32
    %c0_i32_1 = arith.constant 0 : i32
    return %arg0, %c0_i32, %c0_i32_0 : i32, i32, i32
  }
  func.func @transform_4(%arg0: i32) -> (i32, i32, i32) {
    %c0_i32 = arith.constant 0 : i32
    %c0_i32_0 = arith.constant 0 : i32
    %c0_i32_1 = arith.constant 0 : i32
    return %arg0, %c0_i32, %c0_i32_0 : i32, i32, i32
  }
}

</mosaic_0001>

<bundles_post_ra>
// kernel: tpu_custom_call.1
= control target key start
LH: loop header
LB: loop body
LE: loop exit
PB: predicated region body
PF: predicated region fallthrough
CT: control target
= control target key end

     0   :  { %9 = vsyncpa [#allocation6], 0  ;;  %s15468_s0 = inlined_call_operand.vmem [shape: f32[2,1,64], index: 0, kind: input, shape index: {}]   ;;  %s15469_s1 = inlined_call_operand.vmem [shape: f32[2,64,8], index: 1, kind: input, shape index: {}]   ;;  %s15470_s2 = inlined_call_operand.vmem [shape: f32[2,1,64], index: 2, kind: input, shape index: {}]   ;;  %s15471_s3 = inlined_call_operand.vmem [shape: f32[2,64,8], index: 3, kind: input, shape index: {}]   ;;  %s15472_s4 = inlined_call_operand.hbm [shape: f32[2,1,128], index: 4, kind: output, shape index: {}]  }
   0x1   :  { %11 = vsyncpa [#allocation6 + $0x1], 0  ;;  %s10976_s15 = smov 0   ;;  %s10978_s16 = smov 0  }
   0x2   :  { %s10980_s17 = smov 0   ;;  %s10982_s18 = smov 0  }
   0x3 LB: > { %s10997_s19 = sadd.s32 4294967295, %s10948_s18   ;;  %s8467_s20 = sadd.s32 4294967294, %s10948_s18   ;;  %s10948_s18 = sphi %s10982_s18, %s15480_s18   ;;  %s10944_s17 = sphi %s10980_s17, %s15479_s17   ;;  %s10940_s16 = sphi %s10978_s16, %s15478_s16   ;;  %s10936_s15 = sphi %s10976_s15, %s15477_s15  }
   0x4   : > { %s11001_s21 = sadd.s32 1, %s10948_s18   ;;  %s128_s22 = sadd.s32 1, %s10944_s17 }
   0x5   : > { %s125_s23 = ssub.s32 %s10948_s18, %s11001_s21  ;;  %p138_p0 = scmp.ne.s32.totalorder %s10944_s17, %s10940_s16 }
   0x6   : > { %p126_p1 = scmp.eq.s32.totalorder %s125_s23, 0  ;;  %p139_p2 = scmp.eq.s32.totalorder %s10997_s19, 1 }
   0x7   : > { %p144_p3 = scmp.ne.s32.totalorder %s10940_s16, %s10936_s15  ;;  %p145_p4 = scmp.eq.s32.totalorder %s8467_s20, 1 }
   0x8   : > { %s11012_s24 = scalar_select %p126_p1, %s10944_s17, %s128_s22  }
   0x9   : > { %p11014_p5 = por %p139_p2, %p138_p0  ;;  %p11018_p6 = por %p145_p4, %p144_p3 }
   0xa   : > { %p8470_p7 = scmp.ge.s32.totalorder %s10948_s18, 1  ;;  %p191_p8 = scmp.lt.s32.totalorder %s10948_s18, 3 }
   0xc   : > { %p192_p9 = pnand %p8470_p7, %p191_p8 }
   0xd   : > { %p227_p10 = scmp.lt.s32.totalorder (!%p192_p9), %s10997_s19, 1  ;;  %vm269_vm0 = vcmask (!%p192_p9), 64512   ;;  %vm559_vm2 = vcmask (!%p192_p9), 523264   ;;  %vm1268_vm3 = vcmask (!%p192_p9), 516096   ;;  %s225_s20 = sand.u32 (!%p192_p9), 1, %s10940_s16  }
   0xe   : > { %195 = sbr.rel (%p192_p9) target bundleno = 5591 (0x15d7), region = 36  ;;  %vm11036_vm1 = vmpackc.low (!%p192_p9), %vm269_vm0, %vm269_vm0  ;;  %s8683_s22 = sshll.u32 (!%p192_p9), %s10997_s19, 4 }
   0xf   : > { %s226_s23 = scalar_lea.vmem (!%p192_p9), [#allocation5], %s225_s20  ;;  %s15426_s30 = scalar_lea.hbm (!%p192_p9), %s15472_s4, %s8683_s22 }
  0x15   : > { %s11026_s27 = scalar_select %p227_p10, %s10997_s19, 1 }
  0x16   : > { %s10950_s19 = smov [#allocation5]  }
  0x17   : > { %s8686_s28 = sshll.u32 %s11026_s27, 6  ;;  %s11403_s11 = scalar_lea.vmem %s15468_s0, %s11026_s27 }
  0x18   : > { %s11032_s5 = scalar_lea.vmem %s15471_s3, %s8686_s28  ;;  %s11043_s8 = scalar_lea.vmem %s15469_s1, %s8686_s28 }
  0x19   : > { %v11046_v1 = vld [vmem:[%s11032_s5] sm:$0xff]  ;;  %v11049_v2 = vld [vmem:[%s11032_s5 + $0x8] sm:$0xff]  ;;  %v11057_v6 = vld [vmem:[%s11043_s8 + $0x10] sm:$0xff]  ;;  %s11420_s14 = scalar_lea.vmem %s15470_s2, %s11026_s27  ;;  %s8382_s27 = sshll.u32 %s226_s23, 4  ;;  %s15428_s27 = int_to_ptr.vmem [resolvable:$true] %s8382_s27 }
  0x1a   : > { %v245_v3 = vld [vmem:[%s11043_s8] sm:$0xff]  ;;  %v11054_v4 = vpack.c.bf16 %v11049_v2, %v11046_v1  ;;  %v11060_v7 = vld [vmem:[%s11043_s8 + $0x8] sm:$0xff]  ;;  %v11063_v8 = vld [vmem:[%s11032_s5 + $0x10] sm:$0xff]  ;;  %v263_v9 = vmul.f32 %v11057_v6, %v11057_v6  ;;  %v302_v36 = vmul.f32 %v11046_v1, %v11046_v1  ;;  %v303_v38 = vmul.f32 %v11049_v2, %v11049_v2  ;;  %s10886_s6 = scalar_lea.vmem %s15428_s27, 16  ;;  %s10890_s7 = sshll.u32 %s10950_s19, 4  ;;  %s10891_s7 = int_to_ptr.vmem [resolvable:$false] %s10890_s7 }
  0x1b   : > { %v261_v5 = vmul.f32 %v245_v3, %v245_v3  ;;  %8912 = vmatprep.mubr.msk.f32.mxu0 %vm269_vm0, %v245_v3  ;;  %v262_v10 = vmul.f32 %v11060_v7, %v11060_v7  ;;  %v11071_v11 = vpack.c.bf16 %v11060_v7, %v245_v3  ;;  %v11074_v12 = vld [vmem:[%s11032_s5 + $0x18] sm:$0xff]  ;;  %v11080_v14 = vld [vmem:[%s11043_s8 + $0x20] sm:$0xff]  ;;  %8940 = vmatprep.mubr.msk.f32.mxu1 %vm269_vm0, %v245_v3  ;;  %v11094_v18 = vld [vmem:[%s11043_s8 + $0x28] sm:$0xff]  ;;  %p10887_p11 = scmp.ne.s32.totalorder %s15428_s27, %s10886_s6  ;;  %p10893_p0 = scmp.lt.s32.totalorder %s15428_s27, %s10891_s7 }
  0x1c   : > { %v11077_v13 = vld [vmem:[%s11043_s8 + $0x18] sm:$0xff]  ;;  %9262 = vmatprep.subr.msk.bf16.mxu0 %vm11036_vm1, %v11054_v4  ;;  %v11089_v16 = vpack.c.bf16 %v11074_v12, %v11063_v8  ;;  %v276_v19 = vsel %vm269_vm0, %v263_v9, 0.0  ;;  %v265_v22 = vmul.f32 %v11080_v14, %v11080_v14  ;;  %v266_v24 = vmul.f32 %v11094_v18, %v11094_v18  ;;  %v11117_v25 = vld [vmem:[%s11043_s8 + $0x30] sm:$0xff]  ;;  %v11120_v26 = vld [vmem:[%s11032_s5 + $0x20] sm:$0xff] }
  0x1d   : > { %v270_v15 = vsel %vm269_vm0, %v261_v5, 0.0  ;;  %v264_v17 = vmul.f32 %v11077_v13, %v11077_v13  ;;  %9265 = vmatpush3.bf16.xpose.msk.msra.mxu0 %vm11036_vm1, %v11054_v4  ;;  %v11102_v20 = vpack.c.bf16 %v11077_v13, %v11057_v6  ;;  %277 = vadd.xlane.f32.xlu1 %v276_v19  ;;  %v273_v21 = vsel %vm269_vm0, %v262_v10, 0.0  ;;  %v11123_v27 = vld [vmem:[%s11032_s5 + $0x28] sm:$0xff]  ;;  %v11129_v28 = vld [vmem:[%s11043_s8 + $0x38] sm:$0xff]  ;;  %v11161_v39 = vld [vmem:[%s11032_s5 + $0x30] sm:$0xff]  ;;  %p10888_p12 = pnand %p10887_p11, %p11014_p5  ;;  %s10892_s8 = scalar_lea.vmem %s10891_s7, 32 }
  0x1e   : > { %271 = vadd.xlane.f32.xlu0 %v270_v15  ;;  %9268 = vmatprep.subr.msk.bf16.mxu0 %vm11036_vm1, %v11089_v16  ;;  %v282_v29 = vsel %vm269_vm0, %v265_v22, 0.0  ;;  %v267_v30 = vmul.f32 %v11117_v25, %v11117_v25  ;;  %v11139_v31 = vpack.c.bf16 %v11123_v27, %v11120_v26  ;;  %v285_v32 = vsel %vm269_vm0, %v266_v24, 0.0  ;;  %v11164_v40 = vld [vmem:[%s11032_s5 + $0x38] sm:$0xff]  ;;  %p10894_p1 = scmp.lt.s32.totalorder %s10892_s8, %s10886_s6 }
  0x1f   : > { %v279_v23 = vsel %vm269_vm0, %v264_v17, 0.0  ;;  %9286 = vmatprep.subr.msk.bf16.mxu1 %vm11036_vm1, %v11071_v11  ;;  %v268_v33 = vmul.f32 %v11129_v28, %v11129_v28  ;;  %v11149_v34 = vpack.c.bf16 %v11094_v18, %v11080_v14  ;;  %v310_v41 = vsel %vm269_vm0, %v302_v36, 0.0  ;;  %p10889_p13 = pneg %p10888_p12 }
  0x20   : > { %9289 = vmatpush3.bf16.xpose.msk.msra.mxu1 %vm11036_vm1, %v11071_v11  ;;  %v288_v35 = vsel %vm269_vm0, %v267_v30, 0.0  ;;  %v9278_v42 = vpack.c.bf16 %v11164_v40, %v11161_v39  ;;  %v304_v43 = vmul.f32 %v11063_v8, %v11063_v8  ;;  %v313_v44 = vsel %vm269_vm0, %v303_v38, 0.0  ;;  %p10895_p2 = por %p10894_p1, %p10893_p0 }
  0x21   : > { %9292 = vmatprep.subr.msk.bf16.mxu1 %vm11036_vm1, %v11102_v20  ;;  %280 = vadd.xlane.f32.xlu1 %v279_v23  ;;  %v291_v37 = vsel %vm269_vm0, %v268_v33, 0.0  ;;  %v305_v45 = vmul.f32 %v11074_v12, %v11074_v12  ;;  %v11185_v46 = vpack.c.bf16 %v11129_v28, %v11117_v25  ;;  %v306_v48 = vmul.f32 %v11120_v26, %v11120_v26 }
  0x22   : > { %274 = vadd.xlane.f32.xlu0 %v273_v21  ;;  %v316_v47 = vsel %vm269_vm0, %v304_v43, 0.0  ;;  %v307_v50 = vmul.f32 %v11123_v27, %v11123_v27  ;;  %v308_v52 = vmul.f32 %v11161_v39, %v11161_v39  ;;  %v309_v54 = vmul.f32 %v11164_v40, %v11164_v40  ;;  %p10896_p3 = pnand %p10895_p2, %p10889_p13 }
  0x23   : > { %v319_v49 = vsel %vm269_vm0, %v305_v45, 0.0  ;;  %v322_v51 = vsel %vm269_vm0, %v306_v48, 0.0 }
  0x24   : > { %v325_v53 = vsel %vm269_vm0, %v307_v50, 0.0  ;;  %v328_v55 = vsel %vm269_vm0, %v308_v52, 0.0  ;;  %v331_v56 = vsel %vm269_vm0, %v309_v54, 0.0 }
  0x25   : > { %9271 = vmatpush3.bf16.xpose.msk.msra.mxu0 %vm11036_vm1, %v11089_v16  ;;  %286 = vadd.xlane.f32.xlu1 %v285_v32 }
  0x26   : > { %283 = vadd.xlane.f32.xlu0 %v282_v29  ;;  %9274 = vmatprep.subr.msk.bf16.mxu0 %vm11036_vm1, %v11139_v31 }
  0x28   : > { %9295 = vmatpush3.bf16.xpose.msk.msra.mxu1 %vm11036_vm1, %v11102_v20 }
  0x29   : > { %9298 = vmatprep.subr.msk.bf16.mxu1 %vm11036_vm1, %v11149_v34  ;;  %292 = vadd.xlane.f32.xlu1 %v291_v37 }
  0x2a   : > { %289 = vadd.xlane.f32.xlu0 %v288_v35 }
  0x2d   : > { %9277 = vmatpush3.bf16.xpose.msk.msra.mxu0 %vm11036_vm1, %v11139_v31  ;;  %314 = vadd.xlane.f32.xlu1 %v313_v44 }
  0x2e   : > { %311 = vadd.xlane.f32.xlu0 %v310_v41  ;;  %9280 = vmatprep.subr.msk.bf16.mxu0 %vm11036_vm1, %v9278_v42 }
  0x30   : > { %9301 = vmatpush3.bf16.xpose.msk.msra.mxu1 %vm11036_vm1, %v11149_v34 }
  0x31   : > { %9304 = vmatprep.subr.msk.bf16.mxu1 %vm11036_vm1, %v11185_v46  ;;  %320 = vadd.xlane.f32.xlu1 %v319_v49 }
  0x32   : > { %317 = vadd.xlane.f32.xlu0 %v316_v47 }
  0x35   : > { %9283 = vmatpush3.bf16.xpose.msk.msra.mxu0 %vm11036_vm1, %v9278_v42  ;;  %326 = vadd.xlane.f32.xlu1 %v325_v53  ;;  %v850_v53 = vlaneseq }
  0x36   : > { %323 = vadd.xlane.f32.xlu0 %v322_v51  ;;  %9310 = vmatprep.subr.msk.bf16.mxu0 %vm11036_vm1, %v11054_v4 }
  0x38   : > { %9307 = vmatpush3.bf16.xpose.msk.msra.mxu1 %vm11036_vm1, %v11185_v46 }
  0x39   : > { %9334 = vmatprep.subr.msk.bf16.mxu1 %vm11036_vm1, %v11071_v11  ;;  %332 = vadd.xlane.f32.xlu1 %v331_v56 }
  0x3a   : > { %329 = vadd.xlane.f32.xlu0 %v328_v55 }
  0x3c   : > { %8913 = vmatmul.mubr.msk.f32.vlgmr.msra.gmra.mrb[0].mxu0 %vm269_vm0, %v11060_v7 }
  0x3d   : > { %9313 = vmatpush3.bf16.xpose.msk.msra.mxu0 %vm11036_vm1, %v11054_v4  ;;  %8915 = vmatprep.mubr.msk.f32.mxu0 %vm269_vm0, %v11057_v6 }
  0x3e   : > { %9316 = vmatprep.subr.msk.bf16.mxu0 %vm11036_vm1, %v11089_v16 }
  0x3f   : > { %8941 = vmatmul.mubr.msk.f32.vlgmr.msra.gmra.mrb[0].mxu1 %vm269_vm0, %v11060_v7 }
  0x40   : > { %9337 = vmatpush3.bf16.xpose.msk.msra.mxu1 %vm11036_vm1, %v11071_v11  ;;  %8916 = vmatmul.mubr.msk.f32.gmra.mrb[2].mxu0 %vm269_vm0, %v11077_v13 }
  0x41   : > { %9340 = vmatprep.subr.msk.bf16.mxu1 %vm11036_vm1, %v11102_v20  ;;  %8918 = vmatprep.mubr.msk.f32.mxu0 %vm269_vm0, %v11080_v14 }
  0x42   : > { %8943 = vmatprep.mubr.msk.f32.mxu1 %vm269_vm0, %v11057_v6 }
  0x43   : > { %8944 = vmatmul.mubr.msk.f32.gmra.mrb[2].mxu1 %vm269_vm0, %v11077_v13 }
  0x44   : > { %8919 = vmatmul.mubr.msk.f32.gmra.mrb[4].mxu0 %vm269_vm0, %v11094_v18  ;;  %8946 = vmatprep.mubr.msk.f32.mxu1 %vm269_vm0, %v11080_v14 }
  0x45   : > { %9319 = vmatpush3.bf16.xpose.msk.msra.mxu0 %vm11036_vm1, %v11089_v16  ;;  %8921 = vmatprep.mubr.msk.f32.mxu0 %vm269_vm0, %v11117_v25 }
  0x46   : > { %9322 = vmatprep.subr.msk.bf16.mxu0 %vm11036_vm1, %v11139_v31 }
  0x47   : > { %8947 = vmatmul.mubr.msk.f32.gmra.mrb[4].mxu1 %vm269_vm0, %v11094_v18 }
  0x48   : > { %9343 = vmatpush3.bf16.xpose.msk.msra.mxu1 %vm11036_vm1, %v11102_v20  ;;  %8922 = vmatmul.mubr.msk.f32.gmra.mrb[6].mxu0 %vm269_vm0, %v11129_v28 }
  0x49   : > { %9346 = vmatprep.subr.msk.bf16.mxu1 %vm11036_vm1, %v11149_v34  ;;  %8968 = vmatprep.mubr.msk.f32.mxu0 %vm269_vm0, %v11046_v1 }
  0x4a   : > { %8949 = vmatprep.mubr.msk.f32.mxu1 %vm269_vm0, %v11117_v25 }
  0x4b   : > { %8950 = vmatmul.mubr.msk.f32.gmra.mrb[6].mxu1 %vm269_vm0, %v11129_v28 }
  0x4c   : > { %8996 = vmatprep.mubr.msk.f32.mxu1 %vm269_vm0, %v11046_v1 }
  0x4d   : > { %9325 = vmatpush3.bf16.xpose.msk.msra.mxu0 %vm11036_vm1, %v11139_v31 }
  0x4e   : > { %9328 = vmatprep.subr.msk.bf16.mxu0 %vm11036_vm1, %v9278_v42 }
  0x50   : > { %9349 = vmatpush3.bf16.xpose.msk.msra.mxu1 %vm11036_vm1, %v11149_v34 }
  0x51   : > { %9352 = vmatprep.subr.msk.bf16.mxu1 %vm11036_vm1, %v11185_v46 }
  0x55   : > { %9331 = vmatpush3.bf16.xpose.msk.msra.mxu0 %vm11036_vm1, %v9278_v42 }
  0x56   : > { %9358 = vmatprep.subr.msk.bf16.mxu0 %vm11036_vm1, %v11071_v11 }
  0x58   : > { %9355 = vmatpush3.bf16.xpose.msk.msra.mxu1 %vm11036_vm1, %v11185_v46 }
  0x59   : > { %9382 = vmatprep.subr.msk.bf16.mxu1 %vm11036_vm1, %v11071_v11 }
  0x5c   : > { %8969 = vmatmul.mubr.msk.f32.vlgmr.msra.gmra.mrb[8].mxu0 %vm269_vm0, %v11049_v2 }
  0x5d   : > { %8971 = vmatprep.mubr.msk.f32.mxu0 %vm269_vm0, %v11063_v8  ;;  %9361 = vmatpush3.bf16.xpose.msk.msra.mxu0 %vm11036_vm1, %v11071_v11 }
  0x5e   : > { %9364 = vmatprep.subr.msk.bf16.mxu0 %vm11036_vm1, %v11102_v20 }
  0x5f   : > { %8997 = vmatmul.mubr.msk.f32.vlgmr.msra.gmra.mrb[8].mxu1 %vm269_vm0, %v11049_v2 }
  0x60   : > { %8972 = vmatmul.mubr.msk.f32.gmra.mrb[10].mxu0 %vm269_vm0, %v11074_v12  ;;  %8999 = vmatprep.mubr.msk.f32.mxu1 %vm269_vm0, %v11063_v8 }
  0x61   : > { %8974 = vmatprep.mubr.msk.f32.mxu0 %vm269_vm0, %v11120_v26  ;;  %9385 = vmatpush3.bf16.xpose.msk.msra.mxu1 %vm11036_vm1, %v11071_v11 }
  0x62   : > { %9388 = vmatprep.subr.msk.bf16.mxu1 %vm11036_vm1, %v11102_v20 }
  0x63   : > { %9000 = vmatmul.mubr.msk.f32.gmra.mrb[10].mxu1 %vm269_vm0, %v11074_v12 }
  0x64   : > { %8975 = vmatmul.mubr.msk.f32.gmra.mrb[12].mxu0 %vm269_vm0, %v11123_v27  ;;  %9002 = vmatprep.mubr.msk.f32.mxu1 %vm269_vm0, %v11120_v26 }
  0x65   : > { %8977 = vmatprep.mubr.msk.f32.mxu0 %vm269_vm0, %v11161_v39  ;;  %9367 = vmatpush3.bf16.xpose.msk.msra.mxu0 %vm11036_vm1, %v11102_v20 }
  0x66   : > { %9370 = vmatprep.subr.msk.bf16.mxu0 %vm11036_vm1, %v11149_v34 }
  0x67   : > { %9003 = vmatmul.mubr.msk.f32.gmra.mrb[12].mxu1 %vm269_vm0, %v11123_v27 }
  0x68   : > { %8978 = vmatmul.mubr.msk.f32.gmra.mrb[14].mxu0 %vm269_vm0, %v11164_v40  ;;  %9005 = vmatprep.mubr.msk.f32.mxu1 %vm269_vm0, %v11161_v39 }
  0x69   : > { %9391 = vmatpush3.bf16.xpose.msk.msra.mxu1 %vm11036_vm1, %v11102_v20 }
  0x6a   : > { %9394 = vmatprep.subr.msk.bf16.mxu1 %vm11036_vm1, %v11149_v34 }
  0x6b   : > { %9006 = vmatmul.mubr.msk.f32.gmra.mrb[14].mxu1 %vm269_vm0, %v11164_v40 }
  0x6d   : > { %9373 = vmatpush3.bf16.xpose.msk.msra.mxu0 %vm11036_vm1, %v11149_v34 }
  0x6e   : > { %9376 = vmatprep.subr.msk.bf16.mxu0 %vm11036_vm1, %v11185_v46 }
  0x71   : > { %9397 = vmatpush3.bf16.xpose.msk.msra.mxu1 %vm11036_vm1, %v11149_v34 }
  0x72   : > { %9400 = vmatprep.subr.msk.bf16.mxu1 %vm11036_vm1, %v11185_v46 }
  0x75   : > { %9379 = vmatpush3.bf16.xpose.msk.msra.mxu0 %vm11036_vm1, %v11185_v46 }
  0x76   : > { %9406 = vmatprep.subr.msk.bf16.mxu0 %vm11036_vm1, %v11071_v11 }
  0x79   : > { %9403 = vmatpush3.bf16.xpose.msk.msra.mxu1 %vm11036_vm1, %v11185_v46 }
  0x7a   : > { %9430 = vmatprep.subr.msk.bf16.mxu1 %vm11036_vm1, %v11071_v11 }
  0xaa   : > { %v278_v59 = vpop.xlane.xlu1 %277 }
  0xab   : > { %v272_v57 = vpop.xlane.xlu0 %271  ;;  %v296_v1 = vmul.f32 0.5, %v278_v59 }
  0xac   : > { %v294_v58 = vmul.f32 0.5, %v272_v57 }
  0xae   : > { %342 = vxpose.xlu0.b32.start [1/8] (short) (narrow) %v294_v58, 8  ;;  %v281_v62 = vpop.xlane.xlu1 %280  ;;  %v243_v58 = vld [vmem:[%s11403_s11] sm:$0x1] }
  0xaf   : > { %v275_v60 = vpop.xlane.xlu0 %274  ;;  %v297_v4 = vmul.f32 0.5, %v281_v62 }
  0xb0   : > { %v295_v61 = vmul.f32 0.5, %v275_v60  ;;  %v851_v60 = vshrl.u32 %v850_v53, 7 }
  0xb2   : > { %343 = vxpose.xlu0.b32.cont [2/8] (short) (narrow) %v295_v61, 8  ;;  %v287_v2 = vpop.xlane.xlu1 %286 }
  0xb3   : > { %v284_v63 = vpop.xlane.xlu0 %283  ;;  %v299_v13 = vmul.f32 0.5, %v287_v2 }
  0xb4   : > { %v298_v7 = vmul.f32 0.5, %v284_v63 }
  0xb6   : > { %344 = vxpose.xlu0.b32.cont [3/8] (short) (narrow) %v296_v1, 8  ;;  %v293_v5 = vpop.xlane.xlu1 %292 }
  0xb7   : > { %v290_v3 = vpop.xlane.xlu0 %289  ;;  %v301_v19 = vmul.f32 0.5, %v293_v5 }
  0xb8   : > { %v300_v16 = vmul.f32 0.5, %v290_v3 }
  0xba   : > { %345 = vxpose.xlu0.b32.cont [4/8] (short) (narrow) %v297_v4, 8  ;;  %v315_v9 = vpop.xlane.xlu1 %314  ;;  %v11425_v4 = vsub.s32 0, %v851_v60 }
  0xbb   : > { %v312_v6 = vpop.xlane.xlu0 %311  ;;  %v335_v10 = vmul.f32 0.5, %v315_v9 }
  0xbc   : > { %v334_v8 = vmul.f32 0.5, %v312_v6 }
  0xbe   : > { %346 = vxpose.xlu0.b32.cont [5/8] (short) (narrow) %v298_v7, 8  ;;  %374 = vxpose.xlu1.b32.start [1/8] (short) (narrow) %v334_v8, 8  ;;  %v321_v15 = vpop.xlane.xlu1 %320  ;;  %v244_v7 = vld [vmem:[%s11420_s14] sm:$0x1] }
  0xbf   : > { %v318_v12 = vpop.xlane.xlu0 %317  ;;  %v337_v17 = vmul.f32 0.5, %v321_v15 }
  0xc0   : > { %v336_v14 = vmul.f32 0.5, %v318_v12 }
  0xc2   : > { %347 = vxpose.xlu0.b32.cont [6/8] (short) (narrow) %v299_v13, 8  ;;  %375 = vxpose.xlu1.b32.cont [2/8] (short) (narrow) %v335_v10, 8  ;;  %v327_v22 = vpop.xlane.xlu1 %326 }
  0xc3   : > { %v324_v18 = vpop.xlane.xlu0 %323  ;;  %v339_v23 = vmul.f32 0.5, %v327_v22 }
  0xc4   : > { %v338_v21 = vmul.f32 0.5, %v324_v18 }
  0xc6   : > { %348 = vxpose.xlu0.b32.cont [7/8] (short) (narrow) %v300_v16, 8  ;;  %376 = vxpose.xlu1.b32.cont [3/8] (short) (narrow) %v336_v14, 8  ;;  %v333_v26 = vpop.xlane.xlu1 %332 }
  0xc7   : > { %v330_v24 = vpop.xlane.xlu0 %329  ;;  %v341_v27 = vmul.f32 0.5, %v333_v26 }
  0xc8   : > { %v340_v25 = vmul.f32 0.5, %v330_v24 }
  0xca   : > { %349 = vxpose.xlu0.b32.end [8/8] (short) (narrow) %v301_v19, 8  ;;  %377 = vxpose.xlu1.b32.cont [4/8] (short) (narrow) %v337_v17, 8 }
  0xce   : > { %378 = vxpose.xlu1.b32.cont [5/8] (short) (narrow) %v338_v21, 8 }
  0xd2   : > { %379 = vxpose.xlu1.b32.cont [6/8] (short) (narrow) %v339_v23, 8 }
  0xd6   : > { %380 = vxpose.xlu1.b32.cont [7/8] (short) (narrow) %v340_v25, 8 }
  0xda   : > { %381 = vxpose.xlu1.b32.end [8/8] (short) (narrow) %v341_v27, 8 }
 0x10f   : > { %v8914_v28 = vpop.f32.mrb[0].mxu0 }
 0x110   : > { %561 = vst.msk [vmem:[#allocation2 + $0x8] sm:$0xff] %vm559_vm2, %v8914_v28  ;;  %v520_v29 = vpop.f32.mrb[1].mxu0 }
 0x111   : > { %560 = vst.msk [vmem:[#allocation2] sm:$0xff] %vm559_vm2, %v520_v29 }
 0x112   : > { %v8942_v30 = vpop.f32.mrb[0].mxu1 }
 0x113   : > { %v8917_v31 = vpop.f32.mrb[2].mxu0  ;;  %675 = vst.msk [vmem:[#allocation2 + $0x48] sm:$0xff] %vm559_vm2, %v8942_v30  ;;  %v634_v32 = vpop.f32.mrb[1].mxu1 }
 0x114   : > { %563 = vst.msk [vmem:[#allocation2 + $0x18] sm:$0xff] %vm559_vm2, %v8917_v31  ;;  %v530_v33 = vpop.f32.mrb[3].mxu0  ;;  %674 = vst.msk [vmem:[#allocation2 + $0x40] sm:$0xff] %vm559_vm2, %v634_v32 }
 0x115   : > { %562 = vst.msk [vmem:[#allocation2 + $0x10] sm:$0xff] %vm559_vm2, %v530_v33 }
 0x116   : > { %v8945_v35 = vpop.f32.mrb[2].mxu1 }
 0x117   : > { %v8920_v36 = vpop.f32.mrb[4].mxu0  ;;  %677 = vst.msk [vmem:[#allocation2 + $0x58] sm:$0xff] %vm559_vm2, %v8945_v35  ;;  %v644_v37 = vpop.f32.mrb[3].mxu1  ;;  %v801_v3 = vld [vmem:[#allocation2 + $0x8] sm:$0xff] }
 0x118   : > { %565 = vst.msk [vmem:[#allocation2 + $0x28] sm:$0xff] %vm559_vm2, %v8920_v36  ;;  %v540_v38 = vpop.f32.mrb[5].mxu0  ;;  %676 = vst.msk [vmem:[#allocation2 + $0x50] sm:$0xff] %vm559_vm2, %v644_v37  ;;  %v800_v5 = vld [vmem:[#allocation2] sm:$0xff]  ;;  %v825_v15 = vmul.f32 0.0625, %v801_v3 }
 0x119   : > { %564 = vst.msk [vmem:[#allocation2 + $0x20] sm:$0xff] %vm559_vm2, %v540_v38  ;;  %v824_v16 = vmul.f32 0.0625, %v800_v5 }
 0x11a   : > { %v8948_v39 = vpop.f32.mrb[4].mxu1  ;;  %v809_v8 = vld [vmem:[#allocation2 + $0x48] sm:$0xff] }
 0x11b   : > { %v8923_v40 = vpop.f32.mrb[6].mxu0  ;;  %679 = vst.msk [vmem:[#allocation2 + $0x68] sm:$0xff] %vm559_vm2, %v8948_v39  ;;  %v654_v41 = vpop.f32.mrb[5].mxu1  ;;  %v808_v9 = vld [vmem:[#allocation2 + $0x40] sm:$0xff]  ;;  %v833_v19 = vmul.f32 0.0625, %v809_v8  ;;  %v803_v24 = vld [vmem:[#allocation2 + $0x18] sm:$0xff] }
 0x11c   : > { %567 = vst.msk [vmem:[#allocation2 + $0x38] sm:$0xff] %vm559_vm2, %v8923_v40  ;;  %v550_v42 = vpop.f32.mrb[7].mxu0  ;;  %678 = vst.msk [vmem:[#allocation2 + $0x60] sm:$0xff] %vm559_vm2, %v654_v41  ;;  %v832_v21 = vmul.f32 0.0625, %v808_v9  ;;  %v802_v25 = vld [vmem:[#allocation2 + $0x10] sm:$0xff]  ;;  %v827_v32 = vmul.f32 0.0625, %v803_v24 }
 0x11d   : > { %566 = vst.msk [vmem:[#allocation2 + $0x30] sm:$0xff] %vm559_vm2, %v550_v42  ;;  %v826_v33 = vmul.f32 0.0625, %v802_v25 }
 0x11e   : > { %v8951_v43 = vpop.f32.mrb[6].mxu1  ;;  %v811_v35 = vld [vmem:[#allocation2 + $0x58] sm:$0xff] }
 0x11f   : > { %681 = vst.msk [vmem:[#allocation2 + $0x78] sm:$0xff] %vm559_vm2, %v8951_v43  ;;  %v664_v44 = vpop.f32.mrb[7].mxu1  ;;  %v810_v36 = vld [vmem:[#allocation2 + $0x50] sm:$0xff]  ;;  %v835_v41 = vmul.f32 0.0625, %v811_v35  ;;  %v805_v43 = vld [vmem:[#allocation2 + $0x28] sm:$0xff] }
 0x120   : > { %680 = vst.msk [vmem:[#allocation2 + $0x70] sm:$0xff] %vm559_vm2, %v664_v44  ;;  %v834_v42 = vmul.f32 0.0625, %v810_v36  ;;  %v804_v44 = vld [vmem:[#allocation2 + $0x20] sm:$0xff] }
 0x123   : > { %v807_v5 = vld [vmem:[#allocation2 + $0x38] sm:$0xff] }
 0x124   : > { %v831_v8 = vmul.f32 0.0625, %v807_v5 }
 0x12e   : > { %v11394_v49 = vpop.trf.xlu0 }
 0x12f   : > { %v8970_v45 = vpop.f32.mrb[8].mxu0  ;;  %v797_v55 = vmul.f32 0.0625, %v11394_v49 }
 0x130   : > { %789 = vst.msk [vmem:[#allocation2 + $0x88] sm:$0xff] %vm559_vm2, %v8970_v45  ;;  %v748_v47 = vpop.f32.mrb[9].mxu0  ;;  %v829_v45 = vmul.f32 0.0625, %v805_v43 }
 0x131   : > { %788 = vst.msk [vmem:[#allocation2 + $0x80] sm:$0xff] %vm559_vm2, %v748_v47  ;;  %v799_v62 = vsub.f32 %v243_v58, %v797_v55  ;;  %v828_v47 = vmul.f32 0.0625, %v804_v44  ;;  %v812_v58 = vld [vmem:[#allocation2 + $0x60] sm:$0xff] }
 0x132   : > { %v11392_v48 = vpop.f32.mrb[8].mxu1  ;;  %v836_v60 = vmul.f32 0.0625, %v812_v58 }
 0x133   : > { %v8973_v50 = vpop.f32.mrb[10].mxu0  ;;  %v11396_v51 = vpop.f32.mrb[9].mxu1  ;;  %v11435_v13 = vrot.slane %v799_v62, %v11425_v4 }
 0x134   : > { %791 = vst.msk [vmem:[#allocation2 + $0x98] sm:$0xff] %vm559_vm2, %v8973_v50  ;;  %v758_v52 = vpop.f32.mrb[11].mxu0  ;;  %v1409_v43 = vmul.f32 0.0625, %v11396_v51 }
 0x135   : > { %790 = vst.msk [vmem:[#allocation2 + $0x90] sm:$0xff] %vm559_vm2, %v758_v52  ;;  %v11450_v28 = vadd.f32 %v11435_v13, %v833_v19  ;;  %v11453_v29 = vadd.f32 %v11435_v13, %v832_v21  ;;  %v11474_v53 = vadd.f32 %v11435_v13, %v835_v41  ;;  %v11477_v55 = vadd.f32 %v11435_v13, %v834_v42 }
 0x136   : > { %v11406_v54 = vpop.f32.mrb[10].mxu1  ;;  %v11533_v51 = vadd.f32 %v1409_v43, %v11435_v13 }
 0x137   : > { %v8976_v56 = vpop.f32.mrb[12].mxu0  ;;  %v11409_v57 = vpop.f32.mrb[11].mxu1  ;;  %v911_v37 = vsel %vm559_vm2, %v11450_v28, -inf  ;;  %v908_v38 = vsel %vm559_vm2, %v11453_v29, -inf  ;;  %v917_v62 = vsel %vm559_vm2, %v11474_v53, -inf }
 0x138   : > { %793 = vst.msk [vmem:[#allocation2 + $0xa8] sm:$0xff] %vm559_vm2, %v8976_v56  ;;  %v768_v59 = vpop.f32.mrb[13].mxu0  ;;  %v813_v56 = vld [vmem:[#allocation2 + $0x68] sm:$0xff]  ;;  %v1411_v5 = vmul.f32 0.0625, %v11409_v57 }
 0x139   : > { %792 = vst.msk [vmem:[#allocation2 + $0xa0] sm:$0xff] %vm559_vm2, %v768_v59  ;;  %v837_v59 = vmul.f32 0.0625, %v813_v56  ;;  %v1412_v56 = vmul.f32 0.0625, %v11406_v54 }
 0x13a   : > { %v11414_v61 = vpop.f32.mrb[12].mxu1 }
 0x13b   : > { %v8979_v63 = vpop.f32.mrb[14].mxu0  ;;  %v11422_v1 = vpop.f32.mrb[13].mxu1  ;;  %v11544_v54 = vadd.f32 %v1412_v56, %v11435_v13 }
 0x13c   : > { %795 = vst.msk [vmem:[#allocation2 + $0xb8] sm:$0xff] %vm559_vm2, %v8979_v63  ;;  %v778_v2 = vpop.f32.mrb[15].mxu0  ;;  %v914_v63 = vsel %vm559_vm2, %v11477_v55, -inf  ;;  %v818_v42 = vld [vmem:[#allocation2 + $0x90] sm:$0xff] }
 0x13d   : > { %794 = vst.msk [vmem:[#allocation2 + $0xb0] sm:$0xff] %vm559_vm2, %v778_v2  ;;  %v1434_v57 = vsel %vm559_vm2, %v11544_v54, -inf }
 0x13e   : > { %v11428_v6 = vpop.trf.xlu1  ;;  %v11431_v10 = vpop.f32.mrb[14].mxu1 }
 0x13f   : > { %v796_v12 = vmul.f32 0.0625, %v11428_v6  ;;  %v1400_v14 = vpop.f32.mrb[15].mxu1 }
 0x140   : > { %v1415_v17 = vmul.f32 0.0625, %v1400_v14 }
 0x141   : > { %v798_v18 = vsub.f32 %v244_v7, %v796_v12  ;;  %v806_v7 = vld [vmem:[#allocation2 + $0x30] sm:$0xff] }
 0x142   : > { %v11441_v23 = vadd.f32 %v1415_v17, %v11435_v13  ;;  %v830_v9 = vmul.f32 0.0625, %v806_v7  ;;  %v815_v17 = vld [vmem:[#allocation2 + $0x78] sm:$0xff]  ;;  %v1425_v7 = vsel %vm559_vm2, %v11533_v51, -inf }
 0x143   : > { %v11438_v22 = vrot.slane %v798_v18, %v11425_v4  ;;  %v814_v18 = vld [vmem:[#allocation2 + $0x70] sm:$0xff]  ;;  %v839_v19 = vmul.f32 0.0625, %v815_v17 }
 0x144   : > { %v838_v21 = vmul.f32 0.0625, %v814_v18 }
 0x145   : > { %v11444_v26 = vadd.f32 %v11438_v22, %v825_v15  ;;  %v11447_v27 = vadd.f32 %v11438_v22, %v824_v16  ;;  %v11464_v39 = vadd.f32 %v11438_v22, %v827_v32  ;;  %v11467_v40 = vadd.f32 %v11438_v22, %v826_v33  ;;  %v816_v32 = vld [vmem:[#allocation2 + $0x80] sm:$0xff] }
 0x146   : > { %v11484_v2 = vadd.f32 %v11438_v22, %v829_v45  ;;  %v11487_v3 = vadd.f32 %v11438_v22, %v828_v47  ;;  %v11494_v15 = vadd.f32 %v11435_v13, %v837_v59  ;;  %v11497_v16 = vadd.f32 %v11435_v13, %v836_v60 }
 0x147   : > { %v887_v30 = vsel %vm559_vm2, %v11444_v26, -inf  ;;  %v884_v31 = vsel %vm559_vm2, %v11447_v27, -inf  ;;  %v893_v50 = vsel %vm559_vm2, %v11464_v39, -inf  ;;  %v890_v52 = vsel %vm559_vm2, %v11467_v40, -inf }
 0x148   : > { %888 = vmax.xlane.f32.xlu1 %v887_v30  ;;  %885 = vmax.xlane.f32.xlu0 %v884_v31  ;;  %v899_v12 = vsel %vm559_vm2, %v11484_v2, -inf  ;;  %v896_v14 = vsel %vm559_vm2, %v11487_v3, -inf  ;;  %v923_v24 = vsel %vm559_vm2, %v11494_v15, -inf  ;;  %v920_v25 = vsel %vm559_vm2, %v11497_v16, -inf }
 0x149   : > { %v11504_v30 = vadd.f32 %v11438_v22, %v831_v8  ;;  %v11507_v31 = vadd.f32 %v11438_v22, %v830_v9  ;;  %v1410_v33 = vmul.f32 0.0625, %v11392_v48  ;;  %v11511_v35 = vadd.f32 %v11435_v13, %v839_v19 }
 0x14a   : > { %v840_v41 = vmul.f32 0.0625, %v816_v32  ;;  %v11558_v19 = vadd.f32 %v1411_v5, %v11435_v13 }
 0x14b   : > { %v905_v36 = vsel %vm559_vm2, %v11504_v30, -inf  ;;  %v929_v48 = vsel %vm559_vm2, %v11511_v35, -inf  ;;  %v11526_v45 = vadd.f32 %v1410_v33, %v11435_v13 }
 0x14c   : > { %912 = vmax.xlane.f32.xlu1 %v911_v37  ;;  %909 = vmax.xlane.f32.xlu0 %v908_v38  ;;  %v902_v37 = vsel %vm559_vm2, %v11507_v31, -inf  ;;  %v11518_v38 = vadd.f32 %v11435_v13, %v838_v21  ;;  %v11529_v47 = vadd.f32 %v11438_v22, %v840_v41 }
 0x14d   : > { %v1428_v58 = vsel %vm559_vm2, %v11526_v45, -inf }
 0x14e   : > { %v926_v44 = vsel %vm559_vm2, %v11518_v38, -inf  ;;  %v932_v59 = vsel %vm559_vm2, %v11529_v47, -inf }
 0x150   : > { %894 = vmax.xlane.f32.xlu1 %v893_v50  ;;  %891 = vmax.xlane.f32.xlu0 %v890_v52  ;;  %v842_v50 = vmul.f32 0.0625, %v818_v42  ;;  %v820_v52 = vld [vmem:[#allocation2 + $0xa0] sm:$0xff] }
 0x152   : > { %v11540_v60 = vadd.f32 %v11438_v22, %v842_v50 }
 0x154   : > { %918 = vmax.xlane.f32.xlu1 %v917_v62  ;;  %915 = vmax.xlane.f32.xlu0 %v914_v63  ;;  %v844_v62 = vmul.f32 0.0625, %v820_v52  ;;  %v822_v63 = vld [vmem:[#allocation2 + $0xb0] sm:$0xff]  ;;  %v938_v8 = vsel %vm559_vm2, %v11540_v60, -inf }
 0x156   : > { %v11551_v9 = vadd.f32 %v11438_v22, %v844_v62  ;;  %v823_v62 = vld [vmem:[#allocation2 + $0xb8] sm:$0xff] }
 0x158   : > { %900 = vmax.xlane.f32.xlu1 %v899_v12  ;;  %897 = vmax.xlane.f32.xlu0 %v896_v14  ;;  %v846_v12 = vmul.f32 0.0625, %v822_v63  ;;  %v817_v14 = vld [vmem:[#allocation2 + $0x88] sm:$0xff]  ;;  %v944_v18 = vsel %vm559_vm2, %v11551_v9, -inf  ;;  %v1443_v63 = vsel %vm559_vm2, %v11441_v23, -inf }
 0x159   : > { %v841_v17 = vmul.f32 0.0625, %v817_v14  ;;  %v2055_v14 = vld [vmem:[%s11032_s5] sm:$0xff] }
 0x15a   : > { %v11561_v21 = vadd.f32 %v11438_v22, %v846_v12  ;;  %9024 = vmatprep.mubr.msk.f32.mxu0 %vm269_vm0, %v2055_v14 }
 0x15b   : > { %v11569_v33 = vadd.f32 %v11438_v22, %v841_v17  ;;  %v2056_v17 = vld [vmem:[%s11032_s5 + $0x8] sm:$0xff] }
 0x15c   : > { %924 = vmax.xlane.f32.xlu1 %v923_v24  ;;  %921 = vmax.xlane.f32.xlu0 %v920_v25  ;;  %v1414_v24 = vmul.f32 0.0625, %v11414_v61  ;;  %v1431_v25 = vsel %vm559_vm2, %v11558_v19, -inf  ;;  %v950_v32 = vsel %vm559_vm2, %v11561_v21, -inf  ;;  %v819_v61 = vld [vmem:[#allocation2 + $0x98] sm:$0xff] }
 0x15d   : > { %9025 = vmatmul.mubr.msk.f32.vlgmr.msra.gmra.mrb[16].mxu0 %vm269_vm0, %v2056_v17 }
 0x15e   : > { %v11575_v41 = vadd.f32 %v1414_v24, %v11435_v13  ;;  %9409 = vmatpush3.bf16.xpose.msk.msra.mxu0 %vm11036_vm1, %v11071_v11  ;;  %v2060_v24 = vld [vmem:[%s11032_s5 + $0x28] sm:$0xff] }
 0x15f   : > { %9412 = vmatprep.subr.msk.bf16.mxu0 %vm11036_vm1, %v11102_v20 }
 0x160   : > { %906 = vmax.xlane.f32.xlu1 %v905_v36  ;;  %903 = vmax.xlane.f32.xlu0 %v902_v37  ;;  %v1413_v36 = vmul.f32 0.0625, %v11422_v1  ;;  %v935_v37 = vsel %vm559_vm2, %v11569_v33, -inf  ;;  %v1440_v42 = vsel %vm559_vm2, %v11575_v41, -inf }
 0x162   : > { %v11580_v43 = vadd.f32 %v1413_v36, %v11435_v13 }
 0x164   : > { %930 = vmax.xlane.f32.xlu1 %v929_v48  ;;  %927 = vmax.xlane.f32.xlu0 %v926_v44  ;;  %v843_v48 = vmul.f32 0.0625, %v819_v61  ;;  %v1416_v44 = vmul.f32 0.0625, %v11431_v10  ;;  %v1437_v1 = vsel %vm559_vm2, %v11580_v43, -inf }
 0x166   : > { %v11586_v50 = vadd.f32 %v11438_v22, %v843_v48  ;;  %v11591_v56 = vadd.f32 %v1416_v44, %v11435_v13  ;;  %v847_v13 = vmul.f32 0.0625, %v823_v62  ;;  %9415 = vmatpush3.bf16.xpose.msk.msra.mxu0 %vm11036_vm1, %v11102_v20 }
 0x167   : > { %9418 = vmatprep.subr.msk.bf16.mxu0 %vm11036_vm1, %v11149_v34 }
 0x168   : > { %1429 = vmax.xlane.f32.xlu1 %v1428_v58  ;;  %933 = vmax.xlane.f32.xlu0 %v932_v59  ;;  %v941_v52 = vsel %vm559_vm2, %v11586_v50, -inf  ;;  %v821_v58 = vld [vmem:[#allocation2 + $0xa8] sm:$0xff]  ;;  %v1446_v10 = vsel %vm559_vm2, %v11591_v56, -inf }
 0x169   : > { %v845_v59 = vmul.f32 0.0625, %v821_v58 }
 0x16b   : > { %v11598_v5 = vadd.f32 %v11438_v22, %v845_v59 }
 0x16c   : > { %1426 = vmax.xlane.f32.xlu1 %v1425_v7  ;;  %939 = vmax.xlane.f32.xlu0 %v938_v8  ;;  %v11603_v8 = vadd.f32 %v11438_v22, %v847_v13  ;;  %v2057_v22 = vld [vmem:[%s11032_s5 + $0x10] sm:$0xff] }
 0x16d   : > { %v947_v7 = vsel %vm559_vm2, %v11598_v5, -inf  ;;  %9027 = vmatprep.mubr.msk.f32.mxu0 %vm269_vm0, %v2057_v22 }
 0x16e   : > { %v953_v12 = vsel %vm559_vm2, %v11603_v8, -inf  ;;  %9421 = vmatpush3.bf16.xpose.msk.msra.mxu0 %vm11036_vm1, %v11149_v34 }
 0x16f   : > { %9424 = vmatprep.subr.msk.bf16.mxu0 %vm11036_vm1, %v11185_v46 }
 0x170   : > { %1435 = vmax.xlane.f32.xlu1 %v1434_v57  ;;  %945 = vmax.xlane.f32.xlu0 %v944_v18  ;;  %v2058_v57 = vld [vmem:[%s11032_s5 + $0x18] sm:$0xff]  ;;  %v2059_v18 = vld [vmem:[%s11032_s5 + $0x20] sm:$0xff] }
 0x171   : > { %9028 = vmatmul.mubr.msk.f32.gmra.mrb[18].mxu0 %vm269_vm0, %v2058_v57 }
 0x172   : > { %9030 = vmatprep.mubr.msk.f32.mxu0 %vm269_vm0, %v2059_v18 }
 0x174   : > { %1432 = vmax.xlane.f32.xlu1 %v1431_v25  ;;  %951 = vmax.xlane.f32.xlu0 %v950_v32  ;;  %v2061_v25 = vld [vmem:[%s11032_s5 + $0x30] sm:$0xff]  ;;  %v2062_v32 = vld [vmem:[%s11032_s5 + $0x38] sm:$0xff] }
 0x175   : > { %9031 = vmatmul.mubr.msk.f32.gmra.mrb[20].mxu0 %vm269_vm0, %v2060_v24 }
 0x176   : > { %9033 = vmatprep.mubr.msk.f32.mxu0 %vm269_vm0, %v2061_v25  ;;  %9427 = vmatpush3.bf16.xpose.msk.msra.mxu0 %vm11036_vm1, %v11185_v46 }
 0x177   : > { %9454 = vmatprep.subr.msk.bf16.mxu0 %vm11036_vm1, %v11071_v11 }
 0x178   : > { %936 = vmax.xlane.f32.xlu1 %v935_v37 }
 0x179   : > { %9034 = vmatmul.mubr.msk.f32.gmra.mrb[22].mxu0 %vm269_vm0, %v2062_v32 }
 0x17c   : > { %1441 = vmax.xlane.f32.xlu1 %v1440_v42 }
 0x180   : > { %1438 = vmax.xlane.f32.xlu1 %v1437_v1 }
 0x184   : > { %942 = vmax.xlane.f32.xlu1 %v941_v52 }
 0x188   : > { %1447 = vmax.xlane.f32.xlu1 %v1446_v10 }
 0x18c   : > { %1444 = vmax.xlane.f32.xlu1 %v1443_v63 }
 0x190   : > { %948 = vmax.xlane.f32.xlu1 %v947_v7 }
 0x194   : > { %954 = vmax.xlane.f32.xlu1 %v953_v12 }
 0x1d5   : > { %v11647_v36 = vpop.xlane.xlu1 %888  ;;  %v11649_v37 = vpop.xlane.xlu0 %885 }
 0x1d6   : > { %v957_v61 = vsub.f32 %v11444_v26, %v11647_v36  ;;  %v956_v42 = vsub.f32 %v11447_v27, %v11649_v37 }
 0x1d8   : > { %v982_v48 = vmul.f32 1.442695, %v957_v61  ;;  %v980_v44 = vmul.f32 1.442695, %v956_v42 }
 0x1d9   : > { %v11655_v1 = vpop.xlane.xlu1 %912  ;;  %v11657_v52 = vpop.xlane.xlu0 %909 }
 0x1da   : > { %9620 = vpow2.f32 %v982_v48  ;;  %v965_v58 = vsub.f32 %v11450_v28, %v11655_v1  ;;  %v964_v10 = vsub.f32 %v11453_v29, %v11657_v52 }
 0x1db   : > { %9622 = vpow2.f32 %v980_v44 }
 0x1dc   : > { %v998_v59 = vmul.f32 1.442695, %v965_v58  ;;  %v996_v62 = vmul.f32 1.442695, %v964_v10 }
 0x1dd   : > { %v11663_v26 = vpop.xlane.xlu1 %894  ;;  %v11665_v63 = vpop.xlane.xlu0 %891 }
 0x1de   : > { %9624 = vpow2.f32 %v998_v59  ;;  %v959_v27 = vsub.f32 %v11464_v39, %v11663_v26  ;;  %v958_v13 = vsub.f32 %v11467_v40, %v11665_v63 }
 0x1df   : > { %9626 = vpow2.f32 %v996_v62 }
 0x1e0   : > { %v986_v7 = vmul.f32 1.442695, %v959_v27  ;;  %v984_v28 = vmul.f32 1.442695, %v958_v13 }
 0x1e1   : > { %v11671_v12 = vpop.xlane.xlu1 %918  ;;  %v11673_v29 = vpop.xlane.xlu0 %915 }
 0x1e2   : > { %9628 = vpow2.f32 %v986_v7  ;;  %v967_v14 = vsub.f32 %v11474_v53, %v11671_v12  ;;  %v966_v17 = vsub.f32 %v11477_v55, %v11673_v29 }
 0x1e3   : > { %9630 = vpow2.f32 %v984_v28 }
 0x1e4   : > { %v9621_v22 = vpop.eup %9620  ;;  %v1002_v39 = vmul.f32 1.442695, %v967_v14  ;;  %v1000_v57 = vmul.f32 1.442695, %v966_v17 }
 0x1e5   : > { %v9623_v18 = vpop.eup %9622  ;;  %v11679_v40 = vpop.xlane.xlu1 %900  ;;  %v1031_v25 = vsel %vm559_vm2, %v9621_v22, 0.0 }
 0x1e6   : > { %v11681_v24 = vpop.xlane.xlu0 %897  ;;  %9632 = vpow2.f32 %v1002_v39  ;;  %v961_v32 = vsub.f32 %v11484_v2, %v11679_v40  ;;  %1032 = vadd.xlane.f32.xlu1 %v1031_v25  ;;  %v1028_v55 = vsel %vm559_vm2, %v9623_v18, 0.0 }
 0x1e7   : > { %v960_v53 = vsub.f32 %v11487_v3, %v11681_v24  ;;  %9634 = vpow2.f32 %v1000_v57  ;;  %1029 = vadd.xlane.f32.xlu0 %v1028_v55 }
 0x1e8   : > { %v9625_v61 = vpop.eup %9624  ;;  %v990_v42 = vmul.f32 1.442695, %v961_v32 }
 0x1e9   : > { %v988_v48 = vmul.f32 1.442695, %v960_v53  ;;  %v9627_v44 = vpop.eup %9626  ;;  %v11689_v58 = vpop.xlane.xlu1 %924  ;;  %v1055_v59 = vsel %vm559_vm2, %v9625_v61, 0.0 }
 0x1ea   : > { %v11691_v10 = vpop.xlane.xlu0 %921  ;;  %9636 = vpow2.f32 %v990_v42  ;;  %v969_v2 = vsub.f32 %v11494_v15, %v11689_v58  ;;  %1056 = vadd.xlane.f32.xlu1 %v1055_v59  ;;  %v1052_v62 = vsel %vm559_vm2, %v9627_v44, 0.0 }
 0x1eb   : > { %v968_v3 = vsub.f32 %v11497_v16, %v11691_v10  ;;  %9638 = vpow2.f32 %v988_v48  ;;  %1053 = vadd.xlane.f32.xlu0 %v1052_v62 }
 0x1ec   : > { %v9629_v27 = vpop.eup %9628  ;;  %v1006_v13 = vmul.f32 1.442695, %v969_v2 }
 0x1ed   : > { %v1004_v7 = vmul.f32 1.442695, %v968_v3  ;;  %v9631_v28 = vpop.eup %9630  ;;  %v11699_v14 = vpop.xlane.xlu1 %906  ;;  %v1037_v22 = vsel %vm559_vm2, %v9629_v27, 0.0 }
 0x1ee   : > { %v11701_v17 = vpop.xlane.xlu0 %903  ;;  %9640 = vpow2.f32 %v1006_v13  ;;  %v963_v15 = vsub.f32 %v11504_v30, %v11699_v14  ;;  %1038 = vadd.xlane.f32.xlu1 %v1037_v22  ;;  %v1034_v39 = vsel %vm559_vm2, %v9631_v28, 0.0 }
 0x1ef   : > { %v962_v16 = vsub.f32 %v11507_v31, %v11701_v17  ;;  %9642 = vpow2.f32 %v1004_v7  ;;  %1035 = vadd.xlane.f32.xlu0 %v1034_v39 }
 0x1f0   : > { %v9633_v57 = vpop.eup %9632  ;;  %v994_v18 = vmul.f32 1.442695, %v963_v15 }
 0x1f1   : > { %v992_v25 = vmul.f32 1.442695, %v962_v16  ;;  %v9635_v32 = vpop.eup %9634  ;;  %v11709_v53 = vpop.xlane.xlu1 %930  ;;  %v1061_v61 = vsel %vm559_vm2, %v9633_v57, 0.0 }
 0x1f2   : > { %v11711_v55 = vpop.xlane.xlu0 %927  ;;  %9644 = vpow2.f32 %v994_v18  ;;  %v971_v30 = vsub.f32 %v11511_v35, %v11709_v53  ;;  %1062 = vadd.xlane.f32.xlu1 %v1061_v61  ;;  %v1058_v42 = vsel %vm559_vm2, %v9635_v32, 0.0 }
 0x1f3   : > { %v970_v31 = vsub.f32 %v11518_v38, %v11711_v55  ;;  %9646 = vpow2.f32 %v992_v25  ;;  %1059 = vadd.xlane.f32.xlu0 %v1058_v42 }
 0x1f4   : > { %v9637_v48 = vpop.eup %9636  ;;  %v1010_v44 = vmul.f32 1.442695, %v971_v30 }
 0x1f5   : > { %v1008_v59 = vmul.f32 1.442695, %v970_v31  ;;  %v9639_v2 = vpop.eup %9638  ;;  %v11719_v3 = vpop.xlane.xlu1 %1429  ;;  %v1043_v62 = vsel %vm559_vm2, %v9637_v48, 0.0 }
 0x1f6   : > { %9648 = vpow2.f32 %v1010_v44  ;;  %v1450_v35 = vsub.f32 %v11526_v45, %v11719_v3  ;;  %1044 = vadd.xlane.f32.xlu1 %v1043_v62  ;;  %v1040_v38 = vsel %vm559_vm2, %v9639_v2, 0.0  ;;  %v11743_v62 = vpop.xlane.xlu0 %933 }
 0x1f7   : > { %9650 = vpow2.f32 %v1008_v59  ;;  %1041 = vadd.xlane.f32.xlu0 %v1040_v38 }
 0x1f8   : > { %v9641_v27 = vpop.eup %9640  ;;  %v1459_v13 = vmul.f32 1.442695, %v1450_v35 }
 0x1f9   : > { %v9643_v7 = vpop.eup %9642  ;;  %v11725_v28 = vpop.xlane.xlu1 %1426  ;;  %v1067_v22 = vsel %vm559_vm2, %v9641_v27, 0.0 }
 0x1fa   : > { %9652 = vpow2.f32 %v1459_v13  ;;  %v1449_v15 = vsub.f32 %v11533_v51, %v11725_v28  ;;  %1068 = vadd.xlane.f32.xlu1 %v1067_v22  ;;  %v1064_v16 = vsel %vm559_vm2, %v9643_v7, 0.0 }
 0x1fb   : > { %1065 = vadd.xlane.f32.xlu0 %v1064_v16 }
 0x1fc   : > { %v9645_v45 = vpop.eup %9644  ;;  %v1457_v39 = vmul.f32 1.442695, %v1449_v15 }
 0x1fd   : > { %v9647_v57 = vpop.eup %9646  ;;  %v11731_v18 = vpop.xlane.xlu1 %1435  ;;  %v1049_v25 = vsel %vm559_vm2, %v9645_v45, 0.0 }
 0x1fe   : > { %9654 = vpow2.f32 %v1457_v39  ;;  %v1452_v32 = vsub.f32 %v11544_v54, %v11731_v18  ;;  %1050 = vadd.xlane.f32.xlu1 %v1049_v25  ;;  %v1046_v61 = vsel %vm559_vm2, %v9647_v57, 0.0 }
 0x1ff   : > { %1047 = vadd.xlane.f32.xlu0 %v1046_v61 }
 0x200   : > { %v9649_v51 = vpop.eup %9648  ;;  %v1463_v30 = vmul.f32 1.442695, %v1452_v32 }
 0x201   : > { %v9651_v31 = vpop.eup %9650  ;;  %v11737_v42 = vpop.xlane.xlu1 %1432  ;;  %v1073_v48 = vsel %vm559_vm2, %v9649_v51, 0.0 }
 0x202   : > { %9656 = vpow2.f32 %v1463_v30  ;;  %v1451_v44 = vsub.f32 %v11558_v19, %v11737_v42  ;;  %1074 = vadd.xlane.f32.xlu1 %v1073_v48  ;;  %v1070_v59 = vsel %vm559_vm2, %v9651_v31, 0.0  ;;  %v972_v19 = vsub.f32 %v11529_v47, %v11743_v62  ;;  %v11762_v51 = vpop.xlane.xlu0 %939 }
 0x203   : > { %1071 = vadd.xlane.f32.xlu0 %v1070_v59 }
 0x204   : > { %v9653_v54 = vpop.eup %9652  ;;  %v1461_v2 = vmul.f32 1.442695, %v1451_v44  ;;  %v1012_v39 = vmul.f32 1.442695, %v972_v19  ;;  %v974_v44 = vsub.f32 %v11540_v60, %v11762_v51 }
 0x205   : > { %v11745_v35 = vpop.xlane.xlu1 %936  ;;  %v1476_v38 = vsel %vm559_vm2, %v9653_v54, 0.0 }
 0x206   : > { %9658 = vpow2.f32 %v1461_v2  ;;  %v973_v27 = vsub.f32 %v11569_v33, %v11745_v35  ;;  %1477 = vadd.xlane.f32.xlu1 %v1476_v38  ;;  %v11776_v38 = vpop.xlane.xlu0 %945 }
 0x208   : > { %v9655_v13 = vpop.eup %9654  ;;  %v1014_v7 = vmul.f32 1.442695, %v973_v27 }
 0x209   : > { %v11752_v22 = vpop.xlane.xlu1 %1441  ;;  %v1473_v15 = vsel %vm559_vm2, %v9655_v13, 0.0 }
 0x20a   : > { %9660 = vpow2.f32 %v1014_v7  ;;  %v1454_v16 = vsub.f32 %v11575_v41, %v11752_v22  ;;  %1474 = vadd.xlane.f32.xlu0 %v1473_v15 }
 0x20c   : > { %v9657_v45 = vpop.eup %9656  ;;  %v1467_v57 = vmul.f32 1.442695, %v1454_v16 }
 0x20d   : > { %v11757_v25 = vpop.xlane.xlu1 %1438  ;;  %v1482_v33 = vsel %vm559_vm2, %v9657_v45, 0.0  ;;  %v11785_v45 = vpop.xlane.xlu0 %951 }
 0x20e   : > { %9662 = vpow2.f32 %v1467_v57  ;;  %v1453_v47 = vsub.f32 %v11580_v43, %v11757_v25  ;;  %1483 = vadd.xlane.f32.xlu0 %v1482_v33 }
 0x20f   : > { %9664 = vpow2.f32 %v1012_v39 }
 0x210   : > { %v9659_v32 = vpop.eup %9658  ;;  %v1465_v61 = vmul.f32 1.442695, %v1453_v47 }
 0x211   : > { %v11764_v30 = vpop.xlane.xlu1 %942  ;;  %v1479_v41 = vsel %vm559_vm2, %v9659_v32, 0.0 }
 0x212   : > { %v975_v31 = vsub.f32 %v11586_v50, %v11764_v30  ;;  %1480 = vadd.xlane.f32.xlu0 %v1479_v41  ;;  %9666 = vpow2.f32 %v1465_v61  ;;  %v1016_v50 = vmul.f32 1.442695, %v974_v44 }
 0x214   : > { %v9661_v48 = vpop.eup %9660  ;;  %v1018_v43 = vmul.f32 1.442695, %v975_v31 }
 0x215   : > { %v11771_v59 = vpop.xlane.xlu1 %1447  ;;  %v1079_v54 = vsel %vm559_vm2, %v9661_v48, 0.0 }
 0x216   : > { %9668 = vpow2.f32 %v1018_v43  ;;  %v1456_v2 = vsub.f32 %v11591_v56, %v11771_v59  ;;  %1080 = vadd.xlane.f32.xlu1 %v1079_v54  ;;  %v976_v56 = vsub.f32 %v11551_v9, %v11776_v38 }
 0x218   : > { %v9663_v27 = vpop.eup %9662  ;;  %v1471_v13 = vmul.f32 1.442695, %v1456_v2  ;;  %v1020_v61 = vmul.f32 1.442695, %v976_v56 }
 0x219   : > { %v11778_v19 = vpop.xlane.xlu1 %1444  ;;  %v1488_v60 = vsel %vm559_vm2, %v9663_v27, 0.0  ;;  %v9665_v7 = vpop.eup %9664 }
 0x21a   : > { %9670 = vpow2.f32 %v1471_v13  ;;  %v1455_v15 = vsub.f32 %v11441_v23, %v11778_v19  ;;  %1489 = vadd.xlane.f32.xlu0 %v1488_v60  ;;  %v1076_v57 = vsel %vm559_vm2, %v9665_v7, 0.0  ;;  %v978_v23 = vsub.f32 %v11561_v21, %v11785_v45 }
 0x21b   : > { %9672 = vpow2.f32 %v1016_v50 }
 0x21c   : > { %v1469_v16 = vmul.f32 1.442695, %v1455_v15  ;;  %v9667_v33 = vpop.eup %9666  ;;  %v1024_v43 = vmul.f32 1.442695, %v978_v23 }
 0x21d   : > { %v11787_v39 = vpop.xlane.xlu1 %948  ;;  %v1485_v48 = vsel %vm559_vm2, %v9667_v33, 0.0 }
 0x21e   : > { %v977_v47 = vsub.f32 %v11598_v5, %v11787_v39  ;;  %1077 = vadd.xlane.f32.xlu0 %v1076_v57  ;;  %9674 = vpow2.f32 %v1469_v16 }
 0x220   : > { %v9669_v32 = vpop.eup %9668  ;;  %v1022_v41 = vmul.f32 1.442695, %v977_v47 }
 0x221   : > { %v11794_v9 = vpop.xlane.xlu1 %954  ;;  %v1085_v31 = vsel %vm559_vm2, %v9669_v32, 0.0 }
 0x222   : > { %9676 = vpow2.f32 %v1022_v41  ;;  %v979_v44 = vsub.f32 %v11603_v8, %v11794_v9  ;;  %1086 = vadd.xlane.f32.xlu1 %v1085_v31  ;;  %1486 = vadd.xlane.f32.xlu0 %v1485_v48 }
 0x223   : > { %9678 = vpow2.f32 %v1020_v61 }
 0x224   : > { %v9671_v5 = vpop.eup %9670  ;;  %v1026_v54 = vmul.f32 1.442695, %v979_v44 }
 0x225   : > { %v1494_v21 = vsel %vm559_vm2, %v9671_v5, 0.0  ;;  %v9673_v2 = vpop.eup %9672 }
 0x226   : > { %9680 = vpow2.f32 %v1026_v54  ;;  %1495 = vadd.xlane.f32.xlu0 %v1494_v21  ;;  %v1082_v27 = vsel %vm559_vm2, %v9673_v2, 0.0 }
 0x227   : > { %9682 = vpow2.f32 %v1024_v43 }
 0x228   : > { %v9675_v50 = vpop.eup %9674 }
 0x229   : > { %v1491_v8 = vsel %vm559_vm2, %v9675_v50, 0.0 }
 0x22a   : > { %1083 = vadd.xlane.f32.xlu0 %v1082_v27 }
 0x22c   : > { %v9677_v13 = vpop.eup %9676 }
 0x22d   : > { %v1091_v60 = vsel %vm559_vm2, %v9677_v13, 0.0  ;;  %v9679_v7 = vpop.eup %9678 }
 0x22e   : > { %1092 = vadd.xlane.f32.xlu1 %v1091_v60  ;;  %1492 = vadd.xlane.f32.xlu0 %v1491_v8  ;;  %v1088_v16 = vsel %vm559_vm2, %v9679_v7, 0.0 }
 0x230   : > { %v9681_v15 = vpop.eup %9680 }
 0x231   : > { %v1097_v56 = vsel %vm559_vm2, %v9681_v15, 0.0  ;;  %v9683_v57 = vpop.eup %9682 }
 0x232   : > { %1098 = vadd.xlane.f32.xlu1 %v1097_v56  ;;  %1089 = vadd.xlane.f32.xlu0 %v1088_v16  ;;  %v1094_v33 = vsel %vm559_vm2, %v9683_v57, 0.0 }
 0x236   : > { %1095 = vadd.xlane.f32.xlu0 %v1094_v33 }
 0x273   : > { %v1033_v47 = vpop.xlane.xlu1 %1032 }
 0x274   : > { %9684 = vlog2.f32 %v1033_v47  ;;  %v1030_v32 = vpop.xlane.xlu0 %1029 }
 0x275   : > { %9686 = vlog2.f32 %v1030_v32 }
 0x277   : > { %v1057_v61 = vpop.xlane.xlu1 %1056 }
 0x278   : > { %9688 = vlog2.f32 %v1057_v61  ;;  %v1054_v23 = vpop.xlane.xlu0 %1053 }
 0x279   : > { %9690 = vlog2.f32 %v1054_v23 }
 0x27b   : > { %v1039_v41 = vpop.xlane.xlu1 %1038 }
 0x27c   : > { %9692 = vlog2.f32 %v1039_v41  ;;  %v1036_v31 = vpop.xlane.xlu0 %1035 }
 0x27d   : > { %9694 = vlog2.f32 %v1036_v31 }
 0x27e   : > { %v9685_v48 = vpop.eup %9684 }
 0x27f   : > { %v9687_v44 = vpop.eup %9686  ;;  %v1063_v5 = vpop.xlane.xlu1 %1062  ;;  %v1103_v2 = vmul.f32 0.6931472, %v9685_v48 }
 0x280   : > { %v1101_v43 = vmul.f32 0.6931472, %v9687_v44  ;;  %9696 = vlog2.f32 %v1063_v5  ;;  %v1060_v54 = vpop.xlane.xlu0 %1059 }
 0x281   : > { %9698 = vlog2.f32 %v1060_v54  ;;  %v1149_v15 = vadd.f32 %v1103_v2, %v11647_v36 }
 0x282   : > { %v9689_v21 = vpop.eup %9688  ;;  %v1148_v27 = vadd.f32 %v1101_v43, %v11649_v37 }
 0x283   : > { %v9691_v50 = vpop.eup %9690  ;;  %v1045_v13 = vpop.xlane.xlu1 %1044  ;;  %v1119_v56 = vmul.f32 0.6931472, %v9689_v21 }
 0x284   : > { %v1117_v60 = vmul.f32 0.6931472, %v9691_v50  ;;  %9700 = vlog2.f32 %v1045_v13  ;;  %1172 = vxpose.xlu0.b32.start [1/8] (short) (narrow) %v1148_v27, 8  ;;  %v1042_v8 = vpop.xlane.xlu0 %1041  ;;  %v11814_v27 = vpop.f32.mrb[16].mxu0 }
 0x285   : > { %9702 = vlog2.f32 %v1042_v8  ;;  %v1157_v61 = vadd.f32 %v1119_v56, %v11655_v1  ;;  %v11816_v50 = vpop.f32.mrb[17].mxu0 }
 0x286   : > { %v9693_v7 = vpop.eup %9692  ;;  %v1156_v16 = vadd.f32 %v1117_v60, %v11657_v52 }
 0x287   : > { %v9695_v57 = vpop.eup %9694  ;;  %v1069_v33 = vpop.xlane.xlu1 %1068  ;;  %v1107_v23 = vmul.f32 0.6931472, %v9693_v7 }
 0x288   : > { %v1105_v47 = vmul.f32 0.6931472, %v9695_v57  ;;  %9704 = vlog2.f32 %v1069_v33  ;;  %1173 = vxpose.xlu0.b32.cont [2/8] (short) (narrow) %v1149_v15, 8  ;;  %1204 = vxpose.xlu1.b32.start [1/8] (short) (narrow) %v1156_v16, 8  ;;  %v1066_v37 = vpop.xlane.xlu0 %1065  ;;  %v11820_v7 = vpop.f32.mrb[18].mxu0 }
 0x289   : > { %9706 = vlog2.f32 %v1066_v37  ;;  %v1151_v5 = vadd.f32 %v1107_v23, %v11663_v26  ;;  %v11822_v56 = vpop.f32.mrb[19].mxu0 }
 0x28a   : > { %v9697_v32 = vpop.eup %9696  ;;  %v1150_v41 = vadd.f32 %v1105_v47, %v11665_v63 }
 0x28b   : > { %v9699_v31 = vpop.eup %9698  ;;  %v1051_v48 = vpop.xlane.xlu1 %1050  ;;  %v1123_v43 = vmul.f32 0.6931472, %v9697_v32 }
 0x28c   : > { %v1121_v36 = vmul.f32 0.6931472, %v9699_v31  ;;  %9708 = vlog2.f32 %v1051_v48  ;;  %1205 = vxpose.xlu1.b32.cont [2/8] (short) (narrow) %v1157_v61, 8  ;;  %1174 = vxpose.xlu0.b32.cont [3/8] (short) (narrow) %v1150_v41, 8  ;;  %v1048_v52 = vpop.xlane.xlu0 %1047 }
 0x28d   : > { %9710 = vlog2.f32 %v1048_v52  ;;  %v1159_v60 = vadd.f32 %v1123_v43, %v11671_v12 }
 0x28e   : > { %v9701_v44 = vpop.eup %9700  ;;  %v1158_v54 = vadd.f32 %v1121_v36, %v11673_v29 }
 0x28f   : > { %v9703_v21 = vpop.eup %9702  ;;  %v1075_v2 = vpop.xlane.xlu1 %1074  ;;  %v1111_v8 = vmul.f32 0.6931472, %v9701_v44 }
 0x290   : > { %v1109_v1 = vmul.f32 0.6931472, %v9703_v21  ;;  %9712 = vlog2.f32 %v1075_v2  ;;  %1175 = vxpose.xlu0.b32.cont [4/8] (short) (narrow) %v1151_v5, 8  ;;  %1206 = vxpose.xlu1.b32.cont [3/8] (short) (narrow) %v1158_v54, 8  ;;  %v1072_v63 = vpop.xlane.xlu0 %1071 }
 0x291   : > { %9714 = vlog2.f32 %v1072_v63  ;;  %v1153_v57 = vadd.f32 %v1111_v8, %v11679_v40 }
 0x292   : > { %v9705_v13 = vpop.eup %9704  ;;  %v1152_v26 = vadd.f32 %v1109_v1, %v11681_v24  ;;  %v11826_v24 = vpop.f32.mrb[20].mxu0 }
 0x293   : > { %v9707_v29 = vpop.eup %9706  ;;  %v1127_v33 = vmul.f32 0.6931472, %v9705_v13  ;;  %v1478_v37 = vpop.xlane.xlu1 %1477 }
 0x294   : > { %v1125_v15 = vmul.f32 0.6931472, %v9707_v29  ;;  %1207 = vxpose.xlu1.b32.cont [4/8] (short) (narrow) %v1159_v60, 8  ;;  %1176 = vxpose.xlu0.b32.cont [5/8] (short) (narrow) %v1152_v26, 8  ;;  %v11830_v40 = vpop.f32.mrb[21].mxu0 }
 0x295   : > { %v1161_v41 = vadd.f32 %v1127_v33, %v11689_v58  ;;  %v11832_v52 = vpop.f32.mrb[22].mxu0 }
 0x296   : > { %v9709_v16 = vpop.eup %9708  ;;  %v1160_v47 = vadd.f32 %v1125_v15, %v11691_v10  ;;  %v11834_v5 = vpop.f32.mrb[23].mxu0 }
 0x297   : > { %v9711_v32 = vpop.eup %9710  ;;  %v1475_v12 = vpop.xlane.xlu0 %1474  ;;  %v1115_v31 = vmul.f32 0.6931472, %v9709_v16 }
 0x298   : > { %v1113_v61 = vmul.f32 0.6931472, %v9711_v32  ;;  %1177 = vxpose.xlu0.b32.cont [6/8] (short) (narrow) %v1153_v57, 8  ;;  %1208 = vxpose.xlu1.b32.cont [5/8] (short) (narrow) %v1160_v47, 8  ;;  %9716 = vlog2.f32 %v1475_v12 }
 0x299   : > { %9718 = vlog2.f32 %v1478_v37  ;;  %v1155_v43 = vadd.f32 %v1115_v31, %v11699_v14 }
 0x29a   : > { %v9713_v23 = vpop.eup %9712  ;;  %v1154_v48 = vadd.f32 %v1113_v61, %v11701_v17 }
 0x29b   : > { %v9715_v36 = vpop.eup %9714  ;;  %v1484_v10 = vpop.xlane.xlu0 %1483  ;;  %v1131_v54 = vmul.f32 0.6931472, %v9713_v23 }
 0x29c   : > { %v1129_v44 = vmul.f32 0.6931472, %v9715_v36  ;;  %1209 = vxpose.xlu1.b32.cont [6/8] (short) (narrow) %v1161_v41, 8  ;;  %1178 = vxpose.xlu0.b32.cont [7/8] (short) (narrow) %v1154_v48, 8 }
 0x29d   : > { %v1163_v2 = vadd.f32 %v1131_v54, %v11709_v53 }
 0x29e   : > { %v1162_v21 = vadd.f32 %v1129_v44, %v11711_v55 }
 0x29f   : > { %v1481_v58 = vpop.xlane.xlu0 %1480 }
 0x2a0   : > { %1179 = vxpose.xlu0.b32.end [8/8] (short) (narrow) %v1155_v43, 8  ;;  %1210 = vxpose.xlu1.b32.cont [7/8] (short) (narrow) %v1162_v21, 8  ;;  %9720 = vlog2.f32 %v1481_v58 }
 0x2a1   : > { %9722 = vlog2.f32 %v1484_v10 }
 0x2a2   : > { %v9717_v17 = vpop.eup %9716 }
 0x2a3   : > { %v9719_v1 = vpop.eup %9718  ;;  %v1498_v63 = vmul.f32 0.6931472, %v9717_v17  ;;  %v1081_v26 = vpop.xlane.xlu1 %1080 }
 0x2a4   : > { %1211 = vxpose.xlu1.b32.end [8/8] (short) (narrow) %v1163_v2, 8  ;;  %v1500_v60 = vmul.f32 0.6931472, %v9719_v1  ;;  %9724 = vlog2.f32 %v1081_v26 }
 0x2a5   : > { %v1513_v13 = vadd.f32 %v1498_v63, %v11725_v28 }
 0x2a6   : > { %v1514_v55 = vadd.f32 %v1500_v60, %v11719_v3 }
 0x2a7   : > { %v1490_v8 = vpop.xlane.xlu0 %1489 }
 0x2a8   : > { %1521 = vxpose.xlu1.b32.start [1/8] (short) (narrow) %v1513_v13, 8 }
 0x2aa   : > { %v9721_v14 = vpop.eup %9720 }
 0x2ab   : > { %v9723_v29 = vpop.eup %9722  ;;  %v1502_v15 = vmul.f32 0.6931472, %v9721_v14  ;;  %v1078_v16 = vpop.xlane.xlu0 %1077 }
 0x2ac   : > { %1522 = vxpose.xlu1.b32.cont [2/8] (short) (narrow) %v1514_v55, 8  ;;  %9726 = vlog2.f32 %v1078_v16  ;;  %v1504_v57 = vmul.f32 0.6931472, %v9723_v29 }
 0x2ad   : > { %v1515_v53 = vadd.f32 %v1502_v15, %v11737_v42  ;;  %9728 = vlog2.f32 %v1490_v8 }
 0x2ae   : > { %v1516_v28 = vadd.f32 %v1504_v57, %v11731_v18  ;;  %v9725_v32 = vpop.eup %9724 }
 0x2af   : > { %v1487_v33 = vpop.xlane.xlu0 %1486  ;;  %v1087_v37 = vpop.xlane.xlu1 %1086  ;;  %v1135_v23 = vmul.f32 0.6931472, %v9725_v32 }
 0x2b0   : > { %1523 = vxpose.xlu1.b32.cont [3/8] (short) (narrow) %v1515_v53, 8  ;;  %9730 = vlog2.f32 %v1487_v33 }
 0x2b1   : > { %9732 = vlog2.f32 %v1087_v37  ;;  %v1165_v18 = vadd.f32 %v1135_v23, %v11745_v35  ;;  %v1587_v23 = vld [vmem:[#allocation2 + $0x48] sm:$0xff] }
 0x2b3   : > { %v1496_v47 = vpop.xlane.xlu0 %1495 }
 0x2b4   : > { %1524 = vxpose.xlu1.b32.cont [4/8] (short) (narrow) %v1516_v28, 8 }
 0x2b6   : > { %v9727_v3 = vpop.eup %9726 }
 0x2b7   : > { %v1084_v12 = vpop.xlane.xlu0 %1083  ;;  %v1133_v61 = vmul.f32 0.6931472, %v9727_v3  ;;  %v9729_v42 = vpop.eup %9728 }
 0x2b8   : > { %9734 = vlog2.f32 %v1084_v12  ;;  %v1508_v44 = vmul.f32 0.6931472, %v9729_v42  ;;  %v10840_v42 = vld [vmem:[%s11403_s11] sm:$0x1] }
 0x2b9   : > { %v1164_v41 = vadd.f32 %v1133_v61, %v11743_v62  ;;  %9736 = vlog2.f32 %v1496_v47 }
 0x2ba   : > { %v9731_v31 = vpop.eup %9730  ;;  %v1518_v58 = vadd.f32 %v1508_v44, %v11752_v22 }
 0x2bb   : > { %1236 = vxpose.xlu0.b32.start [1/8] (short) (narrow) %v1164_v41, 8  ;;  %v1493_v48 = vpop.xlane.xlu0 %1492  ;;  %v1506_v36 = vmul.f32 0.6931472, %v9731_v31  ;;  %v1093_v10 = vpop.xlane.xlu1 %1092  ;;  %v1586_v41 = vld [vmem:[#allocation2 + $0x40] sm:$0xff] }
 0x2bc   : > { %9738 = vlog2.f32 %v1493_v48  ;;  %v9733_v21 = vpop.eup %9732 }
 0x2bd   : > { %v1517_v43 = vadd.f32 %v1506_v36, %v11757_v25  ;;  %9740 = vlog2.f32 %v1093_v10  ;;  %v1139_v1 = vmul.f32 0.6931472, %v9733_v21  ;;  %v1589_v36 = vld [vmem:[#allocation2 + $0x58] sm:$0xff]  ;;  %v1588_v10 = vld [vmem:[#allocation2 + $0x50] sm:$0xff] }
 0x2bf   : > { %1237 = vxpose.xlu0.b32.cont [2/8] (short) (narrow) %v1165_v18, 8  ;;  %v1090_v54 = vpop.xlane.xlu0 %1089  ;;  %1525 = vxpose.xlu1.b32.cont [5/8] (short) (narrow) %v1517_v43, 8  ;;  %v1099_v13 = vpop.xlane.xlu1 %1098  ;;  %v1167_v8 = vadd.f32 %v1139_v1, %v11764_v30  ;;  %v1611_v18 = vmul.f32 0.0625, %v1587_v23  ;;  %v1610_v43 = vmul.f32 0.0625, %v1586_v41  ;;  %v1590_v1 = vld [vmem:[#allocation2 + $0x60] sm:$0xff]  ;;  %v2199_v41 = vmul.f32 0.0625, %v11832_v52 }
 0x2c0   : > { %9742 = vlog2.f32 %v1090_v54 }
 0x2c2   : > { %v9735_v62 = vpop.eup %9734 }
 0x2c3   : > { %v1137_v17 = vmul.f32 0.6931472, %v9735_v62  ;;  %v1096_v2 = vpop.xlane.xlu0 %1095  ;;  %1526 = vxpose.xlu1.b32.cont [6/8] (short) (narrow) %v1518_v58, 8  ;;  %v9737_v35 = vpop.eup %9736  ;;  %v1613_v62 = vmul.f32 0.0625, %v1589_v36  ;;  %v1612_v58 = vmul.f32 0.0625, %v1588_v10 }
 0x2c4   : > { %9744 = vlog2.f32 %v1096_v2  ;;  %v1512_v14 = vmul.f32 0.6931472, %v9737_v35  ;;  %v1591_v2 = vld [vmem:[#allocation2 + $0x68] sm:$0xff] }
 0x2c5   : > { %v1166_v63 = vadd.f32 %v1137_v17, %v11762_v51  ;;  %9746 = vlog2.f32 %v1099_v13 }
 0x2c6   : > { %v9739_v60 = vpop.eup %9738  ;;  %v1520_v16 = vadd.f32 %v1512_v14, %v11771_v59  ;;  %v1593_v14 = vld [vmem:[#allocation2 + $0x78] sm:$0xff] }
 0x2c7   : > { %1238 = vxpose.xlu0.b32.cont [3/8] (short) (narrow) %v1166_v63, 8  ;;  %v1510_v25 = vmul.f32 0.6931472, %v9739_v60  ;;  %v9741_v26 = vpop.eup %9740 }
 0x2c8   : > { %v1143_v15 = vmul.f32 0.6931472, %v9741_v26 }
 0x2c9   : > { %v1519_v55 = vadd.f32 %v1510_v25, %v11778_v19  ;;  %v1615_v25 = vmul.f32 0.0625, %v1591_v2 }
 0x2ca   : > { %v9743_v22 = vpop.eup %9742  ;;  %v1169_v33 = vadd.f32 %v1143_v15, %v11787_v39 }
 0x2cb   : > { %1239 = vxpose.xlu0.b32.cont [4/8] (short) (narrow) %v1167_v8, 8  ;;  %v1141_v29 = vmul.f32 0.6931472, %v9743_v22  ;;  %1527 = vxpose.xlu1.b32.cont [7/8] (short) (narrow) %v1519_v55, 8  ;;  %v1614_v8 = vmul.f32 0.0625, %v1590_v1  ;;  %v1592_v55 = vld [vmem:[#allocation2 + $0x70] sm:$0xff] }
 0x2cd   : > { %v1168_v51 = vadd.f32 %v1141_v29, %v11776_v38 }
 0x2ce   : > { %v9745_v53 = vpop.eup %9744 }
 0x2cf   : > { %1528 = vxpose.xlu1.b32.end [8/8] (short) (narrow) %v1520_v16, 8  ;;  %1240 = vxpose.xlu0.b32.cont [5/8] (short) (narrow) %v1168_v51, 8  ;;  %v1145_v57 = vmul.f32 0.6931472, %v9745_v53  ;;  %v9747_v30 = vpop.eup %9746  ;;  %v1617_v51 = vmul.f32 0.0625, %v1593_v14  ;;  %v1616_v53 = vmul.f32 0.0625, %v1592_v55 }
 0x2d0   : > { %v1147_v28 = vmul.f32 0.6931472, %v9747_v30  ;;  %v1580_v14 = vld [vmem:[#allocation2 + $0x10] sm:$0xff]  ;;  %v1583_v55 = vld [vmem:[#allocation2 + $0x28] sm:$0xff] }
 0x2d1   : > { %v1170_v19 = vadd.f32 %v1145_v57, %v11785_v45  ;;  %v2193_v57 = vmul.f32 0.0625, %v11814_v27  ;;  %v2194_v27 = vmul.f32 0.0625, %v11822_v56 }
 0x2d2   : > { %v1171_v47 = vadd.f32 %v1147_v28, %v11794_v9 }
 0x2d3   : > { %1241 = vxpose.xlu0.b32.cont [6/8] (short) (narrow) %v1169_v33, 8  ;;  %v2192_v33 = vmul.f32 0.0625, %v11816_v50 }
 0x2d7   : > { %1242 = vxpose.xlu0.b32.cont [7/8] (short) (narrow) %v1170_v19, 8 }
 0x2db   : > { %1243 = vxpose.xlu0.b32.end [8/8] (short) (narrow) %v1171_v47, 8 }
 0x304   : > { %v1188_v59 = vpop.trf.xlu0 }
 0x305   : > { %1269 = vst.msk [vmem:[#allocation3] sm:$0x1] %vm1268_vm3, %v1188_v59 }
 0x308   : > { %v1220_v38 = vpop.trf.xlu1 }
 0x309   : > { %1270 = vst.msk [vmem:[#allocation3 + $0x1] sm:$0x1] %vm1268_vm3, %v1220_v38  ;;  %v2195_v38 = vmul.f32 0.0625, %v11820_v7 }
 0x30c   : > { %v1554_v37 = vld [vmem:[#allocation3] sm:$0x1] }
 0x30d   : > { %v1558_v3 = vmul.f32 16.0, %v1554_v37 }
 0x30f   : > { %v11863_v9 = vsub.f32 %v11394_v49, %v1558_v3  ;;  %v2197_v3 = vmul.f32 0.0625, %v11826_v24 }
 0x310   : > { %v1555_v32 = vld [vmem:[#allocation3 + $0x1] sm:$0x1] }
 0x311   : > { %v1560_v39 = vmul.f32 16.0, %v1555_v32  ;;  %v1575_v48 = vsub.f32 %v11863_v9, %v11394_v49 }
 0x313   : > { %v11858_v12 = vsub.f32 %v11394_v49, %v1560_v39  ;;  %v1576_v17 = vmul.f32 0.0625, %v1575_v48 }
 0x315   : > { %v1567_v45 = vsub.f32 %v11858_v12, %v11394_v49  ;;  %v1577_v26 = vadd.f32 %v10840_v42, %v1576_v17 }
 0x317   : > { %v1570_v61 = vmul.f32 0.0625, %v1567_v45  ;;  %v2204_v30 = vrot.slane %v1577_v26, %v11425_v4  ;;  %v2196_v45 = vmul.f32 0.0625, %v11830_v40 }
 0x319   : > { %v1573_v31 = vadd.f32 %v10840_v42, %v1570_v61  ;;  %v11906_v32 = vadd.f32 %v2204_v30, %v2193_v57  ;;  %v11908_v39 = vadd.f32 %v2204_v30, %v2192_v33  ;;  %v11912_v61 = vadd.f32 %v2204_v30, %v2194_v27 }
 0x31a   : > { %v11918_v23 = vadd.f32 %v2204_v30, %v2195_v38  ;;  %v2198_v42 = vmul.f32 0.0625, %v11834_v5  ;;  %v11928_v36 = vadd.f32 %v2204_v30, %v2197_v3  ;;  %v11931_v10 = vadd.f32 %v2204_v30, %v2199_v41  ;;  %v1585_v38 = vld [vmem:[#allocation2 + $0x38] sm:$0xff] }
 0x31b   : > { %v1636_v44 = vrot.slane %v1573_v31, %v11425_v4  ;;  %v2217_v7 = vsel %vm559_vm2, %v11906_v32, -inf  ;;  %v2214_v56 = vsel %vm559_vm2, %v11908_v39, -inf  ;;  %v11922_v31 = vadd.f32 %v2204_v30, %v2196_v45 }
 0x31c   : > { %v2223_v40 = vsel %vm559_vm2, %v11918_v23, -inf  ;;  %v2220_v48 = vsel %vm559_vm2, %v11912_v61, -inf  ;;  %v11933_v52 = vadd.f32 %v2204_v30, %v2198_v42  ;;  %v2229_v5 = vsel %vm559_vm2, %v11928_v36, -inf  ;;  %v1582_v42 = vld [vmem:[#allocation2 + $0x20] sm:$0xff] }
 0x31d   : > { %v11869_v54 = vadd.f32 %v1636_v44, %v1611_v18  ;;  %v11871_v21 = vadd.f32 %v1636_v44, %v1610_v43  ;;  %v11877_v13 = vadd.f32 %v1636_v44, %v1613_v62  ;;  %v11879_v60 = vadd.f32 %v1636_v44, %v1612_v58 }
 0x31e   : > { %v11885_v15 = vadd.f32 %v1636_v44, %v1615_v25  ;;  %v11887_v16 = vadd.f32 %v1636_v44, %v1614_v8  ;;  %v11896_v47 = vadd.f32 %v1636_v44, %v1617_v51  ;;  %v11898_v59 = vadd.f32 %v1636_v44, %v1616_v53  ;;  %v1579_v25 = vld [vmem:[#allocation2 + $0x8] sm:$0xff]  ;;  %v10841_v8 = vld [vmem:[%s11420_s14] sm:$0x1] }
 0x31f   : > { %v1695_v63 = vsel %vm559_vm2, %v11869_v54, -inf  ;;  %v1692_v35 = vsel %vm559_vm2, %v11871_v21, -inf  ;;  %v1701_v22 = vsel %vm559_vm2, %v11877_v13, -inf  ;;  %v1698_v29 = vsel %vm559_vm2, %v11879_v60, -inf }
 0x320   : > { %1696 = vmax.xlane.f32.xlu1 %v1695_v63  ;;  %1693 = vmax.xlane.f32.xlu0 %v1692_v35  ;;  %v1707_v28 = vsel %vm559_vm2, %v11885_v15, -inf  ;;  %v1704_v19 = vsel %vm559_vm2, %v11887_v16, -inf  ;;  %v1713_v50 = vsel %vm559_vm2, %v11896_v47, -inf  ;;  %v1710_v37 = vsel %vm559_vm2, %v11898_v59, -inf  ;;  %v1578_v35 = vld [vmem:[#allocation2] sm:$0xff] }
 0x321   : > { %v2226_v18 = vsel %vm559_vm2, %v11922_v31, -inf  ;;  %v2235_v43 = vsel %vm559_vm2, %v11931_v10, -inf  ;;  %v2232_v62 = vsel %vm559_vm2, %v11933_v52, -inf  ;;  %v1603_v51 = vmul.f32 0.0625, %v1579_v25  ;;  %v1597_v25 = vld [vmem:[#allocation2 + $0x98] sm:$0xff] }
 0x322   : > { %v1604_v30 = vmul.f32 0.0625, %v1580_v14  ;;  %v1609_v41 = vmul.f32 0.0625, %v1585_v38 }
 0x324   : > { %1702 = vmax.xlane.f32.xlu1 %v1701_v22  ;;  %1699 = vmax.xlane.f32.xlu0 %v1698_v29  ;;  %v1602_v22 = vmul.f32 0.0625, %v1578_v35 }
 0x328   : > { %1708 = vmax.xlane.f32.xlu1 %v1707_v28  ;;  %1705 = vmax.xlane.f32.xlu0 %v1704_v19  ;;  %v1607_v28 = vmul.f32 0.0625, %v1583_v55  ;;  %v1581_v19 = vld [vmem:[#allocation2 + $0x18] sm:$0xff] }
 0x32c   : > { %1714 = vmax.xlane.f32.xlu1 %v1713_v50  ;;  %1711 = vmax.xlane.f32.xlu0 %v1710_v37 }
 0x330   : > { %2218 = vmax.xlane.f32.xlu0 %v2217_v7  ;;  %2215 = vmax.xlane.f32.xlu1 %v2214_v56  ;;  %v1605_v56 = vmul.f32 0.0625, %v1581_v19 }
 0x333   : > { %v1537_v24 = vpop.trf.xlu1 }
 0x334   : > { %1553 = vst.msk [vmem:[#allocation4] sm:$0x1] %vm1268_vm3, %v1537_v24  ;;  %2224 = vmax.xlane.f32.xlu0 %v2223_v40  ;;  %2221 = vmax.xlane.f32.xlu1 %v2220_v48 }
 0x338   : > { %2230 = vmax.xlane.f32.xlu0 %v2229_v5  ;;  %2227 = vmax.xlane.f32.xlu1 %v2226_v18 }
 0x33b   : > { %v1557_v44 = vld [vmem:[#allocation4] sm:$0x1] }
 0x33c   : > { %2236 = vmax.xlane.f32.xlu0 %v2235_v43  ;;  %2233 = vmax.xlane.f32.xlu1 %v2232_v62  ;;  %v1564_v58 = vmul.f32 16.0, %v1557_v44  ;;  %v1606_v43 = vmul.f32 0.0625, %v1582_v42  ;;  %v1595_v62 = vld [vmem:[#allocation2 + $0x88] sm:$0xff]  ;;  %v1601_v42 = vld [vmem:[#allocation2 + $0xb8] sm:$0xff] }
 0x33e   : > { %v11944_v17 = vsub.f32 %v11428_v6, %v1564_v58 }
 0x33f   : > { %v1252_v2 = vpop.trf.xlu0 }
 0x340   : > { %1271 = vst.msk [vmem:[#allocation3 + $0x2] sm:$0x1] %vm1268_vm3, %v1252_v2  ;;  %v1566_v1 = vsub.f32 %v11944_v17, %v11428_v6  ;;  %v1584_v2 = vld [vmem:[#allocation2 + $0x30] sm:$0xff] }
 0x341   : > { %v1608_v55 = vmul.f32 0.0625, %v1584_v2 }
 0x342   : > { %v1569_v63 = vmul.f32 0.0625, %v1566_v1 }
 0x344   : > { %v1572_v26 = vadd.f32 %v10841_v8, %v1569_v63 }
 0x346   : > { %v1632_v29 = vrot.slane %v1572_v26, %v11425_v4  ;;  %v1619_v26 = vmul.f32 0.0625, %v1595_v62 }
 0x347   : > { %v1556_v53 = vld [vmem:[#allocation3 + $0x2] sm:$0x1] }
 0x348   : > { %v11951_v57 = vadd.f32 %v1632_v29, %v1602_v22  ;;  %v11953_v33 = vadd.f32 %v1632_v29, %v1603_v51  ;;  %v1562_v27 = vmul.f32 16.0, %v1556_v53  ;;  %v11959_v3 = vadd.f32 %v1632_v29, %v1604_v30 }
 0x349   : > { %v11961_v45 = vadd.f32 %v1632_v29, %v1607_v28  ;;  %v11972_v5 = vadd.f32 %v1632_v29, %v1605_v56  ;;  %v11974_v18 = vadd.f32 %v1632_v29, %v1609_v41  ;;  %v11980_v35 = vadd.f32 %v1632_v29, %v1606_v43  ;;  %v1599_v28 = vld [vmem:[#allocation2 + $0xa8] sm:$0xff] }
 0x34a   : > { %v1668_v50 = vsel %vm559_vm2, %v11951_v57, -inf  ;;  %v1671_v37 = vsel %vm559_vm2, %v11953_v33, -inf  ;;  %v11964_v7 = vsub.f32 %v11428_v6, %v1562_v27  ;;  %v1674_v40 = vsel %vm559_vm2, %v11959_v3, -inf }
 0x34b   : > { %1669 = vmax.xlane.f32.xlu0 %v1668_v50  ;;  %1672 = vmax.xlane.f32.xlu1 %v1671_v37  ;;  %v1683_v48 = vsel %vm559_vm2, %v11961_v45, -inf  ;;  %v1677_v1 = vsel %vm559_vm2, %v11972_v5, -inf  ;;  %v1689_v63 = vsel %vm559_vm2, %v11974_v18, -inf  ;;  %v1621_v51 = vmul.f32 0.0625, %v1597_v25  ;;  %v1596_v37 = vld [vmem:[#allocation2 + $0x90] sm:$0xff] }
 0x34c   : > { %v1568_v24 = vsub.f32 %v11964_v7, %v11428_v6  ;;  %v1680_v53 = vsel %vm559_vm2, %v11980_v35, -inf  ;;  %v11987_v30 = vadd.f32 %v1632_v29, %v1608_v55  ;;  %v1623_v50 = vmul.f32 0.0625, %v1599_v28 }
 0x34e   : > { %v1571_v44 = vmul.f32 0.0625, %v1568_v24  ;;  %v1686_v56 = vsel %vm559_vm2, %v11987_v30, -inf }
 0x34f   : > { %1675 = vmax.xlane.f32.xlu0 %v1674_v40  ;;  %1684 = vmax.xlane.f32.xlu1 %v1683_v48  ;;  %v1620_v40 = vmul.f32 0.0625, %v1596_v37  ;;  %v1625_v48 = vmul.f32 0.0625, %v1601_v42  ;;  %v2855_v37 = vld [vmem:[%s11032_s5 + $0x18] sm:$0xff]  ;;  %v2858_v42 = vld [vmem:[%s11032_s5 + $0x30] sm:$0xff] }
 0x350   : > { %v1574_v58 = vadd.f32 %v10841_v8, %v1571_v44  ;;  %v1594_v8 = vld [vmem:[#allocation2 + $0x80] sm:$0xff] }
 0x351   : > { %v1618_v27 = vmul.f32 0.0625, %v1594_v8  ;;  %v1598_v44 = vld [vmem:[#allocation2 + $0xa0] sm:$0xff] }
 0x352   : > { %v1640_v14 = vrot.slane %v1574_v58, %v11425_v4 }
 0x353   : > { %1678 = vmax.xlane.f32.xlu0 %v1677_v1  ;;  %1690 = vmax.xlane.f32.xlu1 %v1689_v63  ;;  %v1622_v1 = vmul.f32 0.0625, %v1598_v44  ;;  %v1600_v63 = vld [vmem:[#allocation2 + $0xb0] sm:$0xff] }
 0x354   : > { %v11983_v22 = vadd.f32 %v1640_v14, %v1619_v26  ;;  %v11991_v38 = vadd.f32 %v1640_v14, %v1621_v51  ;;  %v11995_v41 = vadd.f32 %v1640_v14, %v1618_v27  ;;  %v11999_v24 = vadd.f32 %v1640_v14, %v1623_v50  ;;  %v2853_v27 = vld [vmem:[%s11032_s5 + $0x8] sm:$0xff]  ;;  %v2854_v50 = vld [vmem:[%s11032_s5 + $0x10] sm:$0xff] }
 0x355   : > { %v12003_v62 = vadd.f32 %v1640_v14, %v1620_v40  ;;  %v12007_v2 = vadd.f32 %v1640_v14, %v1625_v48  ;;  %v12011_v26 = vadd.f32 %v1640_v14, %v1622_v1  ;;  %v1624_v51 = vmul.f32 0.0625, %v1600_v63 }
 0x356   : > { %v1719_v19 = vsel %vm559_vm2, %v11983_v22, -inf  ;;  %v1725_v29 = vsel %vm559_vm2, %v11991_v38, -inf  ;;  %v1716_v43 = vsel %vm559_vm2, %v11995_v41, -inf  ;;  %v1731_v58 = vsel %vm559_vm2, %v11999_v24, -inf }
 0x357   : > { %1681 = vmax.xlane.f32.xlu0 %v1680_v53  ;;  %1720 = vmax.xlane.f32.xlu1 %v1719_v19  ;;  %v1722_v25 = vsel %vm559_vm2, %v12003_v62, -inf  ;;  %v1737_v55 = vsel %vm559_vm2, %v12007_v2, -inf  ;;  %v1728_v8 = vsel %vm559_vm2, %v12011_v26, -inf  ;;  %v12017_v53 = vadd.f32 %v1640_v14, %v1624_v51  ;;  %v2852_v19 = vld [vmem:[%s11032_s5] sm:$0xff] }
 0x358   : > { %9052 = vmatprep.mubr.msk.f32.mxu1 %vm269_vm0, %v2852_v19  ;;  %v2856_v14 = vld [vmem:[%s11032_s5 + $0x20] sm:$0xff] }
 0x359   : > { %v1734_v28 = vsel %vm559_vm2, %v12017_v53, -inf  ;;  %9053 = vmatmul.mubr.msk.f32.vlgmr.msra.gmra.mrb[16].mxu1 %vm269_vm0, %v2853_v27 }
 0x35a   : > { %9055 = vmatprep.mubr.msk.f32.mxu1 %vm269_vm0, %v2854_v50  ;;  %9433 = vmatpush3.bf16.xpose.msk.msra.mxu1 %vm11036_vm1, %v11071_v11 }
 0x35b   : > { %1687 = vmax.xlane.f32.xlu0 %v1686_v56  ;;  %1726 = vmax.xlane.f32.xlu1 %v1725_v29  ;;  %v2857_v56 = vld [vmem:[%s11032_s5 + $0x28] sm:$0xff]  ;;  %v2859_v29 = vld [vmem:[%s11032_s5 + $0x38] sm:$0xff] }
 0x35c   : > { %9436 = vmatprep.subr.msk.bf16.mxu1 %vm11036_vm1, %v11102_v20 }
 0x35d   : > { %9056 = vmatmul.mubr.msk.f32.gmra.mrb[18].mxu1 %vm269_vm0, %v2855_v37 }
 0x35e   : > { %9058 = vmatprep.mubr.msk.f32.mxu1 %vm269_vm0, %v2856_v14 }
 0x35f   : > { %1717 = vmax.xlane.f32.xlu0 %v1716_v43  ;;  %1732 = vmax.xlane.f32.xlu1 %v1731_v58 }
 0x361   : > { %9059 = vmatmul.mubr.msk.f32.gmra.mrb[20].mxu1 %vm269_vm0, %v2857_v56 }
 0x362   : > { %9061 = vmatprep.mubr.msk.f32.mxu1 %vm269_vm0, %v2858_v42  ;;  %9439 = vmatpush3.bf16.xpose.msk.msra.mxu1 %vm11036_vm1, %v11102_v20 }
 0x363   : > { %1723 = vmax.xlane.f32.xlu0 %v1722_v25  ;;  %1738 = vmax.xlane.f32.xlu1 %v1737_v55 }
 0x364   : > { %9442 = vmatprep.subr.msk.bf16.mxu1 %vm11036_vm1, %v11149_v34 }
 0x365   : > { %9062 = vmatmul.mubr.msk.f32.gmra.mrb[22].mxu1 %vm269_vm0, %v2859_v29 }
 0x367   : > { %1729 = vmax.xlane.f32.xlu0 %v1728_v8 }
 0x36a   : > { %9445 = vmatpush3.bf16.xpose.msk.msra.mxu1 %vm11036_vm1, %v11149_v34 }
 0x36b   : > { %1735 = vmax.xlane.f32.xlu0 %v1734_v28  ;;  %9448 = vmatprep.subr.msk.bf16.mxu1 %vm11036_vm1, %v11185_v46 }
 0x372   : > { %9451 = vmatpush3.bf16.xpose.msk.msra.mxu1 %vm11036_vm1, %v11185_v46 }
 0x373   : > { %9478 = vmatprep.subr.msk.bf16.mxu1 %vm11036_vm1, %v11071_v11 }
 0x3ad   : > { %v12061_v40 = vpop.xlane.xlu1 %1696  ;;  %v12063_v48 = vpop.xlane.xlu0 %1693 }
 0x3ae   : > { %v1749_v44 = vsub.f32 %v11869_v54, %v12061_v40  ;;  %v1748_v43 = vsub.f32 %v11871_v21, %v12063_v48 }
 0x3b0   : > { %v1782_v58 = vmul.f32 1.442695, %v1749_v44  ;;  %v1780_v1 = vmul.f32 1.442695, %v1748_v43 }
 0x3b1   : > { %v12069_v63 = vpop.xlane.xlu1 %1702  ;;  %v12071_v25 = vpop.xlane.xlu0 %1699 }
 0x3b2   : > { %9748 = vpow2.f32 %v1782_v58  ;;  %v1751_v55 = vsub.f32 %v11877_v13, %v12069_v63  ;;  %v1750_v51 = vsub.f32 %v11879_v60, %v12071_v25 }
 0x3b3   : > { %9750 = vpow2.f32 %v1780_v1 }
 0x3b4   : > { %v1786_v8 = vmul.f32 1.442695, %v1751_v55  ;;  %v1784_v28 = vmul.f32 1.442695, %v1750_v51 }
 0x3b5   : > { %v12077_v54 = vpop.xlane.xlu1 %1708  ;;  %v12079_v19 = vpop.xlane.xlu0 %1705 }
 0x3b6   : > { %9752 = vpow2.f32 %v1786_v8  ;;  %v1753_v21 = vsub.f32 %v11885_v15, %v12077_v54  ;;  %v1752_v27 = vsub.f32 %v11887_v16, %v12079_v19 }
 0x3b7   : > { %9754 = vpow2.f32 %v1784_v28 }
 0x3b8   : > { %v1790_v50 = vmul.f32 1.442695, %v1753_v21  ;;  %v1788_v13 = vmul.f32 1.442695, %v1752_v27 }
 0x3b9   : > { %v12085_v37 = vpop.xlane.xlu1 %1714  ;;  %v12087_v60 = vpop.xlane.xlu0 %1711 }
 0x3ba   : > { %9756 = vpow2.f32 %v1790_v50  ;;  %v1755_v14 = vsub.f32 %v11896_v47, %v12085_v37  ;;  %v1754_v56 = vsub.f32 %v11898_v59, %v12087_v60 }
 0x3bb   : > { %9758 = vpow2.f32 %v1788_v13 }
 0x3bc   : > { %v9749_v42 = vpop.eup %9748  ;;  %v1794_v15 = vmul.f32 1.442695, %v1755_v14  ;;  %v1792_v29 = vmul.f32 1.442695, %v1754_v56 }
 0x3bd   : > { %v9751_v44 = vpop.eup %9750  ;;  %v12093_v16 = vpop.xlane.xlu1 %2215  ;;  %v1839_v58 = vsel %vm559_vm2, %v9749_v42, 0.0 }
 0x3be   : > { %v12095_v43 = vpop.xlane.xlu0 %2218  ;;  %9760 = vpow2.f32 %v1794_v15  ;;  %v2238_v1 = vsub.f32 %v11908_v39, %v12093_v16  ;;  %1840 = vadd.xlane.f32.xlu1 %v1839_v58  ;;  %v1836_v59 = vsel %vm559_vm2, %v9751_v44, 0.0 }
 0x3bf   : > { %v2239_v47 = vsub.f32 %v11906_v32, %v12095_v43  ;;  %9762 = vpow2.f32 %v1792_v29  ;;  %1837 = vadd.xlane.f32.xlu0 %v1836_v59 }
 0x3c0   : > { %v9753_v55 = vpop.eup %9752  ;;  %v2246_v51 = vmul.f32 1.442695, %v2238_v1 }
 0x3c1   : > { %v2248_v8 = vmul.f32 1.442695, %v2239_v47  ;;  %v9755_v28 = vpop.eup %9754  ;;  %v12103_v21 = vpop.xlane.xlu1 %2221  ;;  %v1845_v50 = vsel %vm559_vm2, %v9753_v55, 0.0 }
 0x3c2   : > { %v12105_v27 = vpop.xlane.xlu0 %2224  ;;  %9764 = vpow2.f32 %v2246_v51  ;;  %v2240_v39 = vsub.f32 %v11912_v61, %v12103_v21  ;;  %1846 = vadd.xlane.f32.xlu1 %v1845_v50  ;;  %v1842_v32 = vsel %vm559_vm2, %v9755_v28, 0.0 }
 0x3c3   : > { %1843 = vadd.xlane.f32.xlu0 %v1842_v32  ;;  %9766 = vpow2.f32 %v2248_v8  ;;  %v2241_v56 = vsub.f32 %v11918_v23, %v12105_v27 }
 0x3c4   : > { %v9757_v13 = vpop.eup %9756  ;;  %v2250_v14 = vmul.f32 1.442695, %v2240_v39 }
 0x3c5   : > { %v9759_v42 = vpop.eup %9758  ;;  %v12113_v15 = vpop.xlane.xlu1 %2227  ;;  %v1851_v29 = vsel %vm559_vm2, %v9757_v13, 0.0  ;;  %v2252_v58 = vmul.f32 1.442695, %v2241_v56 }
 0x3c6   : > { %1852 = vadd.xlane.f32.xlu1 %v1851_v29  ;;  %v1848_v44 = vsel %vm559_vm2, %v9759_v42, 0.0  ;;  %9768 = vpow2.f32 %v2250_v14  ;;  %v2242_v1 = vsub.f32 %v11922_v31, %v12113_v15  ;;  %v12119_v59 = vpop.xlane.xlu0 %2230 }
 0x3c7   : > { %1849 = vadd.xlane.f32.xlu0 %v1848_v44  ;;  %9770 = vpow2.f32 %v2252_v58  ;;  %v2243_v28 = vsub.f32 %v11928_v36, %v12119_v59 }
 0x3c8   : > { %v9761_v61 = vpop.eup %9760  ;;  %v2254_v8 = vmul.f32 1.442695, %v2242_v1 }
 0x3c9   : > { %v9763_v47 = vpop.eup %9762  ;;  %v1857_v23 = vsel %vm559_vm2, %v9761_v61, 0.0  ;;  %v12125_v50 = vpop.xlane.xlu1 %2233  ;;  %v2256_v32 = vmul.f32 1.442695, %v2243_v28 }
 0x3ca   : > { %1858 = vadd.xlane.f32.xlu1 %v1857_v23  ;;  %v1854_v55 = vsel %vm559_vm2, %v9763_v47, 0.0  ;;  %9772 = vpow2.f32 %v2254_v8  ;;  %v2244_v13 = vsub.f32 %v11933_v52, %v12125_v50  ;;  %v12130_v14 = vpop.xlane.xlu0 %2236 }
 0x3cb   : > { %1855 = vadd.xlane.f32.xlu0 %v1854_v55  ;;  %9774 = vpow2.f32 %v2256_v32  ;;  %v2245_v36 = vsub.f32 %v11931_v10, %v12130_v14 }
 0x3cc   : > { %v9765_v51 = vpop.eup %9764  ;;  %v2258_v29 = vmul.f32 1.442695, %v2244_v13 }
 0x3cd   : > { %v2262_v39 = vsel %vm559_vm2, %v9765_v51, 0.0  ;;  %v9767_v31 = vpop.eup %9766  ;;  %v2260_v58 = vmul.f32 1.442695, %v2245_v36 }
 0x3ce   : > { %2263 = vadd.xlane.f32.xlu1 %v2262_v39  ;;  %v2265_v56 = vsel %vm559_vm2, %v9767_v31, 0.0  ;;  %9776 = vpow2.f32 %v2258_v29 }
 0x3cf   : > { %9778 = vpow2.f32 %v2260_v58 }
 0x3d0   : > { %v9769_v42 = vpop.eup %9768 }
 0x3d1   : > { %v2268_v44 = vsel %vm559_vm2, %v9769_v42, 0.0  ;;  %v9771_v61 = vpop.eup %9770 }
 0x3d2   : > { %2266 = vadd.xlane.f32.xlu1 %v2265_v56  ;;  %v2271_v55 = vsel %vm559_vm2, %v9771_v61, 0.0 }
 0x3d4   : > { %v9773_v51 = vpop.eup %9772 }
 0x3d5   : > { %v2274_v32 = vsel %vm559_vm2, %v9773_v51, 0.0 }
 0x3d6   : > { %2269 = vadd.xlane.f32.xlu1 %v2268_v44 }
 0x3d8   : > { %v12136_v1 = vpop.xlane.xlu1 %1672  ;;  %v12138_v52 = vpop.xlane.xlu0 %1669 }
 0x3d9   : > { %v1741_v47 = vsub.f32 %v11953_v33, %v12136_v1  ;;  %v1740_v23 = vsub.f32 %v11951_v57, %v12138_v52  ;;  %v9775_v33 = vpop.eup %9774 }
 0x3da   : > { %2272 = vadd.xlane.f32.xlu1 %v2271_v55  ;;  %v2277_v36 = vsel %vm559_vm2, %v9775_v33, 0.0 }
 0x3db   : > { %v1764_v10 = vmul.f32 1.442695, %v1740_v23  ;;  %v1766_v8 = vmul.f32 1.442695, %v1741_v47 }
 0x3dc   : > { %v12145_v28 = vpop.xlane.xlu1 %1684  ;;  %v12147_v39 = vpop.xlane.xlu0 %1675 }
 0x3dd   : > { %v1742_v31 = vsub.f32 %v11959_v3, %v12147_v39  ;;  %9780 = vpow2.f32 %v1764_v10  ;;  %v1745_v13 = vsub.f32 %v11961_v45, %v12145_v28  ;;  %v9777_v3 = vpop.eup %9776 }
 0x3de   : > { %2275 = vadd.xlane.f32.xlu1 %v2274_v32  ;;  %9782 = vpow2.f32 %v1766_v8  ;;  %v2280_v55 = vsel %vm559_vm2, %v9777_v3, 0.0 }
 0x3df   : > { %v1768_v57 = vmul.f32 1.442695, %v1742_v31  ;;  %v1774_v61 = vmul.f32 1.442695, %v1745_v13 }
 0x3e0   : > { %v12154_v56 = vpop.xlane.xlu1 %1690  ;;  %v12156_v42 = vpop.xlane.xlu0 %1678 }
 0x3e1   : > { %v1743_v29 = vsub.f32 %v11972_v5, %v12156_v42  ;;  %9784 = vpow2.f32 %v1768_v57  ;;  %v1747_v58 = vsub.f32 %v11974_v18, %v12154_v56  ;;  %v9779_v5 = vpop.eup %9778 }
 0x3e2   : > { %2278 = vadd.xlane.f32.xlu1 %v2277_v36  ;;  %v2283_v33 = vsel %vm559_vm2, %v9779_v5, 0.0 }
 0x3e3   : > { %v1770_v44 = vmul.f32 1.442695, %v1743_v29  ;;  %v1778_v8 = vmul.f32 1.442695, %v1747_v58 }
 0x3e4   : > { %v12163_v47 = vpop.xlane.xlu0 %1681  ;;  %v12165_v45 = vpop.xlane.xlu1 %1720 }
 0x3e5   : > { %v1744_v23 = vsub.f32 %v11980_v35, %v12163_v47  ;;  %9786 = vpow2.f32 %v1770_v44  ;;  %v1757_v31 = vsub.f32 %v11983_v22, %v12165_v45 }
 0x3e6   : > { %2281 = vadd.xlane.f32.xlu1 %v2280_v55  ;;  %9788 = vpow2.f32 %v1774_v61 }
 0x3e7   : > { %v1772_v51 = vmul.f32 1.442695, %v1744_v23  ;;  %v9781_v10 = vpop.eup %9780  ;;  %v1798_v3 = vmul.f32 1.442695, %v1757_v31 }
 0x3e8   : > { %v12172_v18 = vpop.xlane.xlu0 %1687  ;;  %v12174_v32 = vpop.xlane.xlu1 %1726  ;;  %v1812_v57 = vsel %vm559_vm2, %v9781_v10, 0.0 }
 0x3e9   : > { %9790 = vpow2.f32 %v1772_v51  ;;  %v1746_v35 = vsub.f32 %v11987_v30, %v12172_v18  ;;  %v9783_v13 = vpop.eup %9782  ;;  %1813 = vadd.xlane.f32.xlu0 %v1812_v57  ;;  %v1759_v22 = vsub.f32 %v11991_v38, %v12174_v32 }
 0x3ea   : > { %2284 = vadd.xlane.f32.xlu1 %v2283_v33  ;;  %9792 = vpow2.f32 %v1778_v8  ;;  %v1815_v58 = vsel %vm559_vm2, %v9783_v13, 0.0 }
 0x3eb   : > { %v1776_v29 = vmul.f32 1.442695, %v1746_v35  ;;  %v9785_v36 = vpop.eup %9784  ;;  %v1802_v51 = vmul.f32 1.442695, %v1759_v22 }
 0x3ec   : > { %v12182_v44 = vpop.xlane.xlu0 %1717  ;;  %v12184_v61 = vpop.xlane.xlu1 %1732  ;;  %v1818_v23 = vsel %vm559_vm2, %v9785_v36, 0.0 }
 0x3ed   : > { %9794 = vpow2.f32 %v1776_v29  ;;  %v1756_v30 = vsub.f32 %v11995_v41, %v12182_v44  ;;  %1819 = vadd.xlane.f32.xlu0 %v1818_v23  ;;  %v1761_v38 = vsub.f32 %v11999_v24, %v12184_v61 }
 0x3ee   : > { %1816 = vadd.xlane.f32.xlu1 %v1815_v58  ;;  %9796 = vpow2.f32 %v1798_v3 }
 0x3ef   : > { %v1796_v55 = vmul.f32 1.442695, %v1756_v30  ;;  %v9787_v5 = vpop.eup %9786  ;;  %v1806_v13 = vmul.f32 1.442695, %v1761_v38 }
 0x3f0   : > { %v12192_v10 = vpop.xlane.xlu0 %1723  ;;  %v12194_v8 = vpop.xlane.xlu1 %1738  ;;  %v1821_v31 = vsel %vm559_vm2, %v9787_v5, 0.0 }
 0x3f1   : > { %9798 = vpow2.f32 %v1796_v55  ;;  %v1758_v41 = vsub.f32 %v12003_v62, %v12192_v10  ;;  %v9789_v35 = vpop.eup %9788  ;;  %v1763_v29 = vsub.f32 %v12007_v2, %v12194_v8 }
 0x3f2   : > { %1822 = vadd.xlane.f32.xlu1 %v1821_v31  ;;  %9800 = vpow2.f32 %v1802_v51  ;;  %v1827_v62 = vsel %vm559_vm2, %v9789_v35, 0.0 }
 0x3f3   : > { %v9791_v33 = vpop.eup %9790  ;;  %v1800_v57 = vmul.f32 1.442695, %v1758_v41  ;;  %v1810_v23 = vmul.f32 1.442695, %v1763_v29 }
 0x3f4   : > { %v12201_v24 = vpop.xlane.xlu0 %1729  ;;  %v1824_v36 = vsel %vm559_vm2, %v9791_v33, 0.0  ;;  %v9793_v22 = vpop.eup %9792 }
 0x3f5   : > { %9802 = vpow2.f32 %v1800_v57  ;;  %v1760_v3 = vsub.f32 %v12011_v26, %v12201_v24  ;;  %1825 = vadd.xlane.f32.xlu0 %v1824_v36  ;;  %v1833_v51 = vsel %vm559_vm2, %v9793_v22, 0.0 }
 0x3f6   : > { %1828 = vadd.xlane.f32.xlu1 %v1827_v62  ;;  %9804 = vpow2.f32 %v1806_v13 }
 0x3f7   : > { %v9795_v30 = vpop.eup %9794  ;;  %v1804_v58 = vmul.f32 1.442695, %v1760_v3 }
 0x3f8   : > { %v12207_v55 = vpop.xlane.xlu0 %1735  ;;  %v1830_v2 = vsel %vm559_vm2, %v9795_v30, 0.0  ;;  %v9797_v26 = vpop.eup %9796 }
 0x3f9   : > { %9806 = vpow2.f32 %v1804_v58  ;;  %v1762_v5 = vsub.f32 %v12017_v53, %v12207_v55  ;;  %1831 = vadd.xlane.f32.xlu0 %v1830_v2  ;;  %v1863_v35 = vsel %vm559_vm2, %v9797_v26, 0.0 }
 0x3fa   : > { %1834 = vadd.xlane.f32.xlu1 %v1833_v51  ;;  %9808 = vpow2.f32 %v1810_v23 }
 0x3fb   : > { %v9799_v38 = vpop.eup %9798  ;;  %v1808_v41 = vmul.f32 1.442695, %v1762_v5 }
 0x3fc   : > { %v1860_v31 = vsel %vm559_vm2, %v9799_v38, 0.0  ;;  %v9801_v33 = vpop.eup %9800 }
 0x3fd   : > { %9810 = vpow2.f32 %v1808_v41  ;;  %1861 = vadd.xlane.f32.xlu0 %v1860_v31  ;;  %v1869_v53 = vsel %vm559_vm2, %v9801_v33, 0.0 }
 0x3fe   : > { %1864 = vadd.xlane.f32.xlu1 %v1863_v35 }
 0x3ff   : > { %v9803_v57 = vpop.eup %9802 }
 0x400   : > { %v1866_v13 = vsel %vm559_vm2, %v9803_v57, 0.0  ;;  %v9805_v29 = vpop.eup %9804 }
 0x401   : > { %1867 = vadd.xlane.f32.xlu0 %v1866_v13  ;;  %v1875_v62 = vsel %vm559_vm2, %v9805_v29, 0.0 }
 0x402   : > { %1870 = vadd.xlane.f32.xlu1 %v1869_v53 }
 0x403   : > { %v9807_v36 = vpop.eup %9806 }
 0x404   : > { %v1872_v3 = vsel %vm559_vm2, %v9807_v36, 0.0  ;;  %v9809_v22 = vpop.eup %9808 }
 0x405   : > { %1873 = vadd.xlane.f32.xlu0 %v1872_v3  ;;  %v1881_v23 = vsel %vm559_vm2, %v9809_v22, 0.0 }
 0x406   : > { %1876 = vadd.xlane.f32.xlu1 %v1875_v62 }
 0x407   : > { %v9811_v30 = vpop.eup %9810 }
 0x408   : > { %v1878_v58 = vsel %vm559_vm2, %v9811_v30, 0.0 }
 0x409   : > { %1879 = vadd.xlane.f32.xlu0 %v1878_v58 }
 0x40a   : > { %1882 = vadd.xlane.f32.xlu1 %v1881_v23 }
 0x44b   : > { %v1841_v2 = vpop.xlane.xlu1 %1840 }
 0x44c   : > { %9812 = vlog2.f32 %v1841_v2  ;;  %v1838_v5 = vpop.xlane.xlu0 %1837 }
 0x44d   : > { %9814 = vlog2.f32 %v1838_v5 }
 0x44f   : > { %v1847_v51 = vpop.xlane.xlu1 %1846 }
 0x450   : > { %v1844_v26 = vpop.xlane.xlu0 %1843 }
 0x451   : > { %9816 = vlog2.f32 %v1844_v26 }
 0x452   : > { %9818 = vlog2.f32 %v1847_v51 }
 0x453   : > { %v1853_v38 = vpop.xlane.xlu1 %1852 }
 0x454   : > { %v1850_v31 = vpop.xlane.xlu0 %1849 }
 0x455   : > { %9820 = vlog2.f32 %v1850_v31 }
 0x456   : > { %v9813_v41 = vpop.eup %9812 }
 0x457   : > { %v9815_v35 = vpop.eup %9814  ;;  %v1859_v33 = vpop.xlane.xlu1 %1858  ;;  %v1903_v13 = vmul.f32 0.6931472, %v9813_v41 }
 0x458   : > { %v1901_v57 = vmul.f32 0.6931472, %v9815_v35  ;;  %v1856_v22 = vpop.xlane.xlu0 %1855 }
 0x459   : > { %v1941_v3 = vadd.f32 %v1903_v13, %v12061_v40 }
 0x45a   : > { %v1940_v53 = vadd.f32 %v1901_v57, %v12063_v48 }
 0x45b   : > { %v9817_v29 = vpop.eup %9816  ;;  %v2264_v36 = vpop.xlane.xlu1 %2263 }
 0x45c   : > { %9822 = vlog2.f32 %v2264_v36  ;;  %1988 = vxpose.xlu1.b32.start [1/8] (short) (narrow) %v1940_v53, 8  ;;  %v1905_v62 = vmul.f32 0.6931472, %v9817_v29  ;;  %v9819_v30 = vpop.eup %9818 }
 0x45d   : > { %9824 = vlog2.f32 %v1853_v38  ;;  %v1907_v23 = vmul.f32 0.6931472, %v9819_v30 }
 0x45e   : > { %v1942_v2 = vadd.f32 %v1905_v62, %v12071_v25 }
 0x45f   : > { %v2267_v58 = vpop.xlane.xlu1 %2266  ;;  %v9821_v5 = vpop.eup %9820  ;;  %v1943_v26 = vadd.f32 %v1907_v23, %v12069_v63 }
 0x460   : > { %9826 = vlog2.f32 %v2267_v58  ;;  %1989 = vxpose.xlu1.b32.cont [2/8] (short) (narrow) %v1941_v3, 8  ;;  %v1909_v38 = vmul.f32 0.6931472, %v9821_v5 }
 0x461   : > { %9828 = vlog2.f32 %v1856_v22 }
 0x462   : > { %v1944_v25 = vadd.f32 %v1909_v38, %v12079_v19 }
 0x463   : > { %v2270_v51 = vpop.xlane.xlu1 %2269 }
 0x464   : > { %9830 = vlog2.f32 %v2270_v51  ;;  %1990 = vxpose.xlu1.b32.cont [3/8] (short) (narrow) %v1942_v2, 8 }
 0x465   : > { %9832 = vlog2.f32 %v1859_v33 }
 0x466   : > { %v9823_v48 = vpop.eup %9822 }
 0x467   : > { %v9825_v40 = vpop.eup %9824  ;;  %v2287_v41 = vmul.f32 0.6931472, %v9823_v48  ;;  %v2273_v31 = vpop.xlane.xlu1 %2272 }
 0x468   : > { %9834 = vlog2.f32 %v2273_v31  ;;  %1991 = vxpose.xlu1.b32.cont [4/8] (short) (narrow) %v1943_v26, 8  ;;  %v1911_v13 = vmul.f32 0.6931472, %v9825_v40 }
 0x469   : > { %v2302_v35 = vadd.f32 %v2287_v41, %v12093_v16 }
 0x46a   : > { %v9827_v57 = vpop.eup %9826  ;;  %v1945_v3 = vadd.f32 %v1911_v13, %v12077_v54 }
 0x46b   : > { %v9829_v53 = vpop.eup %9828  ;;  %v2289_v29 = vmul.f32 0.6931472, %v9827_v57  ;;  %v2276_v36 = vpop.xlane.xlu1 %2275  ;;  %2310 = vxpose.xlu0.b32.start [1/8] (short) (narrow) %v2302_v35, 8 }
 0x46c   : > { %9836 = vlog2.f32 %v2276_v36  ;;  %1992 = vxpose.xlu1.b32.cont [5/8] (short) (narrow) %v1944_v25, 8  ;;  %v1913_v62 = vmul.f32 0.6931472, %v9829_v53 }
 0x46d   : > { %v2303_v63 = vadd.f32 %v2289_v29, %v12095_v43 }
 0x46e   : > { %v9831_v33 = vpop.eup %9830  ;;  %v1946_v2 = vadd.f32 %v1913_v62, %v12087_v60 }
 0x46f   : > { %v9833_v22 = vpop.eup %9832  ;;  %v2291_v30 = vmul.f32 0.6931472, %v9831_v33  ;;  %v2279_v58 = vpop.xlane.xlu1 %2278  ;;  %2311 = vxpose.xlu0.b32.cont [2/8] (short) (narrow) %v2303_v63, 8 }
 0x470   : > { %9838 = vlog2.f32 %v2279_v58  ;;  %1993 = vxpose.xlu1.b32.cont [6/8] (short) (narrow) %v1945_v3, 8  ;;  %v1915_v23 = vmul.f32 0.6931472, %v9833_v22 }
 0x471   : > { %v2304_v19 = vadd.f32 %v2291_v30, %v12103_v21 }
 0x472   : > { %v9835_v16 = vpop.eup %9834  ;;  %v1947_v48 = vadd.f32 %v1915_v23, %v12085_v37 }
 0x473   : > { %v2293_v5 = vmul.f32 0.6931472, %v9835_v16  ;;  %v2282_v51 = vpop.xlane.xlu1 %2281  ;;  %2312 = vxpose.xlu0.b32.cont [3/8] (short) (narrow) %v2304_v19, 8 }
 0x474   : > { %9840 = vlog2.f32 %v2282_v51  ;;  %1994 = vxpose.xlu1.b32.cont [7/8] (short) (narrow) %v1946_v2, 8 }
 0x475   : > { %v2305_v54 = vadd.f32 %v2293_v5, %v12105_v27 }
 0x476   : > { %v9837_v43 = vpop.eup %9836  ;;  %v1814_v40 = vpop.xlane.xlu0 %1813 }
 0x477   : > { %v2295_v26 = vmul.f32 0.6931472, %v9837_v43  ;;  %v2285_v38 = vpop.xlane.xlu1 %2284  ;;  %2313 = vxpose.xlu0.b32.cont [4/8] (short) (narrow) %v2305_v54, 8 }
 0x478   : > { %9842 = vlog2.f32 %v2285_v38  ;;  %1995 = vxpose.xlu1.b32.end [8/8] (short) (narrow) %v1947_v48, 8 }
 0x479   : > { %v2306_v21 = vadd.f32 %v2295_v26, %v12113_v15  ;;  %9844 = vlog2.f32 %v1814_v40 }
 0x47a   : > { %v9839_v60 = vpop.eup %9838  ;;  %v1820_v27 = vpop.xlane.xlu0 %1819 }
 0x47b   : > { %v2297_v41 = vmul.f32 0.6931472, %v9839_v60  ;;  %v1817_v31 = vpop.xlane.xlu1 %1816  ;;  %2314 = vxpose.xlu0.b32.cont [5/8] (short) (narrow) %v2306_v21, 8  ;;  %v12243_v60 = vpop.f32.mrb[16].mxu1 }
 0x47c   : > { %9846 = vlog2.f32 %v1817_v31  ;;  %v12245_v31 = vpop.f32.mrb[17].mxu1 }
 0x47d   : > { %v2307_v35 = vadd.f32 %v2297_v41, %v12119_v59  ;;  %9848 = vlog2.f32 %v1820_v27 }
 0x47e   : > { %v9841_v57 = vpop.eup %9840 }
 0x47f   : > { %v2299_v13 = vmul.f32 0.6931472, %v9841_v57  ;;  %2315 = vxpose.xlu0.b32.cont [6/8] (short) (narrow) %v2307_v35, 8  ;;  %v1823_v25 = vpop.xlane.xlu1 %1822 }
 0x480   : > { %9850 = vlog2.f32 %v1823_v25 }
 0x481   : > { %v2308_v37 = vadd.f32 %v2299_v13, %v12125_v50 }
 0x482   : > { %v9843_v53 = vpop.eup %9842  ;;  %v1826_v33 = vpop.xlane.xlu0 %1825 }
 0x483   : > { %v9845_v29 = vpop.eup %9844  ;;  %v2301_v36 = vmul.f32 0.6931472, %v9843_v53  ;;  %2316 = vxpose.xlu0.b32.cont [7/8] (short) (narrow) %v2308_v37, 8  ;;  %9852 = vlog2.f32 %v1826_v33  ;;  %v1829_v62 = vpop.xlane.xlu1 %1828 }
 0x484   : > { %v1885_v63 = vmul.f32 0.6931472, %v9845_v29  ;;  %9854 = vlog2.f32 %v1829_v62 }
 0x485   : > { %v2309_v15 = vadd.f32 %v2301_v36, %v12130_v14 }
 0x486   : > { %v9847_v3 = vpop.eup %9846  ;;  %v1932_v22 = vadd.f32 %v1885_v63, %v12138_v52  ;;  %v1832_v58 = vpop.xlane.xlu0 %1831 }
 0x487   : > { %2317 = vxpose.xlu0.b32.end [8/8] (short) (narrow) %v2309_v15, 8  ;;  %v1887_v59 = vmul.f32 0.6931472, %v9847_v3  ;;  %v9849_v30 = vpop.eup %9848  ;;  %9856 = vlog2.f32 %v1832_v58  ;;  %v1835_v23 = vpop.xlane.xlu1 %1834 }
 0x488   : > { %v1889_v50 = vmul.f32 0.6931472, %v9849_v30  ;;  %9858 = vlog2.f32 %v1835_v23 }
 0x489   : > { %v1933_v19 = vadd.f32 %v1887_v59, %v12136_v1 }
 0x48a   : > { %v9851_v16 = vpop.eup %9850  ;;  %v1934_v2 = vadd.f32 %v1889_v50, %v12147_v39  ;;  %v1862_v54 = vpop.xlane.xlu0 %1861 }
 0x48b   : > { %1956 = vxpose.xlu0.b32.start [1/8] (short) (narrow) %v1932_v22, 8  ;;  %v1891_v14 = vmul.f32 0.6931472, %v9851_v16  ;;  %9860 = vlog2.f32 %v1862_v54  ;;  %v1865_v26 = vpop.xlane.xlu1 %1864 }
 0x48c   : > { %9862 = vlog2.f32 %v1865_v26 }
 0x48d   : > { %v9853_v5 = vpop.eup %9852  ;;  %v1935_v52 = vadd.f32 %v1891_v14, %v12156_v42  ;;  %v12247_v42 = vpop.f32.mrb[18].mxu1 }
 0x48e   : > { %v1893_v51 = vmul.f32 0.6931472, %v9853_v5  ;;  %v9855_v43 = vpop.eup %9854  ;;  %v1868_v21 = vpop.xlane.xlu0 %1867 }
 0x48f   : > { %1957 = vxpose.xlu0.b32.cont [2/8] (short) (narrow) %v1933_v19, 8  ;;  %v1895_v48 = vmul.f32 0.6931472, %v9855_v43  ;;  %9864 = vlog2.f32 %v1868_v21  ;;  %v12249_v35 = vpop.f32.mrb[19].mxu1 }
 0x490   : > { %v1936_v1 = vadd.f32 %v1893_v51, %v12163_v47  ;;  %v1871_v47 = vpop.xlane.xlu1 %1870  ;;  %v12252_v13 = vpop.f32.mrb[20].mxu1 }
 0x491   : > { %v9857_v38 = vpop.eup %9856  ;;  %v1937_v39 = vadd.f32 %v1895_v48, %v12145_v28  ;;  %v12254_v25 = vpop.f32.mrb[21].mxu1  ;;  %9866 = vlog2.f32 %v1871_v47 }
 0x492   : > { %v1897_v40 = vmul.f32 0.6931472, %v9857_v38  ;;  %v9859_v41 = vpop.eup %9858  ;;  %v12256_v28 = vpop.f32.mrb[22].mxu1 }
 0x493   : > { %1958 = vxpose.xlu0.b32.cont [3/8] (short) (narrow) %v1934_v2, 8  ;;  %v1899_v27 = vmul.f32 0.6931472, %v9859_v41  ;;  %v12258_v53 = vpop.f32.mrb[23].mxu1  ;;  %v1874_v36 = vpop.xlane.xlu0 %1873 }
 0x494   : > { %v1938_v57 = vadd.f32 %v1897_v40, %v12172_v18  ;;  %9868 = vlog2.f32 %v1874_v36  ;;  %v1877_v18 = vpop.xlane.xlu1 %1876  ;;  %v12288_v36 = vld [vmem:[%s11420_s14] sm:$0x1] }
 0x495   : > { %v9861_v37 = vpop.eup %9860  ;;  %v1939_v15 = vadd.f32 %v1899_v27, %v12154_v56  ;;  %9870 = vlog2.f32 %v1877_v18  ;;  %v10845_v18 = vld [vmem:[#allocation2] sm:$0xff] }
 0x496   : > { %v1917_v29 = vmul.f32 0.6931472, %v9861_v37  ;;  %v9863_v63 = vpop.eup %9862  ;;  %v12284_v37 = vld [vmem:[%s11403_s11] sm:$0x1] }
 0x497   : > { %1959 = vxpose.xlu0.b32.cont [4/8] (short) (narrow) %v1935_v52, 8  ;;  %v1919_v33 = vmul.f32 0.6931472, %v9863_v63  ;;  %v1880_v22 = vpop.xlane.xlu0 %1879  ;;  %v10844_v63 = vld [vmem:[#allocation2 + $0x8] sm:$0xff] }
 0x498   : > { %v1948_v3 = vadd.f32 %v1917_v29, %v12182_v44  ;;  %9872 = vlog2.f32 %v1880_v22  ;;  %v1883_v19 = vpop.xlane.xlu1 %1882  ;;  %v10846_v22 = vld [vmem:[#allocation2 + $0x10] sm:$0xff] }
 0x499   : > { %v9865_v59 = vpop.eup %9864  ;;  %v1949_v30 = vadd.f32 %v1919_v33, %v12165_v45  ;;  %9874 = vlog2.f32 %v1883_v19  ;;  %v2400_v33 = vmul.f32 0.25, %v10844_v63  ;;  %v2347_v63 = vadd.f32 %v11863_v9, %v11394_v49 }
 0x49a   : > { %v1921_v62 = vmul.f32 0.6931472, %v9865_v59 }
 0x49b   : > { %1960 = vxpose.xlu0.b32.cont [5/8] (short) (narrow) %v1936_v1, 8  ;;  %v9867_v50 = vpop.eup %9866  ;;  %v2351_v1 = vadd.f32 %v11858_v12, %v11394_v49 }
 0x49c   : > { %v1923_v58 = vmul.f32 0.6931472, %v9867_v50  ;;  %v1950_v56 = vadd.f32 %v1921_v62, %v12192_v10  ;;  %v10847_v50 = vld [vmem:[#allocation2 + $0x18] sm:$0xff] }
 0x49e   : > { %v9869_v16 = vpop.eup %9868  ;;  %v1951_v44 = vadd.f32 %v1923_v58, %v12174_v32  ;;  %v2402_v58 = vmul.f32 0.25, %v10847_v50 }
 0x49f   : > { %1961 = vxpose.xlu0.b32.cont [6/8] (short) (narrow) %v1937_v39, 8  ;;  %v1925_v14 = vmul.f32 0.6931472, %v9869_v16  ;;  %v9871_v23 = vpop.eup %9870 }
 0x4a0   : > { %v1927_v2 = vmul.f32 0.6931472, %v9871_v23  ;;  %v10850_v23 = vld [vmem:[#allocation2 + $0x30] sm:$0xff] }
 0x4a1   : > { %v1952_v5 = vadd.f32 %v1925_v14, %v12201_v24  ;;  %v10849_v14 = vld [vmem:[#allocation2 + $0x28] sm:$0xff] }
 0x4a2   : > { %v9873_v51 = vpop.eup %9872  ;;  %v1953_v54 = vadd.f32 %v1927_v2, %v12184_v61  ;;  %v2405_v2 = vmul.f32 0.25, %v10850_v23 }
 0x4a3   : > { %1962 = vxpose.xlu0.b32.cont [7/8] (short) (narrow) %v1938_v57, 8  ;;  %v1929_v45 = vmul.f32 0.6931472, %v9873_v51  ;;  %v9875_v52 = vpop.eup %9874 }
 0x4a4   : > { %v1931_v43 = vmul.f32 0.6931472, %v9875_v52  ;;  %v2387_v52 = vld [vmem:[#allocation2 + $0x60] sm:$0xff] }
 0x4a5   : > { %v1954_v10 = vadd.f32 %v1929_v45, %v12207_v55 }
 0x4a6   : > { %v1955_v48 = vadd.f32 %v1931_v43, %v12194_v8  ;;  %v2359_v8 = vadd.f32 %v11944_v17, %v11428_v6 }
 0x4a7   : > { %1963 = vxpose.xlu0.b32.end [8/8] (short) (narrow) %v1939_v15, 8  ;;  %v2385_v15 = vld [vmem:[#allocation2 + $0x50] sm:$0xff] }
 0x4a8   : > { %v2409_v19 = vmul.f32 0.25, %v2385_v15  ;;  %v2382_v15 = vld [vmem:[#allocation2 + $0x38] sm:$0xff] }
 0x4ab   : > { %2020 = vxpose.xlu0.b32.start [1/8] (short) (narrow) %v1948_v3, 8  ;;  %v2399_v3 = vmul.f32 0.25, %v10845_v18 }
 0x4af   : > { %2021 = vxpose.xlu0.b32.cont [2/8] (short) (narrow) %v1949_v30, 8  ;;  %v2401_v30 = vmul.f32 0.25, %v10846_v22  ;;  %v2406_v22 = vmul.f32 0.25, %v2382_v15 }
 0x4b3   : > { %2022 = vxpose.xlu0.b32.cont [3/8] (short) (narrow) %v1950_v56, 8  ;;  %v10848_v56 = vld [vmem:[#allocation2 + $0x20] sm:$0xff] }
 0x4b4   : > { %v2403_v16 = vmul.f32 0.25, %v10848_v56 }
 0x4b7   : > { %2023 = vxpose.xlu0.b32.cont [4/8] (short) (narrow) %v1951_v44, 8  ;;  %v2404_v44 = vmul.f32 0.25, %v10849_v14 }
 0x4bb   : > { %2024 = vxpose.xlu0.b32.cont [5/8] (short) (narrow) %v1952_v5, 8 }
 0x4bf   : > { %2025 = vxpose.xlu0.b32.cont [6/8] (short) (narrow) %v1953_v54, 8 }
 0x4c3   : > { %2026 = vxpose.xlu0.b32.cont [7/8] (short) (narrow) %v1954_v10, 8 }
 0x4c7   : > { %2027 = vxpose.xlu0.b32.end [8/8] (short) (narrow) %v1955_v48, 8 }
 0x4dc   : > { %v2004_v32 = vpop.trf.xlu1 }
 0x4dd   : > { %2053 = vst.msk [vmem:[#allocation3 + $0x1] sm:$0x1] %vm1268_vm3, %v2004_v32 }
 0x4e4   : > { %v2344_v26 = vld [vmem:[#allocation3 + $0x1] sm:$0x1] }
 0x4e5   : > { %v2352_v24 = vmul.f32 16.0, %v2344_v26 }
 0x4e7   : > { %v2353_v38 = vsub.f32 %v2351_v1, %v2352_v24  ;;  %v2411_v1 = vmul.f32 0.25, %v2387_v52 }
 0x4e9   : > { %v12273_v40 = vmul.f32 0.5, %v2353_v38 }
 0x4eb   : > { %v2326_v61 = vpop.trf.xlu0  ;;  %v2364_v39 = vsub.f32 %v12273_v40, %v11394_v49 }
 0x4ec   : > { %2342 = vst.msk [vmem:[#allocation4] sm:$0x1] %vm1268_vm3, %v2326_v61  ;;  %v2389_v61 = vld [vmem:[#allocation2 + $0x70] sm:$0xff] }
 0x4ed   : > { %v2367_v47 = vmul.f32 0.25, %v2364_v39 }
 0x4ef   : > { %v2370_v29 = vadd.f32 %v12284_v37, %v2367_v47 }
 0x4f1   : > { %v12293_v62 = vrot.slane %v2370_v29, %v11425_v4 }
 0x4f3   : > { %v2346_v55 = vld [vmem:[#allocation4] sm:$0x1]  ;;  %v12314_v24 = vadd.f32 %v12293_v62, %v2409_v19 }
 0x4f4   : > { %v2360_v21 = vmul.f32 16.0, %v2346_v55 }
 0x4f5   : > { %v2495_v38 = vsel %vm559_vm2, %v12314_v24, -inf }
 0x4f6   : > { %v2361_v41 = vsub.f32 %v2359_v8, %v2360_v21  ;;  %v12321_v8 = vadd.f32 %v12293_v62, %v2411_v1  ;;  %v2413_v21 = vmul.f32 0.25, %v2389_v61  ;;  %v2991_v1 = vmul.f32 0.25, %v12249_v35  ;;  %v2386_v61 = vld [vmem:[#allocation2 + $0x58] sm:$0xff] }
 0x4f8   : > { %v12279_v27 = vmul.f32 0.5, %v2361_v41  ;;  %v2501_v41 = vsel %vm559_vm2, %v12321_v8, -inf }
 0x4fa   : > { %v2363_v12 = vsub.f32 %v12279_v27, %v11428_v6 }
 0x4fc   : > { %v2366_v57 = vmul.f32 0.25, %v2363_v12  ;;  %v12329_v12 = vadd.f32 %v12293_v62, %v2413_v21  ;;  %v2996_v21 = vmul.f32 0.25, %v12256_v28 }
 0x4fe   : > { %v2369_v17 = vadd.f32 %v12288_v36, %v2366_v57  ;;  %v2507_v57 = vsel %vm559_vm2, %v12329_v12, -inf }
 0x500   : > { %v2429_v59 = vrot.slane %v2369_v17, %v11425_v4 }
 0x502   : > { %v12295_v5 = vadd.f32 %v2429_v59, %v2400_v33  ;;  %v12297_v51 = vadd.f32 %v2429_v59, %v2399_v3  ;;  %v12299_v45 = vadd.f32 %v2429_v59, %v2401_v30  ;;  %v12301_v54 = vadd.f32 %v2429_v59, %v2402_v58  ;;  %v2383_v30 = vld [vmem:[#allocation2 + $0x40] sm:$0xff] }
 0x503   : > { %v12303_v43 = vadd.f32 %v2429_v59, %v2403_v16  ;;  %v12305_v10 = vadd.f32 %v2429_v59, %v2404_v44  ;;  %v12307_v48 = vadd.f32 %v2429_v59, %v2405_v2  ;;  %v12343_v19 = vadd.f32 %v2429_v59, %v2406_v22  ;;  %v2384_v16 = vld [vmem:[#allocation2 + $0x48] sm:$0xff] }
 0x504   : > { %v2468_v32 = vsel %vm559_vm2, %v12295_v5, -inf  ;;  %v2465_v26 = vsel %vm559_vm2, %v12297_v51, -inf  ;;  %v2471_v55 = vsel %vm559_vm2, %v12299_v45, -inf  ;;  %v2474_v47 = vsel %vm559_vm2, %v12301_v54, -inf }
 0x505   : > { %2469 = vmax.xlane.f32.xlu0 %v2468_v32  ;;  %2466 = vmax.xlane.f32.xlu1 %v2465_v26  ;;  %v2477_v29 = vsel %vm559_vm2, %v12303_v43, -inf  ;;  %v2480_v33 = vsel %vm559_vm2, %v12305_v10, -inf  ;;  %v2483_v58 = vsel %vm559_vm2, %v12307_v48, -inf  ;;  %v2407_v9 = vmul.f32 0.25, %v2383_v30 }
 0x506   : > { %v2486_v44 = vsel %vm559_vm2, %v12343_v19, -inf  ;;  %v2990_v2 = vmul.f32 0.25, %v12243_v60  ;;  %v2408_v52 = vmul.f32 0.25, %v2384_v16  ;;  %v2989_v32 = vmul.f32 0.25, %v12245_v31 }
 0x507   : > { %v12350_v23 = vadd.f32 %v12293_v62, %v2407_v9  ;;  %v2992_v26 = vmul.f32 0.25, %v12247_v42  ;;  %v2410_v42 = vmul.f32 0.25, %v2386_v61 }
 0x508   : > { %v12365_v31 = vadd.f32 %v12293_v62, %v2408_v52 }
 0x509   : > { %2496 = vmax.xlane.f32.xlu0 %v2495_v38  ;;  %2472 = vmax.xlane.f32.xlu1 %v2471_v55  ;;  %v2994_v38 = vmul.f32 0.25, %v12252_v13  ;;  %v2993_v55 = vmul.f32 0.25, %v12254_v25 }
 0x50b   : > { %v1972_v39 = vpop.trf.xlu0 }
 0x50c   : > { %2052 = vst.msk [vmem:[#allocation3] sm:$0x1] %vm1268_vm3, %v1972_v39  ;;  %v2995_v39 = vmul.f32 0.25, %v12258_v53 }
 0x50d   : > { %2502 = vmax.xlane.f32.xlu0 %v2501_v41  ;;  %2475 = vmax.xlane.f32.xlu1 %v2474_v47 }
 0x511   : > { %2508 = vmax.xlane.f32.xlu0 %v2507_v57  ;;  %2478 = vmax.xlane.f32.xlu1 %v2477_v29  ;;  %v2388_v29 = vld [vmem:[#allocation2 + $0x68] sm:$0xff] }
 0x513   : > { %v2343_v17 = vld [vmem:[#allocation3] sm:$0x1] }
 0x514   : > { %v2348_v18 = vmul.f32 16.0, %v2343_v17  ;;  %v2492_v17 = vsel %vm559_vm2, %v12365_v31, -inf }
 0x515   : > { %2481 = vmax.xlane.f32.xlu1 %v2480_v33  ;;  %v2412_v33 = vmul.f32 0.25, %v2388_v29 }
 0x516   : > { %v2349_v3 = vsub.f32 %v2347_v63, %v2348_v18  ;;  %v12388_v63 = vadd.f32 %v12293_v62, %v2410_v42  ;;  %v2390_v18 = vld [vmem:[#allocation2 + $0x78] sm:$0xff]  ;;  %v2393_v42 = vld [vmem:[#allocation2 + $0x90] sm:$0xff] }
 0x517   : > { %v12395_v30 = vadd.f32 %v12293_v62, %v2412_v33 }
 0x518   : > { %v12339_v50 = vmul.f32 0.5, %v2349_v3  ;;  %v2498_v3 = vsel %vm559_vm2, %v12388_v63, -inf }
 0x519   : > { %2484 = vmax.xlane.f32.xlu1 %v2483_v58  ;;  %v2414_v58 = vmul.f32 0.25, %v2390_v18  ;;  %v2504_v9 = vsel %vm559_vm2, %v12395_v30, -inf }
 0x51a   : > { %v2372_v56 = vsub.f32 %v12339_v50, %v11394_v49 }
 0x51c   : > { %v2373_v14 = vmul.f32 0.25, %v2372_v56 }
 0x51d   : > { %2487 = vmax.xlane.f32.xlu1 %v2486_v44 }
 0x51e   : > { %v2374_v59 = vadd.f32 %v12284_v37, %v2373_v14  ;;  %v2489_v37 = vsel %vm559_vm2, %v12350_v23, -inf  ;;  %v12403_v14 = vadd.f32 %v12293_v62, %v2414_v58  ;;  %v2417_v58 = vmul.f32 0.25, %v2393_v42 }
 0x520   : > { %v3001_v60 = vrot.slane %v2374_v59, %v11425_v4  ;;  %v2510_v44 = vsel %vm559_vm2, %v12403_v14, -inf  ;;  %v2355_v59 = vadd.f32 %v11964_v7, %v11428_v6  ;;  %v2392_v7 = vld [vmem:[#allocation2 + $0x88] sm:$0xff] }
 0x521   : > { %2490 = vmax.xlane.f32.xlu1 %v2489_v37  ;;  %v2394_v37 = vld [vmem:[#allocation2 + $0x98] sm:$0xff] }
 0x522   : > { %v12367_v35 = vadd.f32 %v3001_v60, %v2990_v2  ;;  %v12369_v41 = vadd.f32 %v3001_v60, %v2989_v32  ;;  %v12371_v13 = vadd.f32 %v3001_v60, %v2992_v26  ;;  %v12373_v25 = vadd.f32 %v3001_v60, %v2991_v1 }
 0x523   : > { %v12375_v28 = vadd.f32 %v3001_v60, %v2994_v38  ;;  %v12377_v53 = vadd.f32 %v3001_v60, %v2993_v55  ;;  %v12379_v47 = vadd.f32 %v3001_v60, %v2996_v21  ;;  %v12381_v57 = vadd.f32 %v3001_v60, %v2995_v39  ;;  %v2391_v39 = vld [vmem:[#allocation2 + $0x80] sm:$0xff] }
 0x524   : > { %v3011_v15 = vsel %vm559_vm2, %v12369_v41, -inf  ;;  %v3017_v22 = vsel %vm559_vm2, %v12373_v25, -inf  ;;  %v3014_v32 = vsel %vm559_vm2, %v12367_v35, -inf  ;;  %v3020_v1 = vsel %vm559_vm2, %v12371_v13, -inf }
 0x525   : > { %2493 = vmax.xlane.f32.xlu1 %v2492_v17  ;;  %3012 = vmax.xlane.f32.xlu0 %v3011_v15  ;;  %v3023_v16 = vsel %vm559_vm2, %v12377_v53, -inf  ;;  %v3029_v2 = vsel %vm559_vm2, %v12381_v57, -inf  ;;  %v3026_v55 = vsel %vm559_vm2, %v12375_v28, -inf  ;;  %v3032_v29 = vsel %vm559_vm2, %v12379_v47, -inf }
 0x526   : > { %v2416_v17 = vmul.f32 0.25, %v2392_v7  ;;  %v2415_v33 = vmul.f32 0.25, %v2391_v39 }
 0x529   : > { %2499 = vmax.xlane.f32.xlu1 %v2498_v3  ;;  %3018 = vmax.xlane.f32.xlu0 %v3017_v22  ;;  %v2418_v22 = vmul.f32 0.25, %v2394_v37 }
 0x52b   : > { %v2036_v56 = vpop.trf.xlu0 }
 0x52c   : > { %2054 = vst.msk [vmem:[#allocation3 + $0x2] sm:$0x1] %vm1268_vm3, %v2036_v56  ;;  %v2396_v56 = vld [vmem:[#allocation2 + $0xa8] sm:$0xff] }
 0x52d   : > { %2505 = vmax.xlane.f32.xlu1 %v2504_v9  ;;  %3024 = vmax.xlane.f32.xlu0 %v3023_v16  ;;  %v2395_v9 = vld [vmem:[#allocation2 + $0xa0] sm:$0xff] }
 0x531   : > { %2511 = vmax.xlane.f32.xlu1 %v2510_v44  ;;  %3030 = vmax.xlane.f32.xlu0 %v3029_v2 }
 0x533   : > { %v2345_v52 = vld [vmem:[#allocation3 + $0x2] sm:$0x1] }
 0x534   : > { %v2356_v26 = vmul.f32 16.0, %v2345_v52  ;;  %v2420_v52 = vmul.f32 0.25, %v2396_v56  ;;  %v3625_v56 = vld [vmem:[%s11032_s5 + $0x20] sm:$0xff] }
 0x535   : > { %3015 = vmax.xlane.f32.xlu1 %v3014_v32  ;;  %v2398_v32 = vld [vmem:[#allocation2 + $0xb8] sm:$0xff] }
 0x536   : > { %v2357_v62 = vsub.f32 %v2355_v59, %v2356_v26  ;;  %v2419_v59 = vmul.f32 0.25, %v2395_v9  ;;  %v2397_v26 = vld [vmem:[#allocation2 + $0xb0] sm:$0xff]  ;;  %v3626_v9 = vld [vmem:[%s11032_s5 + $0x28] sm:$0xff] }
 0x537   : > { %v2421_v7 = vmul.f32 0.25, %v2397_v26 }
 0x538   : > { %v12415_v61 = vmul.f32 0.5, %v2357_v62 }
 0x539   : > { %3021 = vmax.xlane.f32.xlu1 %v3020_v1 }
 0x53a   : > { %v2365_v38 = vsub.f32 %v12415_v61, %v11428_v6 }
 0x53c   : > { %v2368_v21 = vmul.f32 0.25, %v2365_v38 }
 0x53d   : > { %3027 = vmax.xlane.f32.xlu1 %v3026_v55 }
 0x53e   : > { %v2371_v60 = vadd.f32 %v12288_v36, %v2368_v21  ;;  %v2422_v21 = vmul.f32 0.25, %v2398_v32 }
 0x540   : > { %v2437_v15 = vrot.slane %v2371_v60, %v11425_v4 }
 0x541   : > { %3033 = vmax.xlane.f32.xlu1 %v3032_v29 }
 0x542   : > { %v12425_v18 = vadd.f32 %v2437_v15, %v2416_v17  ;;  %v12427_v3 = vadd.f32 %v2437_v15, %v2415_v33  ;;  %v12433_v44 = vadd.f32 %v2437_v15, %v2418_v22  ;;  %v12435_v2 = vadd.f32 %v2437_v15, %v2417_v58  ;;  %v3621_v33 = vld [vmem:[%s11032_s5] sm:$0xff]  ;;  %v3622_v22 = vld [vmem:[%s11032_s5 + $0x8] sm:$0xff]  ;;  %v3623_v58 = vld [vmem:[%s11032_s5 + $0x10] sm:$0xff] }
 0x543   : > { %v12441_v38 = vadd.f32 %v2437_v15, %v2420_v52  ;;  %v12443_v55 = vadd.f32 %v2437_v15, %v2419_v59  ;;  %v12449_v37 = vadd.f32 %v2437_v15, %v2422_v21  ;;  %v12451_v42 = vadd.f32 %v2437_v15, %v2421_v7  ;;  %9080 = vmatprep.mubr.msk.f32.mxu0 %vm269_vm0, %v3621_v33  ;;  %v3624_v15 = vld [vmem:[%s11032_s5 + $0x18] sm:$0xff] }
 0x544   : > { %v2516_v36 = vsel %vm559_vm2, %v12425_v18, -inf  ;;  %v2513_v16 = vsel %vm559_vm2, %v12427_v3, -inf  ;;  %v2522_v62 = vsel %vm559_vm2, %v12433_v44, -inf  ;;  %v2519_v1 = vsel %vm559_vm2, %v12435_v2, -inf  ;;  %9081 = vmatmul.mubr.msk.f32.vlgmr.msra.gmra.mrb[24].mxu0 %vm269_vm0, %v3622_v22 }
 0x545   : > { %2517 = vmax.xlane.f32.xlu1 %v2516_v36  ;;  %2514 = vmax.xlane.f32.xlu0 %v2513_v16  ;;  %v2528_v39 = vsel %vm559_vm2, %v12441_v38, -inf  ;;  %v2525_v60 = vsel %vm559_vm2, %v12443_v55, -inf  ;;  %v2534_v29 = vsel %vm559_vm2, %v12449_v37, -inf  ;;  %v2531_v17 = vsel %vm559_vm2, %v12451_v42, -inf  ;;  %v3627_v36 = vld [vmem:[%s11032_s5 + $0x30] sm:$0xff]  ;;  %v3628_v16 = vld [vmem:[%s11032_s5 + $0x38] sm:$0xff] }
 0x546   : > { %9083 = vmatprep.mubr.msk.f32.mxu0 %vm269_vm0, %v3623_v58  ;;  %9457 = vmatpush3.bf16.xpose.msk.msra.mxu0 %vm11036_vm1, %v11071_v11 }
 0x547   : > { %9460 = vmatprep.subr.msk.bf16.mxu0 %vm11036_vm1, %v11102_v20 }
 0x548   : > { %9084 = vmatmul.mubr.msk.f32.gmra.mrb[26].mxu0 %vm269_vm0, %v3624_v15 }
 0x549   : > { %2523 = vmax.xlane.f32.xlu1 %v2522_v62  ;;  %2520 = vmax.xlane.f32.xlu0 %v2519_v1 }
 0x54a   : > { %9086 = vmatprep.mubr.msk.f32.mxu0 %vm269_vm0, %v3625_v56 }
 0x54c   : > { %9087 = vmatmul.mubr.msk.f32.gmra.mrb[28].mxu0 %vm269_vm0, %v3626_v9 }
 0x54d   : > { %2529 = vmax.xlane.f32.xlu1 %v2528_v39  ;;  %2526 = vmax.xlane.f32.xlu0 %v2525_v60 }
 0x54e   : > { %9089 = vmatprep.mubr.msk.f32.mxu0 %vm269_vm0, %v3627_v36  ;;  %9463 = vmatpush3.bf16.xpose.msk.msra.mxu0 %vm11036_vm1, %v11102_v20 }
 0x54f   : > { %9466 = vmatprep.subr.msk.bf16.mxu0 %vm11036_vm1, %v11149_v34 }
 0x550   : > { %9090 = vmatmul.mubr.msk.f32.gmra.mrb[30].mxu0 %vm269_vm0, %v3628_v16 }
 0x551   : > { %2535 = vmax.xlane.f32.xlu1 %v2534_v29  ;;  %2532 = vmax.xlane.f32.xlu0 %v2531_v17 }
 0x556   : > { %9469 = vmatpush3.bf16.xpose.msk.msra.mxu0 %vm11036_vm1, %v11149_v34 }
 0x557   : > { %9472 = vmatprep.subr.msk.bf16.mxu0 %vm11036_vm1, %v11185_v46 }
 0x55e   : > { %9475 = vmatpush3.bf16.xpose.msk.msra.mxu0 %vm11036_vm1, %v11185_v46 }
 0x55f   : > { %9502 = vmatprep.subr.msk.bf16.mxu0 %vm11036_vm1, %v11071_v11 }
 0x592   : > { %v12497_v52 = vpop.xlane.xlu1 %2466  ;;  %v12499_v59 = vpop.xlane.xlu0 %2469 }
 0x593   : > { %v2537_v32 = vsub.f32 %v12297_v51, %v12497_v52  ;;  %v2538_v26 = vsub.f32 %v12295_v5, %v12499_v59 }
 0x595   : > { %v2561_v62 = vmul.f32 1.442695, %v2537_v32  ;;  %v2563_v1 = vmul.f32 1.442695, %v2538_v26 }
 0x596   : > { %v12505_v21 = vpop.xlane.xlu1 %2472  ;;  %v12517_v15 = vpop.xlane.xlu0 %2496 }
 0x597   : > { %9876 = vpow2.f32 %v2561_v62  ;;  %v2539_v7 = vsub.f32 %v12299_v45, %v12505_v21 }
 0x598   : > { %9878 = vpow2.f32 %v2563_v1 }
 0x599   : > { %v2565_v39 = vmul.f32 1.442695, %v2539_v7 }
 0x59a   : > { %v12509_v60 = vpop.xlane.xlu1 %2475  ;;  %v12530_v62 = vpop.xlane.xlu0 %2502 }
 0x59b   : > { %9880 = vpow2.f32 %v2565_v39  ;;  %v2540_v29 = vsub.f32 %v12301_v54, %v12509_v60 }
 0x59d   : > { %v2567_v51 = vmul.f32 1.442695, %v2540_v29 }
 0x59e   : > { %v12513_v17 = vpop.xlane.xlu1 %2478 }
 0x59f   : > { %9882 = vpow2.f32 %v2567_v51  ;;  %v2541_v5 = vsub.f32 %v12303_v43, %v12513_v17 }
 0x5a1   : > { %v9877_v33 = vpop.eup %9876  ;;  %v2569_v22 = vmul.f32 1.442695, %v2541_v5  ;;  %v2547_v5 = vsub.f32 %v12314_v24, %v12517_v15 }
 0x5a2   : > { %v9879_v58 = vpop.eup %9878  ;;  %v12519_v45 = vpop.xlane.xlu1 %2481  ;;  %v2609_v56 = vsel %vm559_vm2, %v9877_v33, 0.0 }
 0x5a3   : > { %9884 = vpow2.f32 %v2569_v22  ;;  %v2542_v54 = vsub.f32 %v12305_v10, %v12519_v45  ;;  %2610 = vadd.xlane.f32.xlu0 %v2609_v56  ;;  %v2612_v9 = vsel %vm559_vm2, %v9879_v58, 0.0 }
 0x5a4   : > { %2613 = vadd.xlane.f32.xlu1 %v2612_v9  ;;  %v2581_v9 = vmul.f32 1.442695, %v2547_v5 }
 0x5a5   : > { %v9881_v36 = vpop.eup %9880  ;;  %v2571_v16 = vmul.f32 1.442695, %v2542_v54 }
 0x5a6   : > { %v12525_v43 = vpop.xlane.xlu1 %2484  ;;  %v2615_v32 = vsel %vm559_vm2, %v9881_v36, 0.0 }
 0x5a7   : > { %9886 = vpow2.f32 %v2571_v16  ;;  %v2543_v26 = vsub.f32 %v12307_v48, %v12525_v43  ;;  %2616 = vadd.xlane.f32.xlu0 %v2615_v32  ;;  %v12539_v48 = vpop.xlane.xlu0 %2508 }
 0x5a9   : > { %v9883_v1 = vpop.eup %9882  ;;  %v2573_v7 = vmul.f32 1.442695, %v2543_v26 }
 0x5aa   : > { %v12532_v10 = vpop.xlane.xlu1 %2487  ;;  %v2618_v39 = vsel %vm559_vm2, %v9883_v1, 0.0 }
 0x5ab   : > { %9888 = vpow2.f32 %v2573_v7  ;;  %v2544_v29 = vsub.f32 %v12343_v19, %v12532_v10  ;;  %2619 = vadd.xlane.f32.xlu1 %v2618_v39  ;;  %v2549_v19 = vsub.f32 %v12321_v8, %v12530_v62  ;;  %v2551_v7 = vsub.f32 %v12329_v12, %v12539_v48 }
 0x5ad   : > { %v9885_v51 = vpop.eup %9884  ;;  %v2575_v33 = vmul.f32 1.442695, %v2544_v29 }
 0x5ae   : > { %v12541_v22 = vpop.xlane.xlu1 %2490  ;;  %v2621_v58 = vsel %vm559_vm2, %v9885_v51, 0.0 }
 0x5af   : > { %9890 = vpow2.f32 %v2575_v33  ;;  %v2545_v56 = vsub.f32 %v12350_v23, %v12541_v22  ;;  %2622 = vadd.xlane.f32.xlu0 %v2621_v58  ;;  %v2585_v23 = vmul.f32 1.442695, %v2549_v19  ;;  %v2589_v33 = vmul.f32 1.442695, %v2551_v7 }
 0x5b1   : > { %v9887_v54 = vpop.eup %9886  ;;  %v2577_v36 = vmul.f32 1.442695, %v2545_v56 }
 0x5b2   : > { %v12548_v16 = vpop.xlane.xlu1 %2493  ;;  %v12550_v24 = vpop.xlane.xlu0 %3012  ;;  %v2624_v32 = vsel %vm559_vm2, %v9887_v54, 0.0 }
 0x5b3   : > { %9892 = vpow2.f32 %v2577_v36  ;;  %v2546_v26 = vsub.f32 %v12365_v31, %v12548_v16  ;;  %2625 = vadd.xlane.f32.xlu1 %v2624_v32  ;;  %v3035_v58 = vsub.f32 %v12369_v41, %v12550_v24 }
 0x5b4   : > { %9894 = vpow2.f32 %v2581_v9 }
 0x5b5   : > { %v9889_v1 = vpop.eup %9888  ;;  %v2579_v39 = vmul.f32 1.442695, %v2546_v26  ;;  %v3043_v36 = vmul.f32 1.442695, %v3035_v58 }
 0x5b6   : > { %v12557_v8 = vpop.xlane.xlu1 %2499  ;;  %v12559_v29 = vpop.xlane.xlu0 %3018  ;;  %v2627_v51 = vsel %vm559_vm2, %v9889_v1, 0.0 }
 0x5b7   : > { %9896 = vpow2.f32 %v2579_v39  ;;  %v2548_v5 = vsub.f32 %v12388_v63, %v12557_v8  ;;  %2628 = vadd.xlane.f32.xlu0 %v2627_v51  ;;  %v3037_v32 = vsub.f32 %v12373_v25, %v12559_v29 }
 0x5b8   : > { %9898 = vpow2.f32 %v2585_v23 }
 0x5b9   : > { %v9891_v31 = vpop.eup %9890  ;;  %v2583_v56 = vmul.f32 1.442695, %v2548_v5  ;;  %v3047_v39 = vmul.f32 1.442695, %v3037_v32 }
 0x5ba   : > { %v12566_v12 = vpop.xlane.xlu1 %2505  ;;  %v2630_v54 = vsel %vm559_vm2, %v9891_v31, 0.0  ;;  %v12571_v19 = vpop.xlane.xlu0 %3024 }
 0x5bb   : > { %9900 = vpow2.f32 %v2583_v56  ;;  %v2550_v9 = vsub.f32 %v12395_v30, %v12566_v12  ;;  %2631 = vadd.xlane.f32.xlu1 %v2630_v54  ;;  %v3039_v51 = vsub.f32 %v12377_v53, %v12571_v19 }
 0x5bc   : > { %9902 = vpow2.f32 %v2589_v33 }
 0x5bd   : > { %v9893_v63 = vpop.eup %9892  ;;  %v2587_v26 = vmul.f32 1.442695, %v2550_v9  ;;  %v3051_v9 = vmul.f32 1.442695, %v3039_v51 }
 0x5be   : > { %v12575_v41 = vpop.xlane.xlu1 %2511  ;;  %v2633_v1 = vsel %vm559_vm2, %v9893_v63, 0.0  ;;  %v9895_v23 = vpop.eup %9894 }
 0x5bf   : > { %9904 = vpow2.f32 %v2587_v26  ;;  %v2552_v7 = vsub.f32 %v12403_v14, %v12575_v41  ;;  %2634 = vadd.xlane.f32.xlu0 %v2633_v1  ;;  %v12582_v31 = vpop.xlane.xlu0 %3030  ;;  %v2639_v58 = vsel %vm559_vm2, %v9895_v23, 0.0 }
 0x5c0   : > { %9906 = vpow2.f32 %v3043_v36  ;;  %v3041_v53 = vsub.f32 %v12381_v57, %v12582_v31 }
 0x5c1   : > { %v9897_v30 = vpop.eup %9896  ;;  %v2591_v5 = vmul.f32 1.442695, %v2552_v7 }
 0x5c2   : > { %v12584_v25 = vpop.xlane.xlu1 %3015  ;;  %v2636_v33 = vsel %vm559_vm2, %v9897_v30, 0.0  ;;  %v9899_v56 = vpop.eup %9898  ;;  %v3055_v7 = vmul.f32 1.442695, %v3041_v53 }
 0x5c3   : > { %9908 = vpow2.f32 %v2591_v5  ;;  %v3036_v14 = vsub.f32 %v12367_v35, %v12584_v25  ;;  %2637 = vadd.xlane.f32.xlu1 %v2636_v33  ;;  %2640 = vadd.xlane.f32.xlu0 %v2639_v58  ;;  %v2645_v26 = vsel %vm559_vm2, %v9899_v56, 0.0 }
 0x5c4   : > { %9910 = vpow2.f32 %v3047_v39 }
 0x5c5   : > { %v9901_v54 = vpop.eup %9900  ;;  %v3045_v63 = vmul.f32 1.442695, %v3036_v14 }
 0x5c6   : > { %v12592_v36 = vpop.xlane.xlu1 %3021  ;;  %v2642_v32 = vsel %vm559_vm2, %v9901_v54, 0.0  ;;  %v9903_v1 = vpop.eup %9902 }
 0x5c7   : > { %9912 = vpow2.f32 %v3045_v63  ;;  %v3038_v35 = vsub.f32 %v12371_v13, %v12592_v36  ;;  %2643 = vadd.xlane.f32.xlu1 %v2642_v32  ;;  %2646 = vadd.xlane.f32.xlu0 %v2645_v26  ;;  %v2651_v51 = vsel %vm559_vm2, %v9903_v1, 0.0 }
 0x5c8   : > { %9914 = vpow2.f32 %v3051_v9 }
 0x5c9   : > { %v9905_v23 = vpop.eup %9904  ;;  %v3049_v30 = vmul.f32 1.442695, %v3038_v35 }
 0x5ca   : > { %v12598_v39 = vpop.xlane.xlu1 %3027  ;;  %v2648_v57 = vsel %vm559_vm2, %v9905_v23, 0.0  ;;  %v9907_v5 = vpop.eup %9906 }
 0x5cb   : > { %9916 = vpow2.f32 %v3049_v30  ;;  %v3040_v33 = vsub.f32 %v12375_v28, %v12598_v39  ;;  %2649 = vadd.xlane.f32.xlu1 %v2648_v57  ;;  %2652 = vadd.xlane.f32.xlu0 %v2651_v51  ;;  %v3059_v54 = vsel %vm559_vm2, %v9907_v5, 0.0 }
 0x5cc   : > { %9918 = vpow2.f32 %v3055_v7 }
 0x5cd   : > { %v9909_v13 = vpop.eup %9908  ;;  %v3053_v58 = vmul.f32 1.442695, %v3040_v33 }
 0x5ce   : > { %v12604_v56 = vpop.xlane.xlu1 %3033  ;;  %v2654_v14 = vsel %vm559_vm2, %v9909_v13, 0.0  ;;  %v9911_v9 = vpop.eup %9910 }
 0x5cf   : > { %9920 = vpow2.f32 %v3053_v58  ;;  %v3042_v53 = vsub.f32 %v12379_v47, %v12604_v56  ;;  %2655 = vadd.xlane.f32.xlu1 %v2654_v14  ;;  %3060 = vadd.xlane.f32.xlu0 %v3059_v54  ;;  %v3065_v35 = vsel %vm559_vm2, %v9911_v9, 0.0 }
 0x5d1   : > { %v9913_v63 = vpop.eup %9912  ;;  %v3057_v28 = vmul.f32 1.442695, %v3042_v53 }
 0x5d2   : > { %v12610_v32 = vpop.xlane.xlu1 %2517  ;;  %v12612_v26 = vpop.xlane.xlu0 %2514  ;;  %v3062_v1 = vsel %vm559_vm2, %v9913_v63, 0.0 }
 0x5d3   : > { %v9915_v23 = vpop.eup %9914  ;;  %9922 = vpow2.f32 %v3057_v28  ;;  %v2554_v7 = vsub.f32 %v12425_v18, %v12610_v32  ;;  %v2553_v47 = vsub.f32 %v12427_v3, %v12612_v26  ;;  %3063 = vadd.xlane.f32.xlu1 %v3062_v1  ;;  %3066 = vadd.xlane.f32.xlu0 %v3065_v35 }
 0x5d4   : > { %v3071_v58 = vsel %vm559_vm2, %v9915_v23, 0.0 }
 0x5d5   : > { %v9917_v30 = vpop.eup %9916  ;;  %v2595_v57 = vmul.f32 1.442695, %v2554_v7  ;;  %v2593_v51 = vmul.f32 1.442695, %v2553_v47 }
 0x5d6   : > { %v12620_v5 = vpop.xlane.xlu1 %2523  ;;  %v12622_v33 = vpop.xlane.xlu0 %2520  ;;  %v3068_v13 = vsel %vm559_vm2, %v9917_v30, 0.0 }
 0x5d7   : > { %v9919_v14 = vpop.eup %9918  ;;  %9924 = vpow2.f32 %v2595_v57  ;;  %v2556_v18 = vsub.f32 %v12433_v44, %v12620_v5  ;;  %v2555_v3 = vsub.f32 %v12435_v2, %v12622_v33  ;;  %3069 = vadd.xlane.f32.xlu1 %v3068_v13  ;;  %3072 = vadd.xlane.f32.xlu0 %v3071_v58 }
 0x5d8   : > { %9926 = vpow2.f32 %v2593_v51  ;;  %v3077_v35 = vsel %vm559_vm2, %v9919_v14, 0.0 }
 0x5d9   : > { %v9921_v54 = vpop.eup %9920  ;;  %v2599_v9 = vmul.f32 1.442695, %v2556_v18  ;;  %v2597_v53 = vmul.f32 1.442695, %v2555_v3 }
 0x5da   : > { %v12630_v63 = vpop.xlane.xlu1 %2529  ;;  %v12632_v28 = vpop.xlane.xlu0 %2526  ;;  %v3074_v1 = vsel %vm559_vm2, %v9921_v54, 0.0 }
 0x5db   : > { %9928 = vpow2.f32 %v2599_v9  ;;  %v2558_v44 = vsub.f32 %v12441_v38, %v12630_v63  ;;  %v2557_v2 = vsub.f32 %v12443_v55, %v12632_v28  ;;  %3075 = vadd.xlane.f32.xlu1 %v3074_v1  ;;  %3078 = vadd.xlane.f32.xlu0 %v3077_v35 }
 0x5dc   : > { %9930 = vpow2.f32 %v2597_v53 }
 0x5dd   : > { %v9923_v23 = vpop.eup %9922  ;;  %v2603_v7 = vmul.f32 1.442695, %v2558_v44  ;;  %v2601_v47 = vmul.f32 1.442695, %v2557_v2 }
 0x5de   : > { %v12640_v30 = vpop.xlane.xlu1 %2535  ;;  %v12642_v57 = vpop.xlane.xlu0 %2532  ;;  %v3080_v51 = vsel %vm559_vm2, %v9923_v23, 0.0 }
 0x5df   : > { %9932 = vpow2.f32 %v2603_v7  ;;  %v2560_v13 = vsub.f32 %v12449_v37, %v12640_v30  ;;  %v2559_v38 = vsub.f32 %v12451_v42, %v12642_v57  ;;  %3081 = vadd.xlane.f32.xlu1 %v3080_v51 }
 0x5e0   : > { %9934 = vpow2.f32 %v2601_v47 }
 0x5e1   : > { %v9925_v55 = vpop.eup %9924  ;;  %v2607_v58 = vmul.f32 1.442695, %v2560_v13  ;;  %v2605_v14 = vmul.f32 1.442695, %v2559_v38 }
 0x5e2   : > { %v9927_v18 = vpop.eup %9926  ;;  %v2660_v3 = vsel %vm559_vm2, %v9925_v55, 0.0 }
 0x5e3   : > { %9936 = vpow2.f32 %v2607_v58  ;;  %2661 = vadd.xlane.f32.xlu1 %v2660_v3  ;;  %v2657_v54 = vsel %vm559_vm2, %v9927_v18, 0.0 }
 0x5e4   : > { %9938 = vpow2.f32 %v2605_v14  ;;  %2658 = vadd.xlane.f32.xlu0 %v2657_v54 }
 0x5e5   : > { %v9929_v9 = vpop.eup %9928 }
 0x5e6   : > { %v9931_v53 = vpop.eup %9930  ;;  %v2666_v37 = vsel %vm559_vm2, %v9929_v9, 0.0 }
 0x5e7   : > { %2667 = vadd.xlane.f32.xlu1 %v2666_v37  ;;  %v2663_v42 = vsel %vm559_vm2, %v9931_v53, 0.0 }
 0x5e8   : > { %2664 = vadd.xlane.f32.xlu0 %v2663_v42 }
 0x5e9   : > { %v9933_v1 = vpop.eup %9932 }
 0x5ea   : > { %v9935_v35 = vpop.eup %9934  ;;  %v2672_v44 = vsel %vm559_vm2, %v9933_v1, 0.0 }
 0x5eb   : > { %2673 = vadd.xlane.f32.xlu1 %v2672_v44  ;;  %v2669_v2 = vsel %vm559_vm2, %v9935_v35, 0.0 }
 0x5ec   : > { %2670 = vadd.xlane.f32.xlu0 %v2669_v2 }
 0x5ed   : > { %v9937_v23 = vpop.eup %9936 }
 0x5ee   : > { %v9939_v7 = vpop.eup %9938  ;;  %v2678_v47 = vsel %vm559_vm2, %v9937_v23, 0.0 }
 0x5ef   : > { %2679 = vadd.xlane.f32.xlu1 %v2678_v47  ;;  %v2675_v51 = vsel %vm559_vm2, %v9939_v7, 0.0 }
 0x5f0   : > { %2676 = vadd.xlane.f32.xlu0 %v2675_v51 }
 0x630   : > { %v2611_v13 = vpop.xlane.xlu0 %2610 }
 0x631   : > { %v2614_v38 = vpop.xlane.xlu1 %2613  ;;  %9940 = vlog2.f32 %v2611_v13 }
 0x632   : > { %9942 = vlog2.f32 %v2614_v38 }
 0x634   : > { %v2617_v55 = vpop.xlane.xlu0 %2616 }
 0x635   : > { %9944 = vlog2.f32 %v2617_v55 }
 0x638   : > { %v2620_v58 = vpop.xlane.xlu1 %2619 }
 0x639   : > { %9946 = vlog2.f32 %v2620_v58 }
 0x63b   : > { %v9941_v14 = vpop.eup %9940 }
 0x63c   : > { %v9943_v18 = vpop.eup %9942  ;;  %v2682_v3 = vmul.f32 0.6931472, %v9941_v14  ;;  %v2623_v54 = vpop.xlane.xlu0 %2622 }
 0x63d   : > { %9948 = vlog2.f32 %v2623_v54  ;;  %v2684_v9 = vmul.f32 0.6931472, %v9943_v18 }
 0x63e   : > { %v2729_v53 = vadd.f32 %v2682_v3, %v12497_v52 }
 0x63f   : > { %v9945_v37 = vpop.eup %9944  ;;  %v2730_v1 = vadd.f32 %v2684_v9, %v12499_v59  ;;  %v12663_v9 = vpop.f32.mrb[24].mxu0 }
 0x640   : > { %v2626_v42 = vpop.xlane.xlu1 %2625  ;;  %2753 = vxpose.xlu0.b32.start [1/8] (short) (narrow) %v2729_v53, 8  ;;  %v2686_v35 = vmul.f32 0.6931472, %v9945_v37  ;;  %v12665_v53 = vpop.f32.mrb[25].mxu0 }
 0x641   : > { %9950 = vlog2.f32 %v2626_v42 }
 0x642   : > { %v2731_v23 = vadd.f32 %v2686_v35, %v12505_v21 }
 0x643   : > { %v9947_v44 = vpop.eup %9946 }
 0x644   : > { %2754 = vxpose.xlu0.b32.cont [2/8] (short) (narrow) %v2730_v1, 8  ;;  %v2629_v2 = vpop.xlane.xlu0 %2628  ;;  %v2688_v7 = vmul.f32 0.6931472, %v9947_v44 }
 0x645   : > { %9952 = vlog2.f32 %v2629_v2 }
 0x646   : > { %v2732_v52 = vadd.f32 %v2688_v7, %v12509_v60 }
 0x647   : > { %v9949_v47 = vpop.eup %9948 }
 0x648   : > { %v2632_v51 = vpop.xlane.xlu1 %2631  ;;  %2755 = vxpose.xlu0.b32.cont [3/8] (short) (narrow) %v2731_v23, 8  ;;  %v2690_v13 = vmul.f32 0.6931472, %v9949_v47 }
 0x649   : > { %9954 = vlog2.f32 %v2632_v51 }
 0x64a   : > { %v2733_v59 = vadd.f32 %v2690_v13, %v12513_v17  ;;  %v12667_v17 = vpop.f32.mrb[26].mxu0 }
 0x64b   : > { %v9951_v38 = vpop.eup %9950  ;;  %v12670_v44 = vpop.f32.mrb[27].mxu0 }
 0x64c   : > { %2756 = vxpose.xlu0.b32.cont [4/8] (short) (narrow) %v2732_v52, 8  ;;  %v2635_v55 = vpop.xlane.xlu0 %2634  ;;  %v2692_v58 = vmul.f32 0.6931472, %v9951_v38 }
 0x64d   : > { %9956 = vlog2.f32 %v2635_v55 }
 0x64e   : > { %v2734_v21 = vadd.f32 %v2692_v58, %v12519_v45  ;;  %v12672_v45 = vpop.f32.mrb[28].mxu0 }
 0x64f   : > { %v9953_v14 = vpop.eup %9952  ;;  %v12674_v51 = vpop.f32.mrb[29].mxu0 }
 0x650   : > { %v2638_v18 = vpop.xlane.xlu1 %2637  ;;  %2757 = vxpose.xlu0.b32.cont [5/8] (short) (narrow) %v2733_v59, 8  ;;  %v2641_v3 = vpop.xlane.xlu0 %2640  ;;  %v2694_v54 = vmul.f32 0.6931472, %v9953_v14 }
 0x651   : > { %9958 = vlog2.f32 %v2638_v18  ;;  %v12678_v38 = vpop.f32.mrb[30].mxu0 }
 0x652   : > { %9960 = vlog2.f32 %v2641_v3  ;;  %v2735_v1 = vadd.f32 %v2694_v54, %v12525_v43  ;;  %v12680_v55 = vpop.f32.mrb[31].mxu0 }
 0x653   : > { %v9955_v60 = vpop.eup %9954 }
 0x654   : > { %v2644_v37 = vpop.xlane.xlu1 %2643  ;;  %2758 = vxpose.xlu0.b32.cont [6/8] (short) (narrow) %v2734_v21, 8  ;;  %v2647_v42 = vpop.xlane.xlu0 %2646  ;;  %v2696_v35 = vmul.f32 0.6931472, %v9955_v60 }
 0x655   : > { %9962 = vlog2.f32 %v2644_v37 }
 0x656   : > { %9964 = vlog2.f32 %v2647_v42  ;;  %v2736_v52 = vadd.f32 %v2696_v35, %v12532_v10 }
 0x657   : > { %v9957_v2 = vpop.eup %9956 }
 0x658   : > { %v2698_v23 = vmul.f32 0.6931472, %v9957_v2  ;;  %v2650_v7 = vpop.xlane.xlu1 %2649  ;;  %2759 = vxpose.xlu0.b32.cont [7/8] (short) (narrow) %v2735_v1, 8  ;;  %v2653_v47 = vpop.xlane.xlu0 %2652 }
 0x659   : > { %9966 = vlog2.f32 %v2650_v7 }
 0x65a   : > { %v2737_v13 = vadd.f32 %v2698_v23, %v12541_v22  ;;  %9968 = vlog2.f32 %v2653_v47 }
 0x65b   : > { %v9959_v43 = vpop.eup %9958 }
 0x65c   : > { %v9961_v59 = vpop.eup %9960  ;;  %v2700_v58 = vmul.f32 0.6931472, %v9959_v43  ;;  %v2656_v14 = vpop.xlane.xlu1 %2655  ;;  %2760 = vxpose.xlu0.b32.end [8/8] (short) (narrow) %v2736_v52, 8  ;;  %2785 = vxpose.xlu1.b32.start [1/8] (short) (narrow) %v2737_v13, 8 }
 0x65d   : > { %v3061_v18 = vpop.xlane.xlu0 %3060  ;;  %v2702_v21 = vmul.f32 0.6931472, %v9961_v59  ;;  %9970 = vlog2.f32 %v2656_v14 }
 0x65e   : > { %v2738_v3 = vadd.f32 %v2700_v58, %v12548_v16  ;;  %9972 = vlog2.f32 %v3061_v18 }
 0x65f   : > { %v9963_v54 = vpop.eup %9962  ;;  %v2739_v22 = vadd.f32 %v2702_v21, %v12517_v15 }
 0x660   : > { %v3064_v60 = vpop.xlane.xlu1 %3063  ;;  %2786 = vxpose.xlu1.b32.cont [2/8] (short) (narrow) %v2738_v3, 8  ;;  %v2704_v37 = vmul.f32 0.6931472, %v9963_v54  ;;  %v9965_v42 = vpop.eup %9964 }
 0x661   : > { %v3067_v10 = vpop.xlane.xlu0 %3066  ;;  %v2706_v2 = vmul.f32 0.6931472, %v9965_v42  ;;  %9974 = vlog2.f32 %v3064_v60 }
 0x662   : > { %v2740_v35 = vadd.f32 %v2704_v37, %v12557_v8  ;;  %9976 = vlog2.f32 %v3067_v10 }
 0x663   : > { %v9967_v23 = vpop.eup %9966  ;;  %v2741_v16 = vadd.f32 %v2706_v2, %v12530_v62 }
 0x664   : > { %v3070_v1 = vpop.xlane.xlu1 %3069  ;;  %2787 = vxpose.xlu1.b32.cont [3/8] (short) (narrow) %v2739_v22, 8  ;;  %v2708_v13 = vmul.f32 0.6931472, %v9967_v23  ;;  %v9969_v47 = vpop.eup %9968 }
 0x665   : > { %v3073_v7 = vpop.xlane.xlu0 %3072  ;;  %v2710_v58 = vmul.f32 0.6931472, %v9969_v47 }
 0x666   : > { %v2742_v59 = vadd.f32 %v2708_v13, %v12566_v12 }
 0x667   : > { %v9971_v14 = vpop.eup %9970  ;;  %v2743_v21 = vadd.f32 %v2710_v58, %v12539_v48 }
 0x668   : > { %v3076_v52 = vpop.xlane.xlu1 %3075  ;;  %2788 = vxpose.xlu1.b32.cont [4/8] (short) (narrow) %v2740_v35, 8  ;;  %v2712_v18 = vmul.f32 0.6931472, %v9971_v14  ;;  %v9973_v62 = vpop.eup %9972 }
 0x669   : > { %v3079_v15 = vpop.xlane.xlu0 %3078  ;;  %v3084_v22 = vmul.f32 0.6931472, %v9973_v62 }
 0x66a   : > { %v2744_v60 = vadd.f32 %v2712_v18, %v12575_v41 }
 0x66b   : > { %v9975_v12 = vpop.eup %9974  ;;  %v3099_v35 = vadd.f32 %v3084_v22, %v12550_v24 }
 0x66c   : > { %v3082_v43 = vpop.xlane.xlu1 %3081  ;;  %2789 = vxpose.xlu1.b32.cont [5/8] (short) (narrow) %v2741_v16, 8  ;;  %v9977_v10 = vpop.eup %9976  ;;  %v3086_v42 = vmul.f32 0.6931472, %v9975_v12 }
 0x66d   : > { %v3088_v16 = vmul.f32 0.6931472, %v9977_v10 }
 0x66e   : > { %v3100_v41 = vadd.f32 %v3086_v42, %v12584_v25 }
 0x66f   : > { %v3101_v14 = vadd.f32 %v3088_v16, %v12559_v29 }
 0x670   : > { %v2662_v8 = vpop.xlane.xlu1 %2661  ;;  %2790 = vxpose.xlu1.b32.cont [6/8] (short) (narrow) %v2742_v59, 8 }
 0x671   : > { %9978 = vlog2.f32 %v2662_v8  ;;  %v2659_v3 = vpop.xlane.xlu0 %2658 }
 0x672   : > { %9980 = vlog2.f32 %v2659_v3 }
 0x673   : > { %9982 = vlog2.f32 %v3070_v1 }
 0x674   : > { %2791 = vxpose.xlu1.b32.cont [7/8] (short) (narrow) %v2743_v21, 8  ;;  %v2668_v37 = vpop.xlane.xlu1 %2667 }
 0x675   : > { %v2665_v54 = vpop.xlane.xlu0 %2664 }
 0x676   : > { %9984 = vlog2.f32 %v2665_v54 }
 0x677   : > { %9986 = vlog2.f32 %v3073_v7 }
 0x678   : > { %2792 = vxpose.xlu1.b32.end [8/8] (short) (narrow) %v2744_v60, 8  ;;  %9988 = vlog2.f32 %v2668_v37  ;;  %v2674_v59 = vpop.xlane.xlu1 %2673 }
 0x679   : > { %v2671_v2 = vpop.xlane.xlu0 %2670  ;;  %9990 = vlog2.f32 %v3076_v52 }
 0x67a   : > { %9992 = vlog2.f32 %v2671_v2 }
 0x67b   : > { %v9979_v48 = vpop.eup %9978  ;;  %9994 = vlog2.f32 %v3079_v15 }
 0x67c   : > { %v9981_v23 = vpop.eup %9980  ;;  %3107 = vxpose.xlu1.b32.start [1/8] (short) (narrow) %v3099_v35, 8  ;;  %v2716_v47 = vmul.f32 0.6931472, %v9979_v48  ;;  %9996 = vlog2.f32 %v2674_v59  ;;  %v2680_v54 = vpop.xlane.xlu1 %2679 }
 0x67d   : > { %v2714_v1 = vmul.f32 0.6931472, %v9981_v23  ;;  %v9983_v13 = vpop.eup %9982  ;;  %v2677_v3 = vpop.xlane.xlu0 %2676  ;;  %9998 = vlog2.f32 %v3082_v43 }
 0x67e   : > { %v3090_v24 = vmul.f32 0.6931472, %v9983_v13  ;;  %v2746_v21 = vadd.f32 %v2716_v47, %v12610_v32  ;;  %10000 = vlog2.f32 %v2677_v3 }
 0x67f   : > { %v2745_v7 = vadd.f32 %v2714_v1, %v12612_v26  ;;  %10002 = vlog2.f32 %v2680_v54  ;;  %v10853_v54 = vld [vmem:[#allocation2 + $0x40] sm:$0xff] }
 0x680   : > { %v9985_v58 = vpop.eup %9984  ;;  %3108 = vxpose.xlu1.b32.cont [2/8] (short) (narrow) %v3100_v41, 8  ;;  %v3102_v26 = vadd.f32 %v3090_v24, %v12592_v36 }
 0x681   : > { %2817 = vxpose.xlu0.b32.start [1/8] (short) (narrow) %v2745_v7, 8  ;;  %v9987_v8 = vpop.eup %9986  ;;  %v2718_v52 = vmul.f32 0.6931472, %v9985_v58 }
 0x682   : > { %v9989_v18 = vpop.eup %9988  ;;  %v3092_v25 = vmul.f32 0.6931472, %v9987_v8 }
 0x683   : > { %v9991_v62 = vpop.eup %9990  ;;  %v2720_v15 = vmul.f32 0.6931472, %v9989_v18  ;;  %v2747_v60 = vadd.f32 %v2718_v52, %v12622_v33 }
 0x684   : > { %3109 = vxpose.xlu1.b32.cont [3/8] (short) (narrow) %v3101_v14, 8  ;;  %v9993_v22 = vpop.eup %9992  ;;  %v3094_v29 = vmul.f32 0.6931472, %v9991_v62  ;;  %v3103_v32 = vadd.f32 %v3092_v25, %v12571_v19 }
 0x685   : > { %2818 = vxpose.xlu0.b32.cont [2/8] (short) (narrow) %v2746_v21, 8  ;;  %v9995_v12 = vpop.eup %9994  ;;  %v2722_v37 = vmul.f32 0.6931472, %v9993_v22  ;;  %v2748_v43 = vadd.f32 %v2720_v15, %v12620_v5  ;;  %v10852_v15 = vld [vmem:[#allocation2 + $0x48] sm:$0xff]  ;;  %v3178_v22 = vld [vmem:[#allocation2 + $0x50] sm:$0xff] }
 0x686   : > { %v9997_v10 = vpop.eup %9996  ;;  %v3096_v36 = vmul.f32 0.6931472, %v9995_v12  ;;  %v3104_v42 = vadd.f32 %v3094_v29, %v12598_v39 }
 0x687   : > { %v9999_v35 = vpop.eup %9998  ;;  %v2724_v48 = vmul.f32 0.6931472, %v9997_v10  ;;  %v2749_v33 = vadd.f32 %v2722_v37, %v12632_v28 }
 0x688   : > { %3110 = vxpose.xlu1.b32.cont [4/8] (short) (narrow) %v3102_v26, 8  ;;  %v10001_v2 = vpop.eup %10000  ;;  %v3098_v23 = vmul.f32 0.6931472, %v9999_v35  ;;  %v3105_v19 = vadd.f32 %v3096_v36, %v12582_v31 }
 0x689   : > { %2819 = vxpose.xlu0.b32.cont [3/8] (short) (narrow) %v2747_v60, 8  ;;  %v2726_v1 = vmul.f32 0.6931472, %v10001_v2  ;;  %v2750_v16 = vadd.f32 %v2724_v48, %v12630_v63  ;;  %v10003_v5 = vpop.eup %10002  ;;  %v3144_v63 = vadd.f32 %v12339_v50, %v11394_v49 }
 0x68a   : > { %v3106_v41 = vadd.f32 %v3098_v23, %v12604_v56  ;;  %v2728_v39 = vmul.f32 0.6931472, %v10003_v5 }
 0x68b   : > { %v2751_v13 = vadd.f32 %v2726_v1, %v12642_v57  ;;  %v10851_v57 = vld [vmem:[%s11403_s11] sm:$0x1] }
 0x68c   : > { %3111 = vxpose.xlu1.b32.cont [5/8] (short) (narrow) %v3103_v32, 8  ;;  %v2752_v28 = vadd.f32 %v2728_v39, %v12640_v30  ;;  %v10854_v32 = vld [vmem:[#allocation2 + $0x58] sm:$0xff] }
 0x68d   : > { %2820 = vxpose.xlu0.b32.cont [4/8] (short) (narrow) %v2748_v43, 8  ;;  %v3180_v43 = vld [vmem:[#allocation2 + $0x60] sm:$0xff] }
 0x690   : > { %3112 = vxpose.xlu1.b32.cont [6/8] (short) (narrow) %v3104_v42, 8  ;;  %v10855_v42 = vld [vmem:[#allocation2 + $0x68] sm:$0xff] }
 0x691   : > { %2821 = vxpose.xlu0.b32.cont [5/8] (short) (narrow) %v2749_v33, 8  ;;  %v3182_v33 = vld [vmem:[#allocation2 + $0x70] sm:$0xff] }
 0x694   : > { %3113 = vxpose.xlu1.b32.cont [7/8] (short) (narrow) %v3105_v19, 8  ;;  %v10856_v19 = vld [vmem:[#allocation2 + $0x78] sm:$0xff] }
 0x695   : > { %2822 = vxpose.xlu0.b32.cont [6/8] (short) (narrow) %v2750_v16, 8 }
 0x698   : > { %3114 = vxpose.xlu1.b32.end [8/8] (short) (narrow) %v3106_v41, 8 }
 0x699   : > { %2823 = vxpose.xlu0.b32.cont [7/8] (short) (narrow) %v2751_v13, 8 }
 0x69d   : > { %2824 = vxpose.xlu0.b32.end [8/8] (short) (narrow) %v2752_v28, 8 }
 0x6c0   : > { %v2769_v47 = vpop.trf.xlu0 }
 0x6c1   : > { %2849 = vst.msk [vmem:[#allocation3] sm:$0x1] %vm1268_vm3, %v2769_v47 }
 0x6c8   : > { %v3140_v31 = vld [vmem:[#allocation3] sm:$0x1] }
 0x6c9   : > { %v3145_v59 = vmul.f32 4.0, %v3140_v31 }
 0x6cb   : > { %v3146_v7 = vsub.f32 %v3144_v63, %v3145_v59  ;;  %v3156_v63 = vadd.f32 %v12279_v27, %v11428_v6 }
 0x6cd   : > { %v12708_v58 = vmul.f32 0.5, %v3146_v7 }
 0x6cf   : > { %v3166_v56 = vsub.f32 %v12708_v58, %v11394_v49 }
 0x6d1   : > { %v3167_v24 = vadd.f32 %v10851_v57, %v3166_v56 }
 0x6d3   : > { %v3633_v14 = vrot.slane %v3167_v24, %v11425_v4 }
 0x6d5   : > { %v12715_v30 = vadd.f32 %v12663_v9, %v3633_v14  ;;  %v12718_v8 = vadd.f32 %v12665_v53, %v3633_v14  ;;  %v12721_v52 = vadd.f32 %v12667_v17, %v3633_v14  ;;  %v12724_v50 = vadd.f32 %v12670_v44, %v3633_v14 }
 0x6d6   : > { %v12727_v3 = vadd.f32 %v12672_v45, %v3633_v14  ;;  %v12730_v21 = vadd.f32 %v12674_v51, %v3633_v14  ;;  %v12733_v18 = vadd.f32 %v12678_v38, %v3633_v14  ;;  %v12736_v9 = vadd.f32 %v12680_v55, %v3633_v14 }
 0x6d7   : > { %v3148_v44 = vadd.f32 %v12273_v40, %v11394_v49  ;;  %v3767_v28 = vsel %vm559_vm2, %v12715_v30, -inf  ;;  %v3764_v47 = vsel %vm559_vm2, %v12718_v8, -inf  ;;  %v3773_v7 = vsel %vm559_vm2, %v12721_v52, -inf }
 0x6d8   : > { %v3770_v56 = vsel %vm559_vm2, %v12724_v50, -inf  ;;  %v3779_v27 = vsel %vm559_vm2, %v12727_v3, -inf }
 0x6dc   : > { %v2801_v53 = vpop.trf.xlu1 }
 0x6dd   : > { %2850 = vst.msk [vmem:[#allocation3 + $0x1] sm:$0x1] %vm1268_vm3, %v2801_v53  ;;  %v3152_v53 = vadd.f32 %v12415_v61, %v11428_v6  ;;  %v3785_v61 = vsel %vm559_vm2, %v12733_v18, -inf }
 0x6e4   : > { %v3141_v17 = vld [vmem:[#allocation3 + $0x1] sm:$0x1] }
 0x6e5   : > { %v3149_v25 = vmul.f32 4.0, %v3141_v17 }
 0x6e7   : > { %v3150_v26 = vsub.f32 %v3148_v44, %v3149_v25  ;;  %v3776_v44 = vsel %vm559_vm2, %v12730_v21, -inf }
 0x6e9   : > { %v12741_v45 = vmul.f32 0.5, %v3150_v26 }
 0x6eb   : > { %v3161_v51 = vsub.f32 %v12741_v45, %v11394_v49 }
 0x6ed   : > { %v3164_v62 = vadd.f32 %v10851_v57, %v3161_v51  ;;  %v10857_v51 = vld [vmem:[%s11420_s14] sm:$0x1] }
 0x6ef   : > { %v3202_v38 = vrot.slane %v3164_v62, %v11425_v4 }
 0x6f1   : > { %v12746_v55 = vadd.f32 %v10852_v15, %v3202_v38  ;;  %v12748_v60 = vadd.f32 %v10853_v54, %v3202_v38  ;;  %v12754_v12 = vadd.f32 %v10854_v32, %v3202_v38  ;;  %v12756_v37 = vadd.f32 %v3202_v38, %v3178_v22  ;;  %v3169_v22 = vld [vmem:[#allocation2 + $0x8] sm:$0xff] }
 0x6f2   : > { %v12762_v35 = vadd.f32 %v10855_v42, %v3202_v38  ;;  %v12764_v48 = vadd.f32 %v3202_v38, %v3180_v43  ;;  %v12770_v1 = vadd.f32 %v10856_v19, %v3202_v38  ;;  %v12772_v16 = vadd.f32 %v3202_v38, %v3182_v33  ;;  %v3171_v43 = vld [vmem:[#allocation2 + $0x18] sm:$0xff]  ;;  %v3173_v19 = vld [vmem:[#allocation2 + $0x28] sm:$0xff] }
 0x6f3   : > { %v3261_v40 = vsel %vm559_vm2, %v12746_v55, -inf  ;;  %v3258_v29 = vsel %vm559_vm2, %v12748_v60, -inf  ;;  %v3267_v10 = vsel %vm559_vm2, %v12754_v12, -inf  ;;  %v3264_v36 = vsel %vm559_vm2, %v12756_v37, -inf }
 0x6f4   : > { %3262 = vmax.xlane.f32.xlu1 %v3261_v40  ;;  %3259 = vmax.xlane.f32.xlu0 %v3258_v29  ;;  %v3273_v2 = vsel %vm559_vm2, %v12762_v35, -inf  ;;  %v3270_v23 = vsel %vm559_vm2, %v12764_v48, -inf  ;;  %v3279_v41 = vsel %vm559_vm2, %v12770_v1, -inf  ;;  %v3276_v39 = vsel %vm559_vm2, %v12772_v16, -inf  ;;  %v3168_v40 = vld [vmem:[#allocation2] sm:$0xff] }
 0x6f5   : > { %v3782_v15 = vsel %vm559_vm2, %v12736_v9, -inf }
 0x6f8   : > { %3268 = vmax.xlane.f32.xlu1 %v3267_v10  ;;  %3265 = vmax.xlane.f32.xlu0 %v3264_v36  ;;  %v3170_v10 = vld [vmem:[#allocation2 + $0x10] sm:$0xff] }
 0x6fc   : > { %3274 = vmax.xlane.f32.xlu1 %v3273_v2  ;;  %v3123_v5 = vpop.trf.xlu1  ;;  %3271 = vmax.xlane.f32.xlu0 %v3270_v23 }
 0x6fd   : > { %3139 = vst.msk [vmem:[#allocation4] sm:$0x1] %vm1268_vm3, %v3123_v5 }
 0x700   : > { %3280 = vmax.xlane.f32.xlu1 %v3279_v41  ;;  %3277 = vmax.xlane.f32.xlu0 %v3276_v39  ;;  %v3172_v41 = vld [vmem:[#allocation2 + $0x20] sm:$0xff] }
 0x701   : > { %v2833_v13 = vpop.trf.xlu0 }
 0x702   : > { %2851 = vst.msk [vmem:[#allocation3 + $0x2] sm:$0x1] %vm1268_vm3, %v2833_v13 }
 0x704   : > { %v3143_v31 = vld [vmem:[#allocation4] sm:$0x1]  ;;  %3768 = vmax.xlane.f32.xlu1 %v3767_v28  ;;  %3765 = vmax.xlane.f32.xlu0 %v3764_v47 }
 0x705   : > { %v3157_v59 = vmul.f32 4.0, %v3143_v31  ;;  %v3175_v31 = vld [vmem:[#allocation2 + $0x38] sm:$0xff] }
 0x707   : > { %v3158_v57 = vsub.f32 %v3156_v63, %v3157_v59  ;;  %v3174_v59 = vld [vmem:[#allocation2 + $0x30] sm:$0xff] }
 0x708   : > { %3774 = vmax.xlane.f32.xlu1 %v3773_v7  ;;  %3771 = vmax.xlane.f32.xlu0 %v3770_v56 }
 0x709   : > { %v3142_v24 = vld [vmem:[#allocation3 + $0x2] sm:$0x1]  ;;  %v12790_v14 = vmul.f32 0.5, %v3158_v57 }
 0x70a   : > { %v3153_v17 = vmul.f32 4.0, %v3142_v24 }
 0x70b   : > { %v3160_v25 = vsub.f32 %v12790_v14, %v11428_v6 }
 0x70c   : > { %3780 = vmax.xlane.f32.xlu1 %v3779_v27  ;;  %3777 = vmax.xlane.f32.xlu0 %v3776_v44  ;;  %v3154_v26 = vsub.f32 %v3152_v53, %v3153_v17  ;;  %v3185_v53 = vld [vmem:[#allocation2 + $0x88] sm:$0xff]  ;;  %v3184_v17 = vld [vmem:[#allocation2 + $0x80] sm:$0xff] }
 0x70d   : > { %v3163_v62 = vadd.f32 %v10857_v51, %v3160_v25 }
 0x70e   : > { %v12801_v38 = vmul.f32 0.5, %v3154_v26 }
 0x70f   : > { %v3198_v54 = vrot.slane %v3163_v62, %v11425_v4  ;;  %v3186_v62 = vld [vmem:[#allocation2 + $0x90] sm:$0xff] }
 0x710   : > { %3786 = vmax.xlane.f32.xlu1 %v3785_v61  ;;  %3783 = vmax.xlane.f32.xlu0 %v3782_v15  ;;  %v3162_v36 = vsub.f32 %v12801_v38, %v11428_v6 }
 0x711   : > { %v12808_v29 = vadd.f32 %v3198_v54, %v3169_v22  ;;  %v12810_v32 = vadd.f32 %v3198_v54, %v3168_v40  ;;  %v12818_v2 = vadd.f32 %v3198_v54, %v3171_v43  ;;  %v12820_v23 = vadd.f32 %v3198_v54, %v3170_v10  ;;  %v3189_v40 = vld [vmem:[#allocation2 + $0xa8] sm:$0xff]  ;;  %v3188_v43 = vld [vmem:[#allocation2 + $0xa0] sm:$0xff] }
 0x712   : > { %v12822_v5 = vadd.f32 %v3198_v54, %v3173_v19  ;;  %v12828_v28 = vadd.f32 %v3198_v54, %v3172_v41  ;;  %v3165_v47 = vadd.f32 %v10857_v51, %v3162_v36  ;;  %v12830_v63 = vadd.f32 %v3198_v54, %v3175_v31  ;;  %v3187_v51 = vld [vmem:[#allocation2 + $0x98] sm:$0xff]  ;;  %v3190_v41 = vld [vmem:[#allocation2 + $0xb0] sm:$0xff] }
 0x713   : > { %v3237_v42 = vsel %vm559_vm2, %v12808_v29, -inf  ;;  %v3234_v33 = vsel %vm559_vm2, %v12810_v32, -inf  ;;  %v3243_v39 = vsel %vm559_vm2, %v12818_v2, -inf  ;;  %v3240_v13 = vsel %vm559_vm2, %v12820_v23, -inf  ;;  %v3191_v19 = vld [vmem:[#allocation2 + $0xb8] sm:$0xff] }
 0x714   : > { %3238 = vmax.xlane.f32.xlu1 %v3237_v42  ;;  %3235 = vmax.xlane.f32.xlu0 %v3234_v33  ;;  %v3249_v7 = vsel %vm559_vm2, %v12822_v5, -inf  ;;  %v3246_v56 = vsel %vm559_vm2, %v12828_v28, -inf  ;;  %v12836_v57 = vadd.f32 %v3198_v54, %v3174_v59  ;;  %v3206_v24 = vrot.slane %v3165_v47, %v11425_v4 }
 0x715   : > { %v3255_v27 = vsel %vm559_vm2, %v12830_v63, -inf }
 0x716   : > { %v3252_v44 = vsel %vm559_vm2, %v12836_v57, -inf  ;;  %v12843_v25 = vadd.f32 %v3206_v24, %v3185_v53  ;;  %v12845_v26 = vadd.f32 %v3206_v24, %v3184_v17  ;;  %v12851_v54 = vadd.f32 %v3206_v24, %v3187_v51  ;;  %v4399_v53 = vld [vmem:[%s11032_s5 + $0x8] sm:$0xff]  ;;  %v4400_v17 = vld [vmem:[%s11032_s5 + $0x10] sm:$0xff] }
 0x717   : > { %v12853_v22 = vadd.f32 %v3206_v24, %v3186_v62  ;;  %v12859_v42 = vadd.f32 %v3206_v24, %v3189_v40  ;;  %v12861_v33 = vadd.f32 %v3206_v24, %v3188_v43  ;;  %v12867_v47 = vadd.f32 %v3206_v24, %v3191_v19  ;;  %v4404_v51 = vld [vmem:[%s11032_s5 + $0x30] sm:$0xff]  ;;  %v4405_v62 = vld [vmem:[%s11032_s5 + $0x38] sm:$0xff] }
 0x718   : > { %3244 = vmax.xlane.f32.xlu1 %v3243_v39  ;;  %3241 = vmax.xlane.f32.xlu0 %v3240_v13  ;;  %v3285_v61 = vsel %vm559_vm2, %v12843_v25, -inf  ;;  %v3282_v15 = vsel %vm559_vm2, %v12845_v26, -inf  ;;  %v3291_v10 = vsel %vm559_vm2, %v12851_v54, -inf  ;;  %v12869_v31 = vadd.f32 %v3206_v24, %v3190_v41  ;;  %v4401_v24 = vld [vmem:[%s11032_s5 + $0x18] sm:$0xff] }
 0x719   : > { %v3288_v36 = vsel %vm559_vm2, %v12853_v22, -inf  ;;  %v3297_v39 = vsel %vm559_vm2, %v12859_v42, -inf  ;;  %v3294_v13 = vsel %vm559_vm2, %v12861_v33, -inf  ;;  %v3303_v59 = vsel %vm559_vm2, %v12867_v47, -inf }
 0x71c   : > { %3250 = vmax.xlane.f32.xlu1 %v3249_v7  ;;  %3247 = vmax.xlane.f32.xlu0 %v3246_v56  ;;  %v3300_v7 = vsel %vm559_vm2, %v12869_v31, -inf  ;;  %v4398_v56 = vld [vmem:[%s11032_s5] sm:$0xff] }
 0x71d   : > { %9108 = vmatprep.mubr.msk.f32.mxu1 %vm269_vm0, %v4398_v56 }
 0x71e   : > { %9109 = vmatmul.mubr.msk.f32.vlgmr.msra.gmra.mrb[24].mxu1 %vm269_vm0, %v4399_v53 }
 0x71f   : > { %9111 = vmatprep.mubr.msk.f32.mxu1 %vm269_vm0, %v4400_v17  ;;  %9481 = vmatpush3.bf16.xpose.msk.msra.mxu1 %vm11036_vm1, %v11071_v11 }
 0x720   : > { %3256 = vmax.xlane.f32.xlu1 %v3255_v27  ;;  %3253 = vmax.xlane.f32.xlu0 %v3252_v44  ;;  %v4402_v27 = vld [vmem:[%s11032_s5 + $0x20] sm:$0xff]  ;;  %v4403_v44 = vld [vmem:[%s11032_s5 + $0x28] sm:$0xff] }
 0x721   : > { %9484 = vmatprep.subr.msk.bf16.mxu1 %vm11036_vm1, %v11102_v20 }
 0x722   : > { %9112 = vmatmul.mubr.msk.f32.gmra.mrb[26].mxu1 %vm269_vm0, %v4401_v24 }
 0x723   : > { %9114 = vmatprep.mubr.msk.f32.mxu1 %vm269_vm0, %v4402_v27 }
 0x724   : > { %3286 = vmax.xlane.f32.xlu1 %v3285_v61  ;;  %3283 = vmax.xlane.f32.xlu0 %v3282_v15 }
 0x726   : > { %9115 = vmatmul.mubr.msk.f32.gmra.mrb[28].mxu1 %vm269_vm0, %v4403_v44 }
 0x727   : > { %9117 = vmatprep.mubr.msk.f32.mxu1 %vm269_vm0, %v4404_v51  ;;  %9487 = vmatpush3.bf16.xpose.msk.msra.mxu1 %vm11036_vm1, %v11102_v20 }
 0x728   : > { %3292 = vmax.xlane.f32.xlu1 %v3291_v10  ;;  %3289 = vmax.xlane.f32.xlu0 %v3288_v36 }
 0x729   : > { %9490 = vmatprep.subr.msk.bf16.mxu1 %vm11036_vm1, %v11149_v34 }
 0x72a   : > { %9118 = vmatmul.mubr.msk.f32.gmra.mrb[30].mxu1 %vm269_vm0, %v4405_v62 }
 0x72c   : > { %3298 = vmax.xlane.f32.xlu1 %v3297_v39  ;;  %3295 = vmax.xlane.f32.xlu0 %v3294_v13 }
 0x72f   : > { %9493 = vmatpush3.bf16.xpose.msk.msra.mxu1 %vm11036_vm1, %v11149_v34 }
 0x730   : > { %3304 = vmax.xlane.f32.xlu1 %v3303_v59  ;;  %3301 = vmax.xlane.f32.xlu0 %v3300_v7 }
 0x731   : > { %9496 = vmatprep.subr.msk.bf16.mxu1 %vm11036_vm1, %v11185_v46 }
 0x737   : > { %9499 = vmatpush3.bf16.xpose.msk.msra.mxu1 %vm11036_vm1, %v11185_v46 }
 0x738   : > { %9526 = vmatprep.subr.msk.bf16.mxu1 %vm11036_vm1, %v11071_v11 }
 0x781   : > { %v12915_v61 = vpop.xlane.xlu1 %3262  ;;  %v12917_v15 = vpop.xlane.xlu0 %3259 }
 0x782   : > { %v3315_v40 = vsub.f32 %v12746_v55, %v12915_v61  ;;  %v3314_v43 = vsub.f32 %v12748_v60, %v12917_v15 }
 0x784   : > { %v3348_v10 = vmul.f32 1.442695, %v3315_v40  ;;  %v3346_v36 = vmul.f32 1.442695, %v3314_v43 }
 0x785   : > { %v12923_v19 = vpop.xlane.xlu1 %3268  ;;  %v12925_v41 = vpop.xlane.xlu0 %3265 }
 0x786   : > { %10004 = vpow2.f32 %v3348_v10  ;;  %v3317_v39 = vsub.f32 %v12754_v12, %v12923_v19  ;;  %v3316_v13 = vsub.f32 %v12756_v37, %v12925_v41 }
 0x787   : > { %10006 = vpow2.f32 %v3346_v36 }
 0x788   : > { %v3352_v59 = vmul.f32 1.442695, %v3317_v39  ;;  %v3350_v7 = vmul.f32 1.442695, %v3316_v13 }
 0x789   : > { %v12931_v55 = vpop.xlane.xlu1 %3274  ;;  %v12933_v56 = vpop.xlane.xlu0 %3271 }
 0x78a   : > { %10008 = vpow2.f32 %v3352_v59  ;;  %v3319_v60 = vsub.f32 %v12762_v35, %v12931_v55  ;;  %v3318_v53 = vsub.f32 %v12764_v48, %v12933_v56 }
 0x78b   : > { %10010 = vpow2.f32 %v3350_v7 }
 0x78c   : > { %v3356_v17 = vmul.f32 1.442695, %v3319_v60  ;;  %v3354_v12 = vmul.f32 1.442695, %v3318_v53 }
 0x78d   : > { %v12939_v24 = vpop.xlane.xlu1 %3280  ;;  %v12941_v37 = vpop.xlane.xlu0 %3277 }
 0x78e   : > { %10012 = vpow2.f32 %v3356_v17  ;;  %v3321_v27 = vsub.f32 %v12770_v1, %v12939_v24  ;;  %v3320_v44 = vsub.f32 %v12772_v16, %v12941_v37 }
 0x78f   : > { %10014 = vpow2.f32 %v3354_v12 }
 0x790   : > { %v10005_v51 = vpop.eup %10004  ;;  %v3360_v35 = vmul.f32 1.442695, %v3321_v27  ;;  %v3358_v62 = vmul.f32 1.442695, %v3320_v44 }
 0x791   : > { %v10007_v40 = vpop.eup %10006  ;;  %v12947_v48 = vpop.xlane.xlu1 %3768  ;;  %v3405_v10 = vsel %vm559_vm2, %v10005_v51, 0.0 }
 0x792   : > { %v12949_v43 = vpop.xlane.xlu0 %3765  ;;  %10016 = vpow2.f32 %v3360_v35  ;;  %v3789_v36 = vsub.f32 %v12715_v30, %v12947_v48  ;;  %3406 = vadd.xlane.f32.xlu1 %v3405_v10  ;;  %v3402_v16 = vsel %vm559_vm2, %v10007_v40, 0.0 }
 0x793   : > { %v3788_v1 = vsub.f32 %v12718_v8, %v12949_v43  ;;  %10018 = vpow2.f32 %v3358_v62  ;;  %3403 = vadd.xlane.f32.xlu0 %v3402_v16 }
 0x794   : > { %v10009_v39 = vpop.eup %10008  ;;  %v3798_v7 = vmul.f32 1.442695, %v3789_v36 }
 0x795   : > { %v3796_v13 = vmul.f32 1.442695, %v3788_v1  ;;  %v10011_v59 = vpop.eup %10010  ;;  %v12957_v60 = vpop.xlane.xlu1 %3774  ;;  %v3411_v17 = vsel %vm559_vm2, %v10009_v39, 0.0 }
 0x796   : > { %v12959_v53 = vpop.xlane.xlu0 %3771  ;;  %3412 = vadd.xlane.f32.xlu1 %v3411_v17  ;;  %v3408_v8 = vsel %vm559_vm2, %v10011_v59, 0.0  ;;  %v3791_v44 = vsub.f32 %v12721_v52, %v12957_v60 }
 0x797   : > { %v3790_v30 = vsub.f32 %v12724_v50, %v12959_v53  ;;  %10020 = vpow2.f32 %v3796_v13  ;;  %3409 = vadd.xlane.f32.xlu0 %v3408_v8 }
 0x798   : > { %v10013_v12 = vpop.eup %10012  ;;  %10022 = vpow2.f32 %v3798_v7  ;;  %v3802_v1 = vmul.f32 1.442695, %v3791_v44 }
 0x799   : > { %v10015_v27 = vpop.eup %10014  ;;  %v3800_v51 = vmul.f32 1.442695, %v3790_v30  ;;  %v12967_v35 = vpop.xlane.xlu1 %3780  ;;  %v3417_v40 = vsel %vm559_vm2, %v10013_v12, 0.0 }
 0x79a   : > { %v12969_v62 = vpop.xlane.xlu0 %3777  ;;  %3418 = vadd.xlane.f32.xlu1 %v3417_v40  ;;  %v3414_v50 = vsel %vm559_vm2, %v10015_v27, 0.0  ;;  %v3793_v17 = vsub.f32 %v12727_v3, %v12967_v35 }
 0x79b   : > { %3415 = vadd.xlane.f32.xlu0 %v3414_v50  ;;  %10024 = vpow2.f32 %v3800_v51  ;;  %v3792_v16 = vsub.f32 %v12730_v21, %v12969_v62 }
 0x79c   : > { %v10017_v10 = vpop.eup %10016  ;;  %10026 = vpow2.f32 %v3802_v1  ;;  %v3806_v40 = vmul.f32 1.442695, %v3793_v17 }
 0x79d   : > { %v10019_v36 = vpop.eup %10018  ;;  %v12975_v39 = vpop.xlane.xlu1 %3786  ;;  %v3423_v13 = vsel %vm559_vm2, %v10017_v10, 0.0  ;;  %v3804_v30 = vmul.f32 1.442695, %v3792_v16 }
 0x79e   : > { %v12977_v52 = vpop.xlane.xlu0 %3783  ;;  %3424 = vadd.xlane.f32.xlu1 %v3423_v13  ;;  %v3420_v59 = vsel %vm559_vm2, %v10019_v36, 0.0  ;;  %v3795_v13 = vsub.f32 %v12733_v18, %v12975_v39 }
 0x79f   : > { %3421 = vadd.xlane.f32.xlu0 %v3420_v59  ;;  %10028 = vpow2.f32 %v3804_v30  ;;  %v3794_v50 = vsub.f32 %v12736_v9, %v12977_v52 }
 0x7a1   : > { %v10021_v7 = vpop.eup %10020  ;;  %v12983_v8 = vpop.xlane.xlu1 %3238  ;;  %v3808_v59 = vmul.f32 1.442695, %v3794_v50 }
 0x7a2   : > { %v12985_v12 = vpop.xlane.xlu0 %3235  ;;  %v3812_v27 = vsel %vm559_vm2, %v10021_v7, 0.0  ;;  %v10023_v44 = vpop.eup %10022 }
 0x7a3   : > { %v3306_v21 = vsub.f32 %v12810_v32, %v12985_v12  ;;  %3813 = vadd.xlane.f32.xlu1 %v3812_v27  ;;  %v3815_v1 = vsel %vm559_vm2, %v10023_v44, 0.0  ;;  %v3810_v27 = vmul.f32 1.442695, %v3795_v13  ;;  %v3307_v44 = vsub.f32 %v12808_v29, %v12983_v8 }
 0x7a5   : > { %v3330_v51 = vmul.f32 1.442695, %v3306_v21  ;;  %v12992_v10 = vpop.xlane.xlu1 %3244  ;;  %v10025_v32 = vpop.eup %10024 }
 0x7a6   : > { %v12994_v3 = vpop.xlane.xlu0 %3241  ;;  %v10027_v30 = vpop.eup %10026 }
 0x7a7   : > { %v3308_v36 = vsub.f32 %v12820_v23, %v12994_v3  ;;  %10030 = vpow2.f32 %v3330_v51  ;;  %3816 = vadd.xlane.f32.xlu1 %v3815_v1  ;;  %v3818_v23 = vsel %vm559_vm2, %v10025_v32, 0.0  ;;  %v3332_v32 = vmul.f32 1.442695, %v3307_v44 }
 0x7a8   : > { %10032 = vpow2.f32 %v3806_v40 }
 0x7a9   : > { %v3334_v16 = vmul.f32 1.442695, %v3308_v36  ;;  %v13001_v7 = vpop.xlane.xlu1 %3250  ;;  %v10029_v50 = vpop.eup %10028 }
 0x7aa   : > { %v13003_v9 = vpop.xlane.xlu0 %3247 }
 0x7ab   : > { %v3310_v17 = vsub.f32 %v12828_v28, %v13003_v9  ;;  %10034 = vpow2.f32 %v3334_v16  ;;  %3819 = vadd.xlane.f32.xlu1 %v3818_v23  ;;  %v3821_v28 = vsel %vm559_vm2, %v10027_v30, 0.0  ;;  %v3309_v16 = vsub.f32 %v12818_v2, %v12992_v10 }
 0x7ac   : > { %10036 = vpow2.f32 %v3808_v59  ;;  %v3824_v59 = vsel %vm559_vm2, %v10029_v50, 0.0  ;;  %v3311_v2 = vsub.f32 %v12822_v5, %v13001_v7 }
 0x7ad   : > { %v3338_v21 = vmul.f32 1.442695, %v3310_v17  ;;  %v13012_v51 = vpop.xlane.xlu1 %3256 }
 0x7ae   : > { %v13010_v18 = vpop.xlane.xlu0 %3253  ;;  %v3313_v5 = vsub.f32 %v12830_v63, %v13012_v51 }
 0x7af   : > { %v3312_v40 = vsub.f32 %v12836_v57, %v13010_v18  ;;  %10038 = vpow2.f32 %v3338_v21  ;;  %3822 = vadd.xlane.f32.xlu1 %v3821_v28 }
 0x7b0   : > { %10040 = vpow2.f32 %v3810_v27  ;;  %v3336_v27 = vmul.f32 1.442695, %v3309_v16 }
 0x7b1   : > { %v3342_v36 = vmul.f32 1.442695, %v3312_v40  ;;  %v10031_v1 = vpop.eup %10030  ;;  %v13025_v23 = vpop.xlane.xlu1 %3286 }
 0x7b2   : > { %v13019_v29 = vpop.xlane.xlu0 %3283  ;;  %v3378_v57 = vsel %vm559_vm2, %v10031_v1, 0.0  ;;  %v10033_v17 = vpop.eup %10032  ;;  %v3323_v63 = vsub.f32 %v12843_v25, %v13025_v23 }
 0x7b3   : > { %v3322_v13 = vsub.f32 %v12845_v26, %v13019_v29  ;;  %10042 = vpow2.f32 %v3342_v36  ;;  %3825 = vadd.xlane.f32.xlu1 %v3824_v59  ;;  %3379 = vadd.xlane.f32.xlu0 %v3378_v57  ;;  %v3827_v40 = vsel %vm559_vm2, %v10033_v17, 0.0 }
 0x7b4   : > { %10044 = vpow2.f32 %v3332_v32  ;;  %v3340_v32 = vmul.f32 1.442695, %v3311_v2 }
 0x7b5   : > { %v3362_v30 = vmul.f32 1.442695, %v3322_v13  ;;  %v10035_v21 = vpop.eup %10034  ;;  %v13039_v13 = vpop.xlane.xlu1 %3292 }
 0x7b6   : > { %v13029_v44 = vpop.xlane.xlu0 %3289  ;;  %v3384_v28 = vsel %vm559_vm2, %v10035_v21, 0.0  ;;  %v10037_v50 = vpop.eup %10036  ;;  %v3325_v25 = vsub.f32 %v12851_v54, %v13039_v13 }
 0x7b7   : > { %v3324_v26 = vsub.f32 %v12853_v22, %v13029_v44  ;;  %10046 = vpow2.f32 %v3362_v30  ;;  %3828 = vadd.xlane.f32.xlu1 %v3827_v40  ;;  %3385 = vadd.xlane.f32.xlu0 %v3384_v28  ;;  %v3830_v59 = vsel %vm559_vm2, %v10037_v50, 0.0 }
 0x7b8   : > { %10048 = vpow2.f32 %v3336_v27  ;;  %v3344_v27 = vmul.f32 1.442695, %v3313_v5 }
 0x7b9   : > { %v3366_v36 = vmul.f32 1.442695, %v3324_v26  ;;  %v10039_v1 = vpop.eup %10038  ;;  %v13053_v50 = vpop.xlane.xlu1 %3298 }
 0x7ba   : > { %v13037_v16 = vpop.xlane.xlu0 %3295  ;;  %v3390_v57 = vsel %vm559_vm2, %v10039_v1, 0.0  ;;  %v10041_v17 = vpop.eup %10040 }
 0x7bb   : > { %v3326_v22 = vsub.f32 %v12861_v33, %v13037_v16  ;;  %10050 = vpow2.f32 %v3366_v36  ;;  %3831 = vadd.xlane.f32.xlu1 %v3830_v59  ;;  %3391 = vadd.xlane.f32.xlu0 %v3390_v57  ;;  %v3833_v26 = vsel %vm559_vm2, %v10041_v17, 0.0  ;;  %v3368_v57 = vmul.f32 1.442695, %v3325_v25 }
 0x7bc   : > { %10052 = vpow2.f32 %v3340_v32  ;;  %v3364_v32 = vmul.f32 1.442695, %v3323_v63  ;;  %v3327_v17 = vsub.f32 %v12859_v42, %v13053_v50 }
 0x7bd   : > { %v3370_v30 = vmul.f32 1.442695, %v3326_v22  ;;  %v10043_v21 = vpop.eup %10042 }
 0x7be   : > { %v13047_v2 = vpop.xlane.xlu0 %3301  ;;  %v3396_v40 = vsel %vm559_vm2, %v10043_v21, 0.0  ;;  %v10045_v28 = vpop.eup %10044 }
 0x7bf   : > { %v3328_v33 = vsub.f32 %v12869_v31, %v13047_v2  ;;  %10054 = vpow2.f32 %v3370_v30  ;;  %3834 = vadd.xlane.f32.xlu1 %v3833_v26  ;;  %3397 = vadd.xlane.f32.xlu0 %v3396_v40  ;;  %v3381_v5 = vsel %vm559_vm2, %v10045_v28, 0.0  ;;  %v13061_v30 = vpop.xlane.xlu1 %3304 }
 0x7c0   : > { %10056 = vpow2.f32 %v3344_v27  ;;  %v3329_v26 = vsub.f32 %v12867_v47, %v13061_v30 }
 0x7c1   : > { %v3374_v36 = vmul.f32 1.442695, %v3328_v33  ;;  %v10047_v1 = vpop.eup %10046  ;;  %v3372_v33 = vmul.f32 1.442695, %v3327_v17 }
 0x7c2   : > { %v3426_v31 = vsel %vm559_vm2, %v10047_v1, 0.0  ;;  %v10049_v22 = vpop.eup %10048  ;;  %v3376_v1 = vmul.f32 1.442695, %v3329_v26 }
 0x7c3   : > { %10058 = vpow2.f32 %v3374_v36  ;;  %3382 = vadd.xlane.f32.xlu1 %v3381_v5  ;;  %3427 = vadd.xlane.f32.xlu0 %v3426_v31  ;;  %v3387_v21 = vsel %vm559_vm2, %v10049_v22, 0.0 }
 0x7c4   : > { %10060 = vpow2.f32 %v3364_v32 }
 0x7c5   : > { %v10051_v59 = vpop.eup %10050  ;;  %10062 = vpow2.f32 %v3368_v57 }
 0x7c6   : > { %v3432_v54 = vsel %vm559_vm2, %v10051_v59, 0.0  ;;  %v10053_v27 = vpop.eup %10052  ;;  %10064 = vpow2.f32 %v3372_v33 }
 0x7c7   : > { %3388 = vadd.xlane.f32.xlu1 %v3387_v21  ;;  %3433 = vadd.xlane.f32.xlu0 %v3432_v54  ;;  %v3393_v40 = vsel %vm559_vm2, %v10053_v27, 0.0  ;;  %10066 = vpow2.f32 %v3376_v1 }
 0x7c9   : > { %v10055_v63 = vpop.eup %10054 }
 0x7ca   : > { %v3438_v28 = vsel %vm559_vm2, %v10055_v63, 0.0  ;;  %v10057_v42 = vpop.eup %10056 }
 0x7cb   : > { %3394 = vadd.xlane.f32.xlu1 %v3393_v40  ;;  %3439 = vadd.xlane.f32.xlu0 %v3438_v28  ;;  %v3399_v32 = vsel %vm559_vm2, %v10057_v42, 0.0 }
 0x7cd   : > { %v10059_v36 = vpop.eup %10058 }
 0x7ce   : > { %v3444_v25 = vsel %vm559_vm2, %v10059_v36, 0.0  ;;  %v10061_v5 = vpop.eup %10060 }
 0x7cf   : > { %3400 = vadd.xlane.f32.xlu1 %v3399_v32  ;;  %3445 = vadd.xlane.f32.xlu0 %v3444_v25  ;;  %v3429_v47 = vsel %vm559_vm2, %v10061_v5, 0.0  ;;  %v10063_v31 = vpop.eup %10062 }
 0x7d0   : > { %v3435_v22 = vsel %vm559_vm2, %v10063_v31, 0.0  ;;  %v10065_v59 = vpop.eup %10064 }
 0x7d1   : > { %v3441_v57 = vsel %vm559_vm2, %v10065_v59, 0.0  ;;  %v10067_v17 = vpop.eup %10066 }
 0x7d2   : > { %v3447_v21 = vsel %vm559_vm2, %v10067_v17, 0.0 }
 0x7d3   : > { %3430 = vadd.xlane.f32.xlu1 %v3429_v47 }
 0x7d7   : > { %3436 = vadd.xlane.f32.xlu1 %v3435_v22 }
 0x7db   : > { %3442 = vadd.xlane.f32.xlu1 %v3441_v57 }
 0x7df   : > { %3448 = vadd.xlane.f32.xlu1 %v3447_v21 }
 0x81f   : > { %v3407_v54 = vpop.xlane.xlu1 %3406 }
 0x820   : > { %10068 = vlog2.f32 %v3407_v54  ;;  %v3404_v27 = vpop.xlane.xlu0 %3403 }
 0x821   : > { %10070 = vlog2.f32 %v3404_v27 }
 0x823   : > { %v3413_v63 = vpop.xlane.xlu1 %3412 }
 0x824   : > { %v3410_v33 = vpop.xlane.xlu0 %3409 }
 0x825   : > { %10072 = vlog2.f32 %v3410_v33 }
 0x826   : > { %10074 = vlog2.f32 %v3413_v63 }
 0x827   : > { %v3419_v26 = vpop.xlane.xlu1 %3418 }
 0x828   : > { %v3416_v28 = vpop.xlane.xlu0 %3415 }
 0x829   : > { %10076 = vlog2.f32 %v3416_v28 }
 0x82a   : > { %v10069_v40 = vpop.eup %10068  ;;  %10078 = vlog2.f32 %v3419_v26 }
 0x82b   : > { %v10071_v42 = vpop.eup %10070  ;;  %v3425_v36 = vpop.xlane.xlu1 %3424  ;;  %v3469_v32 = vmul.f32 0.6931472, %v10069_v40 }
 0x82c   : > { %v3467_v1 = vmul.f32 0.6931472, %v10071_v42  ;;  %v3422_v31 = vpop.xlane.xlu0 %3421 }
 0x82d   : > { %v3507_v22 = vadd.f32 %v3469_v32, %v12915_v61 }
 0x82e   : > { %v3506_v25 = vadd.f32 %v3467_v1, %v12917_v15 }
 0x82f   : > { %v10073_v5 = vpop.eup %10072 }
 0x830   : > { %v3814_v47 = vpop.xlane.xlu1 %3813  ;;  %3554 = vxpose.xlu1.b32.start [1/8] (short) (narrow) %v3506_v25, 8  ;;  %v3471_v59 = vmul.f32 0.6931472, %v10073_v5  ;;  %v10075_v57 = vpop.eup %10074 }
 0x831   : > { %10080 = vlog2.f32 %v3814_v47  ;;  %v3473_v21 = vmul.f32 0.6931472, %v10075_v57 }
 0x832   : > { %10082 = vlog2.f32 %v3422_v31  ;;  %v3508_v54 = vadd.f32 %v3471_v59, %v12925_v41 }
 0x833   : > { %v10077_v27 = vpop.eup %10076  ;;  %v3509_v33 = vadd.f32 %v3473_v21, %v12923_v19 }
 0x834   : > { %v3817_v17 = vpop.xlane.xlu1 %3816  ;;  %3555 = vxpose.xlu1.b32.cont [2/8] (short) (narrow) %v3507_v22, 8  ;;  %v10079_v63 = vpop.eup %10078  ;;  %v3475_v26 = vmul.f32 0.6931472, %v10077_v27 }
 0x835   : > { %10084 = vlog2.f32 %v3817_v17  ;;  %v3477_v1 = vmul.f32 0.6931472, %v10079_v63 }
 0x836   : > { %10086 = vlog2.f32 %v3425_v36  ;;  %v3510_v32 = vadd.f32 %v3475_v26, %v12933_v56 }
 0x837   : > { %v3511_v19 = vadd.f32 %v3477_v1, %v12931_v55 }
 0x838   : > { %v3820_v15 = vpop.xlane.xlu1 %3819  ;;  %3556 = vxpose.xlu1.b32.cont [3/8] (short) (narrow) %v3508_v54, 8 }
 0x839   : > { %10088 = vlog2.f32 %v3820_v15 }
 0x83b   : > { %v10081_v40 = vpop.eup %10080 }
 0x83c   : > { %v3837_v61 = vmul.f32 0.6931472, %v10081_v40  ;;  %v3823_v28 = vpop.xlane.xlu1 %3822  ;;  %3557 = vxpose.xlu1.b32.cont [4/8] (short) (narrow) %v3509_v33, 8  ;;  %v10083_v42 = vpop.eup %10082 }
 0x83d   : > { %10090 = vlog2.f32 %v3823_v28  ;;  %v3479_v31 = vmul.f32 0.6931472, %v10083_v42 }
 0x83e   : > { %v3852_v41 = vadd.f32 %v3837_v61, %v12949_v43 }
 0x83f   : > { %v10085_v25 = vpop.eup %10084  ;;  %v3512_v43 = vadd.f32 %v3479_v31, %v12941_v37 }
 0x840   : > { %v3839_v36 = vmul.f32 0.6931472, %v10085_v25  ;;  %v3826_v5 = vpop.xlane.xlu1 %3825  ;;  %3860 = vxpose.xlu0.b32.start [1/8] (short) (narrow) %v3852_v41, 8  ;;  %3558 = vxpose.xlu1.b32.cont [5/8] (short) (narrow) %v3510_v32, 8  ;;  %v10087_v47 = vpop.eup %10086 }
 0x841   : > { %10092 = vlog2.f32 %v3826_v5  ;;  %v3481_v56 = vmul.f32 0.6931472, %v10087_v47  ;;  %v3380_v55 = vpop.xlane.xlu0 %3379 }
 0x842   : > { %v3853_v22 = vadd.f32 %v3839_v36, %v12947_v48 }
 0x843   : > { %v10089_v59 = vpop.eup %10088  ;;  %v3513_v48 = vadd.f32 %v3481_v56, %v12939_v24 }
 0x844   : > { %v3841_v57 = vmul.f32 0.6931472, %v10089_v59  ;;  %v3829_v17 = vpop.xlane.xlu1 %3828  ;;  %3861 = vxpose.xlu0.b32.cont [2/8] (short) (narrow) %v3853_v22, 8  ;;  %3559 = vxpose.xlu1.b32.cont [6/8] (short) (narrow) %v3511_v19, 8 }
 0x845   : > { %10094 = vlog2.f32 %v3829_v17  ;;  %v3386_v1 = vpop.xlane.xlu0 %3385 }
 0x846   : > { %v3854_v21 = vadd.f32 %v3841_v57, %v12959_v53 }
 0x847   : > { %v10091_v54 = vpop.eup %10090 }
 0x848   : > { %v3843_v27 = vmul.f32 0.6931472, %v10091_v54  ;;  %v3832_v15 = vpop.xlane.xlu1 %3831  ;;  %3862 = vxpose.xlu0.b32.cont [3/8] (short) (narrow) %v3854_v21, 8  ;;  %3560 = vxpose.xlu1.b32.cont [7/8] (short) (narrow) %v3512_v43, 8 }
 0x849   : > { %10096 = vlog2.f32 %v3832_v15  ;;  %v3392_v47 = vpop.xlane.xlu0 %3391 }
 0x84a   : > { %v3855_v63 = vadd.f32 %v3843_v27, %v12957_v60  ;;  %10098 = vlog2.f32 %v3380_v55 }
 0x84b   : > { %v10093_v33 = vpop.eup %10092 }
 0x84c   : > { %v3845_v26 = vmul.f32 0.6931472, %v10093_v33  ;;  %v3835_v40 = vpop.xlane.xlu1 %3834  ;;  %3863 = vxpose.xlu0.b32.cont [4/8] (short) (narrow) %v3855_v63, 8  ;;  %3561 = vxpose.xlu1.b32.end [8/8] (short) (narrow) %v3513_v48, 8 }
 0x84d   : > { %10100 = vlog2.f32 %v3835_v40  ;;  %v3398_v17 = vpop.xlane.xlu0 %3397  ;;  %v13096_v40 = vpop.f32.mrb[24].mxu1 }
 0x84e   : > { %v3856_v37 = vadd.f32 %v3845_v26, %v12969_v62 }
 0x84f   : > { %v10095_v53 = vpop.eup %10094 }
 0x850   : > { %v3847_v61 = vmul.f32 0.6931472, %v10095_v53  ;;  %v3383_v28 = vpop.xlane.xlu1 %3382  ;;  %3864 = vxpose.xlu0.b32.cont [5/8] (short) (narrow) %v3856_v37, 8  ;;  %v13098_v37 = vpop.f32.mrb[25].mxu1 }
 0x851   : > { %10102 = vlog2.f32 %v3383_v28  ;;  %v3428_v55 = vpop.xlane.xlu0 %3427 }
 0x852   : > { %v3857_v42 = vadd.f32 %v3847_v61, %v12967_v35  ;;  %10104 = vlog2.f32 %v3386_v1 }
 0x853   : > { %v10097_v24 = vpop.eup %10096 }
 0x854   : > { %v3849_v32 = vmul.f32 0.6931472, %v10097_v24  ;;  %3865 = vxpose.xlu0.b32.cont [6/8] (short) (narrow) %v3857_v42, 8  ;;  %v10099_v60 = vpop.eup %10098  ;;  %v3389_v25 = vpop.xlane.xlu1 %3388 }
 0x855   : > { %10106 = vlog2.f32 %v3389_v25  ;;  %v3451_v62 = vmul.f32 0.6931472, %v10099_v60  ;;  %v3434_v61 = vpop.xlane.xlu0 %3433 }
 0x856   : > { %v3858_v41 = vadd.f32 %v3849_v32, %v12977_v52  ;;  %10108 = vlog2.f32 %v3392_v47 }
 0x857   : > { %v10101_v36 = vpop.eup %10100  ;;  %v3498_v59 = vadd.f32 %v3451_v62, %v12985_v12 }
 0x858   : > { %v3851_v5 = vmul.f32 0.6931472, %v10101_v36  ;;  %3866 = vxpose.xlu0.b32.cont [7/8] (short) (narrow) %v3858_v41, 8  ;;  %v3395_v22 = vpop.xlane.xlu1 %3394 }
 0x859   : > { %10110 = vlog2.f32 %v3395_v22 }
 0x85a   : > { %v3859_v19 = vadd.f32 %v3851_v5, %v12975_v39  ;;  %10112 = vlog2.f32 %v3398_v17  ;;  %v3440_v5 = vpop.xlane.xlu0 %3439 }
 0x85b   : > { %v10103_v31 = vpop.eup %10102 }
 0x85c   : > { %3867 = vxpose.xlu0.b32.end [8/8] (short) (narrow) %v3859_v19, 8  ;;  %v3453_v35 = vmul.f32 0.6931472, %v10103_v31  ;;  %v10105_v57 = vpop.eup %10104  ;;  %v3401_v54 = vpop.xlane.xlu1 %3400 }
 0x85d   : > { %v3455_v52 = vmul.f32 0.6931472, %v10105_v57  ;;  %10114 = vlog2.f32 %v3401_v54 }
 0x85e   : > { %v3499_v56 = vadd.f32 %v3453_v35, %v12983_v8  ;;  %10116 = vlog2.f32 %v3428_v55 }
 0x85f   : > { %v10107_v43 = vpop.eup %10106  ;;  %v3500_v39 = vadd.f32 %v3455_v52, %v12994_v3  ;;  %v13100_v3 = vpop.f32.mrb[26].mxu1 }
 0x860   : > { %3522 = vxpose.xlu0.b32.start [1/8] (short) (narrow) %v3498_v59, 8  ;;  %v3457_v21 = vmul.f32 0.6931472, %v10107_v43  ;;  %v10109_v27 = vpop.eup %10108  ;;  %v3431_v33 = vpop.xlane.xlu1 %3430 }
 0x861   : > { %v3459_v15 = vmul.f32 0.6931472, %v10109_v27  ;;  %10118 = vlog2.f32 %v3431_v33  ;;  %v13103_v28 = vpop.f32.mrb[27].mxu1  ;;  %v3446_v59 = vpop.xlane.xlu0 %3445 }
 0x862   : > { %v3501_v12 = vadd.f32 %v3457_v21, %v12992_v10  ;;  %v13105_v1 = vpop.f32.mrb[28].mxu1  ;;  %10120 = vlog2.f32 %v3434_v61 }
 0x863   : > { %v10111_v48 = vpop.eup %10110  ;;  %v3502_v8 = vadd.f32 %v3459_v15, %v13003_v9  ;;  %v13107_v9 = vpop.f32.mrb[29].mxu1 }
 0x864   : > { %3523 = vxpose.xlu0.b32.cont [2/8] (short) (narrow) %v3499_v56, 8  ;;  %v3461_v63 = vmul.f32 0.6931472, %v10111_v48  ;;  %v10113_v26 = vpop.eup %10112  ;;  %v13109_v24 = vpop.f32.mrb[30].mxu1 }
 0x865   : > { %v3463_v53 = vmul.f32 0.6931472, %v10113_v26  ;;  %v3437_v60 = vpop.xlane.xlu1 %3436  ;;  %v13112_v25 = vpop.f32.mrb[31].mxu1 }
 0x866   : > { %v3503_v10 = vadd.f32 %v3461_v63, %v13001_v7  ;;  %10122 = vlog2.f32 %v3437_v60 }
 0x867   : > { %v10115_v42 = vpop.eup %10114  ;;  %v3504_v41 = vadd.f32 %v3463_v53, %v13010_v18  ;;  %10124 = vlog2.f32 %v3440_v5 }
 0x868   : > { %3524 = vxpose.xlu0.b32.cont [3/8] (short) (narrow) %v3500_v39, 8  ;;  %v3465_v32 = vmul.f32 0.6931472, %v10115_v42  ;;  %v10117_v36 = vpop.eup %10116 }
 0x869   : > { %v3483_v7 = vmul.f32 0.6931472, %v10117_v36  ;;  %v3443_v31 = vpop.xlane.xlu1 %3442 }
 0x86a   : > { %v3505_v62 = vadd.f32 %v3465_v32, %v13012_v51  ;;  %10126 = vlog2.f32 %v3443_v31  ;;  %v13136_v32 = vld [vmem:[%s11420_s14] sm:$0x1] }
 0x86b   : > { %v10119_v47 = vpop.eup %10118  ;;  %v3514_v35 = vadd.f32 %v3483_v7, %v13019_v29  ;;  %10128 = vlog2.f32 %v3446_v59  ;;  %v10860_v7 = vld [vmem:[#allocation2] sm:$0xff] }
 0x86c   : > { %3525 = vxpose.xlu0.b32.cont [4/8] (short) (narrow) %v3501_v12, 8  ;;  %v3485_v19 = vmul.f32 0.6931472, %v10119_v47  ;;  %v10121_v22 = vpop.eup %10120  ;;  %v3945_v5 = vmul.f32 4.0, %v10860_v7 }
 0x86d   : > { %v3487_v18 = vmul.f32 0.6931472, %v10121_v22  ;;  %v3449_v56 = vpop.xlane.xlu1 %3448 }
 0x86e   : > { %v3515_v57 = vadd.f32 %v3485_v19, %v13025_v23  ;;  %10130 = vlog2.f32 %v3449_v56  ;;  %v10861_v19 = vld [vmem:[#allocation2 + $0x28] sm:$0xff]  ;;  %v10863_v56 = vld [vmem:[#allocation2 + $0x30] sm:$0xff] }
 0x86f   : > { %v3516_v51 = vadd.f32 %v3487_v18, %v13029_v44  ;;  %v3950_v31 = vmul.f32 4.0, %v10861_v19  ;;  %v3933_v19 = vld [vmem:[#allocation2 + $0x60] sm:$0xff] }
 0x870   : > { %3526 = vxpose.xlu0.b32.cont [5/8] (short) (narrow) %v3502_v8, 8  ;;  %v10123_v52 = vpop.eup %10122  ;;  %v3900_v8 = vadd.f32 %v12741_v45, %v11394_v49 }
 0x871   : > { %v3489_v17 = vmul.f32 0.6931472, %v10123_v52  ;;  %v10125_v43 = vpop.eup %10124 }
 0x872   : > { %v3491_v21 = vmul.f32 0.6931472, %v10125_v43  ;;  %v10864_v43 = vld [vmem:[#allocation2 + $0x18] sm:$0xff] }
 0x873   : > { %v3517_v29 = vadd.f32 %v3489_v17, %v13039_v13 }
 0x874   : > { %3527 = vxpose.xlu0.b32.cont [6/8] (short) (narrow) %v3503_v10, 8  ;;  %v10127_v54 = vpop.eup %10126  ;;  %v3518_v27 = vadd.f32 %v3491_v21, %v13037_v16  ;;  %v3906_v16 = vadd.f32 %v12790_v14, %v11428_v6  ;;  %v3948_v21 = vmul.f32 4.0, %v10864_v43 }
 0x875   : > { %v3493_v39 = vmul.f32 0.6931472, %v10127_v54  ;;  %v10129_v15 = vpop.eup %10128 }
 0x876   : > { %v3495_v23 = vmul.f32 0.6931472, %v10129_v15 }
 0x877   : > { %v3519_v55 = vadd.f32 %v3493_v39, %v13053_v50 }
 0x878   : > { %3528 = vxpose.xlu0.b32.cont [7/8] (short) (narrow) %v3504_v41, 8  ;;  %v10131_v12 = vpop.eup %10130  ;;  %v3520_v44 = vadd.f32 %v3495_v23, %v13047_v2  ;;  %v10859_v41 = vld [vmem:[#allocation2 + $0x8] sm:$0xff] }
 0x879   : > { %v3497_v48 = vmul.f32 0.6931472, %v10131_v12  ;;  %v3946_v45 = vmul.f32 4.0, %v10859_v41 }
 0x87b   : > { %v3521_v63 = vadd.f32 %v3497_v48, %v13061_v30  ;;  %v10867_v48 = vld [vmem:[#allocation2 + $0x20] sm:$0xff] }
 0x87c   : > { %3529 = vxpose.xlu0.b32.end [8/8] (short) (narrow) %v3505_v62, 8 }
 0x880   : > { %3586 = vxpose.xlu0.b32.start [1/8] (short) (narrow) %v3514_v35, 8  ;;  %v10862_v35 = vld [vmem:[#allocation2 + $0x10] sm:$0xff] }
 0x881   : > { %v3947_v22 = vmul.f32 4.0, %v10862_v35  ;;  %v3934_v35 = vld [vmem:[#allocation2 + $0x68] sm:$0xff] }
 0x884   : > { %3587 = vxpose.xlu0.b32.cont [2/8] (short) (narrow) %v3515_v57, 8 }
 0x888   : > { %3588 = vxpose.xlu0.b32.cont [3/8] (short) (narrow) %v3516_v51, 8  ;;  %v3951_v51 = vmul.f32 4.0, %v10863_v56 }
 0x88c   : > { %3589 = vxpose.xlu0.b32.cont [4/8] (short) (narrow) %v3517_v29, 8  ;;  %v13155_v29 = vld [vmem:[%s11403_s11] sm:$0x1] }
 0x890   : > { %3590 = vxpose.xlu0.b32.cont [5/8] (short) (narrow) %v3518_v27, 8 }
 0x894   : > { %3591 = vxpose.xlu0.b32.cont [6/8] (short) (narrow) %v3519_v55, 8  ;;  %v10866_v55 = vld [vmem:[#allocation2 + $0x38] sm:$0xff] }
 0x895   : > { %v3952_v12 = vmul.f32 4.0, %v10866_v55 }
 0x898   : > { %3592 = vxpose.xlu0.b32.cont [7/8] (short) (narrow) %v3520_v44, 8  ;;  %v3949_v44 = vmul.f32 4.0, %v10867_v48 }
 0x89c   : > { %3593 = vxpose.xlu0.b32.end [8/8] (short) (narrow) %v3521_v63, 8  ;;  %v3929_v63 = vld [vmem:[#allocation2 + $0x40] sm:$0xff] }
 0x8b0   : > { %v3570_v13 = vpop.trf.xlu1 }
 0x8b1   : > { %3619 = vst.msk [vmem:[#allocation3 + $0x1] sm:$0x1] %vm1268_vm3, %v3570_v13 }
 0x8b8   : > { %v3894_v50 = vld [vmem:[#allocation3 + $0x1] sm:$0x1] }
 0x8b9   : > { %v3901_v53 = vsub.f32 %v3900_v8, %v3894_v50 }
 0x8bb   : > { %v13133_v10 = vmul.f32 0.5, %v3901_v53  ;;  %v3953_v53 = vmul.f32 4.0, %v3929_v63 }
 0x8bd   : > { %v3910_v14 = vsub.f32 %v13133_v10, %v11394_v49 }
 0x8bf   : > { %v3913_v18 = vmul.f32 4.0, %v3910_v14 }
 0x8c0   : > { %v3876_v33 = vpop.trf.xlu0 }
 0x8c1   : > { %3892 = vst.msk [vmem:[#allocation4] sm:$0x1] %vm1268_vm3, %v3876_v33  ;;  %v3916_v54 = vadd.f32 %v13155_v29, %v3913_v18  ;;  %v3930_v33 = vld [vmem:[#allocation2 + $0x48] sm:$0xff] }
 0x8c3   : > { %v3979_v13 = vrot.slane %v3916_v54, %v11425_v4  ;;  %v3935_v54 = vld [vmem:[#allocation2 + $0x70] sm:$0xff] }
 0x8c8   : > { %v3896_v26 = vld [vmem:[#allocation4] sm:$0x1] }
 0x8c9   : > { %v3907_v2 = vsub.f32 %v3906_v16, %v3896_v26 }
 0x8cb   : > { %v13129_v61 = vmul.f32 0.5, %v3907_v2 }
 0x8cd   : > { %v3909_v30 = vsub.f32 %v13129_v61, %v11428_v6 }
 0x8cf   : > { %v3912_v42 = vmul.f32 4.0, %v3909_v30  ;;  %v3954_v30 = vmul.f32 4.0, %v3930_v33 }
 0x8d1   : > { %v3915_v60 = vadd.f32 %v13136_v32, %v3912_v42  ;;  %v3931_v42 = vld [vmem:[#allocation2 + $0x50] sm:$0xff]  ;;  %v13182_v7 = vadd.f32 %v3979_v13, %v3954_v30 }
 0x8d3   : > { %v3975_v36 = vrot.slane %v3915_v60, %v11425_v4  ;;  %v3932_v60 = vld [vmem:[#allocation2 + $0x58] sm:$0xff]  ;;  %v4038_v18 = vsel %vm559_vm2, %v13182_v7, -inf }
 0x8d5   : > { %v13142_v62 = vadd.f32 %v3975_v36, %v3946_v45  ;;  %v13144_v47 = vadd.f32 %v3975_v36, %v3945_v5  ;;  %v13150_v52 = vadd.f32 %v3975_v36, %v3950_v31  ;;  %v13152_v17 = vadd.f32 %v3975_v36, %v3947_v22 }
 0x8d6   : > { %v13162_v15 = vadd.f32 %v3975_v36, %v3951_v51  ;;  %v13164_v23 = vadd.f32 %v3975_v36, %v3948_v21  ;;  %v13171_v8 = vadd.f32 %v3975_v36, %v3952_v12  ;;  %v13173_v26 = vadd.f32 %v3975_v36, %v3949_v44 }
 0x8d7   : > { %v4014_v59 = vsel %vm559_vm2, %v13142_v62, -inf  ;;  %v4011_v57 = vsel %vm559_vm2, %v13144_v47, -inf  ;;  %v4026_v39 = vsel %vm559_vm2, %v13150_v52, -inf  ;;  %v4017_v27 = vsel %vm559_vm2, %v13152_v17, -inf }
 0x8d8   : > { %4015 = vmax.xlane.f32.xlu0 %v4014_v59  ;;  %4012 = vmax.xlane.f32.xlu1 %v4011_v57  ;;  %v4029_v16 = vsel %vm559_vm2, %v13162_v15, -inf  ;;  %v4020_v50 = vsel %vm559_vm2, %v13164_v23, -inf  ;;  %v4032_v14 = vsel %vm559_vm2, %v13171_v8, -inf  ;;  %v4023_v41 = vsel %vm559_vm2, %v13173_v26, -inf }
 0x8d9   : > { %v13180_v45 = vadd.f32 %v3979_v13, %v3953_v53  ;;  %v3955_v36 = vmul.f32 4.0, %v3931_v42  ;;  %v3956_v5 = vmul.f32 4.0, %v3932_v60  ;;  %v3897_v31 = vadd.f32 %v12708_v58, %v11394_v49  ;;  %v3936_v58 = vld [vmem:[#allocation2 + $0x78] sm:$0xff] }
 0x8da   : > { %v3957_v51 = vmul.f32 4.0, %v3933_v19  ;;  %v3958_v21 = vmul.f32 4.0, %v3934_v35  ;;  %v3959_v44 = vmul.f32 4.0, %v3935_v54  ;;  %v3960_v33 = vmul.f32 4.0, %v3936_v58 }
 0x8db   : > { %v4035_v22 = vsel %vm559_vm2, %v13180_v45, -inf  ;;  %v13190_v59 = vadd.f32 %v3979_v13, %v3955_v36  ;;  %v13192_v57 = vadd.f32 %v3979_v13, %v3956_v5  ;;  %v4536_v42 = vmul.f32 4.0, %v13096_v40 }
 0x8dc   : > { %4027 = vmax.xlane.f32.xlu0 %v4026_v39  ;;  %4018 = vmax.xlane.f32.xlu1 %v4017_v27  ;;  %v13194_v39 = vadd.f32 %v3979_v13, %v3957_v51  ;;  %v13202_v48 = vadd.f32 %v3979_v13, %v3958_v21  ;;  %v13212_v30 = vadd.f32 %v3979_v13, %v3960_v33  ;;  %v4537_v36 = vmul.f32 4.0, %v13103_v28 }
 0x8dd   : > { %v4041_v55 = vsel %vm559_vm2, %v13190_v59, -inf  ;;  %v4044_v12 = vsel %vm559_vm2, %v13192_v57, -inf  ;;  %v4540_v5 = vmul.f32 4.0, %v13105_v1  ;;  %v4539_v19 = vmul.f32 4.0, %v13107_v9 }
 0x8de   : > { %v4050_v53 = vsel %vm559_vm2, %v13202_v48, -inf  ;;  %v3903_v54 = vadd.f32 %v12801_v38, %v11428_v6  ;;  %v3938_v38 = vld [vmem:[#allocation2 + $0x88] sm:$0xff] }
 0x8e0   : > { %4030 = vmax.xlane.f32.xlu0 %v4029_v16  ;;  %4021 = vmax.xlane.f32.xlu1 %v4020_v50  ;;  %v3538_v2 = vpop.trf.xlu0  ;;  %v13206_v16 = vadd.f32 %v3979_v13, %v3959_v44  ;;  %v4541_v13 = vmul.f32 4.0, %v13112_v25 }
 0x8e1   : > { %3618 = vst.msk [vmem:[#allocation3] sm:$0x1] %vm1268_vm3, %v3538_v2  ;;  %v4047_v2 = vsel %vm559_vm2, %v13194_v39, -inf }
 0x8e2   : > { %v4053_v35 = vsel %vm559_vm2, %v13206_v16, -inf }
 0x8e4   : > { %4033 = vmax.xlane.f32.xlu0 %v4032_v14  ;;  %4024 = vmax.xlane.f32.xlu1 %v4023_v41  ;;  %v4535_v14 = vmul.f32 4.0, %v13098_v37  ;;  %v4538_v41 = vmul.f32 4.0, %v13100_v3  ;;  %v4056_v37 = vsel %vm559_vm2, %v13212_v30, -inf }
 0x8e8   : > { %v3893_v56 = vld [vmem:[#allocation3] sm:$0x1]  ;;  %4036 = vmax.xlane.f32.xlu0 %v4035_v22  ;;  %4039 = vmax.xlane.f32.xlu1 %v4038_v18 }
 0x8e9   : > { %v3898_v43 = vsub.f32 %v3897_v31, %v3893_v56  ;;  %v4542_v31 = vmul.f32 4.0, %v13109_v24 }
 0x8eb   : > { %v13196_v27 = vmul.f32 0.5, %v3898_v43 }
 0x8ec   : > { %4042 = vmax.xlane.f32.xlu0 %v4041_v55  ;;  %4045 = vmax.xlane.f32.xlu1 %v4044_v12 }
 0x8ed   : > { %v3918_v63 = vsub.f32 %v13196_v27, %v11394_v49 }
 0x8ef   : > { %v3919_v50 = vmul.f32 4.0, %v3918_v63 }
 0x8f0   : > { %4048 = vmax.xlane.f32.xlu0 %v4047_v2  ;;  %4051 = vmax.xlane.f32.xlu1 %v4050_v53  ;;  %v3937_v53 = vld [vmem:[#allocation2 + $0x80] sm:$0xff] }
 0x8f1   : > { %v3920_v60 = vadd.f32 %v13155_v29, %v3919_v50 }
 0x8f3   : > { %v4547_v40 = vrot.slane %v3920_v60, %v11425_v4  ;;  %v3940_v60 = vld [vmem:[#allocation2 + $0x98] sm:$0xff] }
 0x8f4   : > { %4054 = vmax.xlane.f32.xlu0 %v4053_v35  ;;  %4057 = vmax.xlane.f32.xlu1 %v4056_v37  ;;  %v3942_v37 = vld [vmem:[#allocation2 + $0xa8] sm:$0xff] }
 0x8f5   : > { %v13228_v3 = vadd.f32 %v4547_v40, %v4536_v42  ;;  %v13230_v28 = vadd.f32 %v4547_v40, %v4535_v14  ;;  %v13232_v1 = vadd.f32 %v4547_v40, %v4538_v41  ;;  %v13234_v9 = vadd.f32 %v4547_v40, %v4537_v36  ;;  %v3939_v14 = vld [vmem:[#allocation2 + $0x90] sm:$0xff] }
 0x8f6   : > { %v13236_v24 = vadd.f32 %v4547_v40, %v4540_v5  ;;  %v13238_v25 = vadd.f32 %v4547_v40, %v4539_v19  ;;  %v13240_v29 = vadd.f32 %v4547_v40, %v4542_v31  ;;  %v13242_v22 = vadd.f32 %v4547_v40, %v4541_v13 }
 0x8f7   : > { %v4557_v18 = vsel %vm559_vm2, %v13230_v28, -inf  ;;  %v4560_v56 = vsel %vm559_vm2, %v13228_v3, -inf  ;;  %v4563_v51 = vsel %vm559_vm2, %v13234_v9, -inf  ;;  %v4566_v21 = vsel %vm559_vm2, %v13232_v1, -inf }
 0x8f8   : > { %4558 = vmax.xlane.f32.xlu1 %v4557_v18  ;;  %v4569_v58 = vsel %vm559_vm2, %v13238_v25, -inf  ;;  %v4572_v44 = vsel %vm559_vm2, %v13236_v24, -inf  ;;  %v4575_v50 = vsel %vm559_vm2, %v13242_v22, -inf  ;;  %v4578_v41 = vsel %vm559_vm2, %v13240_v29, -inf  ;;  %v3941_v18 = vld [vmem:[#allocation2 + $0xa0] sm:$0xff] }
 0x8f9   : > { %v3962_v36 = vmul.f32 4.0, %v3938_v38  ;;  %v3961_v19 = vmul.f32 4.0, %v3937_v53  ;;  %v3964_v40 = vmul.f32 4.0, %v3940_v60  ;;  %v3963_v35 = vmul.f32 4.0, %v3939_v14 }
 0x8fc   : > { %4561 = vmax.xlane.f32.xlu1 %v4560_v56 }
 0x900   : > { %4564 = vmax.xlane.f32.xlu1 %v4563_v51  ;;  %v3602_v43 = vpop.trf.xlu0 }
 0x901   : > { %3620 = vst.msk [vmem:[#allocation3 + $0x2] sm:$0x1] %vm1268_vm3, %v3602_v43 }
 0x904   : > { %4567 = vmax.xlane.f32.xlu1 %v4566_v21  ;;  %v3966_v21 = vmul.f32 4.0, %v3942_v37  ;;  %v5199_v37 = vld [vmem:[%s11032_s5 + $0x20] sm:$0xff] }
 0x908   : > { %v3895_v55 = vld [vmem:[#allocation3 + $0x2] sm:$0x1]  ;;  %4570 = vmax.xlane.f32.xlu1 %v4569_v58  ;;  %v3944_v58 = vld [vmem:[#allocation2 + $0xb8] sm:$0xff] }
 0x909   : > { %v3904_v12 = vsub.f32 %v3903_v54, %v3895_v55  ;;  %v3965_v54 = vmul.f32 4.0, %v3941_v18  ;;  %v3943_v55 = vld [vmem:[#allocation2 + $0xb0] sm:$0xff]  ;;  %v5200_v18 = vld [vmem:[%s11032_s5 + $0x28] sm:$0xff] }
 0x90a   : > { %v3967_v38 = vmul.f32 4.0, %v3943_v55 }
 0x90b   : > { %v13259_v63 = vmul.f32 0.5, %v3904_v12 }
 0x90c   : > { %4573 = vmax.xlane.f32.xlu1 %v4572_v44 }
 0x90d   : > { %v3911_v33 = vsub.f32 %v13259_v63, %v11428_v6 }
 0x90f   : > { %v3914_v2 = vmul.f32 4.0, %v3911_v33 }
 0x910   : > { %4576 = vmax.xlane.f32.xlu1 %v4575_v50 }
 0x911   : > { %v3917_v42 = vadd.f32 %v13136_v32, %v3914_v2  ;;  %v3968_v2 = vmul.f32 4.0, %v3944_v58 }
 0x913   : > { %v3983_v5 = vrot.slane %v3917_v42, %v11425_v4 }
 0x914   : > { %4579 = vmax.xlane.f32.xlu1 %v4578_v41 }
 0x915   : > { %v13269_v31 = vadd.f32 %v3983_v5, %v3962_v36  ;;  %v13271_v13 = vadd.f32 %v3983_v5, %v3961_v19  ;;  %v13277_v51 = vadd.f32 %v3983_v5, %v3964_v40  ;;  %v13279_v43 = vadd.f32 %v3983_v5, %v3963_v35  ;;  %v5195_v19 = vld [vmem:[%s11032_s5] sm:$0xff]  ;;  %v5196_v40 = vld [vmem:[%s11032_s5 + $0x8] sm:$0xff]  ;;  %v5197_v35 = vld [vmem:[%s11032_s5 + $0x10] sm:$0xff] }
 0x916   : > { %v13285_v33 = vadd.f32 %v3983_v5, %v3966_v21  ;;  %v13287_v50 = vadd.f32 %v3983_v5, %v3965_v54  ;;  %v13293_v60 = vadd.f32 %v3983_v5, %v3968_v2  ;;  %v13295_v14 = vadd.f32 %v3983_v5, %v3967_v38  ;;  %9136 = vmatprep.mubr.msk.f32.mxu0 %vm269_vm0, %v5195_v19  ;;  %v5198_v5 = vld [vmem:[%s11032_s5 + $0x18] sm:$0xff] }
 0x917   : > { %v4062_v32 = vsel %vm559_vm2, %v13269_v31, -inf  ;;  %v4059_v56 = vsel %vm559_vm2, %v13271_v13, -inf  ;;  %v4068_v12 = vsel %vm559_vm2, %v13277_v51, -inf  ;;  %v4065_v44 = vsel %vm559_vm2, %v13279_v43, -inf  ;;  %9137 = vmatmul.mubr.msk.f32.vlgmr.msra.gmra.mrb[32].mxu0 %vm269_vm0, %v5196_v40 }
 0x918   : > { %4063 = vmax.xlane.f32.xlu1 %v4062_v32  ;;  %4060 = vmax.xlane.f32.xlu0 %v4059_v56  ;;  %v4074_v53 = vsel %vm559_vm2, %v13285_v33, -inf  ;;  %v4071_v42 = vsel %vm559_vm2, %v13287_v50, -inf  ;;  %v4080_v41 = vsel %vm559_vm2, %v13293_v60, -inf  ;;  %v4077_v36 = vsel %vm559_vm2, %v13295_v14, -inf  ;;  %v5201_v32 = vld [vmem:[%s11032_s5 + $0x30] sm:$0xff]  ;;  %v5202_v56 = vld [vmem:[%s11032_s5 + $0x38] sm:$0xff] }
 0x919   : > { %9139 = vmatprep.mubr.msk.f32.mxu0 %vm269_vm0, %v5197_v35  ;;  %9505 = vmatpush3.bf16.xpose.msk.msra.mxu0 %vm11036_vm1, %v11071_v11 }
 0x91a   : > { %9508 = vmatprep.subr.msk.bf16.mxu0 %vm11036_vm1, %v11102_v20 }
 0x91b   : > { %9140 = vmatmul.mubr.msk.f32.gmra.mrb[34].mxu0 %vm269_vm0, %v5198_v5 }
 0x91c   : > { %4069 = vmax.xlane.f32.xlu1 %v4068_v12  ;;  %4066 = vmax.xlane.f32.xlu0 %v4065_v44 }
 0x91d   : > { %9142 = vmatprep.mubr.msk.f32.mxu0 %vm269_vm0, %v5199_v37 }
 0x91f   : > { %9143 = vmatmul.mubr.msk.f32.gmra.mrb[36].mxu0 %vm269_vm0, %v5200_v18 }
 0x920   : > { %4075 = vmax.xlane.f32.xlu1 %v4074_v53  ;;  %4072 = vmax.xlane.f32.xlu0 %v4071_v42 }
 0x921   : > { %9145 = vmatprep.mubr.msk.f32.mxu0 %vm269_vm0, %v5201_v32  ;;  %9511 = vmatpush3.bf16.xpose.msk.msra.mxu0 %vm11036_vm1, %v11102_v20 }
 0x922   : > { %9514 = vmatprep.subr.msk.bf16.mxu0 %vm11036_vm1, %v11149_v34 }
 0x923   : > { %9146 = vmatmul.mubr.msk.f32.gmra.mrb[38].mxu0 %vm269_vm0, %v5202_v56 }
 0x924   : > { %4081 = vmax.xlane.f32.xlu1 %v4080_v41  ;;  %4078 = vmax.xlane.f32.xlu0 %v4077_v36 }
 0x929   : > { %9517 = vmatpush3.bf16.xpose.msk.msra.mxu0 %vm11036_vm1, %v11149_v34 }
 0x92a   : > { %9520 = vmatprep.subr.msk.bf16.mxu0 %vm11036_vm1, %v11185_v46 }
 0x931   : > { %9523 = vmatpush3.bf16.xpose.msk.msra.mxu0 %vm11036_vm1, %v11185_v46 }
 0x932   : > { %9550 = vmatprep.subr.msk.bf16.mxu0 %vm11036_vm1, %v11071_v11 }
 0x965   : > { %v13341_v21 = vpop.xlane.xlu1 %4012  ;;  %v13343_v54 = vpop.xlane.xlu0 %4015 }
 0x966   : > { %v4083_v58 = vsub.f32 %v13144_v47, %v13341_v21  ;;  %v4084_v55 = vsub.f32 %v13142_v62, %v13343_v54 }
 0x968   : > { %v4107_v12 = vmul.f32 1.442695, %v4083_v58  ;;  %v4109_v44 = vmul.f32 1.442695, %v4084_v55 }
 0x969   : > { %v13349_v2 = vpop.xlane.xlu1 %4018  ;;  %v13351_v38 = vpop.xlane.xlu0 %4027 }
 0x96a   : > { %10132 = vpow2.f32 %v4107_v12  ;;  %v4085_v53 = vsub.f32 %v13152_v17, %v13349_v2  ;;  %v4088_v41 = vsub.f32 %v13150_v52, %v13351_v38 }
 0x96b   : > { %10134 = vpow2.f32 %v4109_v44 }
 0x96c   : > { %v4111_v42 = vmul.f32 1.442695, %v4085_v53  ;;  %v4117_v40 = vmul.f32 1.442695, %v4088_v41 }
 0x96d   : > { %v13357_v36 = vpop.xlane.xlu1 %4021  ;;  %v13359_v47 = vpop.xlane.xlu0 %4030 }
 0x96e   : > { %10136 = vpow2.f32 %v4111_v42  ;;  %v4086_v62 = vsub.f32 %v13164_v23, %v13357_v36  ;;  %v4089_v19 = vsub.f32 %v13162_v15, %v13359_v47 }
 0x970   : > { %v4113_v35 = vmul.f32 1.442695, %v4086_v62  ;;  %v4119_v18 = vmul.f32 1.442695, %v4089_v19 }
 0x971   : > { %v13365_v5 = vpop.xlane.xlu1 %4024  ;;  %v13367_v17 = vpop.xlane.xlu0 %4033 }
 0x972   : > { %10138 = vpow2.f32 %v4113_v35  ;;  %v4087_v52 = vsub.f32 %v13173_v26, %v13365_v5  ;;  %v4090_v37 = vsub.f32 %v13171_v8, %v13367_v17 }
 0x973   : > { %10140 = vpow2.f32 %v4117_v40 }
 0x974   : > { %v10133_v32 = vpop.eup %10132  ;;  %v4115_v23 = vmul.f32 1.442695, %v4087_v52  ;;  %v4121_v56 = vmul.f32 1.442695, %v4090_v37 }
 0x975   : > { %v10135_v58 = vpop.eup %10134  ;;  %v13373_v15 = vpop.xlane.xlu1 %4039  ;;  %v4155_v12 = vsel %vm559_vm2, %v10133_v32, 0.0 }
 0x976   : > { %v13375_v55 = vpop.xlane.xlu0 %4036  ;;  %10142 = vpow2.f32 %v4115_v23  ;;  %v4092_v44 = vsub.f32 %v13182_v7, %v13373_v15  ;;  %4156 = vadd.xlane.f32.xlu0 %v4155_v12  ;;  %v4158_v8 = vsel %vm559_vm2, %v10135_v58, 0.0 }
 0x977   : > { %v4091_v26 = vsub.f32 %v13180_v45, %v13375_v55  ;;  %10144 = vpow2.f32 %v4119_v18  ;;  %4159 = vadd.xlane.f32.xlu1 %v4158_v8 }
 0x978   : > { %v10137_v53 = vpop.eup %10136  ;;  %10146 = vpow2.f32 %v4121_v56  ;;  %v4125_v42 = vmul.f32 1.442695, %v4092_v44 }
 0x979   : > { %v4123_v41 = vmul.f32 1.442695, %v4091_v26  ;;  %v13383_v62 = vpop.xlane.xlu1 %4045  ;;  %v4161_v40 = vsel %vm559_vm2, %v10137_v53, 0.0 }
 0x97a   : > { %v13385_v19 = vpop.xlane.xlu0 %4042  ;;  %v4094_v7 = vsub.f32 %v13192_v57, %v13383_v62  ;;  %4162 = vadd.xlane.f32.xlu0 %v4161_v40  ;;  %10148 = vpow2.f32 %v4125_v42 }
 0x97b   : > { %v4093_v45 = vsub.f32 %v13190_v59, %v13385_v19  ;;  %10150 = vpow2.f32 %v4123_v41 }
 0x97c   : > { %v10139_v35 = vpop.eup %10138  ;;  %v4129_v52 = vmul.f32 1.442695, %v4094_v7 }
 0x97d   : > { %v4127_v37 = vmul.f32 1.442695, %v4093_v45  ;;  %v13392_v18 = vpop.xlane.xlu1 %4051  ;;  %v4164_v23 = vsel %vm559_vm2, %v10139_v35, 0.0  ;;  %v10141_v56 = vpop.eup %10140 }
 0x97e   : > { %v13394_v32 = vpop.xlane.xlu0 %4048  ;;  %v4096_v58 = vsub.f32 %v13202_v48, %v13392_v18  ;;  %4165 = vadd.xlane.f32.xlu1 %v4164_v23  ;;  %10152 = vpow2.f32 %v4129_v52  ;;  %v4170_v41 = vsel %vm559_vm2, %v10141_v56, 0.0 }
 0x97f   : > { %v4095_v57 = vsub.f32 %v13194_v39, %v13394_v32  ;;  %10154 = vpow2.f32 %v4127_v37 }
 0x980   : > { %v10143_v59 = vpop.eup %10142  ;;  %v4133_v12 = vmul.f32 1.442695, %v4096_v58 }
 0x981   : > { %v4131_v44 = vmul.f32 1.442695, %v4095_v57  ;;  %v10145_v26 = vpop.eup %10144  ;;  %v13401_v8 = vpop.xlane.xlu1 %4057  ;;  %v4167_v42 = vsel %vm559_vm2, %v10143_v59, 0.0 }
 0x982   : > { %v13403_v53 = vpop.xlane.xlu0 %4054  ;;  %v10147_v40 = vpop.eup %10146  ;;  %v4098_v48 = vsub.f32 %v13212_v30, %v13401_v8  ;;  %4168 = vadd.xlane.f32.xlu0 %v4167_v42  ;;  %4171 = vadd.xlane.f32.xlu1 %v4170_v41  ;;  %10156 = vpow2.f32 %v4133_v12  ;;  %v4173_v37 = vsel %vm559_vm2, %v10145_v26, 0.0 }
 0x983   : > { %v4097_v39 = vsub.f32 %v13206_v16, %v13403_v53  ;;  %10158 = vpow2.f32 %v4131_v44  ;;  %v4176_v23 = vsel %vm559_vm2, %v10147_v40, 0.0 }
 0x984   : > { %v4137_v7 = vmul.f32 1.442695, %v4098_v48  ;;  %v10149_v35 = vpop.eup %10148 }
 0x985   : > { %v4135_v45 = vmul.f32 1.442695, %v4097_v39  ;;  %v13411_v52 = vpop.xlane.xlu1 %4558  ;;  %v10151_v56 = vpop.eup %10150  ;;  %v4182_v59 = vsel %vm559_vm2, %v10149_v35, 0.0 }
 0x986   : > { %v4581_v30 = vsub.f32 %v13230_v28, %v13411_v52  ;;  %4174 = vadd.xlane.f32.xlu0 %v4173_v37  ;;  %4177 = vadd.xlane.f32.xlu1 %v4176_v23  ;;  %10160 = vpow2.f32 %v4137_v7  ;;  %v4179_v12 = vsel %vm559_vm2, %v10151_v56, 0.0 }
 0x987   : > { %10162 = vpow2.f32 %v4135_v45 }
 0x988   : > { %v4589_v16 = vmul.f32 1.442695, %v4581_v30  ;;  %v10153_v58 = vpop.eup %10152 }
 0x989   : > { %v13417_v57 = vpop.xlane.xlu1 %4561  ;;  %v10155_v44 = vpop.eup %10154  ;;  %v4188_v40 = vsel %vm559_vm2, %v10153_v58, 0.0 }
 0x98a   : > { %v4582_v26 = vsub.f32 %v13228_v3, %v13417_v57  ;;  %4183 = vadd.xlane.f32.xlu1 %v4182_v59  ;;  %4180 = vadd.xlane.f32.xlu0 %v4179_v12  ;;  %10164 = vpow2.f32 %v4589_v16  ;;  %v4185_v48 = vsel %vm559_vm2, %v10155_v44, 0.0 }
 0x98c   : > { %v4591_v28 = vmul.f32 1.442695, %v4582_v26  ;;  %v10157_v42 = vpop.eup %10156 }
 0x98d   : > { %v13423_v41 = vpop.xlane.xlu1 %4564  ;;  %v10159_v39 = vpop.eup %10158  ;;  %v4194_v37 = vsel %vm559_vm2, %v10157_v42, 0.0 }
 0x98e   : > { %10166 = vpow2.f32 %v4591_v28  ;;  %v4583_v7 = vsub.f32 %v13234_v9, %v13423_v41  ;;  %4189 = vadd.xlane.f32.xlu1 %v4188_v40  ;;  %4186 = vadd.xlane.f32.xlu0 %v4185_v48  ;;  %v4191_v23 = vsel %vm559_vm2, %v10159_v39, 0.0 }
 0x990   : > { %v4593_v45 = vmul.f32 1.442695, %v4583_v7  ;;  %v10161_v3 = vpop.eup %10160 }
 0x991   : > { %v13429_v35 = vpop.xlane.xlu1 %4567  ;;  %v10163_v56 = vpop.eup %10162  ;;  %v4200_v9 = vsel %vm559_vm2, %v10161_v3, 0.0 }
 0x992   : > { %10168 = vpow2.f32 %v4593_v45  ;;  %v4584_v30 = vsub.f32 %v13232_v1, %v13429_v35  ;;  %4195 = vadd.xlane.f32.xlu1 %v4194_v37  ;;  %4192 = vadd.xlane.f32.xlu0 %v4191_v23  ;;  %v4197_v59 = vsel %vm559_vm2, %v10163_v56, 0.0 }
 0x994   : > { %v4595_v16 = vmul.f32 1.442695, %v4584_v30  ;;  %v10165_v12 = vpop.eup %10164 }
 0x995   : > { %v13435_v58 = vpop.xlane.xlu1 %4570  ;;  %v4605_v40 = vsel %vm559_vm2, %v10165_v12, 0.0 }
 0x996   : > { %10170 = vpow2.f32 %v4595_v16  ;;  %v4585_v44 = vsub.f32 %v13238_v25, %v13435_v58  ;;  %4201 = vadd.xlane.f32.xlu1 %v4200_v9  ;;  %4198 = vadd.xlane.f32.xlu0 %v4197_v59 }
 0x998   : > { %v10167_v26 = vpop.eup %10166  ;;  %v4597_v28 = vmul.f32 1.442695, %v4585_v44 }
 0x999   : > { %v13441_v42 = vpop.xlane.xlu1 %4573  ;;  %v4608_v1 = vsel %vm559_vm2, %v10167_v26, 0.0 }
 0x99a   : > { %10172 = vpow2.f32 %v4597_v28  ;;  %v4586_v48 = vsub.f32 %v13236_v24, %v13441_v42  ;;  %4609 = vadd.xlane.f32.xlu1 %v4608_v1  ;;  %4606 = vadd.xlane.f32.xlu0 %v4605_v40 }
 0x99c   : > { %v10169_v39 = vpop.eup %10168  ;;  %v4599_v7 = vmul.f32 1.442695, %v4586_v48 }
 0x99d   : > { %v13447_v45 = vpop.xlane.xlu1 %4576  ;;  %v4611_v25 = vsel %vm559_vm2, %v10169_v39, 0.0 }
 0x99e   : > { %10174 = vpow2.f32 %v4599_v7  ;;  %v4587_v3 = vsub.f32 %v13242_v22, %v13447_v45  ;;  %4612 = vadd.xlane.f32.xlu0 %v4611_v25 }
 0x9a0   : > { %v10171_v37 = vpop.eup %10170  ;;  %v4601_v23 = vmul.f32 1.442695, %v4587_v3 }
 0x9a1   : > { %v13452_v56 = vpop.xlane.xlu1 %4579  ;;  %v4614_v30 = vsel %vm559_vm2, %v10171_v37, 0.0 }
 0x9a2   : > { %10176 = vpow2.f32 %v4601_v23  ;;  %v4588_v24 = vsub.f32 %v13240_v29, %v13452_v56  ;;  %4615 = vadd.xlane.f32.xlu1 %v4614_v30 }
 0x9a4   : > { %v10173_v16 = vpop.eup %10172  ;;  %v4603_v9 = vmul.f32 1.442695, %v4588_v24 }
 0x9a5   : > { %v13457_v59 = vpop.xlane.xlu1 %4063  ;;  %v13459_v12 = vpop.xlane.xlu0 %4060  ;;  %v4617_v22 = vsel %vm559_vm2, %v10173_v16, 0.0 }
 0x9a6   : > { %10178 = vpow2.f32 %v4603_v9  ;;  %v4100_v44 = vsub.f32 %v13269_v31, %v13457_v59  ;;  %v4099_v26 = vsub.f32 %v13271_v13, %v13459_v12  ;;  %4618 = vadd.xlane.f32.xlu0 %v4617_v22 }
 0x9a8   : > { %v10175_v28 = vpop.eup %10174  ;;  %v4141_v1 = vmul.f32 1.442695, %v4100_v44  ;;  %v4139_v29 = vmul.f32 1.442695, %v4099_v26 }
 0x9a9   : > { %v13466_v40 = vpop.xlane.xlu1 %4069  ;;  %v13468_v48 = vpop.xlane.xlu0 %4066  ;;  %v4620_v39 = vsel %vm559_vm2, %v10175_v28, 0.0 }
 0x9aa   : > { %10180 = vpow2.f32 %v4141_v1  ;;  %v4102_v7 = vsub.f32 %v13277_v51, %v13466_v40  ;;  %v4101_v31 = vsub.f32 %v13279_v43, %v13468_v48  ;;  %4621 = vadd.xlane.f32.xlu1 %v4620_v39 }
 0x9ab   : > { %10182 = vpow2.f32 %v4139_v29 }
 0x9ac   : > { %v10177_v13 = vpop.eup %10176  ;;  %v4145_v25 = vmul.f32 1.442695, %v4102_v7  ;;  %v4143_v3 = vmul.f32 1.442695, %v4101_v31 }
 0x9ad   : > { %v13475_v37 = vpop.xlane.xlu1 %4075  ;;  %v13477_v23 = vpop.xlane.xlu0 %4072  ;;  %v4623_v30 = vsel %vm559_vm2, %v10177_v13, 0.0 }
 0x9ae   : > { %10184 = vpow2.f32 %v4145_v25  ;;  %v4104_v24 = vsub.f32 %v13285_v33, %v13475_v37  ;;  %v4103_v51 = vsub.f32 %v13287_v50, %v13477_v23  ;;  %4624 = vadd.xlane.f32.xlu0 %v4623_v30 }
 0x9af   : > { %10186 = vpow2.f32 %v4143_v3 }
 0x9b0   : > { %v10179_v43 = vpop.eup %10178  ;;  %v4149_v16 = vmul.f32 1.442695, %v4104_v24  ;;  %v4147_v9 = vmul.f32 1.442695, %v4103_v51 }
 0x9b1   : > { %v13484_v22 = vpop.xlane.xlu1 %4081  ;;  %v13486_v44 = vpop.xlane.xlu0 %4078  ;;  %v4626_v26 = vsel %vm559_vm2, %v10179_v43, 0.0 }
 0x9b2   : > { %10188 = vpow2.f32 %v4149_v16  ;;  %v4106_v28 = vsub.f32 %v13293_v60, %v13484_v22  ;;  %v4105_v33 = vsub.f32 %v13295_v14, %v13486_v44  ;;  %4627 = vadd.xlane.f32.xlu1 %v4626_v26 }
 0x9b3   : > { %10190 = vpow2.f32 %v4147_v9 }
 0x9b4   : > { %v10181_v50 = vpop.eup %10180  ;;  %v4153_v1 = vmul.f32 1.442695, %v4106_v28  ;;  %v4151_v29 = vmul.f32 1.442695, %v4105_v33 }
 0x9b5   : > { %v10183_v39 = vpop.eup %10182  ;;  %v4206_v7 = vsel %vm559_vm2, %v10181_v50, 0.0 }
 0x9b6   : > { %10192 = vpow2.f32 %v4153_v1  ;;  %4207 = vadd.xlane.f32.xlu1 %v4206_v7  ;;  %v4203_v31 = vsel %vm559_vm2, %v10183_v39, 0.0 }
 0x9b7   : > { %10194 = vpow2.f32 %v4151_v29  ;;  %4204 = vadd.xlane.f32.xlu0 %v4203_v31 }
 0x9b8   : > { %v10185_v13 = vpop.eup %10184 }
 0x9b9   : > { %v10187_v25 = vpop.eup %10186  ;;  %v4212_v60 = vsel %vm559_vm2, %v10185_v13, 0.0 }
 0x9ba   : > { %4213 = vadd.xlane.f32.xlu1 %v4212_v60  ;;  %v4209_v14 = vsel %vm559_vm2, %v10187_v25, 0.0 }
 0x9bb   : > { %4210 = vadd.xlane.f32.xlu0 %v4209_v14 }
 0x9bc   : > { %v10189_v3 = vpop.eup %10188 }
 0x9bd   : > { %v10191_v30 = vpop.eup %10190  ;;  %v4218_v24 = vsel %vm559_vm2, %v10189_v3, 0.0 }
 0x9be   : > { %4219 = vadd.xlane.f32.xlu1 %v4218_v24  ;;  %v4215_v51 = vsel %vm559_vm2, %v10191_v30, 0.0 }
 0x9bf   : > { %4216 = vadd.xlane.f32.xlu0 %v4215_v51 }
 0x9c0   : > { %v10193_v43 = vpop.eup %10192 }
 0x9c1   : > { %v10195_v16 = vpop.eup %10194  ;;  %v4224_v9 = vsel %vm559_vm2, %v10193_v43, 0.0 }
 0x9c2   : > { %4225 = vadd.xlane.f32.xlu1 %v4224_v9  ;;  %v4221_v26 = vsel %vm559_vm2, %v10195_v16, 0.0 }
 0x9c3   : > { %4222 = vadd.xlane.f32.xlu0 %v4221_v26 }
 0xa03   : > { %v4157_v28 = vpop.xlane.xlu0 %4156 }
 0xa04   : > { %v4160_v33 = vpop.xlane.xlu1 %4159  ;;  %10196 = vlog2.f32 %v4157_v28 }
 0xa05   : > { %10198 = vlog2.f32 %v4160_v33 }
 0xa07   : > { %v4163_v50 = vpop.xlane.xlu0 %4162 }
 0xa08   : > { %10200 = vlog2.f32 %v4163_v50 }
 0xa0b   : > { %v4166_v1 = vpop.xlane.xlu1 %4165 }
 0xa0c   : > { %10202 = vlog2.f32 %v4166_v1 }
 0xa0e   : > { %v10197_v29 = vpop.eup %10196 }
 0xa0f   : > { %v10199_v39 = vpop.eup %10198  ;;  %v4228_v7 = vmul.f32 0.6931472, %v10197_v29  ;;  %v4172_v31 = vpop.xlane.xlu1 %4171 }
 0xa10   : > { %v4169_v13 = vpop.xlane.xlu0 %4168  ;;  %v4230_v25 = vmul.f32 0.6931472, %v10199_v39 }
 0xa11   : > { %v4275_v60 = vadd.f32 %v4228_v7, %v13341_v21  ;;  %10204 = vlog2.f32 %v4169_v13 }
 0xa12   : > { %v10201_v14 = vpop.eup %10200  ;;  %10206 = vlog2.f32 %v4172_v31  ;;  %v4276_v24 = vadd.f32 %v4230_v25, %v13343_v54 }
 0xa13   : > { %v4178_v3 = vpop.xlane.xlu1 %4177  ;;  %4299 = vxpose.xlu0.b32.start [1/8] (short) (narrow) %v4275_v60, 8  ;;  %v4232_v51 = vmul.f32 0.6931472, %v10201_v14  ;;  %v13506_v14 = vpop.f32.mrb[32].mxu0 }
 0xa14   : > { %v4175_v30 = vpop.xlane.xlu0 %4174 }
 0xa15   : > { %10208 = vlog2.f32 %v4175_v30  ;;  %v4277_v26 = vadd.f32 %v4232_v51, %v13349_v2  ;;  %v13509_v30 = vpop.f32.mrb[33].mxu0 }
 0xa16   : > { %v10203_v43 = vpop.eup %10202 }
 0xa17   : > { %v4184_v16 = vpop.xlane.xlu1 %4183  ;;  %4300 = vxpose.xlu0.b32.cont [2/8] (short) (narrow) %v4276_v24, 8  ;;  %v4234_v28 = vmul.f32 0.6931472, %v10203_v43 }
 0xa18   : > { %v4181_v9 = vpop.xlane.xlu0 %4180  ;;  %10210 = vlog2.f32 %v4184_v16 }
 0xa19   : > { %10212 = vlog2.f32 %v4181_v9  ;;  %v4278_v50 = vadd.f32 %v4234_v28, %v13357_v36 }
 0xa1a   : > { %10214 = vlog2.f32 %v4178_v3 }
 0xa1b   : > { %v10205_v21 = vpop.eup %10204  ;;  %4301 = vxpose.xlu0.b32.cont [3/8] (short) (narrow) %v4277_v26, 8  ;;  %v4190_v29 = vpop.xlane.xlu1 %4189 }
 0xa1c   : > { %v4187_v33 = vpop.xlane.xlu0 %4186  ;;  %v4236_v1 = vmul.f32 0.6931472, %v10205_v21  ;;  %v10207_v54 = vpop.eup %10206 }
 0xa1d   : > { %10216 = vlog2.f32 %v4187_v33  ;;  %v4238_v7 = vmul.f32 0.6931472, %v10207_v54 }
 0xa1e   : > { %v4279_v31 = vadd.f32 %v4236_v1, %v13365_v5  ;;  %10218 = vlog2.f32 %v4190_v29  ;;  %v13512_v5 = vpop.f32.mrb[34].mxu0 }
 0xa1f   : > { %4302 = vxpose.xlu0.b32.cont [4/8] (short) (narrow) %v4278_v50, 8  ;;  %v10209_v39 = vpop.eup %10208  ;;  %v4280_v3 = vadd.f32 %v4238_v7, %v13351_v38  ;;  %v4196_v16 = vpop.xlane.xlu1 %4195 }
 0xa20   : > { %v4193_v2 = vpop.xlane.xlu0 %4192  ;;  %v4240_v36 = vmul.f32 0.6931472, %v10209_v39  ;;  %v13514_v26 = vpop.f32.mrb[35].mxu0 }
 0xa21   : > { %10220 = vlog2.f32 %v4193_v2  ;;  %v13517_v38 = vpop.f32.mrb[36].mxu0 }
 0xa22   : > { %v10211_v13 = vpop.eup %10210  ;;  %v4281_v21 = vadd.f32 %v4240_v36, %v13359_v47  ;;  %10222 = vlog2.f32 %v4196_v16  ;;  %v13520_v54 = vpop.f32.mrb[37].mxu0 }
 0xa23   : > { %v10213_v25 = vpop.eup %10212  ;;  %4303 = vxpose.xlu0.b32.cont [5/8] (short) (narrow) %v4279_v31, 8  ;;  %v4246_v51 = vmul.f32 0.6931472, %v10211_v13  ;;  %v13522_v29 = vpop.f32.mrb[38].mxu0 }
 0xa24   : > { %v4244_v60 = vmul.f32 0.6931472, %v10213_v25  ;;  %v10215_v24 = vpop.eup %10214  ;;  %v4199_v1 = vpop.xlane.xlu0 %4198 }
 0xa25   : > { %v4242_v28 = vmul.f32 0.6931472, %v10215_v24  ;;  %v4284_v33 = vadd.f32 %v4246_v51, %v13373_v15  ;;  %v13524_v39 = vpop.f32.mrb[39].mxu0  ;;  %v4202_v31 = vpop.xlane.xlu1 %4201  ;;  %10224 = vlog2.f32 %v4199_v1 }
 0xa26   : > { %v4283_v43 = vadd.f32 %v4244_v60, %v13375_v55  ;;  %10226 = vlog2.f32 %v4202_v31 }
 0xa27   : > { %v10217_v9 = vpop.eup %10216  ;;  %4304 = vxpose.xlu0.b32.cont [6/8] (short) (narrow) %v4280_v3, 8  ;;  %v4282_v7 = vadd.f32 %v4242_v28, %v13367_v17 }
 0xa28   : > { %4331 = vxpose.xlu1.b32.start [1/8] (short) (narrow) %v4283_v43, 8  ;;  %v4248_v50 = vmul.f32 0.6931472, %v10217_v9  ;;  %v10219_v55 = vpop.eup %10218  ;;  %v4607_v60 = vpop.xlane.xlu0 %4606 }
 0xa29   : > { %v4250_v47 = vmul.f32 0.6931472, %v10219_v55  ;;  %v4610_v36 = vpop.xlane.xlu1 %4609  ;;  %10228 = vlog2.f32 %v4607_v60 }
 0xa2a   : > { %v4285_v13 = vadd.f32 %v4248_v50, %v13385_v19  ;;  %10230 = vlog2.f32 %v4610_v36 }
 0xa2b   : > { %4305 = vxpose.xlu0.b32.cont [7/8] (short) (narrow) %v4281_v21, 8  ;;  %v10221_v2 = vpop.eup %10220  ;;  %v4286_v15 = vadd.f32 %v4250_v47, %v13383_v62 }
 0xa2c   : > { %4332 = vxpose.xlu1.b32.cont [2/8] (short) (narrow) %v4284_v33, 8  ;;  %v4252_v25 = vmul.f32 0.6931472, %v10221_v2  ;;  %v10223_v3 = vpop.eup %10222  ;;  %v4613_v16 = vpop.xlane.xlu0 %4612 }
 0xa2d   : > { %v4254_v24 = vmul.f32 0.6931472, %v10223_v3  ;;  %10232 = vlog2.f32 %v4613_v16 }
 0xa2e   : > { %v4287_v17 = vadd.f32 %v4252_v25, %v13394_v32 }
 0xa2f   : > { %4306 = vxpose.xlu0.b32.end [8/8] (short) (narrow) %v4282_v7, 8  ;;  %v10225_v51 = vpop.eup %10224  ;;  %v4616_v43 = vpop.xlane.xlu1 %4615  ;;  %v4288_v19 = vadd.f32 %v4254_v24, %v13392_v18 }
 0xa30   : > { %4333 = vxpose.xlu1.b32.cont [3/8] (short) (narrow) %v4285_v13, 8  ;;  %v4256_v9 = vmul.f32 0.6931472, %v10225_v51  ;;  %v10227_v28 = vpop.eup %10226  ;;  %10234 = vlog2.f32 %v4616_v43 }
 0xa31   : > { %v4258_v33 = vmul.f32 0.6931472, %v10227_v28 }
 0xa32   : > { %v4289_v50 = vadd.f32 %v4256_v9, %v13403_v53 }
 0xa33   : > { %v4619_v62 = vpop.xlane.xlu0 %4618  ;;  %v10229_v1 = vpop.eup %10228  ;;  %v4290_v32 = vadd.f32 %v4258_v33, %v13401_v8 }
 0xa34   : > { %4334 = vxpose.xlu1.b32.cont [4/8] (short) (narrow) %v4286_v15, 8  ;;  %v4630_v31 = vmul.f32 0.6931472, %v10229_v1  ;;  %v10231_v47 = vpop.eup %10230  ;;  %10236 = vlog2.f32 %v4619_v62 }
 0xa35   : > { %v4632_v2 = vmul.f32 0.6931472, %v10231_v47 }
 0xa36   : > { %v4645_v15 = vadd.f32 %v4630_v31, %v13411_v52 }
 0xa37   : > { %v4622_v21 = vpop.xlane.xlu1 %4621  ;;  %v10233_v25 = vpop.eup %10232  ;;  %v4646_v8 = vadd.f32 %v4632_v2, %v13417_v57 }
 0xa38   : > { %4335 = vxpose.xlu1.b32.cont [5/8] (short) (narrow) %v4287_v17, 8  ;;  %v4634_v60 = vmul.f32 0.6931472, %v10233_v25 }
 0xa3a   : > { %v10235_v36 = vpop.eup %10234  ;;  %v4647_v16 = vadd.f32 %v4634_v60, %v13423_v41 }
 0xa3b   : > { %v4625_v7 = vpop.xlane.xlu0 %4624  ;;  %v4636_v51 = vmul.f32 0.6931472, %v10235_v36 }
 0xa3c   : > { %4336 = vxpose.xlu1.b32.cont [6/8] (short) (narrow) %v4288_v19, 8 }
 0xa3d   : > { %v4648_v57 = vadd.f32 %v4636_v51, %v13429_v35 }
 0xa3e   : > { %v10237_v24 = vpop.eup %10236 }
 0xa3f   : > { %v4628_v55 = vpop.xlane.xlu1 %4627  ;;  %v4638_v28 = vmul.f32 0.6931472, %v10237_v24 }
 0xa40   : > { %4337 = vxpose.xlu1.b32.cont [7/8] (short) (narrow) %v4289_v50, 8 }
 0xa43   : > { %v4208_v18 = vpop.xlane.xlu1 %4207 }
 0xa44   : > { %10238 = vlog2.f32 %v4208_v18  ;;  %4338 = vxpose.xlu1.b32.end [8/8] (short) (narrow) %v4290_v32, 8  ;;  %v4205_v13 = vpop.xlane.xlu0 %4204 }
 0xa45   : > { %10240 = vlog2.f32 %v4205_v13 }
 0xa46   : > { %10242 = vlog2.f32 %v4622_v21 }
 0xa47   : > { %v4214_v3 = vpop.xlane.xlu1 %4213 }
 0xa48   : > { %4653 = vxpose.xlu1.b32.start [1/8] (short) (narrow) %v4645_v15, 8  ;;  %v4211_v53 = vpop.xlane.xlu0 %4210 }
 0xa49   : > { %10244 = vlog2.f32 %v4211_v53 }
 0xa4a   : > { %10246 = vlog2.f32 %v4625_v7 }
 0xa4b   : > { %10248 = vlog2.f32 %v4214_v3  ;;  %v4220_v62 = vpop.xlane.xlu1 %4219 }
 0xa4c   : > { %4654 = vxpose.xlu1.b32.cont [2/8] (short) (narrow) %v4646_v8, 8  ;;  %v4217_v43 = vpop.xlane.xlu0 %4216  ;;  %10250 = vlog2.f32 %v4628_v55  ;;  %v4649_v55 = vadd.f32 %v4638_v28, %v13435_v58 }
 0xa4d   : > { %10252 = vlog2.f32 %v4217_v43 }
 0xa4e   : > { %v10239_v17 = vpop.eup %10238  ;;  %10254 = vlog2.f32 %v4220_v62  ;;  %v5332_v62 = vmul.f32 16.0, %v13509_v30 }
 0xa4f   : > { %v10241_v52 = vpop.eup %10240  ;;  %v4262_v21 = vmul.f32 0.6931472, %v10239_v17 }
 0xa50   : > { %v4260_v19 = vmul.f32 0.6931472, %v10241_v52  ;;  %4655 = vxpose.xlu1.b32.cont [3/8] (short) (narrow) %v4647_v16, 8  ;;  %v10243_v9 = vpop.eup %10242  ;;  %v4223_v32 = vpop.xlane.xlu0 %4222 }
 0xa51   : > { %v4640_v7 = vmul.f32 0.6931472, %v10243_v9  ;;  %v4292_v31 = vadd.f32 %v4262_v21, %v13457_v59  ;;  %10256 = vlog2.f32 %v4223_v32  ;;  %v10868_v21 = vld [vmem:[%s11403_s11] sm:$0x1] }
 0xa52   : > { %v4291_v33 = vadd.f32 %v4260_v19, %v13459_v12  ;;  %v4226_v12 = vpop.xlane.xlu1 %4225 }
 0xa53   : > { %v10245_v50 = vpop.eup %10244  ;;  %v4650_v2 = vadd.f32 %v4640_v7, %v13441_v42  ;;  %10258 = vlog2.f32 %v4226_v12  ;;  %v5338_v7 = vmul.f32 16.0, %v13524_v39 }
 0xa54   : > { %4656 = vxpose.xlu1.b32.cont [4/8] (short) (narrow) %v4648_v57, 8  ;;  %4363 = vxpose.xlu0.b32.start [1/8] (short) (narrow) %v4291_v33, 8  ;;  %v10247_v1 = vpop.eup %10246  ;;  %v4264_v41 = vmul.f32 0.6931472, %v10245_v50  ;;  %v5335_v57 = vmul.f32 16.0, %v13512_v5  ;;  %v5334_v33 = vmul.f32 16.0, %v13514_v26 }
 0xa55   : > { %v10249_v47 = vpop.eup %10248  ;;  %v4642_v35 = vmul.f32 0.6931472, %v10247_v1  ;;  %v5336_v50 = vmul.f32 16.0, %v13520_v54  ;;  %v5339_v1 = vmul.f32 16.0, %v13522_v29 }
 0xa56   : > { %v10251_v18 = vpop.eup %10250  ;;  %v4266_v13 = vmul.f32 0.6931472, %v10249_v47  ;;  %v4293_v15 = vadd.f32 %v4264_v41, %v13468_v48 }
 0xa57   : > { %v10253_v25 = vpop.eup %10252  ;;  %v4644_v53 = vmul.f32 0.6931472, %v10251_v18  ;;  %v4651_v59 = vadd.f32 %v4642_v35, %v13447_v45  ;;  %v4694_v18 = vadd.f32 %v13133_v10, %v11394_v49 }
 0xa58   : > { %4657 = vxpose.xlu1.b32.cont [5/8] (short) (narrow) %v4649_v55, 8  ;;  %4364 = vxpose.xlu0.b32.cont [2/8] (short) (narrow) %v4292_v31, 8  ;;  %v4268_v58 = vmul.f32 0.6931472, %v10253_v25  ;;  %v4294_v60 = vadd.f32 %v4266_v13, %v13466_v40  ;;  %v10255_v3 = vpop.eup %10254 }
 0xa59   : > { %v4270_v8 = vmul.f32 0.6931472, %v10255_v3  ;;  %v4652_v36 = vadd.f32 %v4644_v53, %v13452_v56 }
 0xa5a   : > { %v4295_v42 = vadd.f32 %v4268_v58, %v13477_v23  ;;  %v4690_v23 = vadd.f32 %v13196_v27, %v11394_v49  ;;  %v5337_v27 = vmul.f32 16.0, %v13517_v38  ;;  %v4726_v58 = vld [vmem:[#allocation2 + $0x40] sm:$0xff] }
 0xa5b   : > { %v10257_v24 = vpop.eup %10256  ;;  %v4296_v17 = vadd.f32 %v4270_v8, %v13475_v37  ;;  %v4750_v3 = vmul.f32 16.0, %v4726_v58 }
 0xa5c   : > { %4658 = vxpose.xlu1.b32.cont [6/8] (short) (narrow) %v4650_v2, 8  ;;  %4365 = vxpose.xlu0.b32.cont [3/8] (short) (narrow) %v4293_v15, 8  ;;  %v4272_v48 = vmul.f32 0.6931472, %v10257_v24 }
 0xa5d   : > { %v10259_v51 = vpop.eup %10258 }
 0xa5e   : > { %v4274_v45 = vmul.f32 0.6931472, %v10259_v51  ;;  %v4297_v40 = vadd.f32 %v4272_v48, %v13486_v44  ;;  %v5333_v44 = vmul.f32 16.0, %v13506_v14 }
 0xa60   : > { %4659 = vxpose.xlu1.b32.cont [7/8] (short) (narrow) %v4651_v59, 8  ;;  %4366 = vxpose.xlu0.b32.cont [4/8] (short) (narrow) %v4294_v60, 8  ;;  %v4298_v43 = vadd.f32 %v4274_v45, %v13484_v22  ;;  %v4727_v59 = vld [vmem:[#allocation2 + $0x48] sm:$0xff]  ;;  %v4729_v60 = vld [vmem:[#allocation2 + $0x58] sm:$0xff] }
 0xa61   : > { %v4753_v48 = vmul.f32 16.0, %v4729_v60  ;;  %v10869_v60 = vld [vmem:[%s11420_s14] sm:$0x1] }
 0xa64   : > { %4660 = vxpose.xlu1.b32.end [8/8] (short) (narrow) %v4652_v36, 8  ;;  %4367 = vxpose.xlu0.b32.cont [5/8] (short) (narrow) %v4295_v42, 8  ;;  %v4751_v36 = vmul.f32 16.0, %v4727_v59  ;;  %v4718_v59 = vld [vmem:[#allocation2] sm:$0xff] }
 0xa68   : > { %4368 = vxpose.xlu0.b32.cont [6/8] (short) (narrow) %v4296_v17, 8  ;;  %v4731_v17 = vld [vmem:[#allocation2 + $0x68] sm:$0xff] }
 0xa6c   : > { %4369 = vxpose.xlu0.b32.cont [7/8] (short) (narrow) %v4297_v40, 8 }
 0xa70   : > { %4370 = vxpose.xlu0.b32.end [8/8] (short) (narrow) %v4298_v43, 8  ;;  %v4755_v43 = vmul.f32 16.0, %v4731_v17  ;;  %v4721_v17 = vld [vmem:[#allocation2 + $0x18] sm:$0xff] }
 0xa93   : > { %v4315_v16 = vpop.trf.xlu0 }
 0xa94   : > { %4395 = vst.msk [vmem:[#allocation3] sm:$0x1] %vm1268_vm3, %v4315_v16  ;;  %v4733_v16 = vld [vmem:[#allocation2 + $0x78] sm:$0xff] }
 0xa9b   : > { %v4686_v56 = vld [vmem:[#allocation3] sm:$0x1] }
 0xa9c   : > { %v4691_v52 = vmul.f32 0.25, %v4686_v56 }
 0xa9e   : > { %v4692_v19 = vsub.f32 %v4690_v23, %v4691_v52 }
 0xaa0   : > { %v13552_v37 = vmul.f32 0.5, %v4692_v19  ;;  %v4757_v19 = vmul.f32 16.0, %v4733_v16 }
 0xaa2   : > { %v4715_v9 = vsub.f32 %v13552_v37, %v11394_v49 }
 0xaa4   : > { %v4716_v28 = vmul.f32 16.0, %v4715_v9 }
 0xaa6   : > { %v4717_v22 = vadd.f32 %v10868_v21, %v4716_v28 }
 0xaa8   : > { %v5344_v41 = vrot.slane %v4717_v22, %v11425_v4  ;;  %v4347_v32 = vpop.trf.xlu1  ;;  %v4728_v22 = vld [vmem:[#allocation2 + $0x50] sm:$0xff] }
 0xaa9   : > { %4396 = vst.msk [vmem:[#allocation3 + $0x1] sm:$0x1] %vm1268_vm3, %v4347_v32 }
 0xaaa   : > { %v13567_v14 = vadd.f32 %v5344_v41, %v5333_v44  ;;  %v13569_v30 = vadd.f32 %v5344_v41, %v5332_v62  ;;  %v13571_v5 = vadd.f32 %v5344_v41, %v5335_v57  ;;  %v13573_v26 = vadd.f32 %v5344_v41, %v5334_v33 }
 0xaab   : > { %v13575_v38 = vadd.f32 %v5344_v41, %v5337_v27  ;;  %v13577_v54 = vadd.f32 %v5344_v41, %v5336_v50  ;;  %v13579_v29 = vadd.f32 %v5344_v41, %v5339_v1  ;;  %v13581_v39 = vadd.f32 %v5344_v41, %v5338_v7  ;;  %v4730_v50 = vld [vmem:[#allocation2 + $0x60] sm:$0xff] }
 0xaac   : > { %v5354_v55 = vsel %vm559_vm2, %v13569_v30, -inf  ;;  %v5360_v47 = vsel %vm559_vm2, %v13573_v26, -inf  ;;  %v5357_v56 = vsel %vm559_vm2, %v13567_v14, -inf  ;;  %v5363_v28 = vsel %vm559_vm2, %v13571_v5, -inf }
 0xaad   : > { %5355 = vmax.xlane.f32.xlu1 %v5354_v55  ;;  %v5366_v12 = vsel %vm559_vm2, %v13577_v54, -inf  ;;  %v5372_v25 = vsel %vm559_vm2, %v13581_v39, -inf  ;;  %v5369_v62 = vsel %vm559_vm2, %v13575_v38, -inf  ;;  %v4752_v33 = vmul.f32 16.0, %v4728_v22  ;;  %v4723_v22 = vld [vmem:[#allocation2 + $0x28] sm:$0xff] }
 0xaae   : > { %v4702_v1 = vadd.f32 %v13129_v61, %v11428_v6  ;;  %v5375_v7 = vsel %vm559_vm2, %v13579_v29, -inf  ;;  %v4754_v55 = vmul.f32 16.0, %v4730_v50 }
 0xab0   : > { %v4687_v31 = vld [vmem:[#allocation3 + $0x1] sm:$0x1] }
 0xab1   : > { %5361 = vmax.xlane.f32.xlu1 %v5360_v47  ;;  %v4695_v35 = vmul.f32 0.25, %v4687_v31 }
 0xab3   : > { %v4696_v13 = vsub.f32 %v4694_v18, %v4695_v35  ;;  %v4732_v18 = vld [vmem:[#allocation2 + $0x70] sm:$0xff] }
 0xab5   : > { %5367 = vmax.xlane.f32.xlu1 %v5366_v12  ;;  %v13591_v2 = vmul.f32 0.5, %v4696_v13  ;;  %v4756_v12 = vmul.f32 16.0, %v4732_v18 }
 0xab7   : > { %v4707_v15 = vsub.f32 %v13591_v2, %v11394_v49 }
 0xab9   : > { %5373 = vmax.xlane.f32.xlu1 %v5372_v25  ;;  %v4710_v53 = vmul.f32 16.0, %v4707_v15 }
 0xabb   : > { %v4713_v10 = vadd.f32 %v10868_v21, %v4710_v53 }
 0xabd   : > { %v4776_v8 = vrot.slane %v4713_v10, %v11425_v4  ;;  %v4719_v10 = vld [vmem:[#allocation2 + $0x8] sm:$0xff] }
 0xabe   : > { %v4743_v16 = vmul.f32 16.0, %v4719_v10 }
 0xabf   : > { %v13598_v42 = vadd.f32 %v4776_v8, %v4750_v3  ;;  %v13600_v24 = vadd.f32 %v4776_v8, %v4751_v36  ;;  %v13606_v40 = vadd.f32 %v4776_v8, %v4753_v48  ;;  %v13612_v52 = vadd.f32 %v4776_v8, %v4755_v43  ;;  %v4720_v36 = vld [vmem:[#allocation2 + $0x10] sm:$0xff] }
 0xac0   : > { %v13619_v21 = vadd.f32 %v4776_v8, %v4757_v19  ;;  %v13629_v41 = vadd.f32 %v4776_v8, %v4752_v33  ;;  %v13634_v13 = vadd.f32 %v4776_v8, %v4754_v55  ;;  %v13642_v53 = vadd.f32 %v4776_v8, %v4756_v12 }
 0xac1   : > { %v4832_v51 = vsel %vm559_vm2, %v13598_v42, -inf  ;;  %v4835_v45 = vsel %vm559_vm2, %v13600_v24, -inf  ;;  %v4841_v23 = vsel %vm559_vm2, %v13606_v40, -inf  ;;  %v4847_v44 = vsel %vm559_vm2, %v13612_v52, -inf }
 0xac2   : > { %4833 = vmax.xlane.f32.xlu0 %v4832_v51  ;;  %4836 = vmax.xlane.f32.xlu1 %v4835_v45  ;;  %v4853_v57 = vsel %vm559_vm2, %v13619_v21, -inf  ;;  %v4838_v35 = vsel %vm559_vm2, %v13629_v41, -inf  ;;  %v4844_v25 = vsel %vm559_vm2, %v13634_v13, -inf  ;;  %v4850_v51 = vsel %vm559_vm2, %v13642_v53, -inf }
 0xac3   : > { %v4742_v45 = vmul.f32 16.0, %v4718_v59  ;;  %v4745_v19 = vmul.f32 16.0, %v4721_v17  ;;  %v4734_v17 = vld [vmem:[#allocation2 + $0x80] sm:$0xff] }
 0xac6   : > { %5358 = vmax.xlane.f32.xlu0 %v5357_v56  ;;  %4842 = vmax.xlane.f32.xlu1 %v4841_v23  ;;  %v4744_v56 = vmul.f32 16.0, %v4720_v36 }
 0xac8   : > { %v4669_v9 = vpop.trf.xlu1 }
 0xac9   : > { %4685 = vst.msk [vmem:[#allocation4] sm:$0x1] %vm1268_vm3, %v4669_v9  ;;  %v4722_v9 = vld [vmem:[#allocation2 + $0x20] sm:$0xff] }
 0xaca   : > { %5364 = vmax.xlane.f32.xlu0 %v5363_v28  ;;  %4848 = vmax.xlane.f32.xlu1 %v4847_v44  ;;  %v4698_v44 = vadd.f32 %v13259_v63, %v11428_v6  ;;  %v4746_v50 = vmul.f32 16.0, %v4722_v9  ;;  %v4725_v63 = vld [vmem:[#allocation2 + $0x38] sm:$0xff] }
 0xace   : > { %5370 = vmax.xlane.f32.xlu0 %v5369_v62  ;;  %4854 = vmax.xlane.f32.xlu1 %v4853_v57 }
 0xad0   : > { %v4689_v27 = vld [vmem:[#allocation4] sm:$0x1] }
 0xad1   : > { %v4703_v32 = vmul.f32 0.25, %v4689_v27 }
 0xad2   : > { %5376 = vmax.xlane.f32.xlu0 %v5375_v7  ;;  %v4724_v7 = vld [vmem:[#allocation2 + $0x30] sm:$0xff] }
 0xad3   : > { %v4704_v31 = vsub.f32 %v4702_v1, %v4703_v32  ;;  %v4747_v1 = vmul.f32 16.0, %v4723_v22  ;;  %v4748_v12 = vmul.f32 16.0, %v4724_v7 }
 0xad4   : > { %v4379_v47 = vpop.trf.xlu0 }
 0xad5   : > { %4397 = vst.msk [vmem:[#allocation3 + $0x2] sm:$0x1] %vm1268_vm3, %v4379_v47  ;;  %v13636_v61 = vmul.f32 0.5, %v4704_v31 }
 0xad6   : > { %4839 = vmax.xlane.f32.xlu0 %v4838_v35 }
 0xad7   : > { %v4706_v15 = vsub.f32 %v13636_v61, %v11428_v6 }
 0xad9   : > { %v4709_v58 = vmul.f32 16.0, %v4706_v15  ;;  %v4749_v15 = vmul.f32 16.0, %v4725_v63 }
 0xada   : > { %4845 = vmax.xlane.f32.xlu0 %v4844_v25 }
 0xadb   : > { %v4712_v3 = vadd.f32 %v10869_v60, %v4709_v58 }
 0xadc   : > { %v4688_v48 = vld [vmem:[#allocation3 + $0x2] sm:$0x1] }
 0xadd   : > { %v4772_v43 = vrot.slane %v4712_v3, %v11425_v4  ;;  %v4699_v28 = vmul.f32 0.25, %v4688_v48  ;;  %v4735_v48 = vld [vmem:[#allocation2 + $0x88] sm:$0xff] }
 0xade   : > { %4851 = vmax.xlane.f32.xlu0 %v4850_v51 }
 0xadf   : > { %v13648_v8 = vadd.f32 %v4772_v43, %v4742_v45  ;;  %v13650_v23 = vadd.f32 %v4772_v43, %v4743_v16  ;;  %v13658_v33 = vadd.f32 %v4772_v43, %v4744_v56  ;;  %v13660_v27 = vadd.f32 %v4772_v43, %v4745_v19  ;;  %v4737_v16 = vld [vmem:[#allocation2 + $0x98] sm:$0xff]  ;;  %v4736_v56 = vld [vmem:[#allocation2 + $0x90] sm:$0xff] }
 0xae0   : > { %v4700_v32 = vsub.f32 %v4698_v44, %v4699_v28  ;;  %v13662_v55 = vadd.f32 %v4772_v43, %v4746_v50  ;;  %v13668_v18 = vadd.f32 %v4772_v43, %v4747_v1  ;;  %v13674_v58 = vadd.f32 %v4772_v43, %v4748_v12  ;;  %v4738_v50 = vld [vmem:[#allocation2 + $0xa0] sm:$0xff]  ;;  %v4741_v12 = vld [vmem:[#allocation2 + $0xb8] sm:$0xff] }
 0xae1   : > { %v4808_v62 = vsel %vm559_vm2, %v13648_v8, -inf  ;;  %v4811_v57 = vsel %vm559_vm2, %v13650_v23, -inf  ;;  %v4814_v31 = vsel %vm559_vm2, %v13658_v33, -inf  ;;  %v4817_v47 = vsel %vm559_vm2, %v13660_v27, -inf }
 0xae2   : > { %4809 = vmax.xlane.f32.xlu0 %v4808_v62  ;;  %4812 = vmax.xlane.f32.xlu1 %v4811_v57  ;;  %v13670_v35 = vmul.f32 0.5, %v4700_v32  ;;  %v4820_v59 = vsel %vm559_vm2, %v13662_v55, -inf  ;;  %v4823_v10 = vsel %vm559_vm2, %v13668_v18, -inf  ;;  %v13680_v3 = vadd.f32 %v4772_v43, %v4749_v15  ;;  %v4739_v57 = vld [vmem:[#allocation2 + $0xa8] sm:$0xff]  ;;  %v4740_v15 = vld [vmem:[#allocation2 + $0xb0] sm:$0xff] }
 0xae3   : > { %v4759_v45 = vmul.f32 16.0, %v4735_v48  ;;  %v4826_v19 = vsel %vm559_vm2, %v13674_v58, -inf  ;;  %v4758_v44 = vmul.f32 16.0, %v4734_v17  ;;  %v4761_v62 = vmul.f32 16.0, %v4737_v16 }
 0xae4   : > { %v4708_v25 = vsub.f32 %v13670_v35, %v11428_v6  ;;  %v4829_v9 = vsel %vm559_vm2, %v13680_v3, -inf  ;;  %v4765_v48 = vmul.f32 16.0, %v4741_v12  ;;  %v4764_v17 = vmul.f32 16.0, %v4740_v15 }
 0xae6   : > { %4815 = vmax.xlane.f32.xlu0 %v4814_v31  ;;  %4818 = vmax.xlane.f32.xlu1 %v4817_v47  ;;  %v4711_v36 = vmul.f32 16.0, %v4708_v25  ;;  %v4763_v31 = vmul.f32 16.0, %v4739_v57  ;;  %v4762_v47 = vmul.f32 16.0, %v4738_v50  ;;  %v5996_v57 = vld [vmem:[%s11032_s5 + $0x20] sm:$0xff]  ;;  %v5997_v50 = vld [vmem:[%s11032_s5 + $0x28] sm:$0xff] }
 0xae8   : > { %v4714_v51 = vadd.f32 %v10869_v60, %v4711_v36  ;;  %v4760_v60 = vmul.f32 16.0, %v4736_v56 }
 0xaea   : > { %4821 = vmax.xlane.f32.xlu0 %v4820_v59  ;;  %4824 = vmax.xlane.f32.xlu1 %v4823_v10  ;;  %v4780_v28 = vrot.slane %v4714_v51, %v11425_v4 }
 0xaec   : > { %v13687_v43 = vadd.f32 %v4780_v28, %v4759_v45  ;;  %v13689_v22 = vadd.f32 %v4780_v28, %v4758_v44  ;;  %v13695_v32 = vadd.f32 %v4780_v28, %v4761_v62  ;;  %v13697_v63 = vadd.f32 %v4780_v28, %v4760_v60  ;;  %v5992_v44 = vld [vmem:[%s11032_s5] sm:$0xff]  ;;  %v5993_v62 = vld [vmem:[%s11032_s5 + $0x8] sm:$0xff]  ;;  %v5994_v60 = vld [vmem:[%s11032_s5 + $0x10] sm:$0xff] }
 0xaed   : > { %v13703_v10 = vadd.f32 %v4780_v28, %v4763_v31  ;;  %v13705_v36 = vadd.f32 %v4780_v28, %v4762_v47  ;;  %v13711_v16 = vadd.f32 %v4780_v28, %v4765_v48  ;;  %v13713_v56 = vadd.f32 %v4780_v28, %v4764_v17  ;;  %9164 = vmatprep.mubr.msk.f32.mxu1 %vm269_vm0, %v5992_v44  ;;  %v5995_v28 = vld [vmem:[%s11032_s5 + $0x18] sm:$0xff] }
 0xaee   : > { %4827 = vmax.xlane.f32.xlu0 %v4826_v19  ;;  %4830 = vmax.xlane.f32.xlu1 %v4829_v9  ;;  %v4859_v1 = vsel %vm559_vm2, %v13687_v43, -inf  ;;  %v4856_v7 = vsel %vm559_vm2, %v13689_v22, -inf  ;;  %v4865_v25 = vsel %vm559_vm2, %v13695_v32, -inf  ;;  %v4862_v59 = vsel %vm559_vm2, %v13697_v63, -inf }
 0xaef   : > { %v4871_v51 = vsel %vm559_vm2, %v13703_v10, -inf  ;;  %v4868_v45 = vsel %vm559_vm2, %v13705_v36, -inf  ;;  %v4877_v19 = vsel %vm559_vm2, %v13711_v16, -inf  ;;  %v4874_v9 = vsel %vm559_vm2, %v13713_v56, -inf  ;;  %9165 = vmatmul.mubr.msk.f32.vlgmr.msra.gmra.mrb[32].mxu1 %vm269_vm0, %v5993_v62 }
 0xaf0   : > { %9167 = vmatprep.mubr.msk.f32.mxu1 %vm269_vm0, %v5994_v60  ;;  %9529 = vmatpush3.bf16.xpose.msk.msra.mxu1 %vm11036_vm1, %v11071_v11 }
 0xaf1   : > { %9532 = vmatprep.subr.msk.bf16.mxu1 %vm11036_vm1, %v11102_v20 }
 0xaf2   : > { %4860 = vmax.xlane.f32.xlu1 %v4859_v1  ;;  %4857 = vmax.xlane.f32.xlu0 %v4856_v7  ;;  %v5998_v1 = vld [vmem:[%s11032_s5 + $0x30] sm:$0xff]  ;;  %v5999_v7 = vld [vmem:[%s11032_s5 + $0x38] sm:$0xff] }
 0xaf3   : > { %9168 = vmatmul.mubr.msk.f32.gmra.mrb[34].mxu1 %vm269_vm0, %v5995_v28 }
 0xaf4   : > { %9170 = vmatprep.mubr.msk.f32.mxu1 %vm269_vm0, %v5996_v57 }
 0xaf6   : > { %4866 = vmax.xlane.f32.xlu1 %v4865_v25  ;;  %4863 = vmax.xlane.f32.xlu0 %v4862_v59 }
 0xaf7   : > { %9171 = vmatmul.mubr.msk.f32.gmra.mrb[36].mxu1 %vm269_vm0, %v5997_v50 }
 0xaf8   : > { %9173 = vmatprep.mubr.msk.f32.mxu1 %vm269_vm0, %v5998_v1  ;;  %9535 = vmatpush3.bf16.xpose.msk.msra.mxu1 %vm11036_vm1, %v11102_v20 }
 0xaf9   : > { %9538 = vmatprep.subr.msk.bf16.mxu1 %vm11036_vm1, %v11149_v34 }
 0xafa   : > { %4872 = vmax.xlane.f32.xlu1 %v4871_v51  ;;  %4869 = vmax.xlane.f32.xlu0 %v4868_v45 }
 0xafb   : > { %9174 = vmatmul.mubr.msk.f32.gmra.mrb[38].mxu1 %vm269_vm0, %v5999_v7 }
 0xafe   : > { %4878 = vmax.xlane.f32.xlu1 %v4877_v19  ;;  %4875 = vmax.xlane.f32.xlu0 %v4874_v9 }
 0xb00   : > { %9541 = vmatpush3.bf16.xpose.msk.msra.mxu1 %vm11036_vm1, %v11149_v34 }
 0xb01   : > { %9544 = vmatprep.subr.msk.bf16.mxu1 %vm11036_vm1, %v11185_v46 }
 0xb08   : > { %9547 = vmatpush3.bf16.xpose.msk.msra.mxu1 %vm11036_vm1, %v11185_v46 }
 0xb09   : > { %9572 = vmatprep.subr.msk.bf16.mxu1 %vm11036_vm1, %v11071_v11 }
 0xb3a   : > { %v13746_v31 = vpop.xlane.xlu1 %5355 }
 0xb3e   : > { %v13749_v47 = vpop.xlane.xlu1 %5361 }
 0xb42   : > { %v13757_v12 = vpop.xlane.xlu1 %5367 }
 0xb46   : > { %v13765_v15 = vpop.xlane.xlu1 %5373 }
 0xb4f   : > { %v13767_v25 = vpop.xlane.xlu1 %4836  ;;  %v13769_v59 = vpop.xlane.xlu0 %4833 }
 0xb50   : > { %v4889_v48 = vsub.f32 %v13600_v24, %v13767_v25  ;;  %v4888_v17 = vsub.f32 %v13598_v42, %v13769_v59  ;;  %v5378_v24 = vsub.f32 %v13569_v30, %v13746_v31 }
 0xb52   : > { %v4922_v51 = vmul.f32 1.442695, %v4889_v48  ;;  %v4920_v45 = vmul.f32 1.442695, %v4888_v17  ;;  %v5386_v48 = vmul.f32 1.442695, %v5378_v24  ;;  %v5380_v17 = vsub.f32 %v13573_v26, %v13749_v47 }
 0xb53   : > { %v13775_v19 = vpop.xlane.xlu1 %4842  ;;  %v13777_v9 = vpop.xlane.xlu0 %5358 }
 0xb54   : > { %10260 = vpow2.f32 %v4922_v51  ;;  %v4891_v44 = vsub.f32 %v13606_v40, %v13775_v19 }
 0xb55   : > { %10262 = vpow2.f32 %v4920_v45 }
 0xb56   : > { %v4926_v62 = vmul.f32 1.442695, %v4891_v44 }
 0xb57   : > { %v13781_v60 = vpop.xlane.xlu1 %4848  ;;  %v13783_v28 = vpop.xlane.xlu0 %5364 }
 0xb58   : > { %10264 = vpow2.f32 %v4926_v62  ;;  %v4893_v42 = vsub.f32 %v13612_v52, %v13781_v60 }
 0xb5a   : > { %v4930_v57 = vmul.f32 1.442695, %v4893_v42  ;;  %v5390_v42 = vmul.f32 1.442695, %v5380_v17 }
 0xb5b   : > { %v13789_v50 = vpop.xlane.xlu1 %4854  ;;  %v13791_v1 = vpop.xlane.xlu0 %5370 }
 0xb5c   : > { %10266 = vpow2.f32 %v4930_v57  ;;  %v4895_v40 = vsub.f32 %v13619_v21, %v13789_v50  ;;  %v5382_v21 = vsub.f32 %v13577_v54, %v13757_v12 }
 0xb5e   : > { %v10261_v7 = vpop.eup %10260  ;;  %v4934_v51 = vmul.f32 1.442695, %v4895_v40 }
 0xb5f   : > { %v10263_v45 = vpop.eup %10262  ;;  %v13797_v52 = vpop.xlane.xlu0 %5376  ;;  %v4979_v30 = vsel %vm559_vm2, %v10261_v7, 0.0  ;;  %v5394_v7 = vmul.f32 1.442695, %v5382_v21 }
 0xb60   : > { %10268 = vpow2.f32 %v4934_v51  ;;  %4980 = vadd.xlane.f32.xlu1 %v4979_v30  ;;  %v4976_v44 = vsel %vm559_vm2, %v10263_v45, 0.0  ;;  %v5384_v51 = vsub.f32 %v13581_v39, %v13765_v15 }
 0xb61   : > { %4977 = vadd.xlane.f32.xlu0 %v4976_v44  ;;  %10270 = vpow2.f32 %v5386_v48  ;;  %v5379_v44 = vsub.f32 %v13567_v14, %v13777_v9 }
 0xb62   : > { %v10265_v62 = vpop.eup %10264  ;;  %10272 = vpow2.f32 %v5390_v42 }
 0xb63   : > { %v13803_v24 = vpop.xlane.xlu0 %4839  ;;  %v4985_v26 = vsel %vm559_vm2, %v10265_v62, 0.0 }
 0xb64   : > { %v4890_v57 = vsub.f32 %v13629_v41, %v13803_v24  ;;  %4986 = vadd.xlane.f32.xlu1 %v4985_v26  ;;  %v5398_v41 = vmul.f32 1.442695, %v5384_v51 }
 0xb66   : > { %v10267_v40 = vpop.eup %10266  ;;  %v4924_v45 = vmul.f32 1.442695, %v4890_v57  ;;  %v5381_v57 = vsub.f32 %v13571_v5, %v13783_v28 }
 0xb67   : > { %v13810_v48 = vpop.xlane.xlu0 %4845  ;;  %v4991_v17 = vsel %vm559_vm2, %v10267_v40, 0.0 }
 0xb68   : > { %10274 = vpow2.f32 %v4924_v45  ;;  %v4892_v54 = vsub.f32 %v13634_v13, %v13810_v48  ;;  %4992 = vadd.xlane.f32.xlu1 %v4991_v17  ;;  %v5388_v13 = vmul.f32 1.442695, %v5379_v44 }
 0xb69   : > { %10276 = vpow2.f32 %v5394_v7 }
 0xb6a   : > { %v10269_v30 = vpop.eup %10268  ;;  %v4928_v62 = vmul.f32 1.442695, %v4892_v54  ;;  %v5392_v54 = vmul.f32 1.442695, %v5381_v57 }
 0xb6b   : > { %v13817_v42 = vpop.xlane.xlu0 %4851  ;;  %v4997_v39 = vsel %vm559_vm2, %v10269_v30, 0.0  ;;  %v10271_v21 = vpop.eup %10270  ;;  %v5383_v30 = vsub.f32 %v13575_v38, %v13791_v1  ;;  %v5385_v38 = vsub.f32 %v13579_v29, %v13797_v52 }
 0xb6c   : > { %10278 = vpow2.f32 %v4928_v62  ;;  %v4894_v26 = vsub.f32 %v13642_v53, %v13817_v42  ;;  %4998 = vadd.xlane.f32.xlu1 %v4997_v39  ;;  %v5402_v51 = vsel %vm559_vm2, %v10271_v21, 0.0  ;;  %v10273_v45 = vpop.eup %10272 }
 0xb6d   : > { %10280 = vpow2.f32 %v5398_v41  ;;  %v5408_v62 = vsel %vm559_vm2, %v10273_v45, 0.0 }
 0xb6e   : > { %v4932_v40 = vmul.f32 1.442695, %v4894_v26 }
 0xb6f   : > { %v13824_v7 = vpop.xlane.xlu1 %4812  ;;  %v13826_v14 = vpop.xlane.xlu0 %4809 }
 0xb70   : > { %10282 = vpow2.f32 %v4932_v40  ;;  %v4881_v17 = vsub.f32 %v13650_v23, %v13824_v7  ;;  %5403 = vadd.xlane.f32.xlu1 %v5402_v51  ;;  %v4880_v29 = vsub.f32 %v13648_v8, %v13826_v14 }
 0xb71   : > { %10284 = vpow2.f32 %v5388_v13  ;;  %v5396_v13 = vmul.f32 1.442695, %v5383_v30  ;;  %v5400_v30 = vmul.f32 1.442695, %v5385_v38 }
 0xb72   : > { %v10275_v53 = vpop.eup %10274  ;;  %v4906_v5 = vmul.f32 1.442695, %v4881_v17  ;;  %v4904_v38 = vmul.f32 1.442695, %v4880_v29 }
 0xb73   : > { %v13833_v41 = vpop.xlane.xlu1 %4818  ;;  %v13835_v44 = vpop.xlane.xlu0 %4815  ;;  %v4982_v39 = vsel %vm559_vm2, %v10275_v53, 0.0 }
 0xb74   : > { %v10277_v21 = vpop.eup %10276  ;;  %10286 = vpow2.f32 %v4906_v5  ;;  %v4883_v23 = vsub.f32 %v13660_v27, %v13833_v41  ;;  %5409 = vadd.xlane.f32.xlu1 %v5408_v62  ;;  %4983 = vadd.xlane.f32.xlu0 %v4982_v39  ;;  %v4882_v8 = vsub.f32 %v13658_v33, %v13835_v44 }
 0xb75   : > { %10288 = vpow2.f32 %v5392_v54  ;;  %v5414_v45 = vsel %vm559_vm2, %v10277_v21, 0.0 }
 0xb76   : > { %v10279_v26 = vpop.eup %10278  ;;  %v4910_v57 = vmul.f32 1.442695, %v4883_v23  ;;  %v4908_v29 = vmul.f32 1.442695, %v4882_v8 }
 0xb77   : > { %v13843_v40 = vpop.xlane.xlu1 %4824  ;;  %v13845_v51 = vpop.xlane.xlu0 %4821  ;;  %v4988_v17 = vsel %vm559_vm2, %v10279_v26, 0.0 }
 0xb78   : > { %v10281_v53 = vpop.eup %10280  ;;  %10290 = vpow2.f32 %v4910_v57  ;;  %v4885_v27 = vsub.f32 %v13668_v18, %v13843_v40  ;;  %5415 = vadd.xlane.f32.xlu1 %v5414_v45  ;;  %4989 = vadd.xlane.f32.xlu0 %v4988_v17  ;;  %v4884_v33 = vsub.f32 %v13662_v55, %v13845_v51 }
 0xb79   : > { %10292 = vpow2.f32 %v5396_v13  ;;  %v5420_v21 = vsel %vm559_vm2, %v10281_v53, 0.0 }
 0xb7a   : > { %v10283_v54 = vpop.eup %10282  ;;  %v4914_v5 = vmul.f32 1.442695, %v4885_v27 }
 0xb7b   : > { %v13853_v62 = vpop.xlane.xlu1 %4830  ;;  %v13855_v39 = vpop.xlane.xlu0 %4827  ;;  %v4994_v23 = vsel %vm559_vm2, %v10283_v54, 0.0 }
 0xb7c   : > { %v10285_v26 = vpop.eup %10284  ;;  %10294 = vpow2.f32 %v4914_v5  ;;  %v4887_v18 = vsub.f32 %v13680_v3, %v13853_v62  ;;  %5421 = vadd.xlane.f32.xlu1 %v5420_v21  ;;  %4995 = vadd.xlane.f32.xlu0 %v4994_v23  ;;  %v4886_v55 = vsub.f32 %v13674_v58, %v13855_v39 }
 0xb7d   : > { %10296 = vpow2.f32 %v5400_v30  ;;  %v5405_v53 = vsel %vm559_vm2, %v10285_v26, 0.0 }
 0xb7e   : > { %v10287_v13 = vpop.eup %10286  ;;  %v4918_v57 = vmul.f32 1.442695, %v4887_v18 }
 0xb7f   : > { %v13863_v45 = vpop.xlane.xlu1 %4860  ;;  %v4955_v17 = vsel %vm559_vm2, %v10287_v13, 0.0  ;;  %v10289_v27 = vpop.eup %10288 }
 0xb80   : > { %10298 = vpow2.f32 %v4918_v57  ;;  %v4897_v3 = vsub.f32 %v13687_v43, %v13863_v45  ;;  %4956 = vadd.xlane.f32.xlu1 %v4955_v17  ;;  %5406 = vadd.xlane.f32.xlu0 %v5405_v53  ;;  %v13869_v54 = vpop.xlane.xlu0 %4857  ;;  %v5411_v26 = vsel %vm559_vm2, %v10289_v27, 0.0 }
 0xb81   : > { %10300 = vpow2.f32 %v4904_v38  ;;  %v4912_v38 = vmul.f32 1.442695, %v4884_v33  ;;  %v4896_v58 = vsub.f32 %v13689_v22, %v13869_v54 }
 0xb82   : > { %v10291_v30 = vpop.eup %10290  ;;  %v4938_v5 = vmul.f32 1.442695, %v4897_v3 }
 0xb83   : > { %v13873_v21 = vpop.xlane.xlu1 %4866  ;;  %v4961_v23 = vsel %vm559_vm2, %v10291_v30, 0.0  ;;  %v10293_v18 = vpop.eup %10292 }
 0xb84   : > { %10302 = vpow2.f32 %v4938_v5  ;;  %v4899_v43 = vsub.f32 %v13695_v32, %v13873_v21  ;;  %4962 = vadd.xlane.f32.xlu1 %v4961_v23  ;;  %5412 = vadd.xlane.f32.xlu0 %v5411_v26  ;;  %v13881_v57 = vpop.xlane.xlu0 %4863  ;;  %v5417_v27 = vsel %vm559_vm2, %v10293_v18, 0.0 }
 0xb85   : > { %10304 = vpow2.f32 %v4908_v29  ;;  %v4916_v29 = vmul.f32 1.442695, %v4886_v55  ;;  %v4898_v22 = vsub.f32 %v13697_v63, %v13881_v57 }
 0xb86   : > { %v10295_v13 = vpop.eup %10294  ;;  %v4942_v8 = vmul.f32 1.442695, %v4899_v43 }
 0xb87   : > { %v13883_v17 = vpop.xlane.xlu1 %4872  ;;  %v4967_v53 = vsel %vm559_vm2, %v10295_v13, 0.0  ;;  %v10297_v3 = vpop.eup %10296 }
 0xb88   : > { %10306 = vpow2.f32 %v4942_v8  ;;  %v4901_v32 = vsub.f32 %v13703_v10, %v13883_v17  ;;  %4968 = vadd.xlane.f32.xlu1 %v4967_v53  ;;  %5418 = vadd.xlane.f32.xlu0 %v5417_v27  ;;  %v5423_v26 = vsel %vm559_vm2, %v10297_v3, 0.0  ;;  %v13897_v43 = vpop.xlane.xlu0 %4869  ;;  %v4940_v3 = vmul.f32 1.442695, %v4898_v22 }
 0xb89   : > { %10308 = vpow2.f32 %v4912_v38  ;;  %v4936_v38 = vmul.f32 1.442695, %v4896_v58 }
 0xb8a   : > { %v10299_v30 = vpop.eup %10298  ;;  %v4946_v33 = vmul.f32 1.442695, %v4901_v32  ;;  %v4900_v32 = vsub.f32 %v13705_v36, %v13897_v43 }
 0xb8b   : > { %v13891_v5 = vpop.xlane.xlu1 %4878  ;;  %v4973_v23 = vsel %vm559_vm2, %v10299_v30, 0.0  ;;  %v10301_v18 = vpop.eup %10300 }
 0xb8c   : > { %10310 = vpow2.f32 %v4946_v33  ;;  %v4903_v10 = vsub.f32 %v13711_v16, %v13891_v5  ;;  %4974 = vadd.xlane.f32.xlu1 %v4973_v23  ;;  %5424 = vadd.xlane.f32.xlu0 %v5423_v26  ;;  %v4952_v53 = vsel %vm559_vm2, %v10301_v18, 0.0  ;;  %v13905_v30 = vpop.xlane.xlu0 %4875  ;;  %v4944_v23 = vmul.f32 1.442695, %v4900_v32 }
 0xb8d   : > { %10312 = vpow2.f32 %v4916_v29  ;;  %v4902_v26 = vsub.f32 %v13713_v56, %v13905_v30 }
 0xb8e   : > { %v10303_v13 = vpop.eup %10302  ;;  %v4950_v55 = vmul.f32 1.442695, %v4903_v10 }
 0xb8f   : > { %v5003_v8 = vsel %vm559_vm2, %v10303_v13, 0.0  ;;  %v10305_v27 = vpop.eup %10304 }
 0xb90   : > { %10314 = vpow2.f32 %v4950_v55  ;;  %5004 = vadd.xlane.f32.xlu1 %v5003_v8  ;;  %4953 = vadd.xlane.f32.xlu0 %v4952_v53  ;;  %v4958_v63 = vsel %vm559_vm2, %v10305_v27, 0.0 }
 0xb91   : > { %10316 = vpow2.f32 %v4936_v38  ;;  %v4948_v38 = vmul.f32 1.442695, %v4902_v26 }
 0xb92   : > { %v10307_v16 = vpop.eup %10306  ;;  %10318 = vpow2.f32 %v4940_v3 }
 0xb93   : > { %v5009_v29 = vsel %vm559_vm2, %v10307_v16, 0.0  ;;  %v10309_v58 = vpop.eup %10308  ;;  %10320 = vpow2.f32 %v4944_v23 }
 0xb94   : > { %5010 = vadd.xlane.f32.xlu1 %v5009_v29  ;;  %4959 = vadd.xlane.f32.xlu0 %v4958_v63  ;;  %v4964_v10 = vsel %vm559_vm2, %v10309_v58, 0.0  ;;  %10322 = vpow2.f32 %v4948_v38 }
 0xb96   : > { %v10311_v33 = vpop.eup %10310 }
 0xb97   : > { %v5015_v18 = vsel %vm559_vm2, %v10311_v33, 0.0  ;;  %v10313_v36 = vpop.eup %10312 }
 0xb98   : > { %5016 = vadd.xlane.f32.xlu1 %v5015_v18  ;;  %4965 = vadd.xlane.f32.xlu0 %v4964_v10  ;;  %v4970_v55 = vsel %vm559_vm2, %v10313_v36, 0.0 }
 0xb9a   : > { %v10315_v13 = vpop.eup %10314 }
 0xb9b   : > { %v5021_v22 = vsel %vm559_vm2, %v10315_v13, 0.0  ;;  %v10317_v8 = vpop.eup %10316 }
 0xb9c   : > { %5022 = vadd.xlane.f32.xlu1 %v5021_v22  ;;  %4971 = vadd.xlane.f32.xlu0 %v4970_v55  ;;  %v5000_v56 = vsel %vm559_vm2, %v10317_v8, 0.0  ;;  %v10319_v53 = vpop.eup %10318 }
 0xb9d   : > { %v5006_v27 = vsel %vm559_vm2, %v10319_v53, 0.0  ;;  %v10321_v16 = vpop.eup %10320 }
 0xb9e   : > { %v5012_v3 = vsel %vm559_vm2, %v10321_v16, 0.0  ;;  %v10323_v32 = vpop.eup %10322 }
 0xb9f   : > { %v5018_v29 = vsel %vm559_vm2, %v10323_v32, 0.0 }
 0xba0   : > { %5001 = vadd.xlane.f32.xlu0 %v5000_v56 }
 0xba4   : > { %5007 = vadd.xlane.f32.xlu0 %v5006_v27 }
 0xba8   : > { %5013 = vadd.xlane.f32.xlu0 %v5012_v3 }
 0xbac   : > { %5019 = vadd.xlane.f32.xlu0 %v5018_v29 }
 0xbed   : > { %v4981_v63 = vpop.xlane.xlu1 %4980 }
 0xbee   : > { %10324 = vlog2.f32 %v4981_v63  ;;  %v4978_v58 = vpop.xlane.xlu0 %4977 }
 0xbef   : > { %10326 = vlog2.f32 %v4978_v58 }
 0xbf1   : > { %v4987_v33 = vpop.xlane.xlu1 %4986 }
 0xbf2   : > { %10328 = vlog2.f32 %v4987_v33 }
 0xbf5   : > { %v4993_v23 = vpop.xlane.xlu1 %4992 }
 0xbf8   : > { %v10325_v26 = vpop.eup %10324 }
 0xbf9   : > { %v10327_v18 = vpop.eup %10326  ;;  %v5043_v36 = vmul.f32 0.6931472, %v10325_v26  ;;  %v4999_v38 = vpop.xlane.xlu1 %4998 }
 0xbfa   : > { %v5041_v10 = vmul.f32 0.6931472, %v10327_v18 }
 0xbfb   : > { %v5081_v22 = vadd.f32 %v5043_v36, %v13767_v25 }
 0xbfc   : > { %v5080_v13 = vadd.f32 %v5041_v10, %v13769_v59  ;;  %v10329_v16 = vpop.eup %10328 }
 0xbfd   : > { %v5404_v8 = vpop.xlane.xlu1 %5403  ;;  %v5047_v59 = vmul.f32 0.6931472, %v10329_v16 }
 0xbfe   : > { %5128 = vxpose.xlu1.b32.start [1/8] (short) (narrow) %v5080_v13, 8 }
 0xbff   : > { %v5083_v33 = vadd.f32 %v5047_v59, %v13775_v19 }
 0xc01   : > { %v4984_v55 = vpop.xlane.xlu0 %4983  ;;  %v5410_v53 = vpop.xlane.xlu1 %5409 }
 0xc02   : > { %5129 = vxpose.xlu1.b32.cont [2/8] (short) (narrow) %v5081_v22, 8  ;;  %10330 = vlog2.f32 %v4984_v55 }
 0xc05   : > { %v4990_v56 = vpop.xlane.xlu0 %4989  ;;  %v5416_v63 = vpop.xlane.xlu1 %5415 }
 0xc06   : > { %10332 = vlog2.f32 %v4990_v56 }
 0xc07   : > { %10334 = vlog2.f32 %v4993_v23 }
 0xc09   : > { %v4996_v27 = vpop.xlane.xlu0 %4995  ;;  %v5422_v36 = vpop.xlane.xlu1 %5421 }
 0xc0a   : > { %10336 = vlog2.f32 %v4996_v27 }
 0xc0b   : > { %10338 = vlog2.f32 %v4999_v38 }
 0xc0c   : > { %v10331_v3 = vpop.eup %10330  ;;  %10340 = vlog2.f32 %v5404_v8 }
 0xc0d   : > { %v5407_v32 = vpop.xlane.xlu0 %5406  ;;  %v5045_v29 = vmul.f32 0.6931472, %v10331_v3  ;;  %v4957_v27 = vpop.xlane.xlu1 %4956 }
 0xc0e   : > { %10342 = vlog2.f32 %v5407_v32 }
 0xc0f   : > { %v5082_v58 = vadd.f32 %v5045_v29, %v13803_v24  ;;  %10344 = vlog2.f32 %v5410_v53 }
 0xc10   : > { %v10333_v25 = vpop.eup %10332  ;;  %10346 = vlog2.f32 %v4957_v27 }
 0xc11   : > { %v5413_v26 = vpop.xlane.xlu0 %5412  ;;  %5130 = vxpose.xlu1.b32.cont [3/8] (short) (narrow) %v5082_v58, 8  ;;  %v5049_v18 = vmul.f32 0.6931472, %v10333_v25  ;;  %v10335_v10 = vpop.eup %10334 }
 0xc12   : > { %v5051_v23 = vmul.f32 0.6931472, %v10335_v10  ;;  %v4963_v58 = vpop.xlane.xlu1 %4962 }
 0xc13   : > { %v5084_v22 = vadd.f32 %v5049_v18, %v13810_v48 }
 0xc14   : > { %v10337_v55 = vpop.eup %10336  ;;  %v5085_v24 = vadd.f32 %v5051_v23, %v13781_v60 }
 0xc15   : > { %v5419_v13 = vpop.xlane.xlu0 %5418  ;;  %5131 = vxpose.xlu1.b32.cont [4/8] (short) (narrow) %v5083_v33, 8  ;;  %v5053_v16 = vmul.f32 0.6931472, %v10337_v55  ;;  %v10339_v38 = vpop.eup %10338 }
 0xc16   : > { %v5055_v3 = vmul.f32 0.6931472, %v10339_v38  ;;  %v10341_v29 = vpop.eup %10340  ;;  %v4969_v55 = vpop.xlane.xlu1 %4968 }
 0xc17   : > { %v5086_v8 = vadd.f32 %v5053_v16, %v13817_v42  ;;  %v5427_v32 = vmul.f32 0.6931472, %v10341_v29 }
 0xc18   : > { %v5087_v48 = vadd.f32 %v5055_v3, %v13789_v50  ;;  %v10343_v60 = vpop.eup %10342 }
 0xc19   : > { %v5425_v56 = vpop.xlane.xlu0 %5424  ;;  %5132 = vxpose.xlu1.b32.cont [5/8] (short) (narrow) %v5084_v22, 8  ;;  %v10345_v53 = vpop.eup %10344  ;;  %v5429_v33 = vmul.f32 0.6931472, %v10343_v60  ;;  %v5442_v10 = vadd.f32 %v5427_v32, %v13746_v31 }
 0xc1a   : > { %v10347_v25 = vpop.eup %10346  ;;  %v5431_v22 = vmul.f32 0.6931472, %v10345_v53 }
 0xc1b   : > { %v5027_v50 = vmul.f32 0.6931472, %v10347_v25 }
 0xc1c   : > { %v5444_v3 = vadd.f32 %v5431_v22, %v13749_v47 }
 0xc1d   : > { %v4954_v19 = vpop.xlane.xlu0 %4953  ;;  %5133 = vxpose.xlu1.b32.cont [6/8] (short) (narrow) %v5085_v24, 8  ;;  %v5073_v31 = vadd.f32 %v5027_v50, %v13824_v7 }
 0xc1e   : > { %10348 = vlog2.f32 %v4954_v19 }
 0xc1f   : > { %10350 = vlog2.f32 %v5413_v26 }
 0xc21   : > { %v4960_v59 = vpop.xlane.xlu0 %4959  ;;  %5134 = vxpose.xlu1.b32.cont [7/8] (short) (narrow) %v5086_v8, 8 }
 0xc22   : > { %10352 = vlog2.f32 %v4960_v59 }
 0xc23   : > { %10354 = vlog2.f32 %v5416_v63  ;;  %v5443_v63 = vadd.f32 %v5429_v33, %v13777_v9 }
 0xc24   : > { %10356 = vlog2.f32 %v4963_v58 }
 0xc25   : > { %5135 = vxpose.xlu1.b32.end [8/8] (short) (narrow) %v5087_v48, 8  ;;  %v4966_v18 = vpop.xlane.xlu0 %4965  ;;  %10358 = vlog2.f32 %v5419_v13 }
 0xc26   : > { %10360 = vlog2.f32 %v4966_v18 }
 0xc27   : > { %10362 = vlog2.f32 %v5422_v36  ;;  %v4975_v36 = vpop.xlane.xlu1 %4974 }
 0xc28   : > { %v10349_v42 = vpop.eup %10348  ;;  %10364 = vlog2.f32 %v4969_v55 }
 0xc29   : > { %v5025_v23 = vmul.f32 0.6931472, %v10349_v42  ;;  %5450 = vxpose.xlu1.b32.start [1/8] (short) (narrow) %v5442_v10, 8  ;;  %v10351_v26 = vpop.eup %10350  ;;  %v4972_v19 = vpop.xlane.xlu0 %4971  ;;  %10366 = vlog2.f32 %v5425_v56 }
 0xc2a   : > { %v5433_v13 = vmul.f32 0.6931472, %v10351_v26  ;;  %10368 = vlog2.f32 %v4972_v19 }
 0xc2b   : > { %v5072_v27 = vadd.f32 %v5025_v23, %v13826_v14  ;;  %10370 = vlog2.f32 %v4975_v36 }
 0xc2c   : > { %v10353_v24 = vpop.eup %10352  ;;  %v5445_v48 = vadd.f32 %v5433_v13, %v13783_v28  ;;  %v5005_v28 = vpop.xlane.xlu1 %5004 }
 0xc2d   : > { %5451 = vxpose.xlu1.b32.cont [2/8] (short) (narrow) %v5443_v63, 8  ;;  %5096 = vxpose.xlu0.b32.start [1/8] (short) (narrow) %v5072_v27, 8  ;;  %v10355_v16 = vpop.eup %10354  ;;  %v5029_v38 = vmul.f32 0.6931472, %v10353_v24  ;;  %v5002_v60 = vpop.xlane.xlu0 %5001 }
 0xc2e   : > { %v10357_v8 = vpop.eup %10356  ;;  %v5435_v9 = vmul.f32 0.6931472, %v10355_v16  ;;  %10372 = vlog2.f32 %v5002_v60 }
 0xc2f   : > { %v10359_v14 = vpop.eup %10358  ;;  %v5031_v29 = vmul.f32 0.6931472, %v10357_v8  ;;  %v5074_v59 = vadd.f32 %v5029_v38, %v13835_v44  ;;  %10374 = vlog2.f32 %v5005_v28 }
 0xc30   : > { %v10361_v32 = vpop.eup %10360  ;;  %v5437_v58 = vmul.f32 0.6931472, %v10359_v14  ;;  %v5446_v53 = vadd.f32 %v5435_v9, %v13757_v12 }
 0xc31   : > { %5452 = vxpose.xlu1.b32.cont [3/8] (short) (narrow) %v5444_v3, 8  ;;  %5097 = vxpose.xlu0.b32.cont [2/8] (short) (narrow) %v5073_v31, 8  ;;  %v10363_v7 = vpop.eup %10362  ;;  %v5075_v47 = vadd.f32 %v5031_v29, %v13833_v41  ;;  %v5033_v56 = vmul.f32 0.6931472, %v10361_v32  ;;  %v13938_v41 = vpop.f32.mrb[32].mxu1 }
 0xc32   : > { %v10365_v25 = vpop.eup %10364  ;;  %v5439_v44 = vmul.f32 0.6931472, %v10363_v7  ;;  %v5447_v42 = vadd.f32 %v5437_v58, %v13791_v1  ;;  %v5008_v50 = vpop.xlane.xlu0 %5007 }
 0xc33   : > { %v10367_v33 = vpop.eup %10366  ;;  %v5035_v18 = vmul.f32 0.6931472, %v10365_v25  ;;  %v5076_v10 = vadd.f32 %v5033_v56, %v13845_v51  ;;  %v13942_v27 = vpop.f32.mrb[33].mxu1  ;;  %10376 = vlog2.f32 %v5008_v50  ;;  %v5499_v50 = vadd.f32 %v13636_v61, %v11428_v6  ;;  %v5517_v61 = vld [vmem:[#allocation2 + $0x10] sm:$0xff] }
 0xc34   : > { %v10369_v23 = vpop.eup %10368  ;;  %v5441_v26 = vmul.f32 0.6931472, %v10367_v33  ;;  %v5448_v55 = vadd.f32 %v5439_v44, %v13765_v15  ;;  %v13944_v24 = vpop.f32.mrb[34].mxu1 }
 0xc35   : > { %5453 = vxpose.xlu1.b32.cont [4/8] (short) (narrow) %v5445_v48, 8  ;;  %5098 = vxpose.xlu0.b32.cont [3/8] (short) (narrow) %v5074_v59, 8  ;;  %v5077_v12 = vadd.f32 %v5035_v18, %v13843_v40  ;;  %v5037_v22 = vmul.f32 0.6931472, %v10369_v23  ;;  %v10371_v63 = vpop.eup %10370  ;;  %v13946_v1 = vpop.f32.mrb[35].mxu1 }
 0xc36   : > { %v13948_v51 = vpop.f32.mrb[36].mxu1  ;;  %v5039_v16 = vmul.f32 0.6931472, %v10371_v63  ;;  %v5011_v31 = vpop.xlane.xlu1 %5010  ;;  %v5449_v13 = vadd.f32 %v5441_v26, %v13797_v52 }
 0xc37   : > { %v5078_v40 = vadd.f32 %v5037_v22, %v13855_v39  ;;  %v13952_v38 = vpop.f32.mrb[37].mxu1  ;;  %10378 = vlog2.f32 %v5011_v31  ;;  %v5014_v9 = vpop.xlane.xlu0 %5013  ;;  %v5487_v31 = vadd.f32 %v13552_v37, %v11394_v49 }
 0xc38   : > { %v10373_v15 = vpop.eup %10372  ;;  %v13954_v19 = vpop.f32.mrb[38].mxu1  ;;  %v5079_v8 = vadd.f32 %v5039_v16, %v13853_v62  ;;  %10380 = vlog2.f32 %v5014_v9 }
 0xc39   : > { %5454 = vxpose.xlu1.b32.cont [5/8] (short) (narrow) %v5446_v53, 8  ;;  %5099 = vxpose.xlu0.b32.cont [4/8] (short) (narrow) %v5075_v47, 8  ;;  %v13956_v3 = vpop.f32.mrb[39].mxu1  ;;  %v5057_v14 = vmul.f32 0.6931472, %v10373_v15  ;;  %v10375_v29 = vpop.eup %10374 }
 0xc3a   : > { %v5059_v39 = vmul.f32 0.6931472, %v10375_v29  ;;  %v5017_v36 = vpop.xlane.xlu1 %5016 }
 0xc3b   : > { %v5088_v52 = vadd.f32 %v5057_v14, %v13869_v54  ;;  %10382 = vlog2.f32 %v5017_v36  ;;  %v5020_v32 = vpop.xlane.xlu0 %5019  ;;  %v5515_v14 = vld [vmem:[#allocation2] sm:$0xff] }
 0xc3c   : > { %v5089_v7 = vadd.f32 %v5059_v39, %v13863_v45  ;;  %10384 = vlog2.f32 %v5020_v32  ;;  %v10870_v39 = vld [vmem:[#allocation2 + $0x8] sm:$0xff]  ;;  %v10872_v32 = vld [vmem:[#allocation2 + $0x18] sm:$0xff] }
 0xc3d   : > { %5455 = vxpose.xlu1.b32.cont [6/8] (short) (narrow) %v5447_v42, 8  ;;  %5100 = vxpose.xlu0.b32.cont [5/8] (short) (narrow) %v5076_v10, 8  ;;  %v10377_v59 = vpop.eup %10376  ;;  %v5540_v36 = vmul.f32 64.0, %v10870_v39  ;;  %v5524_v39 = vld [vmem:[#allocation2 + $0x48] sm:$0xff] }
 0xc3e   : > { %v5061_v48 = vmul.f32 0.6931472, %v10377_v59  ;;  %v5023_v58 = vpop.xlane.xlu1 %5022  ;;  %v13987_v59 = vld [vmem:[%s11420_s14] sm:$0x1] }
 0xc3f   : > { %10386 = vlog2.f32 %v5023_v58  ;;  %v10873_v58 = vld [vmem:[#allocation2 + $0x28] sm:$0xff] }
 0xc40   : > { %v5090_v56 = vadd.f32 %v5061_v48, %v13881_v57 }
 0xc41   : > { %5456 = vxpose.xlu1.b32.cont [7/8] (short) (narrow) %v5448_v55, 8  ;;  %5101 = vxpose.xlu0.b32.cont [6/8] (short) (narrow) %v5077_v12, 8  ;;  %v10379_v47 = vpop.eup %10378 }
 0xc42   : > { %v5063_v62 = vmul.f32 0.6931472, %v10379_v47  ;;  %v10381_v60 = vpop.eup %10380  ;;  %v5541_v47 = vmul.f32 64.0, %v5517_v61 }
 0xc43   : > { %v5065_v53 = vmul.f32 0.6931472, %v10381_v60  ;;  %v10874_v60 = vld [vmem:[#allocation2 + $0x38] sm:$0xff] }
 0xc44   : > { %v5091_v54 = vadd.f32 %v5063_v62, %v13873_v21  ;;  %v6130_v62 = vmul.f32 64.0, %v13938_v41  ;;  %v6133_v41 = vmul.f32 64.0, %v13952_v38 }
 0xc45   : > { %5457 = vxpose.xlu1.b32.end [8/8] (short) (narrow) %v5449_v13, 8  ;;  %5102 = vxpose.xlu0.b32.cont [7/8] (short) (narrow) %v5078_v40, 8  ;;  %v10383_v25 = vpop.eup %10382  ;;  %v5092_v44 = vadd.f32 %v5065_v53, %v13897_v43  ;;  %v5546_v53 = vmul.f32 64.0, %v10874_v60 }
 0xc46   : > { %v5067_v33 = vmul.f32 0.6931472, %v10383_v25  ;;  %v10385_v18 = vpop.eup %10384 }
 0xc47   : > { %v5069_v45 = vmul.f32 0.6931472, %v10385_v18 }
 0xc48   : > { %v5093_v28 = vadd.f32 %v5067_v33, %v13883_v17  ;;  %v6129_v33 = vmul.f32 64.0, %v13942_v27  ;;  %v5519_v27 = vld [vmem:[#allocation2 + $0x20] sm:$0xff] }
 0xc49   : > { %5103 = vxpose.xlu0.b32.end [8/8] (short) (narrow) %v5079_v8, 8  ;;  %v10387_v10 = vpop.eup %10386  ;;  %v5094_v57 = vadd.f32 %v5069_v45, %v13905_v30  ;;  %v6131_v45 = vmul.f32 64.0, %v13946_v1 }
 0xc4a   : > { %v5071_v42 = vmul.f32 0.6931472, %v10387_v10  ;;  %v6136_v10 = vmul.f32 64.0, %v13954_v19 }
 0xc4c   : > { %v5095_v23 = vadd.f32 %v5071_v42, %v13891_v5  ;;  %v5491_v5 = vadd.f32 %v13591_v2, %v11394_v49  ;;  %v10875_v42 = vld [vmem:[%s11403_s11] sm:$0x1] }
 0xc4d   : > { %5160 = vxpose.xlu0.b32.start [1/8] (short) (narrow) %v5088_v52, 8  ;;  %v5539_v52 = vmul.f32 64.0, %v5515_v14 }
 0xc51   : > { %5161 = vxpose.xlu0.b32.cont [2/8] (short) (narrow) %v5089_v7, 8  ;;  %v5542_v7 = vmul.f32 64.0, %v10872_v32 }
 0xc55   : > { %5162 = vxpose.xlu0.b32.cont [3/8] (short) (narrow) %v5090_v56, 8  ;;  %v5544_v56 = vmul.f32 64.0, %v10873_v58  ;;  %v5526_v58 = vld [vmem:[#allocation2 + $0x58] sm:$0xff] }
 0xc59   : > { %5163 = vxpose.xlu0.b32.cont [4/8] (short) (narrow) %v5091_v54, 8 }
 0xc5d   : > { %5164 = vxpose.xlu0.b32.cont [5/8] (short) (narrow) %v5092_v44, 8  ;;  %v6132_v44 = vmul.f32 64.0, %v13944_v24  ;;  %v6135_v24 = vmul.f32 64.0, %v13956_v3 }
 0xc61   : > { %5165 = vxpose.xlu0.b32.cont [6/8] (short) (narrow) %v5093_v28, 8  ;;  %v6134_v28 = vmul.f32 64.0, %v13948_v51 }
 0xc65   : > { %5166 = vxpose.xlu0.b32.cont [7/8] (short) (narrow) %v5094_v57, 8 }
 0xc69   : > { %5167 = vxpose.xlu0.b32.end [8/8] (short) (narrow) %v5095_v23, 8 }
 0xc89   : > { %v5144_v21 = vpop.trf.xlu1 }
 0xc8a   : > { %5193 = vst.msk [vmem:[#allocation3 + $0x1] sm:$0x1] %vm1268_vm3, %v5144_v21 }
 0xc91   : > { %v5484_v26 = vld [vmem:[#allocation3 + $0x1] sm:$0x1] }
 0xc92   : > { %v5492_v22 = vmul.f32 0.0625, %v5484_v26 }
 0xc94   : > { %v5493_v16 = vsub.f32 %v5491_v5, %v5492_v22  ;;  %v5543_v22 = vmul.f32 64.0, %v5519_v27 }
 0xc96   : > { %v13980_v9 = vmul.f32 0.5, %v5493_v16 }
 0xc98   : > { %v5504_v54 = vsub.f32 %v13980_v9, %v11394_v49 }
 0xc9a   : > { %v5507_v51 = vmul.f32 64.0, %v5504_v54 }
 0xc9c   : > { %v5510_v61 = vadd.f32 %v10875_v42, %v5507_v51  ;;  %v5495_v51 = vadd.f32 %v13670_v35, %v11428_v6 }
 0xc9e   : > { %v5573_v32 = vrot.slane %v5510_v61, %v11425_v4 }
 0xca9   : > { %v5466_v12 = vpop.trf.xlu1 }
 0xcaa   : > { %5482 = vst.msk [vmem:[#allocation4] sm:$0x1] %vm1268_vm3, %v5466_v12 }
 0xcad   : > { %v5112_v43 = vpop.trf.xlu0 }
 0xcae   : > { %5192 = vst.msk [vmem:[#allocation3] sm:$0x1] %vm1268_vm3, %v5112_v43 }
 0xcb1   : > { %v5486_v17 = vld [vmem:[#allocation4] sm:$0x1] }
 0xcb2   : > { %v5500_v30 = vmul.f32 0.0625, %v5486_v17 }
 0xcb4   : > { %v5501_v55 = vsub.f32 %v5499_v50, %v5500_v30 }
 0xcb5   : > { %v5483_v63 = vld [vmem:[#allocation3] sm:$0x1] }
 0xcb6   : > { %v5488_v40 = vmul.f32 0.0625, %v5483_v63  ;;  %v13976_v13 = vmul.f32 0.5, %v5501_v55 }
 0xcb8   : > { %v5489_v15 = vsub.f32 %v5487_v31, %v5488_v40  ;;  %v5503_v8 = vsub.f32 %v13976_v13, %v11428_v6  ;;  %v5521_v40 = vld [vmem:[#allocation2 + $0x30] sm:$0xff] }
 0xcba   : > { %v13982_v29 = vmul.f32 0.5, %v5489_v15  ;;  %v5506_v2 = vmul.f32 64.0, %v5503_v8 }
 0xcbc   : > { %v5512_v37 = vsub.f32 %v13982_v29, %v11394_v49  ;;  %v5509_v48 = vadd.f32 %v13987_v59, %v5506_v2  ;;  %v5545_v2 = vmul.f32 64.0, %v5521_v40 }
 0xcbe   : > { %v5513_v25 = vmul.f32 64.0, %v5512_v37  ;;  %v5569_v18 = vrot.slane %v5509_v48, %v11425_v4 }
 0xcc0   : > { %v5514_v57 = vadd.f32 %v10875_v42, %v5513_v25  ;;  %v14001_v23 = vadd.f32 %v5569_v18, %v5540_v36  ;;  %v14003_v21 = vadd.f32 %v5569_v18, %v5539_v52  ;;  %v14005_v12 = vadd.f32 %v5569_v18, %v5542_v7  ;;  %v5523_v36 = vld [vmem:[#allocation2 + $0x40] sm:$0xff] }
 0xcc1   : > { %v14008_v43 = vadd.f32 %v5569_v18, %v5544_v56  ;;  %v14010_v1 = vadd.f32 %v5569_v18, %v5546_v53  ;;  %v14017_v17 = vadd.f32 %v5569_v18, %v5541_v47  ;;  %v14039_v14 = vadd.f32 %v5569_v18, %v5543_v22  ;;  %v5525_v56 = vld [vmem:[#allocation2 + $0x50] sm:$0xff] }
 0xcc2   : > { %v6141_v38 = vrot.slane %v5514_v57, %v11425_v4  ;;  %v5608_v19 = vsel %vm559_vm2, %v14001_v23, -inf  ;;  %v5605_v26 = vsel %vm559_vm2, %v14003_v21, -inf  ;;  %v5614_v15 = vsel %vm559_vm2, %v14005_v12, -inf }
 0xcc3   : > { %5609 = vmax.xlane.f32.xlu1 %v5608_v19  ;;  %5606 = vmax.xlane.f32.xlu0 %v5605_v26  ;;  %v5611_v8 = vsel %vm559_vm2, %v14017_v17, -inf  ;;  %v5620_v52 = vsel %vm559_vm2, %v14008_v43, -inf  ;;  %v5617_v37 = vsel %vm559_vm2, %v14039_v14, -inf  ;;  %v14045_v48 = vadd.f32 %v5569_v18, %v5545_v2  ;;  %v5528_v18 = vld [vmem:[#allocation2 + $0x68] sm:$0xff]  ;;  %v5529_v26 = vld [vmem:[#allocation2 + $0x70] sm:$0xff] }
 0xcc4   : > { %v14019_v50 = vadd.f32 %v6141_v38, %v6130_v62  ;;  %v14021_v3 = vadd.f32 %v6141_v38, %v6129_v33  ;;  %v14023_v30 = vadd.f32 %v6141_v38, %v6132_v44  ;;  %v14025_v5 = vadd.f32 %v6141_v38, %v6131_v45  ;;  %v5527_v45 = vld [vmem:[#allocation2 + $0x60] sm:$0xff] }
 0xcc5   : > { %v14027_v55 = vadd.f32 %v6141_v38, %v6134_v28  ;;  %v14029_v63 = vadd.f32 %v6141_v38, %v6133_v41  ;;  %v14031_v16 = vadd.f32 %v6141_v38, %v6136_v10  ;;  %v14033_v31 = vadd.f32 %v6141_v38, %v6135_v24  ;;  %v5530_v24 = vld [vmem:[#allocation2 + $0x78] sm:$0xff] }
 0xcc6   : > { %v5548_v7 = vmul.f32 64.0, %v5524_v39  ;;  %v5547_v47 = vmul.f32 64.0, %v5523_v36  ;;  %v5626_v60 = vsel %vm559_vm2, %v14010_v1, -inf  ;;  %v5623_v53 = vsel %vm559_vm2, %v14045_v48, -inf }
 0xcc7   : > { %5615 = vmax.xlane.f32.xlu1 %v5614_v15  ;;  %5612 = vmax.xlane.f32.xlu0 %v5611_v8  ;;  %v5550_v33 = vmul.f32 64.0, %v5526_v58  ;;  %v5549_v44 = vmul.f32 64.0, %v5525_v56  ;;  %v5552_v57 = vmul.f32 64.0, %v5528_v18  ;;  %v5551_v27 = vmul.f32 64.0, %v5527_v45  ;;  %v5532_v18 = vld [vmem:[#allocation2 + $0x88] sm:$0xff]  ;;  %v5531_v45 = vld [vmem:[#allocation2 + $0x80] sm:$0xff] }
 0xcc8   : > { %v14053_v54 = vadd.f32 %v5573_v32, %v5548_v7  ;;  %v14055_v25 = vadd.f32 %v5573_v32, %v5547_v47  ;;  %v5554_v61 = vmul.f32 64.0, %v5530_v24  ;;  %v5553_v2 = vmul.f32 64.0, %v5529_v26 }
 0xcc9   : > { %v14061_v10 = vadd.f32 %v5573_v32, %v5550_v33  ;;  %v14063_v42 = vadd.f32 %v5573_v32, %v5549_v44  ;;  %v14067_v19 = vadd.f32 %v5573_v32, %v5552_v57  ;;  %v14073_v15 = vadd.f32 %v5573_v32, %v5551_v27 }
 0xcca   : > { %v5632_v28 = vsel %vm559_vm2, %v14053_v54, -inf  ;;  %v5629_v41 = vsel %vm559_vm2, %v14055_v25, -inf  ;;  %v14075_v36 = vadd.f32 %v5573_v32, %v5554_v61  ;;  %v6154_v56 = vsel %vm559_vm2, %v14019_v50, -inf }
 0xccb   : > { %5621 = vmax.xlane.f32.xlu1 %v5620_v52  ;;  %5618 = vmax.xlane.f32.xlu0 %v5617_v37  ;;  %v5638_v22 = vsel %vm559_vm2, %v14061_v10, -inf  ;;  %v5635_v40 = vsel %vm559_vm2, %v14063_v42, -inf  ;;  %v5644_v35 = vsel %vm559_vm2, %v14067_v19, -inf  ;;  %v5641_v52 = vsel %vm559_vm2, %v14073_v15, -inf }
 0xccc   : > { %v14081_v37 = vadd.f32 %v5573_v32, %v5553_v2  ;;  %v5650_v47 = vsel %vm559_vm2, %v14075_v36, -inf  ;;  %v6151_v32 = vsel %vm559_vm2, %v14021_v3, -inf  ;;  %v6157_v33 = vsel %vm559_vm2, %v14025_v5, -inf  ;;  %v5536_v2 = vld [vmem:[#allocation2 + $0xa8] sm:$0xff] }
 0xccd   : > { %v5176_v62 = vpop.trf.xlu0  ;;  %v5556_v27 = vmul.f32 64.0, %v5532_v18  ;;  %v5555_v24 = vmul.f32 64.0, %v5531_v45  ;;  %v6169_v26 = vsel %vm559_vm2, %v14033_v31, -inf }
 0xcce   : > { %5194 = vst.msk [vmem:[#allocation3 + $0x2] sm:$0x1] %vm1268_vm3, %v5176_v62  ;;  %v5647_v62 = vsel %vm559_vm2, %v14081_v37, -inf }
 0xccf   : > { %5627 = vmax.xlane.f32.xlu1 %v5626_v60  ;;  %5624 = vmax.xlane.f32.xlu0 %v5623_v53  ;;  %v6160_v53 = vsel %vm559_vm2, %v14023_v30, -inf }
 0xcd3   : > { %5633 = vmax.xlane.f32.xlu1 %v5632_v28  ;;  %5630 = vmax.xlane.f32.xlu0 %v5629_v41  ;;  %v6166_v28 = vsel %vm559_vm2, %v14027_v55, -inf  ;;  %v6163_v41 = vsel %vm559_vm2, %v14029_v63, -inf }
 0xcd5   : > { %v5485_v38 = vld [vmem:[#allocation3 + $0x2] sm:$0x1] }
 0xcd6   : > { %v5496_v8 = vmul.f32 0.0625, %v5485_v38  ;;  %v5533_v38 = vld [vmem:[#allocation2 + $0x90] sm:$0xff] }
 0xcd7   : > { %5639 = vmax.xlane.f32.xlu1 %v5638_v22  ;;  %5636 = vmax.xlane.f32.xlu0 %v5635_v40  ;;  %v5557_v61 = vmul.f32 64.0, %v5533_v38 }
 0xcd8   : > { %v5497_v39 = vsub.f32 %v5495_v51, %v5496_v8  ;;  %v5534_v51 = vld [vmem:[#allocation2 + $0x98] sm:$0xff] }
 0xcd9   : > { %v5558_v8 = vmul.f32 64.0, %v5534_v51 }
 0xcda   : > { %v14083_v7 = vmul.f32 0.5, %v5497_v39  ;;  %v5535_v39 = vld [vmem:[#allocation2 + $0xa0] sm:$0xff] }
 0xcdb   : > { %5645 = vmax.xlane.f32.xlu1 %v5644_v35  ;;  %5642 = vmax.xlane.f32.xlu0 %v5641_v52 }
 0xcdc   : > { %v5505_v58 = vsub.f32 %v14083_v7, %v11428_v6 }
 0xcde   : > { %v5508_v60 = vmul.f32 64.0, %v5505_v58  ;;  %v5560_v58 = vmul.f32 64.0, %v5536_v2  ;;  %v6793_v2 = vld [vmem:[%s11032_s5 + $0x20] sm:$0xff] }
 0xcdf   : > { %5651 = vmax.xlane.f32.xlu1 %v5650_v47  ;;  %5648 = vmax.xlane.f32.xlu0 %v5647_v62 }
 0xce0   : > { %v5511_v44 = vadd.f32 %v13987_v59, %v5508_v60  ;;  %v6172_v59 = vsel %vm559_vm2, %v14031_v16, -inf  ;;  %v5537_v60 = vld [vmem:[#allocation2 + $0xb0] sm:$0xff] }
 0xce2   : > { %v5577_v57 = vrot.slane %v5511_v44, %v11425_v4 }
 0xce3   : > { %6155 = vmax.xlane.f32.xlu0 %v6154_v56  ;;  %6152 = vmax.xlane.f32.xlu1 %v6151_v32  ;;  %v5559_v56 = vmul.f32 64.0, %v5535_v39  ;;  %v5538_v32 = vld [vmem:[#allocation2 + $0xb8] sm:$0xff]  ;;  %v6794_v39 = vld [vmem:[%s11032_s5 + $0x28] sm:$0xff] }
 0xce4   : > { %v14109_v22 = vadd.f32 %v5577_v57, %v5556_v27  ;;  %v14111_v40 = vadd.f32 %v5577_v57, %v5555_v24  ;;  %v14117_v47 = vadd.f32 %v5577_v57, %v5558_v8  ;;  %v14119_v62 = vadd.f32 %v5577_v57, %v5557_v61  ;;  %v6790_v8 = vld [vmem:[%s11032_s5 + $0x8] sm:$0xff]  ;;  %v6791_v61 = vld [vmem:[%s11032_s5 + $0x10] sm:$0xff] }
 0xce5   : > { %v14125_v44 = vadd.f32 %v5577_v57, %v5560_v58  ;;  %v14127_v18 = vadd.f32 %v5577_v57, %v5559_v56  ;;  %v5562_v45 = vmul.f32 64.0, %v5538_v32 }
 0xce6   : > { %v5656_v35 = vsel %vm559_vm2, %v14109_v22, -inf  ;;  %v5653_v52 = vsel %vm559_vm2, %v14111_v40, -inf }
 0xce7   : > { %6161 = vmax.xlane.f32.xlu0 %v6160_v53  ;;  %6158 = vmax.xlane.f32.xlu1 %v6157_v33  ;;  %v5662_v53 = vsel %vm559_vm2, %v14117_v47, -inf  ;;  %v5659_v33 = vsel %vm559_vm2, %v14119_v62, -inf  ;;  %v5665_v27 = vsel %vm559_vm2, %v14127_v18, -inf  ;;  %v14133_v24 = vadd.f32 %v5577_v57, %v5562_v45 }
 0xce9   : > { %v5674_v38 = vsel %vm559_vm2, %v14133_v24, -inf }
 0xceb   : > { %6167 = vmax.xlane.f32.xlu0 %v6166_v28  ;;  %6164 = vmax.xlane.f32.xlu1 %v6163_v41  ;;  %v5561_v28 = vmul.f32 64.0, %v5537_v60  ;;  %v5668_v41 = vsel %vm559_vm2, %v14125_v44, -inf }
 0xced   : > { %v14135_v51 = vadd.f32 %v5577_v57, %v5561_v28  ;;  %v6792_v57 = vld [vmem:[%s11032_s5 + $0x18] sm:$0xff] }
 0xcef   : > { %6173 = vmax.xlane.f32.xlu0 %v6172_v59  ;;  %6170 = vmax.xlane.f32.xlu1 %v6169_v26  ;;  %v5671_v59 = vsel %vm559_vm2, %v14135_v51, -inf  ;;  %v6789_v26 = vld [vmem:[%s11032_s5] sm:$0xff] }
 0xcf0   : > { %9192 = vmatprep.mubr.msk.f32.mxu0 %vm269_vm0, %v6789_v26 }
 0xcf1   : > { %9193 = vmatmul.mubr.msk.f32.vlgmr.msra.gmra.mrb[40].mxu0 %vm269_vm0, %v6790_v8 }
 0xcf2   : > { %9195 = vmatprep.mubr.msk.f32.mxu0 %vm269_vm0, %v6791_v61  ;;  %9553 = vmatpush3.bf16.xpose.msk.msra.mxu0 %vm11036_vm1, %v11071_v11 }
 0xcf3   : > { %5657 = vmax.xlane.f32.xlu1 %v5656_v35  ;;  %5654 = vmax.xlane.f32.xlu0 %v5653_v52  ;;  %v6795_v35 = vld [vmem:[%s11032_s5 + $0x30] sm:$0xff]  ;;  %v6796_v52 = vld [vmem:[%s11032_s5 + $0x38] sm:$0xff] }
 0xcf4   : > { %9556 = vmatprep.subr.msk.bf16.mxu0 %vm11036_vm1, %v11102_v20 }
 0xcf5   : > { %9196 = vmatmul.mubr.msk.f32.gmra.mrb[42].mxu0 %vm269_vm0, %v6792_v57 }
 0xcf6   : > { %9198 = vmatprep.mubr.msk.f32.mxu0 %vm269_vm0, %v6793_v2 }
 0xcf7   : > { %5663 = vmax.xlane.f32.xlu1 %v5662_v53  ;;  %5660 = vmax.xlane.f32.xlu0 %v5659_v33 }
 0xcf9   : > { %9199 = vmatmul.mubr.msk.f32.gmra.mrb[44].mxu0 %vm269_vm0, %v6794_v39 }
 0xcfa   : > { %9201 = vmatprep.mubr.msk.f32.mxu0 %vm269_vm0, %v6795_v35  ;;  %9559 = vmatpush3.bf16.xpose.msk.msra.mxu0 %vm11036_vm1, %v11102_v20 }
 0xcfb   : > { %5669 = vmax.xlane.f32.xlu1 %v5668_v41  ;;  %5666 = vmax.xlane.f32.xlu0 %v5665_v27 }
 0xcfc   : > { %9562 = vmatprep.subr.msk.bf16.mxu0 %vm11036_vm1, %v11149_v34 }
 0xcfd   : > { %9202 = vmatmul.mubr.msk.f32.gmra.mrb[46].mxu0 %vm269_vm0, %v6796_v52 }
 0xcff   : > { %5675 = vmax.xlane.f32.xlu1 %v5674_v38  ;;  %5672 = vmax.xlane.f32.xlu0 %v5671_v59 }
 0xd02   : > { %9565 = vmatpush3.bf16.xpose.msk.msra.mxu0 %vm11036_vm1, %v11149_v34 }
 0xd03   : > { %9568 = vmatprep.subr.msk.bf16.mxu0 %vm11036_vm1, %v11185_v46 }
 0xd0a   : > { %9571 = vmatpush3.bf16.xpose.msk.msra.mxu0 %vm11036_vm1, %v11185_v46 }
 0xd50   : > { %v14178_v58 = vpop.xlane.xlu1 %5609  ;;  %v14180_v56 = vpop.xlane.xlu0 %5606 }
 0xd51   : > { %v5678_v32 = vsub.f32 %v14001_v23, %v14178_v58  ;;  %v5677_v60 = vsub.f32 %v14003_v21, %v14180_v56 }
 0xd53   : > { %v5703_v53 = vmul.f32 1.442695, %v5678_v32  ;;  %v5701_v33 = vmul.f32 1.442695, %v5677_v60 }
 0xd54   : > { %v14186_v45 = vpop.xlane.xlu1 %5615  ;;  %v14188_v28 = vpop.xlane.xlu0 %5612 }
 0xd55   : > { %10388 = vpow2.f32 %v5703_v53  ;;  %v5680_v41 = vsub.f32 %v14005_v12, %v14186_v45  ;;  %v5679_v27 = vsub.f32 %v14017_v17, %v14188_v28 }
 0xd56   : > { %10390 = vpow2.f32 %v5701_v33 }
 0xd57   : > { %v5707_v38 = vmul.f32 1.442695, %v5680_v41  ;;  %v5705_v59 = vmul.f32 1.442695, %v5679_v27 }
 0xd58   : > { %v14194_v23 = vpop.xlane.xlu1 %5621  ;;  %v14196_v26 = vpop.xlane.xlu0 %5618 }
 0xd59   : > { %10392 = vpow2.f32 %v5707_v38  ;;  %v5682_v21 = vsub.f32 %v14008_v43, %v14194_v23  ;;  %v5681_v8 = vsub.f32 %v14039_v14, %v14196_v26 }
 0xd5a   : > { %10394 = vpow2.f32 %v5705_v59 }
 0xd5b   : > { %v5711_v61 = vmul.f32 1.442695, %v5682_v21  ;;  %v5709_v12 = vmul.f32 1.442695, %v5681_v8 }
 0xd5c   : > { %v14202_v57 = vpop.xlane.xlu1 %5627  ;;  %v14204_v17 = vpop.xlane.xlu0 %5624 }
 0xd5d   : > { %10396 = vpow2.f32 %v5711_v61  ;;  %v5684_v2 = vsub.f32 %v14010_v1, %v14202_v57  ;;  %v5683_v39 = vsub.f32 %v14045_v48, %v14204_v17 }
 0xd5e   : > { %10398 = vpow2.f32 %v5709_v12 }
 0xd5f   : > { %v10389_v35 = vpop.eup %10388  ;;  %v5715_v43 = vmul.f32 1.442695, %v5684_v2  ;;  %v5713_v52 = vmul.f32 1.442695, %v5683_v39 }
 0xd60   : > { %v10391_v32 = vpop.eup %10390  ;;  %v14210_v14 = vpop.xlane.xlu1 %5633  ;;  %v5752_v53 = vsel %vm559_vm2, %v10389_v35, 0.0 }
 0xd61   : > { %v14212_v60 = vpop.xlane.xlu0 %5630  ;;  %10400 = vpow2.f32 %v5715_v43  ;;  %v5686_v33 = vsub.f32 %v14053_v54, %v14210_v14  ;;  %5753 = vadd.xlane.f32.xlu1 %v5752_v53  ;;  %v5749_v48 = vsel %vm559_vm2, %v10391_v32, 0.0 }
 0xd62   : > { %v5685_v1 = vsub.f32 %v14055_v25, %v14212_v60  ;;  %10402 = vpow2.f32 %v5713_v52  ;;  %5750 = vadd.xlane.f32.xlu0 %v5749_v48 }
 0xd63   : > { %v10393_v41 = vpop.eup %10392  ;;  %v5719_v27 = vmul.f32 1.442695, %v5686_v33 }
 0xd64   : > { %v5717_v38 = vmul.f32 1.442695, %v5685_v1  ;;  %v10395_v59 = vpop.eup %10394  ;;  %v14220_v21 = vpop.xlane.xlu1 %5639  ;;  %v5758_v61 = vsel %vm559_vm2, %v10393_v41, 0.0 }
 0xd65   : > { %v14222_v8 = vpop.xlane.xlu0 %5636  ;;  %10404 = vpow2.f32 %v5719_v27  ;;  %v5688_v54 = vsub.f32 %v14061_v10, %v14220_v21  ;;  %5759 = vadd.xlane.f32.xlu1 %v5758_v61  ;;  %v5755_v12 = vsel %vm559_vm2, %v10395_v59, 0.0 }
 0xd66   : > { %v5687_v25 = vsub.f32 %v14063_v42, %v14222_v8  ;;  %10406 = vpow2.f32 %v5717_v38  ;;  %5756 = vadd.xlane.f32.xlu0 %v5755_v12 }
 0xd67   : > { %v10397_v2 = vpop.eup %10396  ;;  %v5723_v39 = vmul.f32 1.442695, %v5688_v54 }
 0xd68   : > { %v5721_v35 = vmul.f32 1.442695, %v5687_v25  ;;  %v10399_v43 = vpop.eup %10398  ;;  %v14230_v52 = vpop.xlane.xlu1 %5645  ;;  %v5764_v53 = vsel %vm559_vm2, %v10397_v2, 0.0 }
 0xd69   : > { %v14232_v32 = vpop.xlane.xlu0 %5642  ;;  %10408 = vpow2.f32 %v5723_v39  ;;  %v5690_v10 = vsub.f32 %v14067_v19, %v14230_v52  ;;  %5765 = vadd.xlane.f32.xlu1 %v5764_v53  ;;  %v5761_v33 = vsel %vm559_vm2, %v10399_v43, 0.0 }
 0xd6a   : > { %v5689_v42 = vsub.f32 %v14073_v15, %v14232_v32  ;;  %10410 = vpow2.f32 %v5721_v35  ;;  %5762 = vadd.xlane.f32.xlu0 %v5761_v33 }
 0xd6b   : > { %v10401_v1 = vpop.eup %10400  ;;  %v5727_v48 = vmul.f32 1.442695, %v5690_v10 }
 0xd6c   : > { %v5725_v41 = vmul.f32 1.442695, %v5689_v42  ;;  %v10403_v27 = vpop.eup %10402  ;;  %v14240_v38 = vpop.xlane.xlu1 %5651  ;;  %v5770_v61 = vsel %vm559_vm2, %v10401_v1, 0.0 }
 0xd6d   : > { %v14242_v59 = vpop.xlane.xlu0 %5648  ;;  %10412 = vpow2.f32 %v5727_v48  ;;  %v5692_v19 = vsub.f32 %v14075_v36, %v14240_v38  ;;  %5771 = vadd.xlane.f32.xlu1 %v5770_v61  ;;  %v5767_v54 = vsel %vm559_vm2, %v10403_v27, 0.0 }
 0xd6e   : > { %v5691_v15 = vsub.f32 %v14081_v37, %v14242_v59  ;;  %10414 = vpow2.f32 %v5725_v41  ;;  %5768 = vadd.xlane.f32.xlu0 %v5767_v54 }
 0xd6f   : > { %v10405_v25 = vpop.eup %10404  ;;  %v5731_v12 = vmul.f32 1.442695, %v5692_v19 }
 0xd70   : > { %v5729_v2 = vmul.f32 1.442695, %v5691_v15  ;;  %v10407_v39 = vpop.eup %10406  ;;  %v14250_v35 = vpop.xlane.xlu1 %6152  ;;  %v5776_v53 = vsel %vm559_vm2, %v10405_v25, 0.0 }
 0xd71   : > { %v14252_v43 = vpop.xlane.xlu0 %6155  ;;  %10416 = vpow2.f32 %v5731_v12  ;;  %v6175_v36 = vsub.f32 %v14021_v3, %v14250_v35  ;;  %5777 = vadd.xlane.f32.xlu1 %v5776_v53  ;;  %v5773_v10 = vsel %vm559_vm2, %v10407_v39, 0.0 }
 0xd72   : > { %v6176_v37 = vsub.f32 %v14019_v50, %v14252_v43  ;;  %10418 = vpow2.f32 %v5729_v2  ;;  %5774 = vadd.xlane.f32.xlu0 %v5773_v10 }
 0xd73   : > { %v10409_v42 = vpop.eup %10408  ;;  %v6183_v33 = vmul.f32 1.442695, %v6175_v36 }
 0xd74   : > { %v6185_v1 = vmul.f32 1.442695, %v6176_v37  ;;  %v10411_v48 = vpop.eup %10410  ;;  %v14260_v41 = vpop.xlane.xlu1 %6158  ;;  %v5782_v61 = vsel %vm559_vm2, %v10409_v42, 0.0 }
 0xd75   : > { %v14262_v27 = vpop.xlane.xlu0 %6161  ;;  %10420 = vpow2.f32 %v6183_v33  ;;  %v6177_v3 = vsub.f32 %v14025_v5, %v14260_v41  ;;  %5783 = vadd.xlane.f32.xlu1 %v5782_v61  ;;  %v5779_v50 = vsel %vm559_vm2, %v10411_v48, 0.0 }
 0xd76   : > { %5780 = vadd.xlane.f32.xlu0 %v5779_v50  ;;  %10422 = vpow2.f32 %v6185_v1  ;;  %v6178_v54 = vsub.f32 %v14023_v30, %v14262_v27 }
 0xd77   : > { %v10413_v19 = vpop.eup %10412  ;;  %v6187_v15 = vmul.f32 1.442695, %v6177_v3 }
 0xd78   : > { %v10415_v25 = vpop.eup %10414  ;;  %v14270_v12 = vpop.xlane.xlu1 %6164  ;;  %v5788_v39 = vsel %vm559_vm2, %v10413_v19, 0.0  ;;  %v6189_v36 = vmul.f32 1.442695, %v6178_v54 }
 0xd79   : > { %v14272_v2 = vpop.xlane.xlu0 %6167  ;;  %5789 = vadd.xlane.f32.xlu1 %v5788_v39  ;;  %v5785_v5 = vsel %vm559_vm2, %v10415_v25, 0.0  ;;  %10424 = vpow2.f32 %v6187_v15  ;;  %v6179_v37 = vsub.f32 %v14029_v63, %v14270_v12 }
 0xd7a   : > { %5786 = vadd.xlane.f32.xlu0 %v5785_v5  ;;  %10426 = vpow2.f32 %v6189_v36  ;;  %v6180_v3 = vsub.f32 %v14027_v55, %v14272_v2 }
 0xd7b   : > { %v10417_v53 = vpop.eup %10416  ;;  %v6191_v61 = vmul.f32 1.442695, %v6179_v37 }
 0xd7c   : > { %v10419_v10 = vpop.eup %10418  ;;  %v14278_v42 = vpop.xlane.xlu1 %6170  ;;  %v5794_v33 = vsel %vm559_vm2, %v10417_v53, 0.0  ;;  %v6193_v25 = vmul.f32 1.442695, %v6180_v3 }
 0xd7d   : > { %v14280_v30 = vpop.xlane.xlu0 %6173  ;;  %5795 = vadd.xlane.f32.xlu1 %v5794_v33  ;;  %v5791_v1 = vsel %vm559_vm2, %v10419_v10, 0.0  ;;  %10428 = vpow2.f32 %v6191_v61  ;;  %v6181_v39 = vsub.f32 %v14033_v31, %v14278_v42 }
 0xd7e   : > { %5792 = vadd.xlane.f32.xlu0 %v5791_v1  ;;  %v6182_v10 = vsub.f32 %v14031_v16, %v14280_v30 }
 0xd7f   : > { %v10421_v48 = vpop.eup %10420 }
 0xd80   : > { %v6199_v63 = vsel %vm559_vm2, %v10421_v48, 0.0  ;;  %v10423_v19 = vpop.eup %10422  ;;  %v14291_v54 = vpop.xlane.xlu1 %5657 }
 0xd81   : > { %v14286_v50 = vpop.xlane.xlu0 %5654  ;;  %6200 = vadd.xlane.f32.xlu1 %v6199_v63  ;;  %v6202_v55 = vsel %vm559_vm2, %v10423_v19, 0.0  ;;  %v5694_v63 = vsub.f32 %v14109_v22, %v14291_v54 }
 0xd82   : > { %v5693_v15 = vsub.f32 %v14111_v40, %v14286_v50  ;;  %v6195_v40 = vmul.f32 1.442695, %v6181_v39 }
 0xd83   : > { %v10425_v36 = vpop.eup %10424 }
 0xd84   : > { %v5733_v5 = vmul.f32 1.442695, %v5693_v15  ;;  %v14302_v1 = vpop.xlane.xlu1 %5663  ;;  %v6205_v48 = vsel %vm559_vm2, %v10425_v36, 0.0  ;;  %v10427_v61 = vpop.eup %10426 }
 0xd85   : > { %v14295_v53 = vpop.xlane.xlu0 %5660  ;;  %6203 = vadd.xlane.f32.xlu1 %v6202_v55  ;;  %v6208_v15 = vsel %vm559_vm2, %v10427_v61, 0.0  ;;  %v5696_v55 = vsub.f32 %v14117_v47, %v14302_v1 }
 0xd86   : > { %v5695_v37 = vsub.f32 %v14119_v62, %v14295_v53  ;;  %10430 = vpow2.f32 %v5733_v5  ;;  %v6197_v62 = vmul.f32 1.442695, %v6182_v10 }
 0xd87   : > { %10432 = vpow2.f32 %v6193_v25  ;;  %v10429_v25 = vpop.eup %10428 }
 0xd88   : > { %v5737_v33 = vmul.f32 1.442695, %v5695_v37  ;;  %v14316_v5 = vpop.xlane.xlu1 %5669  ;;  %v6211_v37 = vsel %vm559_vm2, %v10429_v25, 0.0 }
 0xd89   : > { %v14304_v31 = vpop.xlane.xlu0 %5666  ;;  %6206 = vadd.xlane.f32.xlu1 %v6205_v48 }
 0xd8a   : > { %v5697_v3 = vsub.f32 %v14127_v18, %v14304_v31  ;;  %10434 = vpow2.f32 %v5737_v33  ;;  %v5735_v18 = vmul.f32 1.442695, %v5694_v63  ;;  %v5698_v33 = vsub.f32 %v14125_v44, %v14316_v5 }
 0xd8b   : > { %10436 = vpow2.f32 %v6195_v40 }
 0xd8c   : > { %v5741_v19 = vmul.f32 1.442695, %v5697_v3  ;;  %v14324_v61 = vpop.xlane.xlu1 %5675  ;;  %v5743_v63 = vmul.f32 1.442695, %v5698_v33 }
 0xd8d   : > { %v14311_v16 = vpop.xlane.xlu0 %5672  ;;  %6209 = vadd.xlane.f32.xlu1 %v6208_v15 }
 0xd8e   : > { %v5699_v39 = vsub.f32 %v14135_v51, %v14311_v16  ;;  %10438 = vpow2.f32 %v5741_v19  ;;  %v5739_v51 = vmul.f32 1.442695, %v5696_v55  ;;  %v5700_v19 = vsub.f32 %v14133_v24, %v14324_v61 }
 0xd8f   : > { %10440 = vpow2.f32 %v6197_v62 }
 0xd90   : > { %v5745_v36 = vmul.f32 1.442695, %v5699_v39  ;;  %v10431_v22 = vpop.eup %10430 }
 0xd91   : > { %v10433_v40 = vpop.eup %10432  ;;  %6212 = vadd.xlane.f32.xlu1 %v6211_v37  ;;  %v5797_v10 = vsel %vm559_vm2, %v10431_v22, 0.0 }
 0xd92   : > { %10442 = vpow2.f32 %v5745_v36  ;;  %5798 = vadd.xlane.f32.xlu0 %v5797_v10  ;;  %v6214_v47 = vsel %vm559_vm2, %v10433_v40, 0.0 }
 0xd93   : > { %10444 = vpow2.f32 %v5735_v18  ;;  %v5747_v18 = vmul.f32 1.442695, %v5700_v19 }
 0xd94   : > { %v10435_v48 = vpop.eup %10434  ;;  %10446 = vpow2.f32 %v5739_v51 }
 0xd95   : > { %v10437_v3 = vpop.eup %10436  ;;  %6215 = vadd.xlane.f32.xlu1 %v6214_v47  ;;  %v5803_v62 = vsel %vm559_vm2, %v10435_v48, 0.0  ;;  %10448 = vpow2.f32 %v5743_v63 }
 0xd96   : > { %5804 = vadd.xlane.f32.xlu0 %v5803_v62  ;;  %v6217_v25 = vsel %vm559_vm2, %v10437_v3, 0.0  ;;  %10450 = vpow2.f32 %v5747_v18 }
 0xd98   : > { %v10439_v15 = vpop.eup %10438 }
 0xd99   : > { %v10441_v39 = vpop.eup %10440  ;;  %6218 = vadd.xlane.f32.xlu1 %v6217_v25  ;;  %v5809_v44 = vsel %vm559_vm2, %v10439_v15, 0.0 }
 0xd9a   : > { %5810 = vadd.xlane.f32.xlu0 %v5809_v44  ;;  %v6220_v36 = vsel %vm559_vm2, %v10441_v39, 0.0 }
 0xd9c   : > { %v10443_v55 = vpop.eup %10442 }
 0xd9d   : > { %v10445_v22 = vpop.eup %10444  ;;  %6221 = vadd.xlane.f32.xlu1 %v6220_v36  ;;  %v5815_v37 = vsel %vm559_vm2, %v10443_v55, 0.0 }
 0xd9e   : > { %5816 = vadd.xlane.f32.xlu0 %v5815_v37  ;;  %v5800_v24 = vsel %vm559_vm2, %v10445_v22, 0.0  ;;  %v10447_v40 = vpop.eup %10446 }
 0xd9f   : > { %v5806_v10 = vsel %vm559_vm2, %v10447_v40, 0.0  ;;  %v10449_v51 = vpop.eup %10448 }
 0xda0   : > { %v5812_v33 = vsel %vm559_vm2, %v10449_v51, 0.0  ;;  %v10451_v48 = vpop.eup %10450 }
 0xda1   : > { %5801 = vadd.xlane.f32.xlu1 %v5800_v24  ;;  %v5818_v47 = vsel %vm559_vm2, %v10451_v48, 0.0 }
 0xda5   : > { %5807 = vadd.xlane.f32.xlu1 %v5806_v10 }
 0xda9   : > { %5813 = vadd.xlane.f32.xlu1 %v5812_v33 }
 0xdad   : > { %5819 = vadd.xlane.f32.xlu1 %v5818_v47 }
 0xdee   : > { %v5754_v3 = vpop.xlane.xlu1 %5753 }
 0xdef   : > { %10452 = vlog2.f32 %v5754_v3  ;;  %v5751_v62 = vpop.xlane.xlu0 %5750 }
 0xdf0   : > { %10454 = vlog2.f32 %v5751_v62 }
 0xdf2   : > { %v5760_v63 = vpop.xlane.xlu1 %5759 }
 0xdf3   : > { %v5757_v19 = vpop.xlane.xlu0 %5756 }
 0xdf4   : > { %10456 = vlog2.f32 %v5757_v19 }
 0xdf5   : > { %10458 = vlog2.f32 %v5760_v63 }
 0xdf6   : > { %v5766_v15 = vpop.xlane.xlu1 %5765 }
 0xdf7   : > { %v5763_v25 = vpop.xlane.xlu0 %5762 }
 0xdf8   : > { %10460 = vlog2.f32 %v5763_v25 }
 0xdf9   : > { %v10453_v39 = vpop.eup %10452  ;;  %10462 = vlog2.f32 %v5766_v15 }
 0xdfa   : > { %v10455_v44 = vpop.eup %10454  ;;  %v5772_v18 = vpop.xlane.xlu1 %5771  ;;  %v5824_v22 = vmul.f32 0.6931472, %v10453_v39 }
 0xdfb   : > { %v5822_v55 = vmul.f32 0.6931472, %v10455_v44  ;;  %v5769_v36 = vpop.xlane.xlu0 %5768 }
 0xdfc   : > { %v5870_v51 = vadd.f32 %v5824_v22, %v14178_v58 }
 0xdfd   : > { %v5869_v37 = vadd.f32 %v5822_v55, %v14180_v56 }
 0xdfe   : > { %v10457_v24 = vpop.eup %10456  ;;  %v5778_v40 = vpop.xlane.xlu1 %5777 }
 0xdff   : > { %10464 = vlog2.f32 %v5778_v40  ;;  %5893 = vxpose.xlu0.b32.start [1/8] (short) (narrow) %v5869_v37, 8  ;;  %v5775_v10 = vpop.xlane.xlu0 %5774  ;;  %v5826_v33 = vmul.f32 0.6931472, %v10457_v24  ;;  %v10459_v48 = vpop.eup %10458 }
 0xe00   : > { %10466 = vlog2.f32 %v5775_v10  ;;  %v5828_v62 = vmul.f32 0.6931472, %v10459_v48 }
 0xe01   : > { %10468 = vlog2.f32 %v5769_v36  ;;  %v5871_v63 = vadd.f32 %v5826_v33, %v14188_v28 }
 0xe02   : > { %v5784_v47 = vpop.xlane.xlu1 %5783  ;;  %v10461_v56 = vpop.eup %10460  ;;  %v5872_v39 = vadd.f32 %v5828_v62, %v14186_v45 }
 0xe03   : > { %5894 = vxpose.xlu0.b32.cont [2/8] (short) (narrow) %v5870_v51, 8  ;;  %v5781_v3 = vpop.xlane.xlu0 %5780  ;;  %v10463_v15 = vpop.eup %10462  ;;  %v5830_v58 = vmul.f32 0.6931472, %v10461_v56 }
 0xe04   : > { %10470 = vlog2.f32 %v5781_v3  ;;  %v5832_v24 = vmul.f32 0.6931472, %v10463_v15 }
 0xe05   : > { %10472 = vlog2.f32 %v5772_v18  ;;  %v5873_v28 = vadd.f32 %v5830_v58, %v14196_v26  ;;  %v14346_v26 = vpop.f32.mrb[40].mxu0 }
 0xe06   : > { %v5790_v19 = vpop.xlane.xlu1 %5789  ;;  %10474 = vlog2.f32 %v5784_v47  ;;  %v5874_v33 = vadd.f32 %v5832_v24, %v14194_v23  ;;  %v14350_v58 = vpop.f32.mrb[41].mxu0 }
 0xe07   : > { %5895 = vxpose.xlu0.b32.cont [3/8] (short) (narrow) %v5871_v63, 8  ;;  %v5787_v44 = vpop.xlane.xlu0 %5786 }
 0xe08   : > { %10476 = vlog2.f32 %v5787_v44 }
 0xe09   : > { %v10465_v25 = vpop.eup %10464 }
 0xe0a   : > { %v10467_v55 = vpop.eup %10466  ;;  %v5796_v22 = vpop.xlane.xlu1 %5795  ;;  %v5840_v40 = vmul.f32 0.6931472, %v10465_v25 }
 0xe0b   : > { %v5838_v36 = vmul.f32 0.6931472, %v10467_v55  ;;  %5896 = vxpose.xlu0.b32.cont [4/8] (short) (narrow) %v5872_v39, 8  ;;  %v10469_v37 = vpop.eup %10468  ;;  %v5793_v62 = vpop.xlane.xlu0 %5792 }
 0xe0c   : > { %v5834_v48 = vmul.f32 0.6931472, %v10469_v37  ;;  %v5878_v47 = vadd.f32 %v5840_v40, %v14210_v14  ;;  %v14352_v14 = vpop.f32.mrb[42].mxu0 }
 0xe0d   : > { %v5877_v18 = vadd.f32 %v5838_v36, %v14212_v60  ;;  %v14354_v44 = vpop.f32.mrb[43].mxu0 }
 0xe0e   : > { %v10471_v10 = vpop.eup %10470  ;;  %v6201_v51 = vpop.xlane.xlu1 %6200  ;;  %v5875_v15 = vadd.f32 %v5834_v48, %v14204_v17 }
 0xe0f   : > { %10478 = vlog2.f32 %v6201_v51  ;;  %5897 = vxpose.xlu0.b32.cont [5/8] (short) (narrow) %v5873_v28, 8  ;;  %5925 = vxpose.xlu1.b32.start [1/8] (short) (narrow) %v5877_v18, 8  ;;  %v10473_v45 = vpop.eup %10472  ;;  %v5842_v3 = vmul.f32 0.6931472, %v10471_v10  ;;  %v14358_v24 = vpop.f32.mrb[44].mxu0 }
 0xe10   : > { %10480 = vlog2.f32 %v5790_v19  ;;  %v10475_v63 = vpop.eup %10474  ;;  %v5836_v60 = vmul.f32 0.6931472, %v10473_v45  ;;  %v14360_v18 = vpop.f32.mrb[45].mxu0 }
 0xe11   : > { %v5844_v19 = vmul.f32 0.6931472, %v10475_v63  ;;  %v5879_v25 = vadd.f32 %v5842_v3, %v14222_v8  ;;  %v14362_v10 = vpop.f32.mrb[46].mxu0 }
 0xe12   : > { %v6204_v56 = vpop.xlane.xlu1 %6203  ;;  %v10477_v23 = vpop.eup %10476  ;;  %v5876_v36 = vadd.f32 %v5836_v60, %v14202_v57 }
 0xe13   : > { %10482 = vlog2.f32 %v6204_v56  ;;  %5898 = vxpose.xlu0.b32.cont [6/8] (short) (narrow) %v5874_v33, 8  ;;  %5926 = vxpose.xlu1.b32.cont [2/8] (short) (narrow) %v5878_v47, 8  ;;  %v5880_v17 = vadd.f32 %v5844_v19, %v14220_v21  ;;  %v5846_v37 = vmul.f32 0.6931472, %v10477_v23  ;;  %v14365_v51 = vpop.f32.mrb[47].mxu0 }
 0xe14   : > { %10484 = vlog2.f32 %v5793_v62 }
 0xe15   : > { %v5881_v21 = vadd.f32 %v5846_v37, %v14232_v32 }
 0xe16   : > { %v6207_v39 = vpop.xlane.xlu1 %6206 }
 0xe17   : > { %10486 = vlog2.f32 %v6207_v39  ;;  %5899 = vxpose.xlu0.b32.cont [7/8] (short) (narrow) %v5875_v15, 8  ;;  %5927 = vxpose.xlu1.b32.cont [3/8] (short) (narrow) %v5879_v25, 8 }
 0xe18   : > { %10488 = vlog2.f32 %v5796_v22 }
 0xe19   : > { %v10479_v55 = vpop.eup %10478 }
 0xe1a   : > { %v10481_v8 = vpop.eup %10480  ;;  %v6224_v28 = vmul.f32 0.6931472, %v10479_v55  ;;  %v6210_v40 = vpop.xlane.xlu1 %6209 }
 0xe1b   : > { %10490 = vlog2.f32 %v6210_v40  ;;  %5900 = vxpose.xlu0.b32.end [8/8] (short) (narrow) %v5876_v36, 8  ;;  %5928 = vxpose.xlu1.b32.cont [4/8] (short) (narrow) %v5880_v17, 8  ;;  %v5848_v45 = vmul.f32 0.6931472, %v10481_v8 }
 0xe1c   : > { %v6239_v22 = vadd.f32 %v6224_v28, %v14250_v35 }
 0xe1d   : > { %v10483_v57 = vpop.eup %10482  ;;  %v5882_v63 = vadd.f32 %v5848_v45, %v14230_v52 }
 0xe1e   : > { %v10485_v33 = vpop.eup %10484  ;;  %v6226_v48 = vmul.f32 0.6931472, %v10483_v57  ;;  %v6213_v47 = vpop.xlane.xlu1 %6212 }
 0xe1f   : > { %10492 = vlog2.f32 %v6213_v47  ;;  %6247 = vxpose.xlu0.b32.start [1/8] (short) (narrow) %v6239_v22, 8  ;;  %5929 = vxpose.xlu1.b32.cont [5/8] (short) (narrow) %v5881_v21, 8  ;;  %v5850_v56 = vmul.f32 0.6931472, %v10485_v33  ;;  %v5799_v17 = vpop.xlane.xlu0 %5798 }
 0xe20   : > { %v6240_v3 = vadd.f32 %v6226_v48, %v14252_v43 }
 0xe21   : > { %v10487_v62 = vpop.eup %10486  ;;  %v5883_v23 = vadd.f32 %v5850_v56, %v14242_v59 }
 0xe22   : > { %v10489_v60 = vpop.eup %10488  ;;  %v6228_v35 = vmul.f32 0.6931472, %v10487_v62  ;;  %v6216_v15 = vpop.xlane.xlu1 %6215 }
 0xe23   : > { %10494 = vlog2.f32 %v6216_v15  ;;  %6248 = vxpose.xlu0.b32.cont [2/8] (short) (narrow) %v6240_v3, 8  ;;  %5930 = vxpose.xlu1.b32.cont [6/8] (short) (narrow) %v5882_v63, 8  ;;  %v5852_v25 = vmul.f32 0.6931472, %v10489_v60  ;;  %v5805_v57 = vpop.xlane.xlu0 %5804 }
 0xe24   : > { %v6241_v32 = vadd.f32 %v6228_v35, %v14260_v41 }
 0xe25   : > { %v10491_v19 = vpop.eup %10490  ;;  %v5884_v36 = vadd.f32 %v5852_v25, %v14240_v38 }
 0xe26   : > { %v6230_v39 = vmul.f32 0.6931472, %v10491_v19  ;;  %v6219_v55 = vpop.xlane.xlu1 %6218 }
 0xe27   : > { %10496 = vlog2.f32 %v6219_v55  ;;  %6249 = vxpose.xlu0.b32.cont [3/8] (short) (narrow) %v6241_v32, 8  ;;  %5931 = vxpose.xlu1.b32.cont [7/8] (short) (narrow) %v5883_v23, 8  ;;  %v5811_v62 = vpop.xlane.xlu0 %5810 }
 0xe28   : > { %v6242_v52 = vadd.f32 %v6230_v39, %v14262_v27 }
 0xe29   : > { %v10493_v43 = vpop.eup %10492 }
 0xe2a   : > { %v6232_v37 = vmul.f32 0.6931472, %v10493_v43  ;;  %v6222_v8 = vpop.xlane.xlu1 %6221 }
 0xe2b   : > { %10498 = vlog2.f32 %v6222_v8  ;;  %6250 = vxpose.xlu0.b32.cont [4/8] (short) (narrow) %v6242_v52, 8  ;;  %5932 = vxpose.xlu1.b32.end [8/8] (short) (narrow) %v5884_v36, 8  ;;  %v5817_v15 = vpop.xlane.xlu0 %5816 }
 0xe2c   : > { %10500 = vlog2.f32 %v5799_v17  ;;  %v6243_v41 = vadd.f32 %v6232_v37, %v14270_v12 }
 0xe2d   : > { %v10495_v59 = vpop.eup %10494 }
 0xe2e   : > { %v6234_v28 = vmul.f32 0.6931472, %v10495_v59  ;;  %v5802_v40 = vpop.xlane.xlu1 %5801 }
 0xe2f   : > { %6251 = vxpose.xlu0.b32.cont [5/8] (short) (narrow) %v6243_v41, 8  ;;  %10502 = vlog2.f32 %v5802_v40 }
 0xe30   : > { %v6244_v22 = vadd.f32 %v6234_v28, %v14272_v2  ;;  %10504 = vlog2.f32 %v5805_v57 }
 0xe31   : > { %v10497_v27 = vpop.eup %10496 }
 0xe32   : > { %v6236_v45 = vmul.f32 0.6931472, %v10497_v27  ;;  %v5808_v33 = vpop.xlane.xlu1 %5807 }
 0xe33   : > { %6252 = vxpose.xlu0.b32.cont [6/8] (short) (narrow) %v6244_v22, 8  ;;  %10506 = vlog2.f32 %v5808_v33  ;;  %v6929_v33 = vmul.f32 256.0, %v14352_v14 }
 0xe34   : > { %v6245_v38 = vadd.f32 %v6236_v45, %v14278_v42  ;;  %10508 = vlog2.f32 %v5811_v62  ;;  %v10876_v45 = vld [vmem:[%s11403_s11] sm:$0x1] }
 0xe35   : > { %v10499_v21 = vpop.eup %10498 }
 0xe36   : > { %v10501_v48 = vpop.eup %10500  ;;  %v6238_v47 = vmul.f32 0.6931472, %v10499_v21  ;;  %v5814_v56 = vpop.xlane.xlu1 %5813  ;;  %v6926_v21 = vmul.f32 256.0, %v14350_v58 }
 0xe37   : > { %6253 = vxpose.xlu0.b32.cont [7/8] (short) (narrow) %v6245_v38, 8  ;;  %v5854_v3 = vmul.f32 0.6931472, %v10501_v48  ;;  %10510 = vlog2.f32 %v5814_v56  ;;  %v6931_v48 = vmul.f32 256.0, %v14358_v24  ;;  %v6288_v56 = vadd.f32 %v13980_v9, %v11394_v49 }
 0xe38   : > { %v6246_v12 = vadd.f32 %v6238_v47, %v14280_v30  ;;  %10512 = vlog2.f32 %v5817_v15  ;;  %v6930_v47 = vmul.f32 256.0, %v14360_v18 }
 0xe39   : > { %v10503_v63 = vpop.eup %10502  ;;  %v5885_v60 = vadd.f32 %v5854_v3, %v14286_v50  ;;  %v6932_v3 = vmul.f32 256.0, %v14365_v51 }
 0xe3a   : > { %v5856_v2 = vmul.f32 0.6931472, %v10503_v63  ;;  %v10505_v35 = vpop.eup %10504  ;;  %v5820_v25 = vpop.xlane.xlu1 %5819 }
 0xe3b   : > { %6254 = vxpose.xlu0.b32.end [8/8] (short) (narrow) %v6246_v12, 8  ;;  %v5858_v42 = vmul.f32 0.6931472, %v10505_v35  ;;  %10514 = vlog2.f32 %v5820_v25  ;;  %v6933_v12 = vmul.f32 256.0, %v14362_v10  ;;  %v6320_v25 = vld [vmem:[#allocation2 + $0x40] sm:$0xff] }
 0xe3c   : > { %v5886_v32 = vadd.f32 %v5856_v2, %v14291_v54 }
 0xe3d   : > { %v10507_v19 = vpop.eup %10506  ;;  %v5887_v23 = vadd.f32 %v5858_v42, %v14295_v53 }
 0xe3e   : > { %v5860_v30 = vmul.f32 0.6931472, %v10507_v19  ;;  %v10509_v39 = vpop.eup %10508 }
 0xe3f   : > { %5957 = vxpose.xlu0.b32.start [1/8] (short) (narrow) %v5885_v60, 8  ;;  %v5862_v55 = vmul.f32 0.6931472, %v10509_v39 }
 0xe40   : > { %v5888_v50 = vadd.f32 %v5860_v30, %v14302_v1 }
 0xe41   : > { %v10511_v52 = vpop.eup %10510  ;;  %v5889_v36 = vadd.f32 %v5862_v55, %v14304_v31  ;;  %v6284_v31 = vadd.f32 %v13982_v29, %v11394_v49  ;;  %v6928_v29 = vmul.f32 256.0, %v14354_v44  ;;  %v6322_v55 = vld [vmem:[#allocation2 + $0x50] sm:$0xff] }
 0xe42   : > { %v5864_v43 = vmul.f32 0.6931472, %v10511_v52  ;;  %v10513_v17 = vpop.eup %10512 }
 0xe43   : > { %5958 = vxpose.xlu0.b32.cont [2/8] (short) (narrow) %v5886_v32, 8  ;;  %v5866_v54 = vmul.f32 0.6931472, %v10513_v17 }
 0xe44   : > { %v5890_v37 = vadd.f32 %v5864_v43, %v14316_v5 }
 0xe45   : > { %v10515_v8 = vpop.eup %10514  ;;  %v5891_v53 = vadd.f32 %v5866_v54, %v14311_v16  ;;  %v6296_v54 = vadd.f32 %v13976_v13, %v11428_v6 }
 0xe46   : > { %v5868_v41 = vmul.f32 0.6931472, %v10515_v8  ;;  %v6324_v8 = vld [vmem:[#allocation2 + $0x60] sm:$0xff] }
 0xe47   : > { %5959 = vxpose.xlu0.b32.cont [3/8] (short) (narrow) %v5887_v23, 8 }
 0xe48   : > { %v5892_v59 = vadd.f32 %v5868_v41, %v14324_v61  ;;  %v6927_v61 = vmul.f32 256.0, %v14346_v26 }
 0xe4b   : > { %5960 = vxpose.xlu0.b32.cont [4/8] (short) (narrow) %v5888_v50, 8  ;;  %v6344_v50 = vmul.f32 256.0, %v6320_v25 }
 0xe4f   : > { %5961 = vxpose.xlu0.b32.cont [5/8] (short) (narrow) %v5889_v36, 8  ;;  %v6346_v36 = vmul.f32 256.0, %v6322_v55 }
 0xe53   : > { %5962 = vxpose.xlu0.b32.cont [6/8] (short) (narrow) %v5890_v37, 8 }
 0xe57   : > { %5963 = vxpose.xlu0.b32.cont [7/8] (short) (narrow) %v5891_v53, 8 }
 0xe5b   : > { %5964 = vxpose.xlu0.b32.end [8/8] (short) (narrow) %v5892_v59, 8 }
 0xe7f   : > { %v5909_v1 = vpop.trf.xlu0 }
 0xe80   : > { %5989 = vst.msk [vmem:[#allocation3] sm:$0x1] %vm1268_vm3, %v5909_v1 }
 0xe87   : > { %v6280_v28 = vld [vmem:[#allocation3] sm:$0x1] }
 0xe88   : > { %v6285_v40 = vmul.f32 0.015625, %v6280_v28  ;;  %v6348_v28 = vmul.f32 256.0, %v6324_v8  ;;  %v6319_v8 = vld [vmem:[#allocation2 + $0x38] sm:$0xff] }
 0xe8a   : > { %v6286_v22 = vsub.f32 %v6284_v31, %v6285_v40  ;;  %v6326_v40 = vld [vmem:[#allocation2 + $0x70] sm:$0xff] }
 0xe8c   : > { %v14389_v5 = vmul.f32 0.5, %v6286_v22 }
 0xe8e   : > { %v6309_v27 = vsub.f32 %v14389_v5, %v11394_v49 }
 0xe8f   : > { %v5941_v16 = vpop.trf.xlu1 }
 0xe90   : > { %v6310_v57 = vmul.f32 256.0, %v6309_v27  ;;  %5990 = vst.msk [vmem:[#allocation3 + $0x1] sm:$0x1] %vm1268_vm3, %v5941_v16 }
 0xe92   : > { %v6311_v38 = vadd.f32 %v10876_v45, %v6310_v57  ;;  %v6350_v57 = vmul.f32 256.0, %v6326_v40  ;;  %v6312_v40 = vld [vmem:[#allocation2] sm:$0xff] }
 0xe94   : > { %v6938_v62 = vrot.slane %v6311_v38, %v11425_v4 }
 0xe96   : > { %v14404_v63 = vadd.f32 %v6938_v62, %v6927_v61  ;;  %v14406_v26 = vadd.f32 %v6938_v62, %v6926_v21  ;;  %v14408_v2 = vadd.f32 %v6938_v62, %v6929_v33  ;;  %v14410_v58 = vadd.f32 %v6938_v62, %v6928_v29  ;;  %v6321_v61 = vld [vmem:[#allocation2 + $0x48] sm:$0xff] }
 0xe97   : > { %v14412_v14 = vadd.f32 %v6938_v62, %v6931_v48  ;;  %v14414_v44 = vadd.f32 %v6938_v62, %v6930_v47  ;;  %v14416_v24 = vadd.f32 %v6938_v62, %v6933_v12  ;;  %v14418_v18 = vadd.f32 %v6938_v62, %v6932_v3  ;;  %v6281_v10 = vld [vmem:[#allocation3 + $0x1] sm:$0x1]  ;;  %v6313_v29 = vld [vmem:[#allocation2 + $0x8] sm:$0xff]  ;;  %v14469_v47 = vld [vmem:[%s11420_s14] sm:$0x1] }
 0xe98   : > { %v6948_v51 = vsel %vm559_vm2, %v14406_v26, -inf  ;;  %v6289_v60 = vmul.f32 0.015625, %v6281_v10  ;;  %v6951_v42 = vsel %vm559_vm2, %v14404_v63, -inf  ;;  %v6954_v30 = vsel %vm559_vm2, %v14410_v58, -inf  ;;  %v6323_v3 = vld [vmem:[#allocation2 + $0x58] sm:$0xff] }
 0xe99   : > { %6949 = vmax.xlane.f32.xlu1 %v6948_v51  ;;  %v6957_v39 = vsel %vm559_vm2, %v14408_v2, -inf  ;;  %v6960_v37 = vsel %vm559_vm2, %v14414_v44, -inf  ;;  %v6963_v31 = vsel %vm559_vm2, %v14412_v14, -inf  ;;  %v6345_v48 = vmul.f32 256.0, %v6321_v61 }
 0xe9a   : > { %v6290_v35 = vsub.f32 %v6288_v56, %v6289_v60  ;;  %v6969_v62 = vsel %vm559_vm2, %v14416_v24, -inf  ;;  %v6337_v51 = vmul.f32 256.0, %v6313_v29  ;;  %v6317_v60 = vld [vmem:[#allocation2 + $0x28] sm:$0xff] }
 0xe9c   : > { %v14426_v15 = vmul.f32 0.5, %v6290_v35 }
 0xe9d   : > { %6952 = vmax.xlane.f32.xlu1 %v6951_v42 }
 0xe9e   : > { %v6301_v19 = vsub.f32 %v14426_v15, %v11394_v49 }
 0xe9f   : > { %v6263_v32 = vpop.trf.xlu0 }
 0xea0   : > { %6279 = vst.msk [vmem:[#allocation4] sm:$0x1] %vm1268_vm3, %v6263_v32  ;;  %v6304_v9 = vmul.f32 256.0, %v6301_v19  ;;  %v6347_v32 = vmul.f32 256.0, %v6323_v3  ;;  %v6341_v19 = vmul.f32 256.0, %v6317_v60 }
 0xea1   : > { %6955 = vmax.xlane.f32.xlu1 %v6954_v30  ;;  %v6325_v30 = vld [vmem:[#allocation2 + $0x68] sm:$0xff] }
 0xea2   : > { %v6307_v23 = vadd.f32 %v10876_v45, %v6304_v9  ;;  %v6966_v45 = vsel %vm559_vm2, %v14418_v18, -inf }
 0xea4   : > { %v14436_v52 = vrot.slane %v6307_v23, %v11425_v4 }
 0xea5   : > { %6958 = vmax.xlane.f32.xlu1 %v6957_v39  ;;  %v6318_v39 = vld [vmem:[#allocation2 + $0x30] sm:$0xff] }
 0xea6   : > { %v14439_v43 = vadd.f32 %v14436_v52, %v6344_v50  ;;  %v14448_v59 = vadd.f32 %v14436_v52, %v6346_v36  ;;  %v14457_v27 = vadd.f32 %v14436_v52, %v6348_v28  ;;  %v14466_v33 = vadd.f32 %v14436_v52, %v6350_v57 }
 0xea7   : > { %v6283_v17 = vld [vmem:[#allocation4] sm:$0x1]  ;;  %v14475_v10 = vadd.f32 %v14436_v52, %v6345_v48  ;;  %v14487_v23 = vadd.f32 %v14436_v52, %v6347_v32  ;;  %v6349_v50 = vmul.f32 256.0, %v6325_v30  ;;  %v6342_v36 = vmul.f32 256.0, %v6318_v39 }
 0xea8   : > { %v6297_v41 = vmul.f32 0.015625, %v6283_v17  ;;  %v6426_v53 = vsel %vm559_vm2, %v14439_v43, -inf  ;;  %v6432_v22 = vsel %vm559_vm2, %v14448_v59, -inf  ;;  %v6438_v21 = vsel %vm559_vm2, %v14457_v27, -inf  ;;  %v6327_v17 = vld [vmem:[#allocation2 + $0x78] sm:$0xff]  ;;  %v6316_v30 = vld [vmem:[#allocation2 + $0x20] sm:$0xff] }
 0xea9   : > { %6961 = vmax.xlane.f32.xlu1 %v6960_v37  ;;  %6427 = vmax.xlane.f32.xlu0 %v6426_v53  ;;  %v6444_v35 = vsel %vm559_vm2, %v14466_v33, -inf  ;;  %v6429_v9 = vsel %vm559_vm2, %v14475_v10, -inf  ;;  %v14494_v37 = vadd.f32 %v14436_v52, %v6349_v50  ;;  %v6340_v50 = vmul.f32 256.0, %v6316_v30  ;;  %v6334_v30 = vld [vmem:[#allocation2 + $0xb0] sm:$0xff] }
 0xeaa   : > { %v6298_v1 = vsub.f32 %v6296_v54, %v6297_v41  ;;  %v6435_v54 = vsel %vm559_vm2, %v14487_v23, -inf }
 0xeac   : > { %v14452_v13 = vmul.f32 0.5, %v6298_v1  ;;  %v6351_v1 = vmul.f32 256.0, %v6327_v17 }
 0xead   : > { %6964 = vmax.xlane.f32.xlu1 %v6963_v31  ;;  %6433 = vmax.xlane.f32.xlu0 %v6432_v22  ;;  %v6343_v31 = vmul.f32 256.0, %v6319_v8  ;;  %v6441_v22 = vsel %vm559_vm2, %v14494_v37, -inf  ;;  %v6329_v8 = vld [vmem:[#allocation2 + $0x88] sm:$0xff] }
 0xeae   : > { %v6300_v16 = vsub.f32 %v14452_v13, %v11428_v6 }
 0xeb0   : > { %v6303_v38 = vmul.f32 256.0, %v6300_v16  ;;  %v14504_v16 = vadd.f32 %v14436_v52, %v6351_v1 }
 0xeb1   : > { %6967 = vmax.xlane.f32.xlu1 %v6966_v45  ;;  %6439 = vmax.xlane.f32.xlu0 %v6438_v21  ;;  %v6336_v45 = vmul.f32 256.0, %v6312_v40 }
 0xeb2   : > { %v6306_v12 = vadd.f32 %v14469_v47, %v6303_v38  ;;  %v6314_v38 = vld [vmem:[#allocation2 + $0x10] sm:$0xff]  ;;  %v6447_v21 = vsel %vm559_vm2, %v14504_v16, -inf }
 0xeb3   : > { %v6338_v52 = vmul.f32 256.0, %v6314_v38 }
 0xeb4   : > { %v6366_v56 = vrot.slane %v6306_v12, %v11425_v4  ;;  %v6315_v12 = vld [vmem:[#allocation2 + $0x18] sm:$0xff] }
 0xeb5   : > { %6970 = vmax.xlane.f32.xlu1 %v6969_v62  ;;  %6445 = vmax.xlane.f32.xlu0 %v6444_v35  ;;  %v6292_v62 = vadd.f32 %v14083_v7, %v11428_v6  ;;  %v6339_v32 = vmul.f32 256.0, %v6315_v12  ;;  %v6332_v12 = vld [vmem:[#allocation2 + $0xa0] sm:$0xff] }
 0xeb6   : > { %v14480_v42 = vadd.f32 %v6366_v56, %v6337_v51  ;;  %v14489_v55 = vadd.f32 %v6366_v56, %v6341_v19  ;;  %v14498_v53 = vadd.f32 %v6366_v56, %v6342_v36  ;;  %v14508_v61 = vadd.f32 %v6366_v56, %v6343_v31  ;;  %v6330_v31 = vld [vmem:[#allocation2 + $0x90] sm:$0xff] }
 0xeb7   : > { %v14512_v29 = vadd.f32 %v6366_v56, %v6336_v45  ;;  %v14520_v60 = vadd.f32 %v6366_v56, %v6338_v52  ;;  %v14532_v17 = vadd.f32 %v6366_v56, %v6340_v50  ;;  %v6333_v52 = vld [vmem:[#allocation2 + $0xa8] sm:$0xff] }
 0xeb8   : > { %v6405_v25 = vsel %vm559_vm2, %v14480_v42, -inf  ;;  %v6417_v41 = vsel %vm559_vm2, %v14489_v55, -inf  ;;  %v6420_v57 = vsel %vm559_vm2, %v14498_v53, -inf  ;;  %v6423_v48 = vsel %vm559_vm2, %v14508_v61, -inf }
 0xeb9   : > { %6430 = vmax.xlane.f32.xlu1 %v6429_v9  ;;  %6406 = vmax.xlane.f32.xlu0 %v6405_v25  ;;  %v6402_v51 = vsel %vm559_vm2, %v14512_v29, -inf  ;;  %v6408_v9 = vsel %vm559_vm2, %v14520_v60, -inf  ;;  %v14524_v25 = vadd.f32 %v6366_v56, %v6339_v32  ;;  %v6414_v40 = vsel %vm559_vm2, %v14532_v17, -inf }
 0xeba   : > { %v6356_v32 = vmul.f32 256.0, %v6332_v12  ;;  %v7591_v12 = vld [vmem:[%s11032_s5 + $0x28] sm:$0xff] }
 0xebb   : > { %v6411_v36 = vsel %vm559_vm2, %v14524_v25, -inf }
 0xebd   : > { %6436 = vmax.xlane.f32.xlu1 %v6435_v54  ;;  %6418 = vmax.xlane.f32.xlu0 %v6417_v41  ;;  %v6328_v41 = vld [vmem:[#allocation2 + $0x80] sm:$0xff] }
 0xebe   : > { %v6352_v45 = vmul.f32 256.0, %v6328_v41 }
 0xebf   : > { %v5973_v28 = vpop.trf.xlu0 }
 0xec0   : > { %5991 = vst.msk [vmem:[#allocation3 + $0x2] sm:$0x1] %vm1268_vm3, %v5973_v28  ;;  %v6331_v28 = vld [vmem:[#allocation2 + $0x98] sm:$0xff] }
 0xec1   : > { %6442 = vmax.xlane.f32.xlu1 %v6441_v22  ;;  %6421 = vmax.xlane.f32.xlu0 %v6420_v57  ;;  %v6353_v22 = vmul.f32 256.0, %v6329_v8  ;;  %v6358_v8 = vmul.f32 256.0, %v6334_v30 }
 0xec5   : > { %6448 = vmax.xlane.f32.xlu1 %v6447_v21  ;;  %6424 = vmax.xlane.f32.xlu0 %v6423_v48  ;;  %v6355_v21 = vmul.f32 256.0, %v6331_v28  ;;  %v6354_v48 = vmul.f32 256.0, %v6330_v31 }
 0xec7   : > { %v6282_v3 = vld [vmem:[#allocation3 + $0x2] sm:$0x1] }
 0xec8   : > { %v6293_v35 = vmul.f32 0.015625, %v6282_v3 }
 0xec9   : > { %6403 = vmax.xlane.f32.xlu1 %v6402_v51 }
 0xeca   : > { %v6294_v19 = vsub.f32 %v6292_v62, %v6293_v35  ;;  %v6357_v35 = vmul.f32 256.0, %v6333_v52  ;;  %v7590_v52 = vld [vmem:[%s11032_s5 + $0x20] sm:$0xff] }
 0xecc   : > { %v14526_v39 = vmul.f32 0.5, %v6294_v19  ;;  %v6335_v19 = vld [vmem:[#allocation2 + $0xb8] sm:$0xff] }
 0xecd   : > { %6409 = vmax.xlane.f32.xlu1 %v6408_v9 }
 0xece   : > { %v6302_v7 = vsub.f32 %v14526_v39, %v11428_v6 }
 0xed0   : > { %v6305_v54 = vmul.f32 256.0, %v6302_v7 }
 0xed1   : > { %6412 = vmax.xlane.f32.xlu1 %v6411_v36 }
 0xed2   : > { %v6308_v1 = vadd.f32 %v14469_v47, %v6305_v54  ;;  %v6359_v54 = vmul.f32 256.0, %v6335_v19 }
 0xed4   : > { %v6374_v57 = vrot.slane %v6308_v1, %v11425_v4 }
 0xed5   : > { %6415 = vmax.xlane.f32.xlu1 %v6414_v40 }
 0xed6   : > { %v14538_v38 = vadd.f32 %v6374_v57, %v6353_v22  ;;  %v14540_v56 = vadd.f32 %v6374_v57, %v6352_v45  ;;  %v14546_v62 = vadd.f32 %v6374_v57, %v6355_v21  ;;  %v14548_v51 = vadd.f32 %v6374_v57, %v6354_v48  ;;  %v7586_v45 = vld [vmem:[%s11032_s5] sm:$0xff]  ;;  %v7587_v21 = vld [vmem:[%s11032_s5 + $0x8] sm:$0xff]  ;;  %v7588_v48 = vld [vmem:[%s11032_s5 + $0x10] sm:$0xff] }
 0xed7   : > { %v14554_v7 = vadd.f32 %v6374_v57, %v6357_v35  ;;  %v14556_v36 = vadd.f32 %v6374_v57, %v6356_v32  ;;  %v14562_v28 = vadd.f32 %v6374_v57, %v6359_v54  ;;  %v14564_v31 = vadd.f32 %v6374_v57, %v6358_v8  ;;  %9220 = vmatprep.mubr.msk.f32.mxu1 %vm269_vm0, %v7586_v45  ;;  %v7589_v57 = vld [vmem:[%s11032_s5 + $0x18] sm:$0xff] }
 0xed8   : > { %v6453_v47 = vsel %vm559_vm2, %v14538_v38, -inf  ;;  %v6450_v3 = vsel %vm559_vm2, %v14540_v56, -inf  ;;  %v6459_v9 = vsel %vm559_vm2, %v14546_v62, -inf  ;;  %v6456_v50 = vsel %vm559_vm2, %v14548_v51, -inf  ;;  %9221 = vmatmul.mubr.msk.f32.vlgmr.msra.gmra.mrb[40].mxu1 %vm269_vm0, %v7587_v21 }
 0xed9   : > { %6454 = vmax.xlane.f32.xlu1 %v6453_v47  ;;  %6451 = vmax.xlane.f32.xlu0 %v6450_v3  ;;  %v6465_v41 = vsel %vm559_vm2, %v14554_v7, -inf  ;;  %v6462_v1 = vsel %vm559_vm2, %v14556_v36, -inf  ;;  %v6471_v40 = vsel %vm559_vm2, %v14562_v28, -inf  ;;  %v6468_v22 = vsel %vm559_vm2, %v14564_v31, -inf  ;;  %v7592_v47 = vld [vmem:[%s11032_s5 + $0x30] sm:$0xff]  ;;  %v7593_v3 = vld [vmem:[%s11032_s5 + $0x38] sm:$0xff] }
 0xeda   : > { %9223 = vmatprep.mubr.msk.f32.mxu1 %vm269_vm0, %v7588_v48  ;;  %9576 = vmatpush3.bf16.xpose.msk.msra.mxu1 %vm11036_vm1, %v11071_v11 }
 0xedb   : > { %9573 = vmatprep.subr.msk.bf16.mxu1 %vm11036_vm1, %v11102_v20 }
 0xedc   : > { %9224 = vmatmul.mubr.msk.f32.gmra.mrb[42].mxu1 %vm269_vm0, %v7589_v57 }
 0xedd   : > { %6460 = vmax.xlane.f32.xlu1 %v6459_v9  ;;  %6457 = vmax.xlane.f32.xlu0 %v6456_v50 }
 0xede   : > { %9226 = vmatprep.mubr.msk.f32.mxu1 %vm269_vm0, %v7590_v52 }
 0xee0   : > { %9227 = vmatmul.mubr.msk.f32.gmra.mrb[44].mxu1 %vm269_vm0, %v7591_v12 }
 0xee1   : > { %6466 = vmax.xlane.f32.xlu1 %v6465_v41  ;;  %6463 = vmax.xlane.f32.xlu0 %v6462_v1 }
 0xee2   : > { %9229 = vmatprep.mubr.msk.f32.mxu1 %vm269_vm0, %v7592_v47  ;;  %9577 = vmatpush3.bf16.xpose.msk.msra.mxu1 %vm11036_vm1, %v11102_v20 }
 0xee3   : > { %9574 = vmatprep.subr.msk.bf16.mxu1 %vm11036_vm1, %v11149_v34 }
 0xee4   : > { %9230 = vmatmul.mubr.msk.f32.gmra.mrb[46].mxu1 %vm269_vm0, %v7593_v3 }
 0xee5   : > { %6472 = vmax.xlane.f32.xlu1 %v6471_v40  ;;  %6469 = vmax.xlane.f32.xlu0 %v6468_v22 }
 0xeea   : > { %9578 = vmatpush3.bf16.xpose.msk.msra.mxu1 %vm11036_vm1, %v11149_v34 }
 0xeeb   : > { %9575 = vmatprep.subr.msk.bf16.mxu1 %vm11036_vm1, %v11185_v46 }
 0xef2   : > { %9579 = vmatpush3.bf16.xpose.msk.msra.mxu1 %vm11036_vm1, %v11185_v46 }
 0xf26   : > { %v14598_v11 = vpop.xlane.xlu1 %6949 }
 0xf2a   : > { %v14606_v35 = vpop.xlane.xlu1 %6952 }
 0xf2e   : > { %v14608_v32 = vpop.xlane.xlu1 %6955 }
 0xf32   : > { %v14613_v20 = vpop.xlane.xlu1 %6958 }
 0xf33   : > { %v6975_v57 = vsub.f32 %v14408_v2, %v14613_v20 }
 0xf36   : > { %v14615_v19 = vpop.xlane.xlu1 %6961  ;;  %v14617_v30 = vpop.xlane.xlu0 %6427 }
 0xf37   : > { %v6482_v34 = vsub.f32 %v14439_v43, %v14617_v30  ;;  %v6973_v43 = vsub.f32 %v14404_v63, %v14606_v35 }
 0xf39   : > { %v6514_v9 = vmul.f32 1.442695, %v6482_v34  ;;  %v6982_v48 = vmul.f32 1.442695, %v6973_v43  ;;  %v6986_v34 = vmul.f32 1.442695, %v6975_v57 }
 0xf3a   : > { %v14621_v50 = vpop.xlane.xlu1 %6964  ;;  %v14623_v54 = vpop.xlane.xlu0 %6433 }
 0xf3b   : > { %10516 = vpow2.f32 %v6514_v9  ;;  %v6484_v8 = vsub.f32 %v14448_v59, %v14623_v54 }
 0xf3d   : > { %v6518_v0 = vmul.f32 1.442695, %v6484_v8 }
 0xf3e   : > { %v14627_v46 = vpop.xlane.xlu1 %6967  ;;  %v14629_v41 = vpop.xlane.xlu0 %6439 }
 0xf3f   : > { %10518 = vpow2.f32 %v6518_v0  ;;  %v6486_v1 = vsub.f32 %v14457_v27, %v14629_v41 }
 0xf41   : > { %v6522_v40 = vmul.f32 1.442695, %v6486_v1 }
 0xf42   : > { %v14635_v22 = vpop.xlane.xlu1 %6970  ;;  %v14637_v45 = vpop.xlane.xlu0 %6445 }
 0xf43   : > { %10520 = vpow2.f32 %v6522_v40  ;;  %v6488_v59 = vsub.f32 %v14466_v33, %v14637_v45  ;;  %v6977_v33 = vsub.f32 %v14412_v14, %v14621_v50  ;;  %v6979_v40 = vsub.f32 %v14416_v24, %v14635_v22 }
 0xf45   : > { %v10517_v21 = vpop.eup %10516  ;;  %v6526_v52 = vmul.f32 1.442695, %v6488_v59  ;;  %v6990_v43 = vmul.f32 1.442695, %v6977_v33 }
 0xf46   : > { %v14643_v12 = vpop.xlane.xlu1 %6430  ;;  %v6570_v27 = vsel %vm559_vm2, %v10517_v21, 0.0  ;;  %v14664_v21 = vpop.xlane.xlu0 %6406 }
 0xf47   : > { %v6483_v63 = vsub.f32 %v14475_v10, %v14643_v12  ;;  %10522 = vpow2.f32 %v6526_v52  ;;  %6571 = vadd.xlane.f32.xlu0 %v6570_v27  ;;  %v6972_v10 = vsub.f32 %v14406_v26, %v14598_v11  ;;  %v6974_v26 = vsub.f32 %v14410_v58, %v14608_v32 }
 0xf48   : > { %10524 = vpow2.f32 %v6982_v48 }
 0xf49   : > { %v6516_v47 = vmul.f32 1.442695, %v6483_v63  ;;  %v10519_v3 = vpop.eup %10518  ;;  %v6980_v48 = vmul.f32 1.442695, %v6972_v10  ;;  %v6994_v63 = vmul.f32 1.442695, %v6979_v40 }
 0xf4a   : > { %v14650_v9 = vpop.xlane.xlu1 %6436  ;;  %v6576_v8 = vsel %vm559_vm2, %v10519_v3, 0.0  ;;  %v6984_v3 = vmul.f32 1.442695, %v6974_v26  ;;  %v14673_v33 = vpop.xlane.xlu0 %6418 }
 0xf4b   : > { %10526 = vpow2.f32 %v6516_v47  ;;  %v6485_v2 = vsub.f32 %v14487_v23, %v14650_v9  ;;  %6577 = vadd.xlane.f32.xlu0 %v6576_v8 }
 0xf4c   : > { %10528 = vpow2.f32 %v6986_v34  ;;  %v6976_v34 = vsub.f32 %v14414_v44, %v14615_v19  ;;  %v6978_v44 = vsub.f32 %v14418_v18, %v14627_v46 }
 0xf4d   : > { %v6520_v0 = vmul.f32 1.442695, %v6485_v2  ;;  %v10521_v1 = vpop.eup %10520 }
 0xf4e   : > { %v14659_v14 = vpop.xlane.xlu1 %6442  ;;  %v6582_v23 = vsel %vm559_vm2, %v10521_v1, 0.0 }
 0xf4f   : > { %10530 = vpow2.f32 %v6520_v0  ;;  %v6487_v59 = vsub.f32 %v14494_v37, %v14659_v14  ;;  %6583 = vadd.xlane.f32.xlu0 %v6582_v23 }
 0xf50   : > { %10532 = vpow2.f32 %v6990_v43  ;;  %v6988_v43 = vmul.f32 1.442695, %v6976_v34 }
 0xf51   : > { %v6524_v57 = vmul.f32 1.442695, %v6487_v59  ;;  %v10523_v52 = vpop.eup %10522 }
 0xf52   : > { %v14668_v24 = vpop.xlane.xlu1 %6448  ;;  %v6588_v27 = vsel %vm559_vm2, %v10523_v52, 0.0  ;;  %v10525_v47 = vpop.eup %10524 }
 0xf53   : > { %10534 = vpow2.f32 %v6524_v57  ;;  %6589 = vadd.xlane.f32.xlu0 %v6588_v27  ;;  %v6999_v10 = vsel %vm559_vm2, %v10525_v47, 0.0  ;;  %v14689_v57 = vpop.xlane.xlu0 %6421  ;;  %v6489_v18 = vsub.f32 %v14504_v16, %v14668_v24 }
 0xf54   : > { %10536 = vpow2.f32 %v6980_v48 }
 0xf55   : > { %v10527_v37 = vpop.eup %10526  ;;  %10538 = vpow2.f32 %v6994_v63  ;;  %v6992_v63 = vmul.f32 1.442695, %v6978_v44  ;;  %v6528_v16 = vmul.f32 1.442695, %v6489_v18 }
 0xf56   : > { %v14675_v58 = vpop.xlane.xlu1 %6403  ;;  %v6573_v2 = vsel %vm559_vm2, %v10527_v37, 0.0  ;;  %v10529_v0 = vpop.eup %10528  ;;  %10540 = vpow2.f32 %v6984_v3 }
 0xf57   : > { %v6474_v8 = vsub.f32 %v14512_v29, %v14675_v58  ;;  %6574 = vadd.xlane.f32.xlu1 %v6573_v2  ;;  %7000 = vadd.xlane.f32.xlu0 %v6999_v10  ;;  %v7005_v48 = vsel %vm559_vm2, %v10529_v0, 0.0  ;;  %v6475_v2 = vsub.f32 %v14480_v42, %v14664_v21  ;;  %v14701_v10 = vpop.xlane.xlu0 %6424 }
 0xf59   : > { %v10531_v1 = vpop.eup %10530  ;;  %v6498_v40 = vmul.f32 1.442695, %v6474_v8  ;;  %v6480_v8 = vsub.f32 %v14498_v53, %v14689_v57  ;;  %v6500_v42 = vmul.f32 1.442695, %v6475_v2 }
 0xf5a   : > { %v14683_v59 = vpop.xlane.xlu1 %6409  ;;  %v6579_v23 = vsel %vm559_vm2, %v10531_v1, 0.0  ;;  %v10533_v26 = vpop.eup %10532 }
 0xf5b   : > { %10542 = vpow2.f32 %v6498_v40  ;;  %v6476_v29 = vsub.f32 %v14520_v60, %v14683_v59  ;;  %6580 = vadd.xlane.f32.xlu1 %v6579_v23  ;;  %7006 = vadd.xlane.f32.xlu0 %v7005_v48  ;;  %v7011_v60 = vsel %vm559_vm2, %v10533_v26, 0.0 }
 0xf5c   : > { %10544 = vpow2.f32 %v6988_v43 }
 0xf5d   : > { %v10535_v52 = vpop.eup %10534  ;;  %v6502_v27 = vmul.f32 1.442695, %v6476_v29  ;;  %v6510_v29 = vmul.f32 1.442695, %v6480_v8 }
 0xf5e   : > { %v14693_v47 = vpop.xlane.xlu1 %6412  ;;  %v6585_v37 = vsel %vm559_vm2, %v10535_v52, 0.0  ;;  %v10537_v3 = vpop.eup %10536 }
 0xf5f   : > { %10546 = vpow2.f32 %v6502_v27  ;;  %6586 = vadd.xlane.f32.xlu1 %v6585_v37  ;;  %v10539_v34 = vpop.eup %10538  ;;  %7012 = vadd.xlane.f32.xlu0 %v7011_v60  ;;  %v6996_v1 = vsel %vm559_vm2, %v10537_v3, 0.0  ;;  %v6477_v23 = vsub.f32 %v14524_v25, %v14693_v47  ;;  %v6479_v25 = vsub.f32 %v14489_v55, %v14673_v33 }
 0xf60   : > { %10548 = vpow2.f32 %v6992_v63  ;;  %v10541_v43 = vpop.eup %10540  ;;  %v7017_v40 = vsel %vm559_vm2, %v10539_v34, 0.0  ;;  %v6481_v55 = vsub.f32 %v14508_v61, %v14701_v10 }
 0xf61   : > { %10550 = vpow2.f32 %v6528_v16  ;;  %v7002_v52 = vsel %vm559_vm2, %v10541_v43, 0.0  ;;  %v6504_v27 = vmul.f32 1.442695, %v6477_v23 }
 0xf62   : > { %v14703_v0 = vpop.xlane.xlu1 %6415 }
 0xf63   : > { %v6478_v44 = vsub.f32 %v14532_v17, %v14703_v0  ;;  %6997 = vadd.xlane.f32.xlu1 %v6996_v1  ;;  %7018 = vadd.xlane.f32.xlu0 %v7017_v40  ;;  %v6508_v1 = vmul.f32 1.442695, %v6479_v25 }
 0xf65   : > { %v10543_v53 = vpop.eup %10542  ;;  %v6506_v48 = vmul.f32 1.442695, %v6478_v44 }
 0xf66   : > { %v14711_v26 = vpop.xlane.xlu0 %6451  ;;  %v6546_v63 = vsel %vm559_vm2, %v10543_v53, 0.0  ;;  %v10545_v18 = vpop.eup %10544 }
 0xf67   : > { %10552 = vpow2.f32 %v6506_v48  ;;  %v6490_v17 = vsub.f32 %v14540_v56, %v14711_v26  ;;  %7003 = vadd.xlane.f32.xlu1 %v7002_v52  ;;  %v14719_v37 = vpop.xlane.xlu1 %6454  ;;  %6547 = vadd.xlane.f32.xlu0 %v6546_v63  ;;  %v7008_v2 = vsel %vm559_vm2, %v10545_v18, 0.0 }
 0xf68   : > { %10554 = vpow2.f32 %v6500_v42  ;;  %v6491_v61 = vsub.f32 %v14538_v38, %v14719_v37 }
 0xf69   : > { %v10547_v3 = vpop.eup %10546  ;;  %10556 = vpow2.f32 %v6510_v29  ;;  %v6530_v60 = vmul.f32 1.442695, %v6490_v17 }
 0xf6a   : > { %v14721_v34 = vpop.xlane.xlu0 %6457  ;;  %v6552_v8 = vsel %vm559_vm2, %v10547_v3, 0.0  ;;  %v10549_v16 = vpop.eup %10548  ;;  %10558 = vpow2.f32 %v6504_v27  ;;  %v6532_v27 = vmul.f32 1.442695, %v6491_v61 }
 0xf6b   : > { %v6492_v56 = vsub.f32 %v14548_v51, %v14721_v34  ;;  %7009 = vadd.xlane.f32.xlu1 %v7008_v2  ;;  %6553 = vadd.xlane.f32.xlu0 %v6552_v8  ;;  %10560 = vpow2.f32 %v6530_v60  ;;  %v14729_v44 = vpop.xlane.xlu1 %6460  ;;  %v7014_v42 = vsel %vm559_vm2, %v10549_v16, 0.0  ;;  %v10551_v23 = vpop.eup %10550  ;;  %v6512_v51 = vmul.f32 1.442695, %v6481_v55 }
 0xf6c   : > { %10562 = vpow2.f32 %v6508_v1  ;;  %v6591_v18 = vsel %vm559_vm2, %v10551_v23, 0.0  ;;  %v6493_v38 = vsub.f32 %v14546_v62, %v14729_v44 }
 0xf6d   : > { %v6534_v43 = vmul.f32 1.442695, %v6492_v56 }
 0xf6e   : > { %v14731_v40 = vpop.xlane.xlu0 %6463 }
 0xf6f   : > { %v6494_v53 = vsub.f32 %v14556_v36, %v14731_v40  ;;  %7015 = vadd.xlane.f32.xlu1 %v7014_v42  ;;  %10564 = vpow2.f32 %v6534_v43  ;;  %v14744_v3 = vpop.xlane.xlu1 %6466 }
 0xf70   : > { %10566 = vpow2.f32 %v6512_v51  ;;  %v6495_v1 = vsub.f32 %v14554_v7, %v14744_v3 }
 0xf71   : > { %v10553_v29 = vpop.eup %10552  ;;  %v6538_v48 = vmul.f32 1.442695, %v6494_v53 }
 0xf72   : > { %v10555_v52 = vpop.eup %10554  ;;  %v14738_v63 = vpop.xlane.xlu0 %6469  ;;  %v6558_v17 = vsel %vm559_vm2, %v10553_v29, 0.0  ;;  %v6540_v53 = vmul.f32 1.442695, %v6495_v1 }
 0xf73   : > { %v10557_v25 = vpop.eup %10556  ;;  %v6496_v36 = vsub.f32 %v14564_v31, %v14738_v63  ;;  %6592 = vadd.xlane.f32.xlu1 %v6591_v18  ;;  %6559 = vadd.xlane.f32.xlu0 %v6558_v17  ;;  %10568 = vpow2.f32 %v6538_v48  ;;  %v6549_v8 = vsel %vm559_vm2, %v10555_v52, 0.0  ;;  %v6536_v31 = vmul.f32 1.442695, %v6493_v38  ;;  %v14752_v43 = vpop.xlane.xlu1 %6472 }
 0xf74   : > { %v10559_v2 = vpop.eup %10558  ;;  %v6564_v16 = vsel %vm559_vm2, %v10557_v25, 0.0  ;;  %10570 = vpow2.f32 %v6532_v27  ;;  %v6497_v51 = vsub.f32 %v14562_v28, %v14752_v43 }
 0xf75   : > { %v6542_v60 = vmul.f32 1.442695, %v6496_v36  ;;  %v10561_v56 = vpop.eup %10560  ;;  %v6555_v62 = vsel %vm559_vm2, %v10559_v2, 0.0 }
 0xf76   : > { %v10563_v55 = vpop.eup %10562  ;;  %v6594_v42 = vsel %vm559_vm2, %v10561_v56, 0.0  ;;  %v6544_v52 = vmul.f32 1.442695, %v6497_v51 }
 0xf77   : > { %6550 = vadd.xlane.f32.xlu1 %v6549_v8  ;;  %6565 = vadd.xlane.f32.xlu0 %v6564_v16  ;;  %10572 = vpow2.f32 %v6542_v60  ;;  %v6561_v29 = vsel %vm559_vm2, %v10563_v55, 0.0 }
 0xf78   : > { %10574 = vpow2.f32 %v6536_v31 }
 0xf79   : > { %v10565_v23 = vpop.eup %10564  ;;  %10576 = vpow2.f32 %v6540_v53 }
 0xf7a   : > { %v10567_v61 = vpop.eup %10566  ;;  %v6600_v7 = vsel %vm559_vm2, %v10565_v23, 0.0  ;;  %10578 = vpow2.f32 %v6544_v52 }
 0xf7b   : > { %6556 = vadd.xlane.f32.xlu1 %v6555_v62  ;;  %6595 = vadd.xlane.f32.xlu0 %v6594_v42  ;;  %v6567_v17 = vsel %vm559_vm2, %v10567_v61, 0.0 }
 0xf7d   : > { %v10569_v48 = vpop.eup %10568 }
 0xf7e   : > { %v10571_v18 = vpop.eup %10570  ;;  %v6606_v25 = vsel %vm559_vm2, %v10569_v48, 0.0 }
 0xf7f   : > { %6562 = vadd.xlane.f32.xlu1 %v6561_v29  ;;  %6601 = vadd.xlane.f32.xlu0 %v6600_v7  ;;  %v6597_v28 = vsel %vm559_vm2, %v10571_v18, 0.0 }
 0xf81   : > { %v10573_v36 = vpop.eup %10572 }
 0xf82   : > { %v6612_v27 = vsel %vm559_vm2, %v10573_v36, 0.0  ;;  %v10575_v38 = vpop.eup %10574 }
 0xf83   : > { %6568 = vadd.xlane.f32.xlu1 %v6567_v17  ;;  %6607 = vadd.xlane.f32.xlu0 %v6606_v25  ;;  %v6603_v60 = vsel %vm559_vm2, %v10575_v38, 0.0  ;;  %v10577_v2 = vpop.eup %10576 }
 0xf84   : > { %v6609_v8 = vsel %vm559_vm2, %v10577_v2, 0.0  ;;  %v10579_v16 = vpop.eup %10578 }
 0xf85   : > { %v6615_v56 = vsel %vm559_vm2, %v10579_v16, 0.0 }
 0xf87   : > { %6598 = vadd.xlane.f32.xlu1 %v6597_v28  ;;  %6613 = vadd.xlane.f32.xlu0 %v6612_v27 }
 0xf8b   : > { %6604 = vadd.xlane.f32.xlu1 %v6603_v60 }
 0xf8f   : > { %6610 = vadd.xlane.f32.xlu1 %v6609_v8 }
 0xf93   : > { %6616 = vadd.xlane.f32.xlu1 %v6615_v56 }
 0xfd4   : > { %v6572_v31 = vpop.xlane.xlu0 %6571 }
 0xfd5   : > { %10580 = vlog2.f32 %v6572_v31 }
 0xfd8   : > { %v6578_v1 = vpop.xlane.xlu0 %6577 }
 0xfd9   : > { %10582 = vlog2.f32 %v6578_v1 }
 0xfdc   : > { %v6584_v55 = vpop.xlane.xlu0 %6583 }
 0xfdf   : > { %v10581_v62 = vpop.eup %10580 }
 0xfe0   : > { %v6635_v42 = vmul.f32 0.6931472, %v10581_v62  ;;  %v6590_v23 = vpop.xlane.xlu0 %6589 }
 0xfe2   : > { %v6674_v53 = vadd.f32 %v6635_v42, %v14617_v30 }
 0xfe3   : > { %v10583_v18 = vpop.eup %10582 }
 0xfe4   : > { %v6575_v51 = vpop.xlane.xlu1 %6574  ;;  %6722 = vxpose.xlu1.b32.start [1/8] (short) (narrow) %v6674_v53, 8  ;;  %v7001_v61 = vpop.xlane.xlu0 %7000  ;;  %v6639_v30 = vmul.f32 0.6931472, %v10583_v18 }
 0xfe5   : > { %10584 = vlog2.f32 %v6575_v51 }
 0xfe6   : > { %v6676_v8 = vadd.f32 %v6639_v30, %v14623_v54 }
 0xfe8   : > { %v6581_v29 = vpop.xlane.xlu1 %6580  ;;  %v7007_v7 = vpop.xlane.xlu0 %7006 }
 0xfe9   : > { %10586 = vlog2.f32 %v6581_v29 }
 0xfea   : > { %10588 = vlog2.f32 %v6584_v55 }
 0xfec   : > { %v6587_v48 = vpop.xlane.xlu1 %6586  ;;  %v14768_v52 = vpop.xlane.xlu0 %7012 }
 0xfed   : > { %10590 = vlog2.f32 %v6587_v48 }
 0xfee   : > { %10592 = vlog2.f32 %v6590_v23 }
 0xfef   : > { %v10585_v17 = vpop.eup %10584 }
 0xff0   : > { %v6637_v25 = vmul.f32 0.6931472, %v10585_v17  ;;  %v6998_v36 = vpop.xlane.xlu1 %6997  ;;  %v14770_v28 = vpop.xlane.xlu0 %7018 }
 0xff2   : > { %v6675_v27 = vadd.f32 %v6637_v25, %v14643_v12 }
 0xff3   : > { %v10587_v38 = vpop.eup %10586 }
 0xff4   : > { %v7004_v60 = vpop.xlane.xlu1 %7003  ;;  %6723 = vxpose.xlu1.b32.cont [2/8] (short) (narrow) %v6675_v27, 8  ;;  %v6548_v2 = vpop.xlane.xlu0 %6547  ;;  %v6641_v16 = vmul.f32 0.6931472, %v10587_v38 }
 0xff5   : > { %10594 = vlog2.f32 %v6548_v2  ;;  %v10589_v56 = vpop.eup %10588 }
 0xff6   : > { %v6643_v1 = vmul.f32 0.6931472, %v10589_v56  ;;  %v6677_v55 = vadd.f32 %v6641_v16, %v14650_v9  ;;  %10596 = vlog2.f32 %v6998_v36 }
 0xff7   : > { %v10591_v62 = vpop.eup %10590 }
 0xff8   : > { %v7010_v31 = vpop.xlane.xlu1 %7009  ;;  %6724 = vxpose.xlu1.b32.cont [3/8] (short) (narrow) %v6676_v8, 8  ;;  %v6678_v12 = vadd.f32 %v6643_v1, %v14629_v41  ;;  %v6645_v53 = vmul.f32 0.6931472, %v10591_v62  ;;  %v10593_v51 = vpop.eup %10592 }
 0xff9   : > { %v6554_v48 = vpop.xlane.xlu0 %6553  ;;  %v6647_v18 = vmul.f32 0.6931472, %v10593_v51 }
 0xffa   : > { %v6679_v17 = vadd.f32 %v6645_v53, %v14659_v14 }
 0xffb   : > { %v6680_v41 = vadd.f32 %v6647_v18, %v14637_v45 }
 0xffc   : > { %v7016_v42 = vpop.xlane.xlu1 %7015  ;;  %6725 = vxpose.xlu1.b32.cont [4/8] (short) (narrow) %v6677_v55, 8 }
 0xfff   : > { %v10595_v29 = vpop.eup %10594 }
0x1000   : > { %v6593_v23 = vpop.xlane.xlu1 %6592  ;;  %6726 = vxpose.xlu1.b32.cont [5/8] (short) (narrow) %v6678_v12, 8  ;;  %v6619_v54 = vmul.f32 0.6931472, %v10595_v29  ;;  %v10597_v30 = vpop.eup %10596 }
0x1001   : > { %10598 = vlog2.f32 %v6593_v23  ;;  %v6560_v27 = vpop.xlane.xlu0 %6559 }
0x1002   : > { %10600 = vlog2.f32 %v7001_v61  ;;  %v6666_v9 = vadd.f32 %v6619_v54, %v14675_v58  ;;  %v7021_v58 = vmul.f32 0.6931472, %v10597_v30 }
0x1003   : > { %10602 = vlog2.f32 %v6554_v48 }
0x1004   : > { %v6551_v25 = vpop.xlane.xlu1 %6550  ;;  %6727 = vxpose.xlu1.b32.cont [6/8] (short) (narrow) %v6679_v17, 8  ;;  %6690 = vxpose.xlu0.b32.start [1/8] (short) (narrow) %v6666_v9, 8 }
0x1005   : > { %10604 = vlog2.f32 %v6551_v25  ;;  %v6566_v12 = vpop.xlane.xlu0 %6565 }
0x1006   : > { %10606 = vlog2.f32 %v7004_v60 }
0x1008   : > { %v6557_v36 = vpop.xlane.xlu1 %6556  ;;  %6728 = vxpose.xlu1.b32.cont [7/8] (short) (narrow) %v6680_v41, 8 }
0x1009   : > { %10608 = vlog2.f32 %v6557_v36  ;;  %v6596_v17 = vpop.xlane.xlu0 %6595 }
0x100a   : > { %10610 = vlog2.f32 %v7007_v7  ;;  %v7036_v7 = vadd.f32 %v7021_v58, %v14598_v11  ;;  %v14792_v58 = vpop.f32.mrb[40].mxu1 }
0x100b   : > { %v10599_v38 = vpop.eup %10598  ;;  %10612 = vlog2.f32 %v6560_v27 }
0x100c   : > { %v6649_v2 = vmul.f32 0.6931472, %v10599_v38  ;;  %v10601_v14 = vpop.eup %10600  ;;  %v6563_v16 = vpop.xlane.xlu1 %6562  ;;  %10614 = vlog2.f32 %v7010_v31 }
0x100d   : > { %v10603_v61 = vpop.eup %10602  ;;  %10616 = vlog2.f32 %v6563_v16  ;;  %v7023_v60 = vmul.f32 0.6931472, %v10601_v14 }
0x100e   : > { %v6681_v8 = vadd.f32 %v6649_v2, %v14668_v24  ;;  %v6623_v55 = vmul.f32 0.6931472, %v10603_v61  ;;  %10618 = vlog2.f32 %v14768_v52  ;;  %v6602_v2 = vpop.xlane.xlu0 %6601 }
0x100f   : > { %v10605_v56 = vpop.eup %10604  ;;  %10620 = vlog2.f32 %v6566_v12  ;;  %v7037_v54 = vadd.f32 %v7023_v60, %v14606_v35  ;;  %v14796_v60 = vpop.f32.mrb[41].mxu1 }
0x1010   : > { %v6621_v1 = vmul.f32 0.6931472, %v10605_v56  ;;  %6729 = vxpose.xlu1.b32.end [8/8] (short) (narrow) %v6681_v8, 8  ;;  %v10607_v45 = vpop.eup %10606  ;;  %v6668_v31 = vadd.f32 %v6623_v55, %v14683_v59  ;;  %v6569_v23 = vpop.xlane.xlu1 %6568  ;;  %10622 = vlog2.f32 %v7016_v42 }
0x1011   : > { %v7025_v51 = vmul.f32 0.6931472, %v10607_v45  ;;  %10624 = vlog2.f32 %v6569_v23 }
0x1012   : > { %v6667_v62 = vadd.f32 %v6621_v1, %v14664_v21  ;;  %10626 = vlog2.f32 %v14770_v28 }
0x1013   : > { %v10609_v53 = vpop.eup %10608  ;;  %v7038_v9 = vadd.f32 %v7025_v51, %v14608_v32  ;;  %10628 = vlog2.f32 %v6596_v17 }
0x1014   : > { %7044 = vxpose.xlu1.b32.start [1/8] (short) (narrow) %v7036_v7, 8  ;;  %6691 = vxpose.xlu0.b32.cont [2/8] (short) (narrow) %v6667_v62, 8  ;;  %v10611_v24 = vpop.eup %10610  ;;  %v6625_v29 = vmul.f32 0.6931472, %v10609_v53  ;;  %v6599_v36 = vpop.xlane.xlu1 %6598 }
0x1015   : > { %v10613_v48 = vpop.eup %10612  ;;  %v7027_v21 = vmul.f32 0.6931472, %v10611_v24  ;;  %10630 = vlog2.f32 %v6599_v36  ;;  %v6608_v7 = vpop.xlane.xlu0 %6607 }
0x1016   : > { %v10615_v11 = vpop.eup %10614  ;;  %v6627_v18 = vmul.f32 0.6931472, %v10613_v48  ;;  %v6669_v52 = vadd.f32 %v6625_v29, %v14693_v47  ;;  %10632 = vlog2.f32 %v6602_v2 }
0x1017   : > { %v10617_v25 = vpop.eup %10616  ;;  %v7029_v59 = vmul.f32 0.6931472, %v10615_v11  ;;  %v7039_v30 = vadd.f32 %v7027_v21, %v14613_v20 }
0x1018   : > { %7045 = vxpose.xlu1.b32.cont [2/8] (short) (narrow) %v7037_v54, 8  ;;  %6692 = vxpose.xlu0.b32.cont [3/8] (short) (narrow) %v6668_v31, 8  ;;  %v10619_v35 = vpop.eup %10618  ;;  %v6670_v42 = vadd.f32 %v6627_v18, %v14703_v0  ;;  %v6629_v41 = vmul.f32 0.6931472, %v10617_v25  ;;  %v6605_v56 = vpop.xlane.xlu1 %6604 }
0x1019   : > { %v10621_v27 = vpop.eup %10620  ;;  %v7031_v32 = vmul.f32 0.6931472, %v10619_v35  ;;  %v7040_v14 = vadd.f32 %v7029_v59, %v14615_v19  ;;  %v14798_v19 = vpop.f32.mrb[42].mxu1  ;;  %10634 = vlog2.f32 %v6605_v56  ;;  %v7085_v56 = vadd.f32 %v14426_v15, %v11394_v49 }
0x101a   : > { %v10623_v47 = vpop.eup %10622  ;;  %v6631_v38 = vmul.f32 0.6931472, %v10621_v27  ;;  %v6671_v28 = vadd.f32 %v6629_v41, %v14673_v33  ;;  %v14800_v33 = vpop.f32.mrb[43].mxu1  ;;  %10636 = vlog2.f32 %v6608_v7  ;;  %v7726_v7 = vmul.f32 400.0, %v14798_v19 }
0x101b   : > { %v10625_v61 = vpop.eup %10624  ;;  %v7033_v20 = vmul.f32 0.6931472, %v10623_v47  ;;  %v7041_v1 = vadd.f32 %v7031_v32, %v14621_v50  ;;  %v14804_v53 = vpop.f32.mrb[44].mxu1 }
0x101c   : > { %7046 = vxpose.xlu1.b32.cont [3/8] (short) (narrow) %v7038_v9, 8  ;;  %6693 = vxpose.xlu0.b32.cont [4/8] (short) (narrow) %v6669_v52, 8  ;;  %v10627_v0 = vpop.eup %10626  ;;  %v6672_v8 = vadd.f32 %v6631_v38, %v14689_v57  ;;  %v6633_v16 = vmul.f32 0.6931472, %v10625_v61  ;;  %v14806_v24 = vpop.f32.mrb[45].mxu1 }
0x101d   : > { %v10629_v45 = vpop.eup %10628  ;;  %v7035_v55 = vmul.f32 0.6931472, %v10627_v0  ;;  %v7042_v57 = vadd.f32 %v7033_v20, %v14627_v46  ;;  %v14808_v51 = vpop.f32.mrb[46].mxu1  ;;  %v7727_v15 = vmul.f32 400.0, %v14806_v24 }
0x101e   : > { %v6651_v62 = vmul.f32 0.6931472, %v10629_v45  ;;  %v6673_v12 = vadd.f32 %v6633_v16, %v14701_v10  ;;  %v14810_v31 = vpop.f32.mrb[47].mxu1  ;;  %v6611_v23 = vpop.xlane.xlu1 %6610  ;;  %v7724_v45 = vmul.f32 400.0, %v14792_v58 }
0x101f   : > { %v10631_v50 = vpop.eup %10630  ;;  %v7043_v54 = vadd.f32 %v7035_v55, %v14635_v22  ;;  %10638 = vlog2.f32 %v6611_v23  ;;  %v6614_v11 = vpop.xlane.xlu0 %6613  ;;  %v7723_v55 = vmul.f32 400.0, %v14796_v60  ;;  %v7730_v23 = vmul.f32 400.0, %v14808_v51 }
0x1020   : > { %7047 = vxpose.xlu1.b32.cont [4/8] (short) (narrow) %v7039_v30, 8  ;;  %6694 = vxpose.xlu0.b32.cont [5/8] (short) (narrow) %v6670_v42, 8  ;;  %v6653_v29 = vmul.f32 0.6931472, %v10631_v50  ;;  %v6682_v10 = vadd.f32 %v6651_v62, %v14711_v26  ;;  %v10633_v48 = vpop.eup %10632  ;;  %10640 = vlog2.f32 %v6614_v11  ;;  %v7729_v58 = vmul.f32 400.0, %v14810_v31 }
0x1021   : > { %v6655_v46 = vmul.f32 0.6931472, %v10633_v48 }
0x1022   : > { %v6683_v21 = vadd.f32 %v6653_v29, %v14719_v37  ;;  %v6617_v17 = vpop.xlane.xlu1 %6616  ;;  %v7728_v29 = vmul.f32 400.0, %v14804_v53  ;;  %v7110_v53 = vld [vmem:[#allocation2 + $0x8] sm:$0xff] }
0x1023   : > { %v10635_v18 = vpop.eup %10634  ;;  %v6684_v9 = vadd.f32 %v6655_v46, %v14721_v34  ;;  %10642 = vlog2.f32 %v6617_v17 }
0x1024   : > { %7048 = vxpose.xlu1.b32.cont [5/8] (short) (narrow) %v7040_v14, 8  ;;  %6695 = vxpose.xlu0.b32.cont [6/8] (short) (narrow) %v6671_v28, 8  ;;  %v6657_v52 = vmul.f32 0.6931472, %v10635_v18  ;;  %v10637_v25 = vpop.eup %10636 }
0x1025   : > { %v6659_v22 = vmul.f32 0.6931472, %v10637_v25  ;;  %v10880_v25 = vld [vmem:[#allocation2] sm:$0xff] }
0x1026   : > { %v6685_v26 = vadd.f32 %v6657_v52, %v14729_v44  ;;  %v7134_v52 = vmul.f32 400.0, %v7110_v53 }
0x1027   : > { %v6686_v42 = vadd.f32 %v6659_v22, %v14731_v40  ;;  %v7133_v22 = vmul.f32 400.0, %v10880_v25 }
0x1028   : > { %7049 = vxpose.xlu1.b32.cont [6/8] (short) (narrow) %v7041_v1, 8  ;;  %6696 = vxpose.xlu0.b32.cont [7/8] (short) (narrow) %v6672_v8, 8 }
0x1029   : > { %v10639_v35 = vpop.eup %10638 }
0x102a   : > { %v6661_v59 = vmul.f32 0.6931472, %v10639_v35  ;;  %v10641_v41 = vpop.eup %10640 }
0x102b   : > { %v6663_v37 = vmul.f32 0.6931472, %v10641_v41  ;;  %v10883_v41 = vld [vmem:[#allocation2 + $0x20] sm:$0xff] }
0x102c   : > { %7050 = vxpose.xlu1.b32.cont [7/8] (short) (narrow) %v7042_v57, 8  ;;  %6697 = vxpose.xlu0.b32.end [8/8] (short) (narrow) %v6673_v12, 8  ;;  %v6687_v36 = vadd.f32 %v6661_v59, %v14744_v3  ;;  %v7081_v3 = vadd.f32 %v14389_v5, %v11394_v49  ;;  %v7725_v57 = vmul.f32 400.0, %v14800_v33  ;;  %v10882_v59 = vld [vmem:[#allocation2 + $0x10] sm:$0xff] }
0x102d   : > { %v10643_v30 = vpop.eup %10642  ;;  %v6688_v34 = vadd.f32 %v6663_v37, %v14738_v63  ;;  %v7137_v37 = vmul.f32 400.0, %v10883_v41 }
0x102e   : > { %v6665_v27 = vmul.f32 0.6931472, %v10643_v30 }
0x1030   : > { %7051 = vxpose.xlu1.b32.end [8/8] (short) (narrow) %v7043_v54, 8  ;;  %6754 = vxpose.xlu0.b32.start [1/8] (short) (narrow) %v6682_v10, 8  ;;  %v6689_v47 = vadd.f32 %v6665_v27, %v14752_v43  ;;  %v7093_v43 = vadd.f32 %v14452_v13, %v11428_v6  ;;  %v10878_v13 = vld [vmem:[%s11403_s11] sm:$0x1] }
0x1034   : > { %6755 = vxpose.xlu0.b32.cont [2/8] (short) (narrow) %v6683_v21, 8  ;;  %v14867_v21 = vld [vmem:[%s11420_s14] sm:$0x1] }
0x1038   : > { %6756 = vxpose.xlu0.b32.cont [3/8] (short) (narrow) %v6684_v9, 8 }
0x103c   : > { %6757 = vxpose.xlu0.b32.cont [4/8] (short) (narrow) %v6685_v26, 8  ;;  %v10881_v26 = vld [vmem:[#allocation2 + $0x18] sm:$0xff] }
0x103d   : > { %v7136_v35 = vmul.f32 400.0, %v10881_v26 }
0x1040   : > { %6758 = vxpose.xlu0.b32.cont [5/8] (short) (narrow) %v6686_v42, 8  ;;  %v7135_v42 = vmul.f32 400.0, %v10882_v59 }
0x1044   : > { %6759 = vxpose.xlu0.b32.cont [6/8] (short) (narrow) %v6687_v36, 8 }
0x1048   : > { %6760 = vxpose.xlu0.b32.cont [7/8] (short) (narrow) %v6688_v34, 8 }
0x104c   : > { %6761 = vxpose.xlu0.b32.end [8/8] (short) (narrow) %v6689_v47, 8  ;;  %v7114_v47 = vld [vmem:[#allocation2 + $0x28] sm:$0xff] }
0x1074   : > { %v6738_v44 = vpop.trf.xlu1 }
0x1075   : > { %6787 = vst.msk [vmem:[#allocation3 + $0x1] sm:$0x1] %vm1268_vm3, %v6738_v44 }
0x107c   : > { %v7078_v2 = vld [vmem:[#allocation3 + $0x1] sm:$0x1] }
0x107d   : > { %v7086_v20 = vmul.f32 0.00390625, %v7078_v2  ;;  %v7115_v2 = vld [vmem:[#allocation2 + $0x30] sm:$0xff] }
0x107f   : > { %v7087_v62 = vsub.f32 %v7085_v56, %v7086_v20  ;;  %v7118_v56 = vld [vmem:[#allocation2 + $0x48] sm:$0xff] }
0x1081   : > { %v14848_v10 = vmul.f32 0.5, %v7087_v62 }
0x1083   : > { %v7098_v17 = vsub.f32 %v14848_v10, %v11394_v49 }
0x1090   : > { %v6706_v32 = vpop.trf.xlu0 }
0x1091   : > { %6786 = vst.msk [vmem:[#allocation3] sm:$0x1] %vm1268_vm3, %v6706_v32  ;;  %v7101_v32 = vmul.f32 400.0, %v7098_v17 }
0x1094   : > { %v7060_v40 = vpop.trf.xlu1 }
0x1095   : > { %7076 = vst.msk [vmem:[#allocation4] sm:$0x1] %vm1268_vm3, %v7060_v40 }
0x1098   : > { %v7077_v38 = vld [vmem:[#allocation3] sm:$0x1] }
0x1099   : > { %v7082_v28 = vmul.f32 0.00390625, %v7077_v38 }
0x109b   : > { %v7083_v63 = vsub.f32 %v7081_v3, %v7082_v28  ;;  %v7138_v28 = vmul.f32 400.0, %v7114_v47 }
0x109c   : > { %v7080_v14 = vld [vmem:[#allocation4] sm:$0x1] }
0x109d   : > { %v14828_v61 = vmul.f32 0.5, %v7083_v63  ;;  %v7094_v0 = vmul.f32 0.00390625, %v7080_v14  ;;  %v7116_v63 = vld [vmem:[#allocation2 + $0x38] sm:$0xff]  ;;  %v7104_v14 = vadd.f32 %v10878_v13, %v7101_v32 }
0x109f   : > { %v7106_v8 = vsub.f32 %v14828_v61, %v11394_v49  ;;  %v7095_v16 = vsub.f32 %v7093_v43, %v7094_v0 }
0x10a1   : > { %v7107_v5 = vmul.f32 400.0, %v7106_v8  ;;  %v14834_v1 = vmul.f32 0.5, %v7095_v16  ;;  %v7140_v8 = vmul.f32 400.0, %v7116_v63  ;;  %v7139_v16 = vmul.f32 400.0, %v7115_v2 }
0x10a3   : > { %v7108_v12 = vadd.f32 %v10878_v13, %v7107_v5  ;;  %v7097_v50 = vsub.f32 %v14834_v1, %v11428_v6  ;;  %v14895_v5 = vrot.slane %v7104_v14, %v11425_v4 }
0x10a5   : > { %v7735_v60 = vrot.slane %v7108_v12, %v11425_v4  ;;  %v7100_v54 = vmul.f32 400.0, %v7097_v50  ;;  %v7119_v50 = vld [vmem:[#allocation2 + $0x50] sm:$0xff] }
0x10a7   : > { %v14850_v19 = vadd.f32 %v7735_v60, %v7724_v45  ;;  %v14852_v33 = vadd.f32 %v7735_v60, %v7723_v55  ;;  %v14854_v48 = vadd.f32 %v7735_v60, %v7726_v7  ;;  %v14856_v46 = vadd.f32 %v7735_v60, %v7725_v57  ;;  %v7117_v45 = vld [vmem:[#allocation2 + $0x40] sm:$0xff] }
0x10a8   : > { %v14858_v11 = vadd.f32 %v7735_v60, %v7728_v29  ;;  %v14860_v24 = vadd.f32 %v7735_v60, %v7727_v15  ;;  %v14862_v51 = vadd.f32 %v7735_v60, %v7730_v23  ;;  %v14864_v31 = vadd.f32 %v7735_v60, %v7729_v58 }
0x10a9   : > { %v7103_v18 = vadd.f32 %v14867_v21, %v7100_v54  ;;  %v7142_v7 = vmul.f32 400.0, %v7118_v56  ;;  %v7141_v57 = vmul.f32 400.0, %v7117_v45  ;;  %v7143_v54 = vmul.f32 400.0, %v7119_v50 }
0x10aa   : > { %v7751_v59 = vsel %vm559_vm2, %v14856_v46, -inf  ;;  %v7754_v41 = vsel %vm559_vm2, %v14854_v48, -inf  ;;  %v7766_v56 = vsel %vm559_vm2, %v14862_v51, -inf }
0x10ab   : > { %v7163_v9 = vrot.slane %v7103_v18, %v11425_v4  ;;  %v14910_v23 = vadd.f32 %v14895_v5, %v7142_v7  ;;  %v14913_v58 = vadd.f32 %v14895_v5, %v7141_v57 }
0x10ad   : > { %v14873_v36 = vadd.f32 %v7163_v9, %v7134_v52  ;;  %v14875_v30 = vadd.f32 %v7163_v9, %v7133_v22  ;;  %v14877_v27 = vadd.f32 %v7163_v9, %v7136_v35  ;;  %v14879_v34 = vadd.f32 %v7163_v9, %v7135_v42 }
0x10ae   : > { %v14881_v44 = vadd.f32 %v7163_v9, %v7137_v37  ;;  %v14892_v20 = vadd.f32 %v7163_v9, %v7138_v28  ;;  %v14901_v13 = vadd.f32 %v7163_v9, %v7140_v8  ;;  %v14903_v12 = vadd.f32 %v7163_v9, %v7139_v16  ;;  %v7124_v16 = vld [vmem:[#allocation2 + $0x78] sm:$0xff] }
0x10af   : > { %v7202_v40 = vsel %vm559_vm2, %v14873_v36, -inf  ;;  %v7199_v38 = vsel %vm559_vm2, %v14875_v30, -inf  ;;  %v7208_v43 = vsel %vm559_vm2, %v14877_v27, -inf  ;;  %v7205_v0 = vsel %vm559_vm2, %v14879_v34, -inf }
0x10b0   : > { %7203 = vmax.xlane.f32.xlu1 %v7202_v40  ;;  %7200 = vmax.xlane.f32.xlu0 %v7199_v38  ;;  %v6770_v3 = vpop.trf.xlu0  ;;  %v7214_v55 = vsel %vm559_vm2, %v14892_v20, -inf  ;;  %v7211_v62 = vsel %vm559_vm2, %v14881_v44, -inf  ;;  %v7220_v29 = vsel %vm559_vm2, %v14901_v13, -inf  ;;  %v7217_v15 = vsel %vm559_vm2, %v14903_v12, -inf  ;;  %v7121_v40 = vld [vmem:[#allocation2 + $0x60] sm:$0xff]  ;;  %v7122_v38 = vld [vmem:[#allocation2 + $0x68] sm:$0xff] }
0x10b1   : > { %6788 = vst.msk [vmem:[#allocation3 + $0x2] sm:$0x1] %vm1268_vm3, %v6770_v3  ;;  %v7226_v53 = vsel %vm559_vm2, %v14910_v23, -inf  ;;  %v7223_v18 = vsel %vm559_vm2, %v14913_v58, -inf  ;;  %v14920_v52 = vadd.f32 %v14895_v5, %v7143_v54  ;;  %v7089_v9 = vadd.f32 %v14526_v39, %v11428_v6  ;;  %v7120_v39 = vld [vmem:[#allocation2 + $0x58] sm:$0xff] }
0x10b2   : > { %v7745_v22 = vsel %vm559_vm2, %v14852_v33, -inf  ;;  %v7748_v35 = vsel %vm559_vm2, %v14850_v19, -inf  ;;  %v7757_v37 = vsel %vm559_vm2, %v14860_v24, -inf  ;;  %v7144_v32 = vmul.f32 400.0, %v7120_v39 }
0x10b3   : > { %v7229_v25 = vsel %vm559_vm2, %v14920_v52, -inf  ;;  %v7760_v3 = vsel %vm559_vm2, %v14858_v11, -inf  ;;  %v7763_v28 = vsel %vm559_vm2, %v14864_v31, -inf  ;;  %v7145_v14 = vmul.f32 400.0, %v7121_v40 }
0x10b4   : > { %7209 = vmax.xlane.f32.xlu1 %v7208_v43  ;;  %7206 = vmax.xlane.f32.xlu0 %v7205_v0  ;;  %v14945_v63 = vadd.f32 %v14895_v5, %v7144_v32  ;;  %v7146_v43 = vmul.f32 400.0, %v7122_v38  ;;  %v7123_v0 = vld [vmem:[#allocation2 + $0x70] sm:$0xff]  ;;  %v7148_v57 = vmul.f32 400.0, %v7124_v16 }
0x10b5   : > { %v14948_v8 = vadd.f32 %v14895_v5, %v7145_v14  ;;  %v7147_v7 = vmul.f32 400.0, %v7123_v0  ;;  %v7131_v14 = vld [vmem:[#allocation2 + $0xb0] sm:$0xff] }
0x10b6   : > { %v7232_v45 = vsel %vm559_vm2, %v14945_v63, -inf }
0x10b7   : > { %v14959_v50 = vadd.f32 %v14895_v5, %v7147_v7 }
0x10b8   : > { %7215 = vmax.xlane.f32.xlu1 %v7214_v55  ;;  %7212 = vmax.xlane.f32.xlu0 %v7211_v62  ;;  %v7079_v60 = vld [vmem:[#allocation3 + $0x2] sm:$0x1]  ;;  %v14955_v55 = vadd.f32 %v14895_v5, %v7146_v43 }
0x10b9   : > { %v7090_v17 = vmul.f32 0.00390625, %v7079_v60  ;;  %v7235_v60 = vsel %vm559_vm2, %v14948_v8, -inf }
0x10ba   : > { %v7238_v54 = vsel %vm559_vm2, %v14955_v55, -inf }
0x10bb   : > { %v7091_v26 = vsub.f32 %v7089_v9, %v7090_v17  ;;  %v7128_v9 = vld [vmem:[#allocation2 + $0x98] sm:$0xff] }
0x10bc   : > { %7221 = vmax.xlane.f32.xlu1 %v7220_v29  ;;  %7218 = vmax.xlane.f32.xlu0 %v7217_v15  ;;  %v7126_v29 = vld [vmem:[#allocation2 + $0x88] sm:$0xff]  ;;  %v7125_v15 = vld [vmem:[#allocation2 + $0x80] sm:$0xff] }
0x10bd   : > { %v14932_v42 = vmul.f32 0.5, %v7091_v26  ;;  %v7149_v17 = vmul.f32 400.0, %v7125_v15 }
0x10bf   : > { %v7099_v47 = vsub.f32 %v14932_v42, %v11428_v6 }
0x10c0   : > { %7227 = vmax.xlane.f32.xlu1 %v7226_v53  ;;  %7224 = vmax.xlane.f32.xlu0 %v7223_v18  ;;  %v14966_v53 = vadd.f32 %v14895_v5, %v7148_v57  ;;  %v7150_v18 = vmul.f32 400.0, %v7126_v29  ;;  %v7152_v5 = vmul.f32 400.0, %v7128_v9  ;;  %v8060_v9 = vld [vmem:[%s11032_s5 + $0x8] sm:$0xff] }
0x10c1   : > { %v7102_v2 = vmul.f32 400.0, %v7099_v47 }
0x10c2   : > { %v7244_v26 = vsel %vm559_vm2, %v14966_v53, -inf }
0x10c3   : > { %v7105_v62 = vadd.f32 %v14867_v21, %v7102_v2  ;;  %v7132_v2 = vld [vmem:[#allocation2 + $0xb8] sm:$0xff] }
0x10c4   : > { %7230 = vmax.xlane.f32.xlu0 %v7229_v25  ;;  %7746 = vmax.xlane.f32.xlu1 %v7745_v22  ;;  %v7127_v25 = vld [vmem:[#allocation2 + $0x90] sm:$0xff]  ;;  %v7241_v22 = vsel %vm559_vm2, %v14959_v50, -inf }
0x10c5   : > { %v7171_v21 = vrot.slane %v7105_v62, %v11425_v4  ;;  %v7151_v39 = vmul.f32 400.0, %v7127_v25  ;;  %v7155_v62 = vmul.f32 400.0, %v7131_v14  ;;  %v8061_v25 = vld [vmem:[%s11032_s5 + $0x10] sm:$0xff] }
0x10c7   : > { %v14981_v40 = vadd.f32 %v7171_v21, %v7152_v5  ;;  %v14983_v38 = vadd.f32 %v7171_v21, %v7151_v39  ;;  %v14999_v15 = vadd.f32 %v7171_v21, %v7155_v62  ;;  %v8066_v5 = vld [vmem:[%s11032_s5 + $0x38] sm:$0xff] }
0x10c8   : > { %7749 = vmax.xlane.f32.xlu0 %v7748_v35  ;;  %7752 = vmax.xlane.f32.xlu1 %v7751_v59  ;;  %v14973_v35 = vadd.f32 %v7171_v21, %v7150_v18  ;;  %v14975_v59 = vadd.f32 %v7171_v21, %v7149_v17  ;;  %v8059_v18 = vld [vmem:[%s11032_s5] sm:$0xff] }
0x10c9   : > { %v7256_v43 = vsel %vm559_vm2, %v14981_v40, -inf  ;;  %v7253_v0 = vsel %vm559_vm2, %v14983_v38, -inf  ;;  %v8063_v17 = vld [vmem:[%s11032_s5 + $0x20] sm:$0xff]  ;;  %9248 = vmatprep.mubr.msk.f32.mxu0 %vm269_vm0, %v8059_v18 }
0x10ca   : > { %v7250_v47 = vsel %vm559_vm2, %v14973_v35, -inf  ;;  %v7247_v32 = vsel %vm559_vm2, %v14975_v59, -inf  ;;  %9254 = vmatprep.mubr.msk.f32.mxu1 %vm269_vm0, %v8063_v17  ;;  %9249 = vmatmul.mubr.msk.f32.vlgmr.msra.gmra.mrb[48].mxu0 %vm269_vm0, %v8060_v9 }
0x10cb   : > { %9251 = vmatprep.mubr.msk.f32.mxu0 %vm269_vm0, %v8061_v25 }
0x10cc   : > { %7755 = vmax.xlane.f32.xlu0 %v7754_v41  ;;  %7758 = vmax.xlane.f32.xlu1 %v7757_v37  ;;  %v7130_v41 = vld [vmem:[#allocation2 + $0xa8] sm:$0xff]  ;;  %v7129_v37 = vld [vmem:[#allocation2 + $0xa0] sm:$0xff] }
0x10d0   : > { %7761 = vmax.xlane.f32.xlu0 %v7760_v3  ;;  %7764 = vmax.xlane.f32.xlu1 %v7763_v28  ;;  %v7154_v3 = vmul.f32 400.0, %v7130_v41  ;;  %v7153_v28 = vmul.f32 400.0, %v7129_v37 }
0x10d2   : > { %v14989_v16 = vadd.f32 %v7171_v21, %v7154_v3 }
0x10d4   : > { %7767 = vmax.xlane.f32.xlu0 %v7766_v56  ;;  %7233 = vmax.xlane.f32.xlu1 %v7232_v45  ;;  %v14991_v56 = vadd.f32 %v7171_v21, %v7153_v28  ;;  %v7156_v45 = vmul.f32 400.0, %v7132_v2  ;;  %v7262_v7 = vsel %vm559_vm2, %v14989_v16, -inf }
0x10d6   : > { %v7259_v57 = vsel %vm559_vm2, %v14991_v56, -inf  ;;  %v14997_v29 = vadd.f32 %v7171_v21, %v7156_v45  ;;  %v8064_v21 = vld [vmem:[%s11032_s5 + $0x28] sm:$0xff] }
0x10d7   : > { %9255 = vmatmul.mubr.msk.f32.vlgmr.msra.gmra.mrb[48].mxu1 %vm269_vm0, %v8064_v21 }
0x10d8   : > { %7236 = vmax.xlane.f32.xlu0 %v7235_v60  ;;  %7239 = vmax.xlane.f32.xlu1 %v7238_v54  ;;  %v7268_v60 = vsel %vm559_vm2, %v14997_v29, -inf  ;;  %v7265_v54 = vsel %vm559_vm2, %v14999_v15, -inf }
0x10dc   : > { %7242 = vmax.xlane.f32.xlu0 %v7241_v22  ;;  %7245 = vmax.xlane.f32.xlu1 %v7244_v26  ;;  %v8065_v22 = vld [vmem:[%s11032_s5 + $0x30] sm:$0xff]  ;;  %v8062_v26 = vld [vmem:[%s11032_s5 + $0x18] sm:$0xff]  ;;  %s8370_s5 = scalar_lea.sflag [#allocation6], %s225_s20 }
0x10dd   : > { %9257 = vmatprep.mubr.msk.f32.mxu1 %vm269_vm0, %v8065_v22  ;;  %9252 = vmatmul.mubr.msk.f32.gmra.mrb[50].mxu0 %vm269_vm0, %v8062_v26 }
0x10de   : > { %9258 = vmatmul.mubr.msk.f32.gmra.mrb[50].mxu1 %vm269_vm0, %v8066_v5 }
0x10e0   : > { %7251 = vmax.xlane.f32.xlu1 %v7250_v47  ;;  %7248 = vmax.xlane.f32.xlu0 %v7247_v32 }
0x10e4   : > { %7257 = vmax.xlane.f32.xlu1 %v7256_v43  ;;  %7254 = vmax.xlane.f32.xlu0 %v7253_v0 }
0x10e8   : > { %7263 = vmax.xlane.f32.xlu1 %v7262_v7  ;;  %7260 = vmax.xlane.f32.xlu0 %v7259_v57 }
0x10ec   : > { %7269 = vmax.xlane.f32.xlu1 %v7268_v60  ;;  %7266 = vmax.xlane.f32.xlu0 %v7265_v54 }
0x113d   : > { %v15021_v39 = vpop.xlane.xlu1 %7203  ;;  %v15023_v41 = vpop.xlane.xlu0 %7200 }
0x113e   : > { %v7272_v37 = vsub.f32 %v14873_v36, %v15021_v39  ;;  %v7271_v47 = vsub.f32 %v14875_v30, %v15023_v41 }
0x1140   : > { %v7297_v32 = vmul.f32 1.442695, %v7272_v37  ;;  %v7295_v3 = vmul.f32 1.442695, %v7271_v47 }
0x1141   : > { %v15029_v28 = vpop.xlane.xlu1 %7209  ;;  %v15031_v2 = vpop.xlane.xlu0 %7206 }
0x1142   : > { %10644 = vpow2.f32 %v7297_v32  ;;  %v7274_v14 = vsub.f32 %v14877_v27, %v15029_v28  ;;  %v7273_v43 = vsub.f32 %v14879_v34, %v15031_v2 }
0x1143   : > { %10646 = vpow2.f32 %v7295_v3 }
0x1144   : > { %v7301_v0 = vmul.f32 1.442695, %v7274_v14  ;;  %v7299_v45 = vmul.f32 1.442695, %v7273_v43 }
0x1145   : > { %v15037_v36 = vpop.xlane.xlu1 %7215  ;;  %v15039_v62 = vpop.xlane.xlu0 %7212 }
0x1146   : > { %10648 = vpow2.f32 %v7301_v0  ;;  %v7276_v30 = vsub.f32 %v14892_v20, %v15037_v36  ;;  %v7275_v7 = vsub.f32 %v14881_v44, %v15039_v62 }
0x1147   : > { %10650 = vpow2.f32 %v7299_v45 }
0x1148   : > { %v7305_v57 = vmul.f32 1.442695, %v7276_v30  ;;  %v7303_v27 = vmul.f32 1.442695, %v7275_v7 }
0x1149   : > { %v15045_v60 = vpop.xlane.xlu1 %7221  ;;  %v15047_v34 = vpop.xlane.xlu0 %7218 }
0x114a   : > { %10652 = vpow2.f32 %v7305_v57  ;;  %v7278_v54 = vsub.f32 %v14901_v13, %v15045_v60  ;;  %v7277_v18 = vsub.f32 %v14903_v12, %v15047_v34 }
0x114b   : > { %10654 = vpow2.f32 %v7303_v27 }
0x114c   : > { %v10645_v17 = vpop.eup %10644  ;;  %v7309_v20 = vmul.f32 1.442695, %v7278_v54  ;;  %v7307_v9 = vmul.f32 1.442695, %v7277_v18 }
0x114d   : > { %v10647_v21 = vpop.eup %10646  ;;  %v15053_v44 = vpop.xlane.xlu1 %7227  ;;  %v7346_v22 = vsel %vm559_vm2, %v10645_v17, 0.0 }
0x114e   : > { %v15055_v25 = vpop.xlane.xlu0 %7224  ;;  %10656 = vpow2.f32 %v7309_v20  ;;  %v7280_v26 = vsub.f32 %v14910_v23, %v15053_v44  ;;  %7347 = vadd.xlane.f32.xlu1 %v7346_v22  ;;  %v7343_v12 = vsel %vm559_vm2, %v10647_v21, 0.0 }
0x114f   : > { %v7279_v13 = vsub.f32 %v14913_v58, %v15055_v25  ;;  %10658 = vpow2.f32 %v7307_v9  ;;  %7344 = vadd.xlane.f32.xlu0 %v7343_v12 }
0x1150   : > { %v10649_v5 = vpop.eup %10648  ;;  %v7313_v37 = vmul.f32 1.442695, %v7280_v26 }
0x1151   : > { %v7311_v47 = vmul.f32 1.442695, %v7279_v13  ;;  %v10651_v32 = vpop.eup %10650  ;;  %v15063_v3 = vpop.xlane.xlu1 %7746  ;;  %v7352_v43 = vsel %vm559_vm2, %v10649_v5, 0.0 }
0x1152   : > { %v15065_v14 = vpop.xlane.xlu0 %7230  ;;  %10660 = vpow2.f32 %v7313_v37  ;;  %7353 = vadd.xlane.f32.xlu1 %v7352_v43  ;;  %v7349_v58 = vsel %vm559_vm2, %v10651_v32, 0.0 }
0x1153   : > { %v7281_v23 = vsub.f32 %v14920_v52, %v15065_v14  ;;  %10662 = vpow2.f32 %v7311_v47  ;;  %7350 = vadd.xlane.f32.xlu0 %v7349_v58 }
0x1154   : > { %v10653_v0 = vpop.eup %10652 }
0x1155   : > { %v7315_v45 = vmul.f32 1.442695, %v7281_v23  ;;  %v10655_v30 = vpop.eup %10654  ;;  %v15071_v7 = vpop.xlane.xlu1 %7752  ;;  %v7358_v27 = vsel %vm559_vm2, %v10653_v0, 0.0 }
0x1156   : > { %v15073_v57 = vpop.xlane.xlu0 %7749  ;;  %7359 = vadd.xlane.f32.xlu1 %v7358_v27  ;;  %v7355_v54 = vsel %vm559_vm2, %v10655_v30, 0.0 }
0x1157   : > { %10664 = vpow2.f32 %v7315_v45  ;;  %7356 = vadd.xlane.f32.xlu0 %v7355_v54 }
0x1158   : > { %v10657_v52 = vpop.eup %10656 }
0x1159   : > { %v10659_v18 = vpop.eup %10658  ;;  %v15077_v17 = vpop.xlane.xlu1 %7758  ;;  %v7364_v9 = vsel %vm559_vm2, %v10657_v52, 0.0  ;;  %v7769_v52 = vsub.f32 %v14852_v33, %v15063_v3  ;;  %v7771_v33 = vsub.f32 %v14856_v46, %v15071_v7 }
0x115a   : > { %v15079_v20 = vpop.xlane.xlu0 %7755  ;;  %7365 = vadd.xlane.f32.xlu1 %v7364_v9  ;;  %v7361_v21 = vsel %vm559_vm2, %v10659_v18, 0.0  ;;  %v7770_v9 = vsub.f32 %v14850_v19, %v15073_v57 }
0x115b   : > { %7362 = vadd.xlane.f32.xlu0 %v7361_v21  ;;  %v7772_v19 = vsub.f32 %v14854_v48, %v15079_v20 }
0x115c   : > { %v10661_v22 = vpop.eup %10660 }
0x115d   : > { %v10663_v26 = vpop.eup %10662  ;;  %v15083_v13 = vpop.xlane.xlu1 %7764  ;;  %v7370_v5 = vsel %vm559_vm2, %v10661_v22, 0.0  ;;  %v7783_v46 = vmul.f32 1.442695, %v7772_v19 }
0x115e   : > { %v15085_v12 = vpop.xlane.xlu0 %7761  ;;  %7371 = vadd.xlane.f32.xlu1 %v7370_v5  ;;  %v7367_v37 = vsel %vm559_vm2, %v10663_v26, 0.0 }
0x115f   : > { %7368 = vadd.xlane.f32.xlu0 %v7367_v37 }
0x1161   : > { %v10665_v47 = vpop.eup %10664  ;;  %v15089_v32 = vpop.xlane.xlu1 %7233 }
0x1162   : > { %v15091_v43 = vpop.xlane.xlu0 %7767  ;;  %v7282_v23 = vsub.f32 %v14945_v63, %v15089_v32  ;;  %v7373_v58 = vsel %vm559_vm2, %v10665_v47, 0.0  ;;  %v7779_v47 = vmul.f32 1.442695, %v7770_v9 }
0x1163   : > { %7374 = vadd.xlane.f32.xlu0 %v7373_v58 }
0x1164   : > { %v7317_v0 = vmul.f32 1.442695, %v7282_v23 }
0x1165   : > { %v15096_v45 = vpop.xlane.xlu1 %7239 }
0x1166   : > { %v15098_v30 = vpop.xlane.xlu0 %7236  ;;  %10666 = vpow2.f32 %v7317_v0  ;;  %v7284_v27 = vsub.f32 %v14955_v55, %v15096_v45 }
0x1167   : > { %v7283_v54 = vsub.f32 %v14948_v8, %v15098_v30  ;;  %v7777_v8 = vmul.f32 1.442695, %v7769_v52 }
0x1168   : > { %v7321_v18 = vmul.f32 1.442695, %v7284_v27  ;;  %v7774_v27 = vsub.f32 %v14858_v11, %v15085_v12 }
0x1169   : > { %v7319_v63 = vmul.f32 1.442695, %v7283_v54  ;;  %v15108_v21 = vpop.xlane.xlu1 %7245 }
0x116a   : > { %v15110_v22 = vpop.xlane.xlu0 %7242  ;;  %10668 = vpow2.f32 %v7321_v18  ;;  %v7286_v26 = vsub.f32 %v14966_v53, %v15108_v21  ;;  %v7781_v53 = vmul.f32 1.442695, %v7771_v33  ;;  %v7775_v18 = vsub.f32 %v14864_v31, %v15083_v13 }
0x116b   : > { %v7285_v55 = vsub.f32 %v14959_v50, %v15110_v22  ;;  %10670 = vpow2.f32 %v7319_v63  ;;  %v7773_v50 = vsub.f32 %v14860_v24, %v15077_v17  ;;  %v7787_v9 = vmul.f32 1.442695, %v7774_v27 }
0x116c   : > { %v7325_v5 = vmul.f32 1.442695, %v7286_v26  ;;  %v7776_v24 = vsub.f32 %v14862_v51, %v15091_v43 }
0x116d   : > { %v7323_v37 = vmul.f32 1.442695, %v7285_v55  ;;  %v15120_v23 = vpop.xlane.xlu1 %7251  ;;  %v7785_v52 = vmul.f32 1.442695, %v7773_v50 }
0x116e   : > { %10672 = vpow2.f32 %v7325_v5  ;;  %v15124_v0 = vpop.xlane.xlu0 %7248  ;;  %v7789_v5 = vmul.f32 1.442695, %v7775_v18  ;;  %v7288_v31 = vsub.f32 %v14973_v35, %v15120_v23 }
0x116f   : > { %10674 = vpow2.f32 %v7323_v37  ;;  %v7287_v51 = vsub.f32 %v14975_v59, %v15124_v0 }
0x1170   : > { %v10667_v58 = vpop.eup %10666  ;;  %10676 = vpow2.f32 %v7777_v8  ;;  %v7329_v27 = vmul.f32 1.442695, %v7288_v31 }
0x1171   : > { %10678 = vpow2.f32 %v7779_v47  ;;  %v7376_v54 = vsel %vm559_vm2, %v10667_v58, 0.0  ;;  %v15133_v26 = vpop.xlane.xlu1 %7257  ;;  %v7791_v47 = vmul.f32 1.442695, %v7776_v24 }
0x1172   : > { %7377 = vadd.xlane.f32.xlu1 %v7376_v54  ;;  %10680 = vpow2.f32 %v7781_v53  ;;  %v15136_v11 = vpop.xlane.xlu0 %7254  ;;  %v7290_v35 = vsub.f32 %v14981_v40, %v15133_v26 }
0x1173   : > { %10682 = vpow2.f32 %v7783_v46  ;;  %v7289_v59 = vsub.f32 %v14983_v38, %v15136_v11 }
0x1174   : > { %v10669_v48 = vpop.eup %10668  ;;  %10684 = vpow2.f32 %v7785_v52  ;;  %v7333_v24 = vmul.f32 1.442695, %v7290_v35 }
0x1175   : > { %v10671_v63 = vpop.eup %10670  ;;  %v7382_v55 = vsel %vm559_vm2, %v10669_v48, 0.0  ;;  %10686 = vpow2.f32 %v7787_v9  ;;  %v15145_v46 = vpop.xlane.xlu1 %7263  ;;  %v7327_v48 = vmul.f32 1.442695, %v7287_v51 }
0x1176   : > { %7383 = vadd.xlane.f32.xlu1 %v7382_v55  ;;  %v7379_v8 = vsel %vm559_vm2, %v10671_v63, 0.0  ;;  %10688 = vpow2.f32 %v7789_v5  ;;  %v15149_v54 = vpop.xlane.xlu0 %7260  ;;  %v7292_v40 = vsub.f32 %v14989_v16, %v15145_v46  ;;  %v7331_v55 = vmul.f32 1.442695, %v7289_v59 }
0x1177   : > { %7380 = vadd.xlane.f32.xlu0 %v7379_v8  ;;  %10690 = vpow2.f32 %v7791_v47  ;;  %v7291_v8 = vsub.f32 %v14991_v56, %v15149_v54 }
0x1178   : > { %v10673_v33 = vpop.eup %10672  ;;  %10692 = vpow2.f32 %v7329_v27  ;;  %v7337_v51 = vmul.f32 1.442695, %v7292_v40 }
0x1179   : > { %v10675_v37 = vpop.eup %10674  ;;  %v7388_v19 = vsel %vm559_vm2, %v10673_v33, 0.0  ;;  %10694 = vpow2.f32 %v7327_v48  ;;  %v15159_v33 = vpop.xlane.xlu1 %7269 }
0x117a   : > { %v10677_v58 = vpop.eup %10676  ;;  %7389 = vadd.xlane.f32.xlu1 %v7388_v19  ;;  %v7385_v53 = vsel %vm559_vm2, %v10675_v37, 0.0  ;;  %v15162_v31 = vpop.xlane.xlu0 %7266  ;;  %10696 = vpow2.f32 %v7333_v24  ;;  %v7294_v16 = vsub.f32 %v14997_v29, %v15159_v33  ;;  %v7335_v19 = vmul.f32 1.442695, %v7291_v8 }
0x117b   : > { %v10679_v50 = vpop.eup %10678  ;;  %7386 = vadd.xlane.f32.xlu0 %v7385_v53  ;;  %v7793_v52 = vsel %vm559_vm2, %v10677_v58, 0.0  ;;  %10698 = vpow2.f32 %v7331_v55  ;;  %v7293_v56 = vsub.f32 %v14999_v15, %v15162_v31 }
0x117c   : > { %v10681_v18 = vpop.eup %10680  ;;  %v7796_v63 = vsel %vm559_vm2, %v10679_v50, 0.0  ;;  %10700 = vpow2.f32 %v7337_v51  ;;  %v7341_v35 = vmul.f32 1.442695, %v7294_v16 }
0x117d   : > { %v10683_v9 = vpop.eup %10682  ;;  %v7799_v38 = vsel %vm559_vm2, %v10681_v18, 0.0  ;;  %10702 = vpow2.f32 %v7335_v19  ;;  %v7339_v48 = vmul.f32 1.442695, %v7293_v56 }
0x117e   : > { %7794 = vadd.xlane.f32.xlu1 %v7793_v52  ;;  %v10685_v5 = vpop.eup %10684  ;;  %v7802_v37 = vsel %vm559_vm2, %v10683_v9, 0.0  ;;  %10704 = vpow2.f32 %v7341_v35 }
0x117f   : > { %7797 = vadd.xlane.f32.xlu0 %v7796_v63  ;;  %v10687_v47 = vpop.eup %10686  ;;  %v7805_v58 = vsel %vm559_vm2, %v10685_v5, 0.0  ;;  %10706 = vpow2.f32 %v7339_v48 }
0x1180   : > { %v10689_v53 = vpop.eup %10688  ;;  %v7808_v50 = vsel %vm559_vm2, %v10687_v47, 0.0 }
0x1181   : > { %v10691_v27 = vpop.eup %10690  ;;  %v7811_v59 = vsel %vm559_vm2, %v10689_v53, 0.0 }
0x1182   : > { %7800 = vadd.xlane.f32.xlu1 %v7799_v38  ;;  %v10693_v29 = vpop.eup %10692  ;;  %v7814_v52 = vsel %vm559_vm2, %v10691_v27, 0.0 }
0x1183   : > { %7803 = vadd.xlane.f32.xlu0 %v7802_v37  ;;  %v10695_v18 = vpop.eup %10694  ;;  %v7394_v15 = vsel %vm559_vm2, %v10693_v29, 0.0 }
0x1184   : > { %v10697_v63 = vpop.eup %10696  ;;  %v7391_v9 = vsel %vm559_vm2, %v10695_v18, 0.0 }
0x1185   : > { %v10699_v24 = vpop.eup %10698  ;;  %v7400_v40 = vsel %vm559_vm2, %v10697_v63, 0.0 }
0x1186   : > { %7806 = vadd.xlane.f32.xlu1 %v7805_v58  ;;  %v10701_v55 = vpop.eup %10700  ;;  %v7397_v8 = vsel %vm559_vm2, %v10699_v24, 0.0 }
0x1187   : > { %7809 = vadd.xlane.f32.xlu0 %v7808_v50  ;;  %v10703_v38 = vpop.eup %10702  ;;  %v7406_v5 = vsel %vm559_vm2, %v10701_v55, 0.0 }
0x1188   : > { %v10705_v37 = vpop.eup %10704  ;;  %v7403_v47 = vsel %vm559_vm2, %v10703_v38, 0.0 }
0x1189   : > { %v10707_v51 = vpop.eup %10706  ;;  %v7412_v16 = vsel %vm559_vm2, %v10705_v37, 0.0 }
0x118a   : > { %7812 = vadd.xlane.f32.xlu1 %v7811_v59  ;;  %v7409_v19 = vsel %vm559_vm2, %v10707_v51, 0.0 }
0x118b   : > { %7815 = vadd.xlane.f32.xlu0 %v7814_v52 }
0x118e   : > { %7395 = vadd.xlane.f32.xlu1 %v7394_v15 }
0x118f   : > { %7392 = vadd.xlane.f32.xlu0 %v7391_v9 }
0x1192   : > { %7401 = vadd.xlane.f32.xlu1 %v7400_v40 }
0x1193   : > { %7398 = vadd.xlane.f32.xlu0 %v7397_v8 }
0x1196   : > { %7407 = vadd.xlane.f32.xlu1 %v7406_v5 }
0x1197   : > { %7404 = vadd.xlane.f32.xlu0 %v7403_v47 }
0x119a   : > { %7413 = vadd.xlane.f32.xlu1 %v7412_v16 }
0x119b   : > { %7410 = vadd.xlane.f32.xlu0 %v7409_v19 }
0x11db   : > { %v7348_v56 = vpop.xlane.xlu1 %7347 }
0x11dc   : > { %10708 = vlog2.f32 %v7348_v56  ;;  %v7345_v58 = vpop.xlane.xlu0 %7344 }
0x11dd   : > { %10710 = vlog2.f32 %v7345_v58 }
0x11df   : > { %v7354_v53 = vpop.xlane.xlu1 %7353 }
0x11e0   : > { %v7351_v50 = vpop.xlane.xlu0 %7350 }
0x11e1   : > { %10712 = vlog2.f32 %v7351_v50 }
0x11e2   : > { %10714 = vlog2.f32 %v7354_v53 }
0x11e3   : > { %v7360_v27 = vpop.xlane.xlu1 %7359 }
0x11e4   : > { %v7357_v35 = vpop.xlane.xlu0 %7356 }
0x11e5   : > { %10716 = vlog2.f32 %v7357_v35 }
0x11e6   : > { %v10709_v48 = vpop.eup %10708  ;;  %10718 = vlog2.f32 %v7360_v27 }
0x11e7   : > { %v10711_v59 = vpop.eup %10710  ;;  %v7366_v29 = vpop.xlane.xlu1 %7365  ;;  %v7418_v15 = vmul.f32 0.6931472, %v10709_v48 }
0x11e8   : > { %v7416_v52 = vmul.f32 0.6931472, %v10711_v59  ;;  %v7363_v18 = vpop.xlane.xlu0 %7362 }
0x11e9   : > { %v7464_v55 = vadd.f32 %v7418_v15, %v15021_v39 }
0x11ea   : > { %v7463_v63 = vadd.f32 %v7416_v52, %v15023_v41 }
0x11eb   : > { %v10713_v9 = vpop.eup %10712  ;;  %v7372_v24 = vpop.xlane.xlu1 %7371 }
0x11ec   : > { %10720 = vlog2.f32 %v7372_v24  ;;  %7487 = vxpose.xlu0.b32.start [1/8] (short) (narrow) %v7463_v63, 8  ;;  %v7369_v40 = vpop.xlane.xlu0 %7368  ;;  %v7420_v8 = vmul.f32 0.6931472, %v10713_v9  ;;  %v10715_v38 = vpop.eup %10714 }
0x11ed   : > { %10722 = vlog2.f32 %v7369_v40  ;;  %v7422_v37 = vmul.f32 0.6931472, %v10715_v38  ;;  %v15189_v63 = vpop.f32.mrb[48].mxu0  ;;  %v15193_v40 = vpop.f32.mrb[48].mxu1 }
0x11ee   : > { %10724 = vlog2.f32 %v7363_v18  ;;  %v7465_v47 = vadd.f32 %v7420_v8, %v15031_v2 }
0x11ef   : > { %v10717_v51 = vpop.eup %10716  ;;  %v7466_v19 = vadd.f32 %v7422_v37, %v15029_v28 }
0x11f0   : > { %7488 = vxpose.xlu0.b32.cont [2/8] (short) (narrow) %v7464_v55, 8  ;;  %v7375_v5 = vpop.xlane.xlu0 %7374  ;;  %v10719_v41 = vpop.eup %10718  ;;  %v7424_v56 = vmul.f32 0.6931472, %v10717_v51 }
0x11f1   : > { %10726 = vlog2.f32 %v7375_v5  ;;  %v7426_v50 = vmul.f32 0.6931472, %v10719_v41  ;;  %v15197_v55 = vpop.f32.mrb[49].mxu1 }
0x11f2   : > { %10728 = vlog2.f32 %v7366_v29  ;;  %v7467_v27 = vadd.f32 %v7424_v56, %v15039_v62  ;;  %v15202_v5 = vpop.f32.mrb[50].mxu1 }
0x11f3   : > { %v7468_v2 = vadd.f32 %v7426_v50, %v15037_v36 }
0x11f4   : > { %7489 = vxpose.xlu0.b32.cont [3/8] (short) (narrow) %v7465_v47, 8 }
0x11f6   : > { %v10721_v16 = vpop.eup %10720 }
0x11f7   : > { %v10723_v58 = vpop.eup %10722  ;;  %v7434_v35 = vmul.f32 0.6931472, %v10721_v16 }
0x11f8   : > { %v7432_v53 = vmul.f32 0.6931472, %v10723_v58  ;;  %7490 = vxpose.xlu0.b32.cont [4/8] (short) (narrow) %v7466_v19, 8  ;;  %v10725_v39 = vpop.eup %10724 }
0x11f9   : > { %v7428_v29 = vmul.f32 0.6931472, %v10725_v39  ;;  %v7472_v52 = vadd.f32 %v7434_v35, %v15053_v44  ;;  %v15195_v44 = vpop.f32.mrb[49].mxu0 }
0x11fa   : > { %v7471_v48 = vadd.f32 %v7432_v53, %v15055_v25  ;;  %v15199_v8 = vpop.f32.mrb[50].mxu0 }
0x11fb   : > { %v10727_v59 = vpop.eup %10726  ;;  %v7469_v9 = vadd.f32 %v7428_v29, %v15047_v34  ;;  %v15204_v34 = vpop.f32.mrb[51].mxu0 }
0x11fc   : > { %7491 = vxpose.xlu0.b32.cont [5/8] (short) (narrow) %v7467_v27, 8  ;;  %7519 = vxpose.xlu1.b32.start [1/8] (short) (narrow) %v7471_v48, 8  ;;  %v7436_v28 = vmul.f32 0.6931472, %v10727_v59  ;;  %v10729_v18 = vpop.eup %10728 }
0x11fd   : > { %v7430_v62 = vmul.f32 0.6931472, %v10729_v18 }
0x11fe   : > { %v7473_v25 = vadd.f32 %v7436_v28, %v15065_v14  ;;  %v15206_v14 = vpop.f32.mrb[51].mxu1 }
0x11ff   : > { %v7378_v15 = vpop.xlane.xlu1 %7377  ;;  %v7470_v38 = vadd.f32 %v7430_v62, %v15045_v60 }
0x1200   : > { %10730 = vlog2.f32 %v7378_v15  ;;  %7492 = vxpose.xlu0.b32.cont [6/8] (short) (narrow) %v7468_v2, 8  ;;  %7520 = vxpose.xlu1.b32.cont [2/8] (short) (narrow) %v7472_v52, 8 }
0x1203   : > { %v7384_v24 = vpop.xlane.xlu1 %7383 }
0x1204   : > { %10732 = vlog2.f32 %v7384_v24  ;;  %7493 = vxpose.xlu0.b32.cont [7/8] (short) (narrow) %v7469_v9, 8  ;;  %7521 = vxpose.xlu1.b32.cont [3/8] (short) (narrow) %v7473_v25, 8  ;;  %v7381_v36 = vpop.xlane.xlu0 %7380 }
0x1205   : > { %10734 = vlog2.f32 %v7381_v36 }
0x1207   : > { %v7390_v37 = vpop.xlane.xlu1 %7389 }
0x1208   : > { %7494 = vxpose.xlu0.b32.end [8/8] (short) (narrow) %v7470_v38, 8  ;;  %v7387_v47 = vpop.xlane.xlu0 %7386 }
0x1209   : > { %10736 = vlog2.f32 %v7387_v47 }
0x120a   : > { %v10731_v51 = vpop.eup %10730  ;;  %10738 = vlog2.f32 %v7390_v37 }
0x120b   : > { %v7438_v41 = vmul.f32 0.6931472, %v10731_v51  ;;  %v7795_v56 = vpop.xlane.xlu1 %7794 }
0x120c   : > { %10740 = vlog2.f32 %v7795_v56  ;;  %v7798_v50 = vpop.xlane.xlu0 %7797 }
0x120d   : > { %v7474_v16 = vadd.f32 %v7438_v41, %v15089_v32  ;;  %10742 = vlog2.f32 %v7798_v50 }
0x120e   : > { %v10733_v19 = vpop.eup %10732 }
0x120f   : > { %v10735_v58 = vpop.eup %10734  ;;  %7522 = vxpose.xlu1.b32.cont [4/8] (short) (narrow) %v7474_v16, 8  ;;  %v7442_v53 = vmul.f32 0.6931472, %v10733_v19  ;;  %v7801_v59 = vpop.xlane.xlu1 %7800 }
0x1210   : > { %v7440_v60 = vmul.f32 0.6931472, %v10735_v58  ;;  %10744 = vlog2.f32 %v7801_v59  ;;  %v7804_v52 = vpop.xlane.xlu0 %7803 }
0x1211   : > { %v7476_v35 = vadd.f32 %v7442_v53, %v15096_v45  ;;  %10746 = vlog2.f32 %v7804_v52 }
0x1212   : > { %v7475_v39 = vadd.f32 %v7440_v60, %v15098_v30 }
0x1213   : > { %v10737_v27 = vpop.eup %10736  ;;  %v7807_v15 = vpop.xlane.xlu1 %7806 }
0x1214   : > { %7523 = vxpose.xlu1.b32.cont [5/8] (short) (narrow) %v7475_v39, 8  ;;  %v7444_v48 = vmul.f32 0.6931472, %v10737_v27  ;;  %v10739_v2 = vpop.eup %10738  ;;  %10748 = vlog2.f32 %v7807_v15  ;;  %v7810_v9 = vpop.xlane.xlu0 %7809  ;;  %v8197_v15 = vmul.f32 400.0, %v15189_v63  ;;  %v8202_v63 = vmul.f32 400.0, %v15206_v14 }
0x1215   : > { %v7446_v32 = vmul.f32 0.6931472, %v10739_v2  ;;  %10750 = vlog2.f32 %v7810_v9  ;;  %v8201_v9 = vmul.f32 400.0, %v15193_v40 }
0x1216   : > { %v7477_v29 = vadd.f32 %v7444_v48, %v15110_v22  ;;  %v10741_v28 = vpop.eup %10740 }
0x1217   : > { %v7478_v30 = vadd.f32 %v7446_v32, %v15108_v21  ;;  %v7818_v18 = vmul.f32 0.6931472, %v10741_v28  ;;  %v10743_v62 = vpop.eup %10742  ;;  %v7813_v22 = vpop.xlane.xlu1 %7812 }
0x1218   : > { %7524 = vxpose.xlu1.b32.cont [6/8] (short) (narrow) %v7476_v35, 8  ;;  %v7820_v45 = vmul.f32 0.6931472, %v10743_v62  ;;  %10752 = vlog2.f32 %v7813_v22  ;;  %v7816_v47 = vpop.xlane.xlu0 %7815  ;;  %v15241_v62 = vld [vmem:[%s11403_s11] sm:$0x1]  ;;  %v8203_v22 = vmul.f32 400.0, %v15202_v5 }
0x1219   : > { %v7833_v25 = vadd.f32 %v7818_v18, %v15063_v3  ;;  %10754 = vlog2.f32 %v7816_v47 }
0x121a   : > { %v10745_v24 = vpop.eup %10744  ;;  %v7834_v38 = vadd.f32 %v7820_v45, %v15073_v57 }
0x121b   : > { %v7822_v36 = vmul.f32 0.6931472, %v10745_v24  ;;  %v10747_v37 = vpop.eup %10746 }
0x121c   : > { %7525 = vxpose.xlu1.b32.cont [7/8] (short) (narrow) %v7477_v29, 8  ;;  %v7824_v21 = vmul.f32 0.6931472, %v10747_v37 }
0x121d   : > { %v7835_v51 = vadd.f32 %v7822_v36, %v15071_v7  ;;  %v8199_v36 = vmul.f32 400.0, %v15199_v8 }
0x121e   : > { %v10749_v41 = vpop.eup %10748  ;;  %v7836_v3 = vadd.f32 %v7824_v21, %v15079_v20  ;;  %v15221_v20 = vpop.xlane.xlu0 %7392 }
0x121f   : > { %v7826_v16 = vmul.f32 0.6931472, %v10749_v41  ;;  %v10751_v19 = vpop.eup %10750 }
0x1220   : > { %7526 = vxpose.xlu1.b32.end [8/8] (short) (narrow) %v7478_v30, 8  ;;  %v7828_v56 = vmul.f32 0.6931472, %v10751_v19 }
0x1221   : > { %v7837_v58 = vadd.f32 %v7826_v16, %v15077_v17  ;;  %v7890_v16 = vadd.f32 %v14834_v1, %v11428_v6 }
0x1222   : > { %v10753_v60 = vpop.eup %10752  ;;  %v7838_v53 = vadd.f32 %v7828_v56, %v15085_v12  ;;  %v15223_v35 = vpop.xlane.xlu0 %7398 }
0x1223   : > { %v7830_v57 = vmul.f32 0.6931472, %v10753_v60  ;;  %v10755_v39 = vpop.eup %10754  ;;  %v15230_v12 = vpop.xlane.xlu1 %7395 }
0x1224   : > { %7841 = vxpose.xlu1.b32.start [1/8] (short) (narrow) %v7833_v25, 8  ;;  %v7832_v50 = vmul.f32 0.6931472, %v10755_v39  ;;  %v8196_v25 = vmul.f32 400.0, %v15195_v44  ;;  %v15276_v39 = vld [vmem:[%s11420_s14] sm:$0x1] }
0x1225   : > { %v7839_v7 = vadd.f32 %v7830_v57, %v15083_v13  ;;  %v7901_v57 = vld [vmem:[#allocation2 + $0x8] sm:$0xff] }
0x1226   : > { %v7840_v27 = vadd.f32 %v7832_v50, %v15091_v43  ;;  %v15225_v17 = vpop.xlane.xlu0 %7404  ;;  %v7878_v43 = vadd.f32 %v14828_v61, %v11394_v49  ;;  %v8200_v61 = vmul.f32 400.0, %v15197_v55 }
0x1227   : > { %v15232_v2 = vpop.xlane.xlu1 %7401 }
0x1228   : > { %7842 = vxpose.xlu1.b32.cont [2/8] (short) (narrow) %v7834_v38, 8  ;;  %v8198_v38 = vmul.f32 400.0, %v15204_v34 }
0x122a   : > { %v15227_v48 = vpop.xlane.xlu0 %7410 }
0x122b   : > { %v15236_v28 = vpop.xlane.xlu1 %7407 }
0x122c   : > { %7843 = vxpose.xlu1.b32.cont [3/8] (short) (narrow) %v7835_v51, 8 }
0x122f   : > { %v15247_v24 = vpop.xlane.xlu1 %7413 }
0x1230   : > { %7844 = vxpose.xlu1.b32.cont [4/8] (short) (narrow) %v7836_v3, 8 }
0x1234   : > { %7845 = vxpose.xlu1.b32.cont [5/8] (short) (narrow) %v7837_v58, 8 }
0x1238   : > { %7846 = vxpose.xlu1.b32.cont [6/8] (short) (narrow) %v7838_v53, 8  ;;  %v7900_v53 = vld [vmem:[#allocation2] sm:$0xff] }
0x123c   : > { %7847 = vxpose.xlu1.b32.cont [7/8] (short) (narrow) %v7839_v7, 8  ;;  %v7903_v7 = vld [vmem:[#allocation2 + $0x18] sm:$0xff] }
0x1240   : > { %7848 = vxpose.xlu1.b32.end [8/8] (short) (narrow) %v7840_v27, 8  ;;  %v7902_v27 = vld [vmem:[#allocation2 + $0x10] sm:$0xff] }
0x126c   : > { %v7503_v59 = vpop.trf.xlu0 }
0x126d   : > { %7583 = vst.msk [vmem:[#allocation3] sm:$0x1] %vm1268_vm3, %v7503_v59  ;;  %v7909_v59 = vmul.f32 400.0, %v7901_v57 }
0x1274   : > { %v7874_v13 = vld [vmem:[#allocation3] sm:$0x1] }
0x1275   : > { %v7879_v32 = vmul.f32 0.0025, %v7874_v13 }
0x1277   : > { %v7880_v29 = vsub.f32 %v7878_v43, %v7879_v32  ;;  %v7908_v43 = vmul.f32 400.0, %v7900_v53 }
0x1279   : > { %v7881_v52 = vmul.f32 0.5, %v7880_v29  ;;  %v7911_v29 = vmul.f32 400.0, %v7903_v7 }
0x127b   : > { %v7897_v30 = vsub.f32 %v7881_v52, %v11394_v49  ;;  %v7910_v52 = vmul.f32 400.0, %v7902_v27 }
0x127d   : > { %v7898_v18 = vmul.f32 400.0, %v7897_v30  ;;  %v7905_v30 = vld [vmem:[#allocation2 + $0x28] sm:$0xff] }
0x127f   : > { %v7899_v45 = vadd.f32 %v15241_v62, %v7898_v18  ;;  %v7904_v18 = vld [vmem:[#allocation2 + $0x20] sm:$0xff] }
0x1281   : > { %v8208_v37 = vrot.slane %v7899_v45, %v11425_v4 }
0x1283   : > { %v15254_v21 = vadd.f32 %v8208_v37, %v8197_v15  ;;  %v15256_v47 = vadd.f32 %v8208_v37, %v8201_v9  ;;  %v15258_v40 = vadd.f32 %v8208_v37, %v8196_v25  ;;  %v15260_v44 = vadd.f32 %v8208_v37, %v8200_v61 }
0x1284   : > { %v15262_v55 = vadd.f32 %v8208_v37, %v8199_v36  ;;  %v15264_v51 = vadd.f32 %v8208_v37, %v8203_v22  ;;  %v15266_v8 = vadd.f32 %v8208_v37, %v8198_v38  ;;  %v15268_v5 = vadd.f32 %v8208_v37, %v8202_v63  ;;  %v7535_v34 = vpop.trf.xlu1  ;;  %v7907_v22 = vld [vmem:[#allocation2 + $0x38] sm:$0xff]  ;;  %v7906_v38 = vld [vmem:[#allocation2 + $0x30] sm:$0xff] }
0x1285   : > { %7584 = vst.msk [vmem:[#allocation3 + $0x1] sm:$0x1] %vm1268_vm3, %v7535_v34  ;;  %v7913_v61 = vmul.f32 400.0, %v7905_v30  ;;  %v7912_v36 = vmul.f32 400.0, %v7904_v18 }
0x12a4   : > { %v7857_v14 = vpop.trf.xlu1 }
0x12a5   : > { %7873 = vst.msk [vmem:[#allocation4] sm:$0x1] %vm1268_vm3, %v7857_v14  ;;  %v7915_v14 = vmul.f32 400.0, %v7907_v22 }
0x12ac   : > { %v7877_v41 = vld [vmem:[#allocation4] sm:$0x1] }
0x12ad   : > { %v7891_v3 = vmul.f32 0.0025, %v7877_v41  ;;  %v7914_v41 = vmul.f32 400.0, %v7906_v38 }
0x12af   : > { %v7892_v19 = vsub.f32 %v7890_v16, %v7891_v3 }
0x12b1   : > { %v7893_v56 = vmul.f32 0.5, %v7892_v19 }
0x12b3   : > { %v7894_v58 = vsub.f32 %v7893_v56, %v11428_v6 }
0x12b5   : > { %v7895_v60 = vmul.f32 400.0, %v7894_v58 }
0x12b7   : > { %v7896_v50 = vadd.f32 %v15276_v39, %v7895_v60 }
0x12b9   : > { %v7920_v13 = vrot.slane %v7896_v50, %v11425_v4 }
0x12bb   : > { %v7923_v32 = vadd.f32 %v7920_v13, %v7909_v59  ;;  %v7922_v1 = vadd.f32 %v7920_v13, %v7908_v43  ;;  %v7925_v9 = vadd.f32 %v7920_v13, %v7911_v29  ;;  %v7924_v25 = vadd.f32 %v7920_v13, %v7910_v52 }
0x12bc   : > { %v7927_v37 = vadd.f32 %v7920_v13, %v7913_v61  ;;  %v7926_v34 = vadd.f32 %v7920_v13, %v7912_v36  ;;  %v7929_v19 = vadd.f32 %v7920_v13, %v7915_v14  ;;  %v7928_v56 = vadd.f32 %v7920_v13, %v7914_v41 }
0x12bd   : > { %v7933_v15 = vsel %vm559_vm2, %v7923_v32, -inf  ;;  %v7930_v45 = vsel %vm559_vm2, %v7922_v1, -inf  ;;  %v7939_v4 = vsel %vm559_vm2, %v7925_v9, -inf  ;;  %v7936_v63 = vsel %vm559_vm2, %v7924_v25, -inf }
0x12be   : > { %7934 = vmax.xlane.f32.xlu1 %v7933_v15  ;;  %7931 = vmax.xlane.f32.xlu0 %v7930_v45  ;;  %v7945_v16 = vsel %vm559_vm2, %v7927_v37, -inf  ;;  %v7942_v3 = vsel %vm559_vm2, %v7926_v34, -inf  ;;  %v7951_v58 = vsel %vm559_vm2, %v7929_v19, -inf  ;;  %v7948_v60 = vsel %vm559_vm2, %v7928_v56, -inf }
0x12c2   : > { %7940 = vmax.xlane.f32.xlu1 %v7939_v4  ;;  %7937 = vmax.xlane.f32.xlu0 %v7936_v63 }
0x12c6   : > { %7946 = vmax.xlane.f32.xlu1 %v7945_v16  ;;  %7943 = vmax.xlane.f32.xlu0 %v7942_v3 }
0x12ca   : > { %7952 = vmax.xlane.f32.xlu1 %v7951_v58  ;;  %7949 = vmax.xlane.f32.xlu0 %v7948_v60 }
0x134b   : > { %v15288_v57 = vpop.xlane.xlu1 %7934  ;;  %v15290_v53 = vpop.xlane.xlu0 %7931 }
0x134c   : > { %v7955_v50 = vsub.f32 %v7923_v32, %v15288_v57  ;;  %v7954_v7 = vsub.f32 %v7922_v1, %v15290_v53 }
0x134e   : > { %v7964_v27 = vmul.f32 1.442695, %v7955_v50  ;;  %v7962_v59 = vmul.f32 1.442695, %v7954_v7 }
0x134f   : > { %v15294_v43 = vpop.xlane.xlu1 %7940  ;;  %v15296_v13 = vpop.xlane.xlu0 %7937 }
0x1350   : > { %10756 = vpow2.f32 %v7964_v27  ;;  %v7957_v29 = vsub.f32 %v7925_v9, %v15294_v43  ;;  %v7956_v52 = vsub.f32 %v7924_v25, %v15296_v13 }
0x1351   : > { %10758 = vpow2.f32 %v7962_v59 }
0x1352   : > { %v7968_v30 = vmul.f32 1.442695, %v7957_v29  ;;  %v7966_v18 = vmul.f32 1.442695, %v7956_v52 }
0x1353   : > { %v15300_v15 = vpop.xlane.xlu1 %7946  ;;  %v15302_v45 = vpop.xlane.xlu0 %7943 }
0x1354   : > { %10760 = vpow2.f32 %v7968_v30  ;;  %v7959_v32 = vsub.f32 %v7927_v37, %v15300_v15  ;;  %v7958_v1 = vsub.f32 %v7926_v34, %v15302_v45  ;;  %v8218_v30 = vsel %vm559_vm2, %v15258_v40, -inf }
0x1355   : > { %10762 = vpow2.f32 %v7966_v18  ;;  %v8221_v18 = vsel %vm559_vm2, %v15254_v21, -inf }
0x1356   : > { %v7972_v61 = vmul.f32 1.442695, %v7959_v32  ;;  %v7970_v36 = vmul.f32 1.442695, %v7958_v1  ;;  %v8224_v32 = vsel %vm559_vm2, %v15266_v8, -inf  ;;  %v8227_v1 = vsel %vm559_vm2, %v15262_v55, -inf }
0x1357   : > { %v15306_v22 = vpop.xlane.xlu1 %7952  ;;  %v15308_v9 = vpop.xlane.xlu0 %7949 }
0x1358   : > { %10764 = vpow2.f32 %v7972_v61  ;;  %v7961_v25 = vsub.f32 %v7929_v19, %v15306_v22  ;;  %v7960_v38 = vsub.f32 %v7928_v56, %v15308_v9  ;;  %v8230_v61 = vsel %vm559_vm2, %v15260_v44, -inf }
0x1359   : > { %10766 = vpow2.f32 %v7970_v36  ;;  %v8233_v36 = vsel %vm559_vm2, %v15256_v47, -inf }
0x135a   : > { %v10757_v4 = vpop.eup %10756  ;;  %v7976_v63 = vmul.f32 1.442695, %v7961_v25  ;;  %v7974_v14 = vmul.f32 1.442695, %v7960_v38  ;;  %v8236_v25 = vsel %vm559_vm2, %v15268_v5, -inf  ;;  %v8239_v38 = vsel %vm559_vm2, %v15264_v51, -inf }
0x135b   : > { %v10759_v41 = vpop.eup %10758  ;;  %v7981_v37 = vsel %vm559_vm2, %v10757_v4, 0.0 }
0x135c   : > { %10768 = vpow2.f32 %v7976_v63  ;;  %7982 = vadd.xlane.f32.xlu1 %v7981_v37  ;;  %v7978_v34 = vsel %vm559_vm2, %v10759_v41, 0.0 }
0x135d   : > { %10770 = vpow2.f32 %v7974_v14  ;;  %7979 = vadd.xlane.f32.xlu0 %v7978_v34 }
0x135e   : > { %v10761_v16 = vpop.eup %10760  ;;  %10772 = vlog2.f32 %v15221_v20 }
0x135f   : > { %v10763_v3 = vpop.eup %10762  ;;  %v7987_v58 = vsel %vm559_vm2, %v10761_v16, 0.0  ;;  %10774 = vlog2.f32 %v15230_v12 }
0x1360   : > { %7988 = vadd.xlane.f32.xlu1 %v7987_v58  ;;  %v7984_v19 = vsel %vm559_vm2, %v10763_v3, 0.0  ;;  %10776 = vlog2.f32 %v15223_v35 }
0x1361   : > { %7985 = vadd.xlane.f32.xlu0 %v7984_v19  ;;  %10778 = vlog2.f32 %v15232_v2 }
0x1362   : > { %v10765_v56 = vpop.eup %10764  ;;  %10780 = vlog2.f32 %v15225_v17 }
0x1363   : > { %v10767_v60 = vpop.eup %10766  ;;  %v7993_v50 = vsel %vm559_vm2, %v10765_v56, 0.0  ;;  %10782 = vlog2.f32 %v15236_v28 }
0x1364   : > { %7994 = vadd.xlane.f32.xlu1 %v7993_v50  ;;  %v7990_v7 = vsel %vm559_vm2, %v10767_v60, 0.0  ;;  %10784 = vlog2.f32 %v15227_v48 }
0x1365   : > { %7991 = vadd.xlane.f32.xlu0 %v7990_v7  ;;  %10786 = vlog2.f32 %v15247_v24 }
0x1366   : > { %v10769_v27 = vpop.eup %10768 }
0x1367   : > { %v10771_v59 = vpop.eup %10770  ;;  %v7999_v29 = vsel %vm559_vm2, %v10769_v27, 0.0 }
0x1368   : > { %8000 = vadd.xlane.f32.xlu1 %v7999_v29  ;;  %v7996_v52 = vsel %vm559_vm2, %v10771_v59, 0.0  ;;  %v10773_v4 = vpop.eup %10772 }
0x1369   : > { %7997 = vadd.xlane.f32.xlu0 %v7996_v52  ;;  %v7448_v63 = vmul.f32 0.6931472, %v10773_v4  ;;  %v10775_v14 = vpop.eup %10774 }
0x136a   : > { %v7450_v20 = vmul.f32 0.6931472, %v10775_v14  ;;  %v10777_v37 = vpop.eup %10776 }
0x136b   : > { %v7479_v41 = vadd.f32 %v7448_v63, %v15124_v0  ;;  %v7452_v34 = vmul.f32 0.6931472, %v10777_v37  ;;  %v10779_v16 = vpop.eup %10778 }
0x136c   : > { %8219 = vmax.xlane.f32.xlu1 %v8218_v30  ;;  %v7480_v12 = vadd.f32 %v7450_v20, %v15120_v23  ;;  %v7454_v35 = vmul.f32 0.6931472, %v10779_v16  ;;  %v10781_v3 = vpop.eup %10780 }
0x136d   : > { %v7481_v2 = vadd.f32 %v7452_v34, %v15136_v11  ;;  %v7456_v17 = vmul.f32 0.6931472, %v10781_v3  ;;  %v10783_v58 = vpop.eup %10782 }
0x136e   : > { %v7482_v0 = vadd.f32 %v7454_v35, %v15133_v26  ;;  %v7458_v28 = vmul.f32 0.6931472, %v10783_v58  ;;  %v10785_v19 = vpop.eup %10784 }
0x136f   : > { %v7483_v23 = vadd.f32 %v7456_v17, %v15149_v54  ;;  %v7460_v48 = vmul.f32 0.6931472, %v10785_v19  ;;  %v10787_v60 = vpop.eup %10786 }
0x1370   : > { %8222 = vmax.xlane.f32.xlu1 %v8221_v18  ;;  %v7484_v56 = vadd.f32 %v7458_v28, %v15145_v46  ;;  %v7462_v11 = vmul.f32 0.6931472, %v10787_v60 }
0x1371   : > { %v7485_v50 = vadd.f32 %v7460_v48, %v15162_v31 }
0x1372   : > { %v7486_v24 = vadd.f32 %v7462_v11, %v15159_v33 }
0x1374   : > { %8225 = vmax.xlane.f32.xlu1 %v8224_v32 }
0x1378   : > { %8228 = vmax.xlane.f32.xlu1 %v8227_v1 }
0x137c   : > { %8231 = vmax.xlane.f32.xlu1 %v8230_v61 }
0x1380   : > { %8234 = vmax.xlane.f32.xlu1 %v8233_v36 }
0x1384   : > { %8237 = vmax.xlane.f32.xlu1 %v8236_v25 }
0x1388   : > { %8240 = vmax.xlane.f32.xlu1 %v8239_v38 }
0x1396   : > { %7551 = vxpose.xlu0.b32.start [1/8] (short) (narrow) %v7479_v41, 8 }
0x139a   : > { %7552 = vxpose.xlu0.b32.cont [2/8] (short) (narrow) %v7480_v12, 8 }
0x139e   : > { %7553 = vxpose.xlu0.b32.cont [3/8] (short) (narrow) %v7481_v2, 8 }
0x13a2   : > { %7554 = vxpose.xlu0.b32.cont [4/8] (short) (narrow) %v7482_v0, 8 }
0x13a6   : > { %7555 = vxpose.xlu0.b32.cont [5/8] (short) (narrow) %v7483_v23, 8 }
0x13aa   : > { %7556 = vxpose.xlu0.b32.cont [6/8] (short) (narrow) %v7484_v56, 8 }
0x13ae   : > { %7557 = vxpose.xlu0.b32.cont [7/8] (short) (narrow) %v7485_v50, 8 }
0x13b2   : > { %7558 = vxpose.xlu0.b32.end [8/8] (short) (narrow) %v7486_v24, 8 }
0x13e9   : > { %v7983_v26 = vpop.xlane.xlu1 %7982 }
0x13ea   : > { %10788 = vlog2.f32 %v7983_v26  ;;  %v7980_v7 = vpop.xlane.xlu0 %7979 }
0x13eb   : > { %10790 = vlog2.f32 %v7980_v7 }
0x13ed   : > { %v7989_v27 = vpop.xlane.xlu1 %7988 }
0x13ee   : > { %v7986_v54 = vpop.xlane.xlu0 %7985 }
0x13ef   : > { %10792 = vlog2.f32 %v7986_v54 }
0x13f0   : > { %10794 = vlog2.f32 %v7989_v27 }
0x13f1   : > { %v7995_v59 = vpop.xlane.xlu1 %7994 }
0x13f2   : > { %v7992_v29 = vpop.xlane.xlu0 %7991 }
0x13f3   : > { %10796 = vlog2.f32 %v7992_v29 }
0x13f4   : > { %v10789_v46 = vpop.eup %10788  ;;  %10798 = vlog2.f32 %v7995_v59 }
0x13f5   : > { %v10791_v52 = vpop.eup %10790  ;;  %v8001_v30 = vpop.xlane.xlu1 %8000  ;;  %v8005_v31 = vmul.f32 0.6931472, %v10789_v46 }
0x13f6   : > { %v8003_v18 = vmul.f32 0.6931472, %v10791_v52  ;;  %v7998_v25 = vpop.xlane.xlu0 %7997 }
0x13f7   : > { %v8019_v4 = vadd.f32 %v8005_v31, %v15288_v57 }
0x13f8   : > { %v8018_v32 = vadd.f32 %v8003_v18, %v15290_v53 }
0x13f9   : > { %v10793_v33 = vpop.eup %10792  ;;  %v15353_v1 = vpop.xlane.xlu1 %8219 }
0x13fa   : > { %v8242_v61 = vsub.f32 %v15258_v40, %v15353_v1  ;;  %8026 = vxpose.xlu0.b32.start [1/8] (short) (narrow) %v8018_v32, 8  ;;  %v8007_v36 = vmul.f32 0.6931472, %v10793_v33  ;;  %v10795_v63 = vpop.eup %10794 }
0x13fb   : > { %v8009_v20 = vmul.f32 0.6931472, %v10795_v63 }
0x13fc   : > { %v8250_v38 = vmul.f32 1.442695, %v8242_v61  ;;  %v8020_v40 = vadd.f32 %v8007_v36, %v15296_v13 }
0x13fd   : > { %v15358_v14 = vpop.xlane.xlu1 %8222  ;;  %v10797_v37 = vpop.eup %10796  ;;  %v8021_v35 = vadd.f32 %v8009_v20, %v15294_v43 }
0x13fe   : > { %10800 = vpow2.f32 %v8250_v38  ;;  %v8243_v53 = vsub.f32 %v15254_v21, %v15358_v14  ;;  %8027 = vxpose.xlu0.b32.cont [2/8] (short) (narrow) %v8019_v4, 8  ;;  %v8011_v34 = vmul.f32 0.6931472, %v10797_v37  ;;  %v10799_v21 = vpop.eup %10798  ;;  %v7875_v4 = vld [vmem:[#allocation3 + $0x1] sm:$0x1] }
0x13ff   : > { %10802 = vlog2.f32 %v7998_v25  ;;  %v8013_v0 = vmul.f32 0.6931472, %v10799_v21  ;;  %v8353_v25 = vmul.f32 1.442695, %v15241_v62  ;;  %v7883_v63 = vmul.f32 0.0025, %v7875_v4 }
0x1400   : > { %v8252_v41 = vmul.f32 1.442695, %v8243_v53  ;;  %v8022_v58 = vadd.f32 %v8011_v34, %v15302_v45  ;;  %v7882_v53 = vadd.f32 %v14848_v10, %v11394_v49 }
0x1401   : > { %v15363_v12 = vpop.xlane.xlu1 %8225  ;;  %v8023_v48 = vadd.f32 %v8013_v0, %v15300_v15 }
0x1402   : > { %10804 = vpow2.f32 %v8252_v41  ;;  %v8244_v57 = vsub.f32 %v15266_v8, %v15363_v12  ;;  %8028 = vxpose.xlu0.b32.cont [3/8] (short) (narrow) %v8020_v40, 8  ;;  %v7884_v20 = vsub.f32 %v7882_v53, %v7883_v63 }
0x1403   : > { %10806 = vlog2.f32 %v8001_v30 }
0x1404   : > { %v8254_v16 = vmul.f32 1.442695, %v8244_v57  ;;  %v7885_v37 = vmul.f32 0.5, %v7884_v20 }
0x1405   : > { %v15368_v2 = vpop.xlane.xlu1 %8228 }
0x1406   : > { %10808 = vpow2.f32 %v8254_v16  ;;  %v8245_v13 = vsub.f32 %v15262_v55, %v15368_v2  ;;  %8029 = vxpose.xlu0.b32.cont [4/8] (short) (narrow) %v8021_v35, 8 }
0x1408   : > { %v10801_v3 = vpop.eup %10800  ;;  %v8256_v17 = vmul.f32 1.442695, %v8245_v13 }
0x1409   : > { %v10803_v8 = vpop.eup %10802  ;;  %v15373_v28 = vpop.xlane.xlu1 %8231  ;;  %v8266_v23 = vsel %vm559_vm2, %v10801_v3, 0.0 }
0x140a   : > { %10810 = vpow2.f32 %v8256_v17  ;;  %v8246_v43 = vsub.f32 %v15260_v44, %v15373_v28  ;;  %8030 = vxpose.xlu0.b32.cont [5/8] (short) (narrow) %v8022_v58, 8  ;;  %8267 = vadd.xlane.f32.xlu1 %v8266_v23  ;;  %v8015_v56 = vmul.f32 0.6931472, %v10803_v8 }
0x140c   : > { %v10805_v19 = vpop.eup %10804  ;;  %v8258_v55 = vmul.f32 1.442695, %v8246_v43  ;;  %v8024_v7 = vadd.f32 %v8015_v56, %v15308_v9 }
0x140d   : > { %v10807_v60 = vpop.eup %10806  ;;  %v15379_v11 = vpop.xlane.xlu1 %8234  ;;  %v8269_v45 = vsel %vm559_vm2, %v10805_v19, 0.0 }
0x140e   : > { %10812 = vpow2.f32 %v8258_v55  ;;  %v8247_v50 = vsub.f32 %v15256_v47, %v15379_v11  ;;  %8031 = vxpose.xlu0.b32.cont [6/8] (short) (narrow) %v8023_v48, 8  ;;  %8270 = vadd.xlane.f32.xlu1 %v8269_v45  ;;  %v8017_v44 = vmul.f32 0.6931472, %v10807_v60 }
0x1410   : > { %v10809_v24 = vpop.eup %10808  ;;  %v8260_v26 = vmul.f32 1.442695, %v8247_v50  ;;  %v8025_v47 = vadd.f32 %v8017_v44, %v15306_v22 }
0x1411   : > { %v15385_v27 = vpop.xlane.xlu1 %8237  ;;  %v8272_v15 = vsel %vm559_vm2, %v10809_v24, 0.0 }
0x1412   : > { %10814 = vpow2.f32 %v8260_v26  ;;  %v8248_v54 = vsub.f32 %v15268_v5, %v15385_v27  ;;  %8032 = vxpose.xlu0.b32.cont [7/8] (short) (narrow) %v8024_v7, 8  ;;  %8273 = vadd.xlane.f32.xlu1 %v8272_v15 }
0x1414   : > { %v10811_v59 = vpop.eup %10810  ;;  %v8262_v46 = vmul.f32 1.442695, %v8248_v54 }
0x1415   : > { %v15391_v29 = vpop.xlane.xlu1 %8240  ;;  %v8275_v52 = vsel %vm559_vm2, %v10811_v59, 0.0 }
0x1416   : > { %10816 = vpow2.f32 %v8262_v46  ;;  %v8249_v9 = vsub.f32 %v15264_v51, %v15391_v29  ;;  %8033 = vxpose.xlu0.b32.end [8/8] (short) (narrow) %v8025_v47, 8  ;;  %v7567_v30 = vpop.trf.xlu0  ;;  %8276 = vadd.xlane.f32.xlu1 %v8275_v52 }
0x1417   : > { %7585 = vst.msk [vmem:[#allocation3 + $0x2] sm:$0x1] %vm1268_vm3, %v7567_v30 }
0x1418   : > { %v10813_v5 = vpop.eup %10812  ;;  %v8264_v18 = vmul.f32 1.442695, %v8249_v9  ;;  %v8355_v9 = vmul.f32 1.442695, %v15276_v39 }
0x1419   : > { %v8278_v31 = vsel %vm559_vm2, %v10813_v5, 0.0  ;;  %v7886_v5 = vadd.f32 %v14932_v42, %v11428_v6 }
0x141a   : > { %10818 = vpow2.f32 %v8264_v18  ;;  %8279 = vadd.xlane.f32.xlu1 %v8278_v31 }
0x141b   : > { %10820 = vpow2.f32 %v8353_v25 }
0x141c   : > { %v10815_v22 = vpop.eup %10814 }
0x141d   : > { %v8281_v32 = vsel %vm559_vm2, %v10815_v22, 0.0 }
0x141e   : > { %8282 = vadd.xlane.f32.xlu1 %v8281_v32 }
0x1420   : > { %v10817_v33 = vpop.eup %10816 }
0x1421   : > { %v8284_v61 = vsel %vm559_vm2, %v10817_v33, 0.0 }
0x1422   : > { %8285 = vadd.xlane.f32.xlu1 %v8284_v61 }
0x1424   : > { %v10819_v51 = vpop.eup %10818 }
0x1425   : > { %v8287_v36 = vsel %vm559_vm2, %v10819_v51, 0.0  ;;  %v10821_v34 = vpop.eup %10820 }
0x1426   : > { %8288 = vadd.xlane.f32.xlu1 %v8287_v36 }
0x147a   : > { %v8042_v38 = vpop.trf.xlu0 }
0x147b   : > { %8058 = vst.msk [vmem:[#allocation3] sm:$0x1] %vm1268_vm3, %v8042_v38 }
0x1482   : > { %v8347_v41 = vld [vmem:[#allocation3] sm:$0x1] }
0x1483   : > { %v8349_v40 = vmul.f32 0.0025, %v8347_v41 }
0x1485   : > { %v8350_v57 = vsub.f32 %v11394_v49, %v8349_v40 }
0x1487   : > { %v8357_v16 = vsub.f32 %v8350_v57, %v7885_v37 }
0x1489   : > { %v8358_v35 = vmul.f32 %v10821_v34, %v8357_v16 }
0x148b   : > { %v8359_v62 = vsel %vm1268_vm3, %v8358_v35, 0.0 }
0x148c   : > { %8360 = vadd.xlane.f32.xlu0 %v8359_v62 }
0x1497   : > { %v8268_v21 = vpop.xlane.xlu1 %8267 }
0x1498   : > { %10822 = vlog2.f32 %v8268_v21 }
0x149b   : > { %v8271_v13 = vpop.xlane.xlu1 %8270 }
0x149c   : > { %10824 = vlog2.f32 %v8271_v13 }
0x149f   : > { %v8274_v3 = vpop.xlane.xlu1 %8273 }
0x14a0   : > { %10826 = vlog2.f32 %v8274_v3 }
0x14a2   : > { %v10823_v0 = vpop.eup %10822 }
0x14a3   : > { %v8291_v10 = vmul.f32 0.6931472, %v10823_v0  ;;  %v8277_v17 = vpop.xlane.xlu1 %8276 }
0x14a4   : > { %10828 = vlog2.f32 %v8277_v17 }
0x14a5   : > { %v8306_v58 = vadd.f32 %v8291_v10, %v15353_v1 }
0x14a6   : > { %v10825_v8 = vpop.eup %10824 }
0x14a7   : > { %v8293_v49 = vmul.f32 0.6931472, %v10825_v8  ;;  %8314 = vxpose.xlu1.b32.start [1/8] (short) (narrow) %v8306_v58, 8  ;;  %v8280_v23 = vpop.xlane.xlu1 %8279 }
0x14a8   : > { %10830 = vlog2.f32 %v8280_v23 }
0x14a9   : > { %v8307_v43 = vadd.f32 %v8293_v49, %v15358_v14 }
0x14aa   : > { %v10827_v19 = vpop.eup %10826 }
0x14ab   : > { %v8295_v56 = vmul.f32 0.6931472, %v10827_v19  ;;  %8315 = vxpose.xlu1.b32.cont [2/8] (short) (narrow) %v8307_v43, 8  ;;  %v8283_v55 = vpop.xlane.xlu1 %8282 }
0x14ac   : > { %10832 = vlog2.f32 %v8283_v55 }
0x14ad   : > { %v8308_v48 = vadd.f32 %v8295_v56, %v15363_v12 }
0x14ae   : > { %v10829_v60 = vpop.eup %10828 }
0x14af   : > { %v8297_v45 = vmul.f32 0.6931472, %v10829_v60  ;;  %8316 = vxpose.xlu1.b32.cont [3/8] (short) (narrow) %v8308_v48, 8  ;;  %v8286_v50 = vpop.xlane.xlu1 %8285 }
0x14b0   : > { %10834 = vlog2.f32 %v8286_v50 }
0x14b1   : > { %v8309_v1 = vadd.f32 %v8297_v45, %v15368_v2 }
0x14b2   : > { %v10831_v24 = vpop.eup %10830 }
0x14b3   : > { %v8299_v44 = vmul.f32 0.6931472, %v10831_v24  ;;  %8317 = vxpose.xlu1.b32.cont [4/8] (short) (narrow) %v8309_v1, 8  ;;  %v8289_v26 = vpop.xlane.xlu1 %8288 }
0x14b4   : > { %10836 = vlog2.f32 %v8289_v26 }
0x14b5   : > { %v8310_v14 = vadd.f32 %v8299_v44, %v15373_v28  ;;  %v7876_v28 = vld [vmem:[#allocation3 + $0x2] sm:$0x1]  ;;  %10838 = vpow2.f32 %v8355_v9 }
0x14b6   : > { %v10833_v7 = vpop.eup %10832 }
0x14b7   : > { %v8301_v15 = vmul.f32 0.6931472, %v10833_v7  ;;  %8318 = vxpose.xlu1.b32.cont [5/8] (short) (narrow) %v8310_v14, 8 }
0x14b9   : > { %v8311_v54 = vadd.f32 %v8301_v15, %v15379_v11  ;;  %v7887_v11 = vmul.f32 0.0025, %v7876_v28 }
0x14ba   : > { %v10835_v12 = vpop.eup %10834 }
0x14bb   : > { %v8303_v59 = vmul.f32 0.6931472, %v10835_v12  ;;  %8319 = vxpose.xlu1.b32.cont [6/8] (short) (narrow) %v8311_v54, 8 }
0x14bd   : > { %v8312_v46 = vadd.f32 %v8303_v59, %v15385_v27  ;;  %v7888_v27 = vsub.f32 %v7886_v5, %v7887_v11 }
0x14be   : > { %v10837_v47 = vpop.eup %10836 }
0x14bf   : > { %v8305_v52 = vmul.f32 0.6931472, %v10837_v47  ;;  %8320 = vxpose.xlu1.b32.cont [7/8] (short) (narrow) %v8312_v46, 8  ;;  %v7889_v22 = vmul.f32 0.5, %v7888_v27  ;;  %v10839_v32 = vpop.eup %10838 }
0x14c1   : > { %v8313_v2 = vadd.f32 %v8305_v52, %v15391_v29 }
0x14c3   : > { %8321 = vxpose.xlu1.b32.end [8/8] (short) (narrow) %v8313_v2, 8 }
0x1519   : > { %v8361_v51 = vpop.xlane.xlu0 %8360 }
0x1527   : > { %v8330_v30 = vpop.trf.xlu1 }
0x1528   : > { %8346 = vst.msk [vmem:[#allocation4] sm:$0x1] %vm1268_vm3, %v8330_v30 }
0x152f   : > { %v8348_v18 = vld [vmem:[#allocation4] sm:$0x1] }
0x1530   : > { %v8351_v31 = vmul.f32 0.0025, %v8348_v18 }
0x1532   : > { %v8352_v29 = vsub.f32 %v11428_v6, %v8351_v31 }
0x1534   : > { %v8362_v33 = vsub.f32 %v8352_v29, %v7889_v22 }
0x1536   : > { %v8363_v39 = vmul.f32 %v10839_v32, %v8362_v33 }
0x1538   : > { %v8364_v61 = vsel %vm1268_vm3, %v8363_v39, 0.0 }
0x1539   : > { %8365 = vadd.xlane.f32.xlu0 %v8364_v61 }
0x15c6   : > { %v8366_v36 = vpop.xlane.xlu0 %8365 }
0x15c7   : > { %v8367_v42 = vadd.f32 %v8366_v36, %v8361_v51 }
0x15c9   : > { %8368 = vst [vmem:[%s226_s23] sm:$0x1] %v8367_v42 }
0x15ca   : > { %10899 = shalt.err (!%p10896_p3)
}
0x15cb   : > { %s10900_s9 = scalar_lea.hbm %s15426_s30, 16  ;;  %s10904_s12 = scalar_lea.hbm %s15472_s4, 32 }
0x15cc   : > { %p10901_p4 = scmp.ne.s32.totalorder %s15426_s30, %s10900_s9  ;;  %p10905_p9 = scmp.lt.u32.totalorder %s15426_s30, %s15472_s4 }
0x15cd   : > { %p10906_p10 = scmp.lt.u32.totalorder %s10904_s12, %s10900_s9  ;;  %p10908_p12 = scmp.lt.u32.totalorder %s10900_s9, %s15426_s30 }
0x15ce   : > { %p10902_p7 = pnand %p10901_p4, %p11014_p5 }
0x15cf   : > { %p10907_p11 = por %p10906_p10, %p10905_p9 }
0x15d0   : > { %p10903_p8 = pneg %p10902_p7 }
0x15d1   : > { %p10909_p13 = por %p10908_p12, %p10907_p11 }
0x15d3   : > { %p10910_p0 = pnand %p10909_p13, %p10903_p8 }
0x15d5   : > { %10913 = shalt.err (!%p10910_p0)
}
0x15d6   : > { %9580 = dma.vmem_to_hbm [thread:$0]  (%p11014_p5), %s15428_s27, 16, %s15426_s30, %s8370_s5  }
0x15d7 PF: > { %p9586_p1 = scmp.ge.s32.totalorder %s10948_s18, 2  ;;  %s8394_s20 = sand.u32 1, %s10936_s15  }
0x15d8   : > { %s8395_s22 = scalar_lea.sflag [#allocation6], %s8394_s20 }
0x15d9   : > { %p9583_p2 = pnand %p9586_p1, %p11018_p6 }
0x15db   : > { %10931 = dma.done.wait (!%p9583_p2), %s8395_s22, 16  }
0x15dc   : > { %10933 = vsyncadd (!%p9583_p2), %s8395_s22, 4294967280  ;;  %p14_p3 = scmp.ge.s32.totalorder %s11001_s21, 4   ;;  %s15477_s15 = smov %s10940_s16 }
0x15dd   : > { %s15478_s16 = smov %s10944_s17  ;;  %s15479_s17 = smov %s11012_s24 }
0x15de   : > { %s15480_s18 = smov %s11001_s21  ;;  %16 = sbr.rel (!%p14_p3) target bundleno = 3 (0x3), region = 82 }
0x15e5   :  { %8399 = vsyncpa [#allocation6], 1 }
0x15e6   :  { %8401 = vsyncpa [#allocation6 + $0x1], 1 }

</bundles_post_ra>
